<compile_context>
chip_gen: v7x
topology: tpu7x:2x2x1
jax: 0.10.0
libtpu: 0.0.40
codegen_flags: <defaults>
</compile_context>

<pallas_src>
import functools

import jax
import jax.numpy as jnp
from jax.experimental import pallas as pl
from jax.experimental.pallas import tpu as pltpu


def _fused_axial_attention_kernel(x_ref, wq_ref, wk_ref, wv_ref, wo_ref, bo_ref,
                                  o_ref, *, heads, dim_head):
    """Both axial self-attentions + sum for one batch-element slab.

    x_ref : (1, S1, S2, D)        input slab, original layout (no HBM transpose)
    wq_ref/wk_ref/wv_ref : (2, H, D, e)   per-pass, per-head projection weights
    wo_ref: (2, H, e, D)          per-pass, per-head output-projection weights
    bo_ref: (2, 1, D)             per-pass output bias
    o_ref : (1, S1, S2*D)         lane-dense output slab
    """
    _, S1, S2, D = x_ref.shape
    x3 = x_ref[0]                                       # (S1, S2, D), input dtype

    # Weights are tiny; load once and index values (static ints) per pass/head.
    wq = wq_ref[...]
    wk = wk_ref[...]
    wv = wv_ref[...]
    wo = wo_ref[...]
    bo = bo_ref[...]

    scale = dim_head ** -0.5

    def mha(xf, n_batch, n_tok, p):
        """Multi-head self-attention on flat rows xf=(n_batch*n_tok, D) -> f32."""
        acc = None
        for h in range(heads):                          # static unroll over heads
            # Per-head weights -> no 8-lane activation slices anywhere.
            q = jnp.dot(xf, wq[p, h], preferred_element_type=jnp.float32)   # (R, e)
            k = jnp.dot(xf, wk[p, h], preferred_element_type=jnp.float32)
            v = jnp.dot(xf, wv[p, h], preferred_element_type=jnp.float32)
            q3 = q.reshape(n_batch, n_tok, dim_head)     # leading-dim split (free)
            k3 = k.reshape(n_batch, n_tok, dim_head)
            v3 = v.reshape(n_batch, n_tok, dim_head)

            # Row-batched score / PV matmuls (flash pattern, no explicit .T).
            s = jnp.einsum("bqe,bke->bqk", q3, k3,
                           preferred_element_type=jnp.float32) * scale      # (nb,T,T)
            s = s - jnp.max(s, axis=-1, keepdims=True)                       # stable
            e_s = jnp.exp(s)
            inv = pl.reciprocal(jnp.sum(e_s, axis=-1, keepdims=True),
                                approx=True)                                 # EUP slot
            p_attn = e_s * inv
            o_h = jnp.einsum("bqk,bke->bqe", p_attn, v3,
                             preferred_element_type=jnp.float32)             # (nb,T,e)

            # Accumulate the per-head output projection (no concatenate).
            contrib = jnp.dot(o_h.reshape(n_batch * n_tok, dim_head), wo[p, h],
                              preferred_element_type=jnp.float32)            # (R, D)
            acc = contrib if acc is None else acc + contrib
        return acc + bo[p]                               # bias broadcast (1, D)

    # ---- axial pass over S2 (identity permutation, params[1]) ---------------
    xf_s2 = x3.reshape(S1 * S2, D)                       # rows ordered (s1, s2)
    y_s2 = mha(xf_s2, S1, S2, p=1).reshape(S1, S2, D)

    # ---- axial pass over S1 (permutation [0, 2, 1, 3], params[0]) -----------
    # Fold PermuteToFrom's permute into a cheap in-VMEM re-ordering (static
    # middle-dim slices + leading-axis stack) instead of an HBM transpose.
    xt = jnp.stack([x3[:, j, :] for j in range(S2)], axis=0)   # (S2, S1, D)
    xf_s1 = xt.reshape(S2 * S1, D)                       # rows ordered (s2, s1)
    y_s1 = mha(xf_s1, S2, S1, p=0).reshape(S2, S1, D)

    # ---- sum + inverse permutation + lane-dense store ------------------------
    # out[s1, j*D:(j+1)*D] = y_s1[j, s1, :] + y_s2[s1, j, :]
    pieces = [y_s1[j] + y_s2[:, j, :] for j in range(S2)]       # each (S1, D)
    wide = jnp.concatenate(pieces, axis=-1)                      # (S1, S2*D)
    o_ref[0] = wide.astype(o_ref.dtype)


def _split_heads_per_pass(params, heads, dim_head):
    """Repack per-pass (wq, wkv, wo, bo) into stacked per-pass, per-head weights."""
    wq_l, wk_l, wv_l, wo_l, bo_l = [], [], [], [], []
    for wq, wkv, wo, bo in params:
        D, dh = wq.shape
        wk, wv = wkv[:, :dh], wkv[:, dh:]      # split fused to_kv at the wrapper
        wq_l.append(jnp.transpose(wq.reshape(D, heads, dim_head), (1, 0, 2)))
        wk_l.append(jnp.transpose(wk.reshape(D, heads, dim_head), (1, 0, 2)))
        wv_l.append(jnp.transpose(wv.reshape(D, heads, dim_head), (1, 0, 2)))
        wo_l.append(wo.reshape(heads, dim_head, D))
        bo_l.append(bo)
    return (jnp.stack(wq_l), jnp.stack(wk_l), jnp.stack(wv_l),
            jnp.stack(wo_l), jnp.stack(bo_l))


def axial_attention_forward(x, params, heads, dim_heads):
    """AxialAttention forward (kv=None, sum_axial_out=True), one fused kernel."""
    B, S1, S2, D = x.shape
    dh = heads * dim_heads
    wq, wk, wv, wo, bo = _split_heads_per_pass(params, heads, dim_heads)

    kernel = functools.partial(_fused_axial_attention_kernel,
                               heads=heads, dim_head=dim_heads)

    # Advisory cost estimate for the XLA scheduler.
    rows = S1 * S2
    flops = (2 * B * 2 * (4 * rows * D * dh)                    # qkv + out proj
             + 2 * B * (2 * rows * S1 * dh + 2 * rows * S2 * dh))  # scores + PV
    transcendentals = B * heads * rows * (S1 + S2)
    bytes_accessed = (2 * B * rows * D) * x.dtype.itemsize + sum(
        int(w.size) * w.dtype.itemsize for w in (wq, wk, wv, wo, bo))

    out_wide = pl.pallas_call(
        kernel,
        out_shape=jax.ShapeDtypeStruct((B, S1, S2 * D), x.dtype),
        grid=(B,),
        in_specs=[
            pl.BlockSpec((1, S1, S2, D), lambda b: (b, 0, 0, 0)),
            pl.BlockSpec((2, heads, D, dim_heads), lambda b: (0, 0, 0, 0)),
            pl.BlockSpec((2, heads, D, dim_heads), lambda b: (0, 0, 0, 0)),
            pl.BlockSpec((2, heads, D, dim_heads), lambda b: (0, 0, 0, 0)),
            pl.BlockSpec((2, heads, dim_heads, D), lambda b: (0, 0, 0, 0)),
            pl.BlockSpec((2, 1, D), lambda b: (0, 0, 0)),
        ],
        out_specs=pl.BlockSpec((1, S1, S2 * D), lambda b: (b, 0, 0)),
        compiler_params=pltpu.CompilerParams(
            dimension_semantics=("parallel",)),    # batch grid -> megacore/v7x split
        cost_estimate=pl.CostEstimate(flops=flops,
                                      transcendentals=transcendentals,
                                      bytes_accessed=bytes_accessed),
    )(x, wq, wk, wv, wo, bo)

    # Free reshape: the kernel already wrote the data in (b, s1, s2, d)
    # row-major order, just lane-dense.
    return out_wide.reshape(B, S1, S2, D)


def init_axial_attention_params(key, dim, heads, dim_heads=None, num_dimensions=2):
    """Deterministic synthetic init. Shapes match SelfAttention.__init__."""
    dim_heads = dim // heads if dim_heads is None else dim_heads
    dh = heads * dim_heads
    params = []
    for _ in range(num_dimensions):
        key, k1, k2, k3, k4 = jax.random.split(key, 5)
        wq = 0.05 * jax.random.normal(k1, (dim, dh), jnp.float32)       # to_q (no bias)
        wkv = 0.05 * jax.random.normal(k2, (dim, 2 * dh), jnp.float32)  # to_kv (no bias)
        wo = 0.05 * jax.random.normal(k3, (dh, dim), jnp.float32)       # to_out weight
        bo = 0.05 * jax.random.normal(k4, (1, dim), jnp.float32)        # to_out bias
        params.append((wq, wkv, wo, bo))
    return params


def _self_attention_ref(x3d, wq, wkv, wo, bo, heads, dim_heads):
    """Pure-JAX reference for one SelfAttention (for verification)."""
    NB, T, D = x3d.shape
    dh = heads * dim_heads
    q = x3d @ wq
    kv = x3d @ wkv
    k, v = kv[..., :dh], kv[..., dh:]

    def split_heads(a):
        return a.reshape(NB, T, heads, dim_heads).transpose(0, 2, 1, 3)

    qh, kh, vh = map(split_heads, (q, k, v))
    dots = jnp.einsum("bhie,bhje->bhij", qh, kh) * dim_heads ** (-0.5)
    p = jax.nn.softmax(dots, axis=-1)
    out = jnp.einsum("bhij,bhje->bhie", p, vh)
    out = out.transpose(0, 2, 1, 3).reshape(NB, T, dh)
    return out @ wo + bo


def axial_attention_ref(x, params, heads, dim_heads):
    """Pure-JAX reference mirroring PermuteToFrom + SelfAttention (sum_axial_out)."""
    B, S1, S2, D = x.shape
    wq, wkv, wo, bo = params[0]                 # permutation [0, 2, 1, 3]
    x1 = jnp.transpose(x, (0, 2, 1, 3)).reshape(B * S2, S1, D)
    y1 = _self_attention_ref(x1, wq, wkv, wo, bo, heads, dim_heads)
    y1 = jnp.transpose(y1.reshape(B, S2, S1, D), (0, 2, 1, 3))

    wq, wkv, wo, bo = params[1]                 # identity permutation
    x2 = x.reshape(B * S1, S2, D)
    y2 = _self_attention_ref(x2, wq, wkv, wo, bo, heads, dim_heads)
    y2 = y2.reshape(B, S1, S2, D)
    return y1 + y2


if __name__ == "__main__":
    # Small deterministic example: dim=32, heads=4 -> dim_heads=8.
    B, S1, S2, D = 2, 8, 16, 32
    heads = 4
    dim_heads = D // heads

    key = jax.random.PRNGKey(0)
    kx, kp = jax.random.split(key)
    x = jax.random.normal(kx, (B, S1, S2, D), jnp.float32)
    params = init_axial_attention_params(kp, D, heads)

    out = axial_attention_forward(x, params, heads, dim_heads)
    out = jax.block_until_ready(out)

    assert out.shape == (B, S1, S2, D)

    ref = axial_attention_ref(x, params, heads, dim_heads)
    max_diff = jnp.max(jnp.abs(out - ref))
    # Slightly looser tolerance than exact f32 because the softmax denominator
    # uses the EUP approximate reciprocal (pl.reciprocal(approx=True)).
    assert jnp.allclose(out, ref, rtol=3e-3, atol=3e-3), \
        f"max abs diff {max_diff}"

    print("KERNEL_OK")
</pallas_src>

<mosaic_0001>
module attributes {stable_mosaic.version = 11 : i64} {
  func.func @_fused_axial_attention_kernel(%arg0: i32, %arg1: memref<1x8x16x32xf32, #tpu.memory_space<vmem>>, %arg2: memref<2x4x32x8xf32, #tpu.memory_space<vmem>>, %arg3: memref<2x4x32x8xf32, #tpu.memory_space<vmem>>, %arg4: memref<2x4x32x8xf32, #tpu.memory_space<vmem>>, %arg5: memref<2x4x8x32xf32, #tpu.memory_space<vmem>>, %arg6: memref<2x1x32xf32, #tpu.memory_space<vmem>>, %arg7: memref<1x8x512xf32, #tpu.memory_space<vmem>>) attributes {dimension_semantics = [#tpu.dimension_semantics<parallel>], iteration_bounds = array<i64: 2>, scalar_prefetch = 0 : i64, scratch_operands = 0 : i64, tpu.core_type = #tpu.core_type<tc>, window_params = [{transform_indices = @transform_0, window_bounds = array<i64: 1, 8, 16, 32>}, {pipeline_mode = #tpu.pipeline_mode<synchronous>, transform_indices = @transform_1, window_bounds = array<i64: 2, 4, 32, 8>}, {pipeline_mode = #tpu.pipeline_mode<synchronous>, transform_indices = @transform_2, window_bounds = array<i64: 2, 4, 32, 8>}, {pipeline_mode = #tpu.pipeline_mode<synchronous>, transform_indices = @transform_3, window_bounds = array<i64: 2, 4, 32, 8>}, {pipeline_mode = #tpu.pipeline_mode<synchronous>, transform_indices = @transform_4, window_bounds = array<i64: 2, 4, 8, 32>}, {pipeline_mode = #tpu.pipeline_mode<synchronous>, transform_indices = @transform_5, window_bounds = array<i64: 2, 1, 32>}, {transform_indices = @transform_6, window_bounds = array<i64: 1, 8, 512>}]} {
    %c0 = arith.constant 0 : index
    %c0_0 = arith.constant 0 : index
    %c0_1 = arith.constant 0 : index
    %c0_2 = arith.constant 0 : index
    %0 = vector.load %arg1[%c0, %c0_0, %c0_1, %c0_2] : memref<1x8x16x32xf32, #tpu.memory_space<vmem>>, vector<1x8x16x32xf32>
    %1 = vector.shape_cast %0 : vector<1x8x16x32xf32> to vector<8x16x32xf32>
    %c0_3 = arith.constant 0 : index
    %c0_4 = arith.constant 0 : index
    %c0_5 = arith.constant 0 : index
    %c0_6 = arith.constant 0 : index
    %2 = vector.load %arg2[%c0_3, %c0_4, %c0_5, %c0_6] : memref<2x4x32x8xf32, #tpu.memory_space<vmem>>, vector<2x4x32x8xf32>
    %c0_7 = arith.constant 0 : index
    %c0_8 = arith.constant 0 : index
    %c0_9 = arith.constant 0 : index
    %c0_10 = arith.constant 0 : index
    %3 = vector.load %arg3[%c0_7, %c0_8, %c0_9, %c0_10] : memref<2x4x32x8xf32, #tpu.memory_space<vmem>>, vector<2x4x32x8xf32>
    %c0_11 = arith.constant 0 : index
    %c0_12 = arith.constant 0 : index
    %c0_13 = arith.constant 0 : index
    %c0_14 = arith.constant 0 : index
    %4 = vector.load %arg4[%c0_11, %c0_12, %c0_13, %c0_14] : memref<2x4x32x8xf32, #tpu.memory_space<vmem>>, vector<2x4x32x8xf32>
    %c0_15 = arith.constant 0 : index
    %c0_16 = arith.constant 0 : index
    %c0_17 = arith.constant 0 : index
    %c0_18 = arith.constant 0 : index
    %5 = vector.load %arg5[%c0_15, %c0_16, %c0_17, %c0_18] : memref<2x4x8x32xf32, #tpu.memory_space<vmem>>, vector<2x4x8x32xf32>
    %c0_19 = arith.constant 0 : index
    %c0_20 = arith.constant 0 : index
    %c0_21 = arith.constant 0 : index
    %6 = vector.load %arg6[%c0_19, %c0_20, %c0_21] : memref<2x1x32xf32, #tpu.memory_space<vmem>>, vector<2x1x32xf32>
    %7 = vector.shape_cast %1 : vector<8x16x32xf32> to vector<128x32xf32>
    %8 = vector.extract_strided_slice %2 {offsets = [1, 0, 0, 0], sizes = [1, 1, 32, 8], strides = [1, 1, 1, 1]} : vector<2x4x32x8xf32> to vector<1x1x32x8xf32>
    %9 = vector.shape_cast %8 : vector<1x1x32x8xf32> to vector<32x8xf32>
    %cst = arith.constant dense<0.000000e+00> : vector<128x8xf32>
    %10 = tpu.matmul %7, %9, %cst {dimension_numbers = #tpu.dot_dimension_numbers<[1], [0], [0], [1], [0, 0, 1, 1], [], []>} : vector<128x32xf32>, vector<32x8xf32>, vector<128x8xf32> -> vector<128x8xf32>
    %11 = vector.extract_strided_slice %3 {offsets = [1, 0, 0, 0], sizes = [1, 1, 32, 8], strides = [1, 1, 1, 1]} : vector<2x4x32x8xf32> to vector<1x1x32x8xf32>
    %12 = vector.shape_cast %11 : vector<1x1x32x8xf32> to vector<32x8xf32>
    %cst_22 = arith.constant dense<0.000000e+00> : vector<128x8xf32>
    %13 = tpu.matmul %7, %12, %cst_22 {dimension_numbers = #tpu.dot_dimension_numbers<[1], [0], [0], [1], [0, 0, 1, 1], [], []>} : vector<128x32xf32>, vector<32x8xf32>, vector<128x8xf32> -> vector<128x8xf32>
    %14 = vector.extract_strided_slice %4 {offsets = [1, 0, 0, 0], sizes = [1, 1, 32, 8], strides = [1, 1, 1, 1]} : vector<2x4x32x8xf32> to vector<1x1x32x8xf32>
    %15 = vector.shape_cast %14 : vector<1x1x32x8xf32> to vector<32x8xf32>
    %cst_23 = arith.constant dense<0.000000e+00> : vector<128x8xf32>
    %16 = tpu.matmul %7, %15, %cst_23 {dimension_numbers = #tpu.dot_dimension_numbers<[1], [0], [0], [1], [0, 0, 1, 1], [], []>} : vector<128x32xf32>, vector<32x8xf32>, vector<128x8xf32> -> vector<128x8xf32>
    %17 = vector.shape_cast %10 : vector<128x8xf32> to vector<8x16x8xf32>
    %18 = vector.shape_cast %13 : vector<128x8xf32> to vector<8x16x8xf32>
    %19 = vector.shape_cast %16 : vector<128x8xf32> to vector<8x16x8xf32>
    "tpu.trace_start"() <{level = 10 : i32, message = "bqe,bke->bqk"}> : () -> ()
    %cst_24 = arith.constant dense<0.000000e+00> : vector<8x16x16xf32>
    %20 = tpu.matmul %17, %18, %cst_24 {dimension_numbers = #tpu.dot_dimension_numbers<[2], [2], [1], [1], [0, 0, 0, 1, 1, 1], [0], [0]>} : vector<8x16x8xf32>, vector<8x16x8xf32>, vector<8x16x16xf32> -> vector<8x16x16xf32>
    "tpu.trace_stop"() : () -> ()
    %cst_25 = arith.constant 0.353553385 : f32
    %21 = vector.broadcast %cst_25 : f32 to vector<8x16x16xf32>
    %22 = arith.mulf %20, %21 : vector<8x16x16xf32>
    %cst_26 = arith.constant dense<0xFF800000> : vector<8x16xf32>
    %23 = vector.multi_reduction <maximumf>, %22, %cst_26 [2] : vector<8x16x16xf32> to vector<8x16xf32>
    %24 = vector.shape_cast %23 : vector<8x16xf32> to vector<8x16x1xf32>
    %25 = vector.broadcast %24 : vector<8x16x1xf32> to vector<8x16x16xf32>
    %26 = arith.subf %22, %25 : vector<8x16x16xf32>
    %27 = math.exp %26 : vector<8x16x16xf32>
    %cst_27 = arith.constant dense<0.000000e+00> : vector<8x16xf32>
    %28 = vector.multi_reduction <add>, %27, %cst_27 [2] : vector<8x16x16xf32> to vector<8x16xf32>
    %29 = vector.shape_cast %28 : vector<8x16xf32> to vector<8x16x1xf32>
    %30 = tpu.reciprocal %29 {approx = true} : vector<8x16x1xf32> -> vector<8x16x1xf32>
    %31 = vector.broadcast %30 : vector<8x16x1xf32> to vector<8x16x16xf32>
    %32 = arith.mulf %27, %31 : vector<8x16x16xf32>
    "tpu.trace_start"() <{level = 10 : i32, message = "bqk,bke->bqe"}> : () -> ()
    %cst_28 = arith.constant dense<0.000000e+00> : vector<8x16x8xf32>
    %33 = tpu.matmul %32, %19, %cst_28 {dimension_numbers = #tpu.dot_dimension_numbers<[2], [1], [1], [2], [0, 0, 0, 1, 1, 2], [0], [0]>} : vector<8x16x16xf32>, vector<8x16x8xf32>, vector<8x16x8xf32> -> vector<8x16x8xf32>
    "tpu.trace_stop"() : () -> ()
    %34 = vector.shape_cast %33 : vector<8x16x8xf32> to vector<128x8xf32>
    %35 = vector.extract_strided_slice %5 {offsets = [1, 0, 0, 0], sizes = [1, 1, 8, 32], strides = [1, 1, 1, 1]} : vector<2x4x8x32xf32> to vector<1x1x8x32xf32>
    %36 = vector.shape_cast %35 : vector<1x1x8x32xf32> to vector<8x32xf32>
    %cst_29 = arith.constant dense<0.000000e+00> : vector<128x32xf32>
    %37 = tpu.matmul %34, %36, %cst_29 {dimension_numbers = #tpu.dot_dimension_numbers<[1], [0], [0], [1], [0, 0, 1, 1], [], []>} : vector<128x8xf32>, vector<8x32xf32>, vector<128x32xf32> -> vector<128x32xf32>
    %38 = vector.extract_strided_slice %2 {offsets = [1, 1, 0, 0], sizes = [1, 1, 32, 8], strides = [1, 1, 1, 1]} : vector<2x4x32x8xf32> to vector<1x1x32x8xf32>
    %39 = vector.shape_cast %38 : vector<1x1x32x8xf32> to vector<32x8xf32>
    %cst_30 = arith.constant dense<0.000000e+00> : vector<128x8xf32>
    %40 = tpu.matmul %7, %39, %cst_30 {dimension_numbers = #tpu.dot_dimension_numbers<[1], [0], [0], [1], [0, 0, 1, 1], [], []>} : vector<128x32xf32>, vector<32x8xf32>, vector<128x8xf32> -> vector<128x8xf32>
    %41 = vector.extract_strided_slice %3 {offsets = [1, 1, 0, 0], sizes = [1, 1, 32, 8], strides = [1, 1, 1, 1]} : vector<2x4x32x8xf32> to vector<1x1x32x8xf32>
    %42 = vector.shape_cast %41 : vector<1x1x32x8xf32> to vector<32x8xf32>
    %cst_31 = arith.constant dense<0.000000e+00> : vector<128x8xf32>
    %43 = tpu.matmul %7, %42, %cst_31 {dimension_numbers = #tpu.dot_dimension_numbers<[1], [0], [0], [1], [0, 0, 1, 1], [], []>} : vector<128x32xf32>, vector<32x8xf32>, vector<128x8xf32> -> vector<128x8xf32>
    %44 = vector.extract_strided_slice %4 {offsets = [1, 1, 0, 0], sizes = [1, 1, 32, 8], strides = [1, 1, 1, 1]} : vector<2x4x32x8xf32> to vector<1x1x32x8xf32>
    %45 = vector.shape_cast %44 : vector<1x1x32x8xf32> to vector<32x8xf32>
    %cst_32 = arith.constant dense<0.000000e+00> : vector<128x8xf32>
    %46 = tpu.matmul %7, %45, %cst_32 {dimension_numbers = #tpu.dot_dimension_numbers<[1], [0], [0], [1], [0, 0, 1, 1], [], []>} : vector<128x32xf32>, vector<32x8xf32>, vector<128x8xf32> -> vector<128x8xf32>
    %47 = vector.shape_cast %40 : vector<128x8xf32> to vector<8x16x8xf32>
    %48 = vector.shape_cast %43 : vector<128x8xf32> to vector<8x16x8xf32>
    %49 = vector.shape_cast %46 : vector<128x8xf32> to vector<8x16x8xf32>
    "tpu.trace_start"() <{level = 10 : i32, message = "bqe,bke->bqk"}> : () -> ()
    %cst_33 = arith.constant dense<0.000000e+00> : vector<8x16x16xf32>
    %50 = tpu.matmul %47, %48, %cst_33 {dimension_numbers = #tpu.dot_dimension_numbers<[2], [2], [1], [1], [0, 0, 0, 1, 1, 1], [0], [0]>} : vector<8x16x8xf32>, vector<8x16x8xf32>, vector<8x16x16xf32> -> vector<8x16x16xf32>
    "tpu.trace_stop"() : () -> ()
    %cst_34 = arith.constant 0.353553385 : f32
    %51 = vector.broadcast %cst_34 : f32 to vector<8x16x16xf32>
    %52 = arith.mulf %50, %51 : vector<8x16x16xf32>
    %cst_35 = arith.constant dense<0xFF800000> : vector<8x16xf32>
    %53 = vector.multi_reduction <maximumf>, %52, %cst_35 [2] : vector<8x16x16xf32> to vector<8x16xf32>
    %54 = vector.shape_cast %53 : vector<8x16xf32> to vector<8x16x1xf32>
    %55 = vector.broadcast %54 : vector<8x16x1xf32> to vector<8x16x16xf32>
    %56 = arith.subf %52, %55 : vector<8x16x16xf32>
    %57 = math.exp %56 : vector<8x16x16xf32>
    %cst_36 = arith.constant dense<0.000000e+00> : vector<8x16xf32>
    %58 = vector.multi_reduction <add>, %57, %cst_36 [2] : vector<8x16x16xf32> to vector<8x16xf32>
    %59 = vector.shape_cast %58 : vector<8x16xf32> to vector<8x16x1xf32>
    %60 = tpu.reciprocal %59 {approx = true} : vector<8x16x1xf32> -> vector<8x16x1xf32>
    %61 = vector.broadcast %60 : vector<8x16x1xf32> to vector<8x16x16xf32>
    %62 = arith.mulf %57, %61 : vector<8x16x16xf32>
    "tpu.trace_start"() <{level = 10 : i32, message = "bqk,bke->bqe"}> : () -> ()
    %cst_37 = arith.constant dense<0.000000e+00> : vector<8x16x8xf32>
    %63 = tpu.matmul %62, %49, %cst_37 {dimension_numbers = #tpu.dot_dimension_numbers<[2], [1], [1], [2], [0, 0, 0, 1, 1, 2], [0], [0]>} : vector<8x16x16xf32>, vector<8x16x8xf32>, vector<8x16x8xf32> -> vector<8x16x8xf32>
    "tpu.trace_stop"() : () -> ()
    %64 = vector.shape_cast %63 : vector<8x16x8xf32> to vector<128x8xf32>
    %65 = vector.extract_strided_slice %5 {offsets = [1, 1, 0, 0], sizes = [1, 1, 8, 32], strides = [1, 1, 1, 1]} : vector<2x4x8x32xf32> to vector<1x1x8x32xf32>
    %66 = vector.shape_cast %65 : vector<1x1x8x32xf32> to vector<8x32xf32>
    %cst_38 = arith.constant dense<0.000000e+00> : vector<128x32xf32>
    %67 = tpu.matmul %64, %66, %cst_38 {dimension_numbers = #tpu.dot_dimension_numbers<[1], [0], [0], [1], [0, 0, 1, 1], [], []>} : vector<128x8xf32>, vector<8x32xf32>, vector<128x32xf32> -> vector<128x32xf32>
    %68 = arith.addf %37, %67 : vector<128x32xf32>
    %69 = vector.extract_strided_slice %2 {offsets = [1, 2, 0, 0], sizes = [1, 1, 32, 8], strides = [1, 1, 1, 1]} : vector<2x4x32x8xf32> to vector<1x1x32x8xf32>
    %70 = vector.shape_cast %69 : vector<1x1x32x8xf32> to vector<32x8xf32>
    %cst_39 = arith.constant dense<0.000000e+00> : vector<128x8xf32>
    %71 = tpu.matmul %7, %70, %cst_39 {dimension_numbers = #tpu.dot_dimension_numbers<[1], [0], [0], [1], [0, 0, 1, 1], [], []>} : vector<128x32xf32>, vector<32x8xf32>, vector<128x8xf32> -> vector<128x8xf32>
    %72 = vector.extract_strided_slice %3 {offsets = [1, 2, 0, 0], sizes = [1, 1, 32, 8], strides = [1, 1, 1, 1]} : vector<2x4x32x8xf32> to vector<1x1x32x8xf32>
    %73 = vector.shape_cast %72 : vector<1x1x32x8xf32> to vector<32x8xf32>
    %cst_40 = arith.constant dense<0.000000e+00> : vector<128x8xf32>
    %74 = tpu.matmul %7, %73, %cst_40 {dimension_numbers = #tpu.dot_dimension_numbers<[1], [0], [0], [1], [0, 0, 1, 1], [], []>} : vector<128x32xf32>, vector<32x8xf32>, vector<128x8xf32> -> vector<128x8xf32>
    %75 = vector.extract_strided_slice %4 {offsets = [1, 2, 0, 0], sizes = [1, 1, 32, 8], strides = [1, 1, 1, 1]} : vector<2x4x32x8xf32> to vector<1x1x32x8xf32>
    %76 = vector.shape_cast %75 : vector<1x1x32x8xf32> to vector<32x8xf32>
    %cst_41 = arith.constant dense<0.000000e+00> : vector<128x8xf32>
    %77 = tpu.matmul %7, %76, %cst_41 {dimension_numbers = #tpu.dot_dimension_numbers<[1], [0], [0], [1], [0, 0, 1, 1], [], []>} : vector<128x32xf32>, vector<32x8xf32>, vector<128x8xf32> -> vector<128x8xf32>
    %78 = vector.shape_cast %71 : vector<128x8xf32> to vector<8x16x8xf32>
    %79 = vector.shape_cast %74 : vector<128x8xf32> to vector<8x16x8xf32>
    %80 = vector.shape_cast %77 : vector<128x8xf32> to vector<8x16x8xf32>
    "tpu.trace_start"() <{level = 10 : i32, message = "bqe,bke->bqk"}> : () -> ()
    %cst_42 = arith.constant dense<0.000000e+00> : vector<8x16x16xf32>
    %81 = tpu.matmul %78, %79, %cst_42 {dimension_numbers = #tpu.dot_dimension_numbers<[2], [2], [1], [1], [0, 0, 0, 1, 1, 1], [0], [0]>} : vector<8x16x8xf32>, vector<8x16x8xf32>, vector<8x16x16xf32> -> vector<8x16x16xf32>
    "tpu.trace_stop"() : () -> ()
    %cst_43 = arith.constant 0.353553385 : f32
    %82 = vector.broadcast %cst_43 : f32 to vector<8x16x16xf32>
    %83 = arith.mulf %81, %82 : vector<8x16x16xf32>
    %cst_44 = arith.constant dense<0xFF800000> : vector<8x16xf32>
    %84 = vector.multi_reduction <maximumf>, %83, %cst_44 [2] : vector<8x16x16xf32> to vector<8x16xf32>
    %85 = vector.shape_cast %84 : vector<8x16xf32> to vector<8x16x1xf32>
    %86 = vector.broadcast %85 : vector<8x16x1xf32> to vector<8x16x16xf32>
    %87 = arith.subf %83, %86 : vector<8x16x16xf32>
    %88 = math.exp %87 : vector<8x16x16xf32>
    %cst_45 = arith.constant dense<0.000000e+00> : vector<8x16xf32>
    %89 = vector.multi_reduction <add>, %88, %cst_45 [2] : vector<8x16x16xf32> to vector<8x16xf32>
    %90 = vector.shape_cast %89 : vector<8x16xf32> to vector<8x16x1xf32>
    %91 = tpu.reciprocal %90 {approx = true} : vector<8x16x1xf32> -> vector<8x16x1xf32>
    %92 = vector.broadcast %91 : vector<8x16x1xf32> to vector<8x16x16xf32>
    %93 = arith.mulf %88, %92 : vector<8x16x16xf32>
    "tpu.trace_start"() <{level = 10 : i32, message = "bqk,bke->bqe"}> : () -> ()
    %cst_46 = arith.constant dense<0.000000e+00> : vector<8x16x8xf32>
    %94 = tpu.matmul %93, %80, %cst_46 {dimension_numbers = #tpu.dot_dimension_numbers<[2], [1], [1], [2], [0, 0, 0, 1, 1, 2], [0], [0]>} : vector<8x16x16xf32>, vector<8x16x8xf32>, vector<8x16x8xf32> -> vector<8x16x8xf32>
    "tpu.trace_stop"() : () -> ()
    %95 = vector.shape_cast %94 : vector<8x16x8xf32> to vector<128x8xf32>
    %96 = vector.extract_strided_slice %5 {offsets = [1, 2, 0, 0], sizes = [1, 1, 8, 32], strides = [1, 1, 1, 1]} : vector<2x4x8x32xf32> to vector<1x1x8x32xf32>
    %97 = vector.shape_cast %96 : vector<1x1x8x32xf32> to vector<8x32xf32>
    %cst_47 = arith.constant dense<0.000000e+00> : vector<128x32xf32>
    %98 = tpu.matmul %95, %97, %cst_47 {dimension_numbers = #tpu.dot_dimension_numbers<[1], [0], [0], [1], [0, 0, 1, 1], [], []>} : vector<128x8xf32>, vector<8x32xf32>, vector<128x32xf32> -> vector<128x32xf32>
    %99 = arith.addf %68, %98 : vector<128x32xf32>
    %100 = vector.extract_strided_slice %2 {offsets = [1, 3, 0, 0], sizes = [1, 1, 32, 8], strides = [1, 1, 1, 1]} : vector<2x4x32x8xf32> to vector<1x1x32x8xf32>
    %101 = vector.shape_cast %100 : vector<1x1x32x8xf32> to vector<32x8xf32>
    %cst_48 = arith.constant dense<0.000000e+00> : vector<128x8xf32>
    %102 = tpu.matmul %7, %101, %cst_48 {dimension_numbers = #tpu.dot_dimension_numbers<[1], [0], [0], [1], [0, 0, 1, 1], [], []>} : vector<128x32xf32>, vector<32x8xf32>, vector<128x8xf32> -> vector<128x8xf32>
    %103 = vector.extract_strided_slice %3 {offsets = [1, 3, 0, 0], sizes = [1, 1, 32, 8], strides = [1, 1, 1, 1]} : vector<2x4x32x8xf32> to vector<1x1x32x8xf32>
    %104 = vector.shape_cast %103 : vector<1x1x32x8xf32> to vector<32x8xf32>
    %cst_49 = arith.constant dense<0.000000e+00> : vector<128x8xf32>
    %105 = tpu.matmul %7, %104, %cst_49 {dimension_numbers = #tpu.dot_dimension_numbers<[1], [0], [0], [1], [0, 0, 1, 1], [], []>} : vector<128x32xf32>, vector<32x8xf32>, vector<128x8xf32> -> vector<128x8xf32>
    %106 = vector.extract_strided_slice %4 {offsets = [1, 3, 0, 0], sizes = [1, 1, 32, 8], strides = [1, 1, 1, 1]} : vector<2x4x32x8xf32> to vector<1x1x32x8xf32>
    %107 = vector.shape_cast %106 : vector<1x1x32x8xf32> to vector<32x8xf32>
    %cst_50 = arith.constant dense<0.000000e+00> : vector<128x8xf32>
    %108 = tpu.matmul %7, %107, %cst_50 {dimension_numbers = #tpu.dot_dimension_numbers<[1], [0], [0], [1], [0, 0, 1, 1], [], []>} : vector<128x32xf32>, vector<32x8xf32>, vector<128x8xf32> -> vector<128x8xf32>
    %109 = vector.shape_cast %102 : vector<128x8xf32> to vector<8x16x8xf32>
    %110 = vector.shape_cast %105 : vector<128x8xf32> to vector<8x16x8xf32>
    %111 = vector.shape_cast %108 : vector<128x8xf32> to vector<8x16x8xf32>
    "tpu.trace_start"() <{level = 10 : i32, message = "bqe,bke->bqk"}> : () -> ()
    %cst_51 = arith.constant dense<0.000000e+00> : vector<8x16x16xf32>
    %112 = tpu.matmul %109, %110, %cst_51 {dimension_numbers = #tpu.dot_dimension_numbers<[2], [2], [1], [1], [0, 0, 0, 1, 1, 1], [0], [0]>} : vector<8x16x8xf32>, vector<8x16x8xf32>, vector<8x16x16xf32> -> vector<8x16x16xf32>
    "tpu.trace_stop"() : () -> ()
    %cst_52 = arith.constant 0.353553385 : f32
    %113 = vector.broadcast %cst_52 : f32 to vector<8x16x16xf32>
    %114 = arith.mulf %112, %113 : vector<8x16x16xf32>
    %cst_53 = arith.constant dense<0xFF800000> : vector<8x16xf32>
    %115 = vector.multi_reduction <maximumf>, %114, %cst_53 [2] : vector<8x16x16xf32> to vector<8x16xf32>
    %116 = vector.shape_cast %115 : vector<8x16xf32> to vector<8x16x1xf32>
    %117 = vector.broadcast %116 : vector<8x16x1xf32> to vector<8x16x16xf32>
    %118 = arith.subf %114, %117 : vector<8x16x16xf32>
    %119 = math.exp %118 : vector<8x16x16xf32>
    %cst_54 = arith.constant dense<0.000000e+00> : vector<8x16xf32>
    %120 = vector.multi_reduction <add>, %119, %cst_54 [2] : vector<8x16x16xf32> to vector<8x16xf32>
    %121 = vector.shape_cast %120 : vector<8x16xf32> to vector<8x16x1xf32>
    %122 = tpu.reciprocal %121 {approx = true} : vector<8x16x1xf32> -> vector<8x16x1xf32>
    %123 = vector.broadcast %122 : vector<8x16x1xf32> to vector<8x16x16xf32>
    %124 = arith.mulf %119, %123 : vector<8x16x16xf32>
    "tpu.trace_start"() <{level = 10 : i32, message = "bqk,bke->bqe"}> : () -> ()
    %cst_55 = arith.constant dense<0.000000e+00> : vector<8x16x8xf32>
    %125 = tpu.matmul %124, %111, %cst_55 {dimension_numbers = #tpu.dot_dimension_numbers<[2], [1], [1], [2], [0, 0, 0, 1, 1, 2], [0], [0]>} : vector<8x16x16xf32>, vector<8x16x8xf32>, vector<8x16x8xf32> -> vector<8x16x8xf32>
    "tpu.trace_stop"() : () -> ()
    %126 = vector.shape_cast %125 : vector<8x16x8xf32> to vector<128x8xf32>
    %127 = vector.extract_strided_slice %5 {offsets = [1, 3, 0, 0], sizes = [1, 1, 8, 32], strides = [1, 1, 1, 1]} : vector<2x4x8x32xf32> to vector<1x1x8x32xf32>
    %128 = vector.shape_cast %127 : vector<1x1x8x32xf32> to vector<8x32xf32>
    %cst_56 = arith.constant dense<0.000000e+00> : vector<128x32xf32>
    %129 = tpu.matmul %126, %128, %cst_56 {dimension_numbers = #tpu.dot_dimension_numbers<[1], [0], [0], [1], [0, 0, 1, 1], [], []>} : vector<128x8xf32>, vector<8x32xf32>, vector<128x32xf32> -> vector<128x32xf32>
    %130 = arith.addf %99, %129 : vector<128x32xf32>
    %131 = vector.extract_strided_slice %6 {offsets = [1, 0, 0], sizes = [1, 1, 32], strides = [1, 1, 1]} : vector<2x1x32xf32> to vector<1x1x32xf32>
    %132 = vector.shape_cast %131 : vector<1x1x32xf32> to vector<1x32xf32>
    %133 = vector.broadcast %132 : vector<1x32xf32> to vector<128x32xf32>
    %134 = arith.addf %130, %133 : vector<128x32xf32>
    %135 = vector.shape_cast %134 : vector<128x32xf32> to vector<8x16x32xf32>
    %136 = vector.extract_strided_slice %1 {offsets = [0, 0, 0], sizes = [8, 1, 32], strides = [1, 1, 1]} : vector<8x16x32xf32> to vector<8x1x32xf32>
    %137 = vector.shape_cast %136 : vector<8x1x32xf32> to vector<8x32xf32>
    %138 = vector.extract_strided_slice %1 {offsets = [0, 1, 0], sizes = [8, 1, 32], strides = [1, 1, 1]} : vector<8x16x32xf32> to vector<8x1x32xf32>
    %139 = vector.shape_cast %138 : vector<8x1x32xf32> to vector<8x32xf32>
    %140 = vector.extract_strided_slice %1 {offsets = [0, 2, 0], sizes = [8, 1, 32], strides = [1, 1, 1]} : vector<8x16x32xf32> to vector<8x1x32xf32>
    %141 = vector.shape_cast %140 : vector<8x1x32xf32> to vector<8x32xf32>
    %142 = vector.extract_strided_slice %1 {offsets = [0, 3, 0], sizes = [8, 1, 32], strides = [1, 1, 1]} : vector<8x16x32xf32> to vector<8x1x32xf32>
    %143 = vector.shape_cast %142 : vector<8x1x32xf32> to vector<8x32xf32>
    %144 = vector.extract_strided_slice %1 {offsets = [0, 4, 0], sizes = [8, 1, 32], strides = [1, 1, 1]} : vector<8x16x32xf32> to vector<8x1x32xf32>
    %145 = vector.shape_cast %144 : vector<8x1x32xf32> to vector<8x32xf32>
    %146 = vector.extract_strided_slice %1 {offsets = [0, 5, 0], sizes = [8, 1, 32], strides = [1, 1, 1]} : vector<8x16x32xf32> to vector<8x1x32xf32>
    %147 = vector.shape_cast %146 : vector<8x1x32xf32> to vector<8x32xf32>
    %148 = vector.extract_strided_slice %1 {offsets = [0, 6, 0], sizes = [8, 1, 32], strides = [1, 1, 1]} : vector<8x16x32xf32> to vector<8x1x32xf32>
    %149 = vector.shape_cast %148 : vector<8x1x32xf32> to vector<8x32xf32>
    %150 = vector.extract_strided_slice %1 {offsets = [0, 7, 0], sizes = [8, 1, 32], strides = [1, 1, 1]} : vector<8x16x32xf32> to vector<8x1x32xf32>
    %151 = vector.shape_cast %150 : vector<8x1x32xf32> to vector<8x32xf32>
    %152 = vector.extract_strided_slice %1 {offsets = [0, 8, 0], sizes = [8, 1, 32], strides = [1, 1, 1]} : vector<8x16x32xf32> to vector<8x1x32xf32>
    %153 = vector.shape_cast %152 : vector<8x1x32xf32> to vector<8x32xf32>
    %154 = vector.extract_strided_slice %1 {offsets = [0, 9, 0], sizes = [8, 1, 32], strides = [1, 1, 1]} : vector<8x16x32xf32> to vector<8x1x32xf32>
    %155 = vector.shape_cast %154 : vector<8x1x32xf32> to vector<8x32xf32>
    %156 = vector.extract_strided_slice %1 {offsets = [0, 10, 0], sizes = [8, 1, 32], strides = [1, 1, 1]} : vector<8x16x32xf32> to vector<8x1x32xf32>
    %157 = vector.shape_cast %156 : vector<8x1x32xf32> to vector<8x32xf32>
    %158 = vector.extract_strided_slice %1 {offsets = [0, 11, 0], sizes = [8, 1, 32], strides = [1, 1, 1]} : vector<8x16x32xf32> to vector<8x1x32xf32>
    %159 = vector.shape_cast %158 : vector<8x1x32xf32> to vector<8x32xf32>
    %160 = vector.extract_strided_slice %1 {offsets = [0, 12, 0], sizes = [8, 1, 32], strides = [1, 1, 1]} : vector<8x16x32xf32> to vector<8x1x32xf32>
    %161 = vector.shape_cast %160 : vector<8x1x32xf32> to vector<8x32xf32>
    %162 = vector.extract_strided_slice %1 {offsets = [0, 13, 0], sizes = [8, 1, 32], strides = [1, 1, 1]} : vector<8x16x32xf32> to vector<8x1x32xf32>
    %163 = vector.shape_cast %162 : vector<8x1x32xf32> to vector<8x32xf32>
    %164 = vector.extract_strided_slice %1 {offsets = [0, 14, 0], sizes = [8, 1, 32], strides = [1, 1, 1]} : vector<8x16x32xf32> to vector<8x1x32xf32>
    %165 = vector.shape_cast %164 : vector<8x1x32xf32> to vector<8x32xf32>
    %166 = vector.extract_strided_slice %1 {offsets = [0, 15, 0], sizes = [8, 1, 32], strides = [1, 1, 1]} : vector<8x16x32xf32> to vector<8x1x32xf32>
    %167 = vector.shape_cast %166 : vector<8x1x32xf32> to vector<8x32xf32>
    %168 = vector.shape_cast %137 : vector<8x32xf32> to vector<1x8x32xf32>
    %169 = vector.shape_cast %139 : vector<8x32xf32> to vector<1x8x32xf32>
    %170 = vector.shape_cast %141 : vector<8x32xf32> to vector<1x8x32xf32>
    %171 = vector.shape_cast %143 : vector<8x32xf32> to vector<1x8x32xf32>
    %172 = vector.shape_cast %145 : vector<8x32xf32> to vector<1x8x32xf32>
    %173 = vector.shape_cast %147 : vector<8x32xf32> to vector<1x8x32xf32>
    %174 = vector.shape_cast %149 : vector<8x32xf32> to vector<1x8x32xf32>
    %175 = vector.shape_cast %151 : vector<8x32xf32> to vector<1x8x32xf32>
    %176 = vector.shape_cast %153 : vector<8x32xf32> to vector<1x8x32xf32>
    %177 = vector.shape_cast %155 : vector<8x32xf32> to vector<1x8x32xf32>
    %178 = vector.shape_cast %157 : vector<8x32xf32> to vector<1x8x32xf32>
    %179 = vector.shape_cast %159 : vector<8x32xf32> to vector<1x8x32xf32>
    %180 = vector.shape_cast %161 : vector<8x32xf32> to vector<1x8x32xf32>
    %181 = vector.shape_cast %163 : vector<8x32xf32> to vector<1x8x32xf32>
    %182 = vector.shape_cast %165 : vector<8x32xf32> to vector<1x8x32xf32>
    %183 = vector.shape_cast %167 : vector<8x32xf32> to vector<1x8x32xf32>
    %184 = tpu.concatenate %168, %169, %170, %171, %172, %173, %174, %175, %176, %177, %178, %179, %180, %181, %182, %183 in 0 : vector<1x8x32xf32>, vector<1x8x32xf32>, vector<1x8x32xf32>, vector<1x8x32xf32>, vector<1x8x32xf32>, vector<1x8x32xf32>, vector<1x8x32xf32>, vector<1x8x32xf32>, vector<1x8x32xf32>, vector<1x8x32xf32>, vector<1x8x32xf32>, vector<1x8x32xf32>, vector<1x8x32xf32>, vector<1x8x32xf32>, vector<1x8x32xf32>, vector<1x8x32xf32> -> vector<16x8x32xf32>
    %185 = vector.shape_cast %184 : vector<16x8x32xf32> to vector<128x32xf32>
    %186 = vector.extract_strided_slice %2 {offsets = [0, 0, 0, 0], sizes = [1, 1, 32, 8], strides = [1, 1, 1, 1]} : vector<2x4x32x8xf32> to vector<1x1x32x8xf32>
    %187 = vector.shape_cast %186 : vector<1x1x32x8xf32> to vector<32x8xf32>
    %cst_57 = arith.constant dense<0.000000e+00> : vector<128x8xf32>
    %188 = tpu.matmul %185, %187, %cst_57 {dimension_numbers = #tpu.dot_dimension_numbers<[1], [0], [0], [1], [0, 0, 1, 1], [], []>} : vector<128x32xf32>, vector<32x8xf32>, vector<128x8xf32> -> vector<128x8xf32>
    %189 = vector.extract_strided_slice %3 {offsets = [0, 0, 0, 0], sizes = [1, 1, 32, 8], strides = [1, 1, 1, 1]} : vector<2x4x32x8xf32> to vector<1x1x32x8xf32>
    %190 = vector.shape_cast %189 : vector<1x1x32x8xf32> to vector<32x8xf32>
    %cst_58 = arith.constant dense<0.000000e+00> : vector<128x8xf32>
    %191 = tpu.matmul %185, %190, %cst_58 {dimension_numbers = #tpu.dot_dimension_numbers<[1], [0], [0], [1], [0, 0, 1, 1], [], []>} : vector<128x32xf32>, vector<32x8xf32>, vector<128x8xf32> -> vector<128x8xf32>
    %192 = vector.extract_strided_slice %4 {offsets = [0, 0, 0, 0], sizes = [1, 1, 32, 8], strides = [1, 1, 1, 1]} : vector<2x4x32x8xf32> to vector<1x1x32x8xf32>
    %193 = vector.shape_cast %192 : vector<1x1x32x8xf32> to vector<32x8xf32>
    %cst_59 = arith.constant dense<0.000000e+00> : vector<128x8xf32>
    %194 = tpu.matmul %185, %193, %cst_59 {dimension_numbers = #tpu.dot_dimension_numbers<[1], [0], [0], [1], [0, 0, 1, 1], [], []>} : vector<128x32xf32>, vector<32x8xf32>, vector<128x8xf32> -> vector<128x8xf32>
    %195 = vector.shape_cast %188 : vector<128x8xf32> to vector<16x8x8xf32>
    %196 = vector.shape_cast %191 : vector<128x8xf32> to vector<16x8x8xf32>
    %197 = vector.shape_cast %194 : vector<128x8xf32> to vector<16x8x8xf32>
    "tpu.trace_start"() <{level = 10 : i32, message = "bqe,bke->bqk"}> : () -> ()
    %cst_60 = arith.constant dense<0.000000e+00> : vector<16x8x8xf32>
    %198 = tpu.matmul %195, %196, %cst_60 {dimension_numbers = #tpu.dot_dimension_numbers<[2], [2], [1], [1], [0, 0, 0, 1, 1, 1], [0], [0]>} : vector<16x8x8xf32>, vector<16x8x8xf32>, vector<16x8x8xf32> -> vector<16x8x8xf32>
    "tpu.trace_stop"() : () -> ()
    %cst_61 = arith.constant 0.353553385 : f32
    %199 = vector.broadcast %cst_61 : f32 to vector<16x8x8xf32>
    %200 = arith.mulf %198, %199 : vector<16x8x8xf32>
    %cst_62 = arith.constant dense<0xFF800000> : vector<16x8xf32>
    %201 = vector.multi_reduction <maximumf>, %200, %cst_62 [2] : vector<16x8x8xf32> to vector<16x8xf32>
    %202 = vector.shape_cast %201 : vector<16x8xf32> to vector<16x8x1xf32>
    %203 = vector.broadcast %202 : vector<16x8x1xf32> to vector<16x8x8xf32>
    %204 = arith.subf %200, %203 : vector<16x8x8xf32>
    %205 = math.exp %204 : vector<16x8x8xf32>
    %cst_63 = arith.constant dense<0.000000e+00> : vector<16x8xf32>
    %206 = vector.multi_reduction <add>, %205, %cst_63 [2] : vector<16x8x8xf32> to vector<16x8xf32>
    %207 = vector.shape_cast %206 : vector<16x8xf32> to vector<16x8x1xf32>
    %208 = tpu.reciprocal %207 {approx = true} : vector<16x8x1xf32> -> vector<16x8x1xf32>
    %209 = vector.broadcast %208 : vector<16x8x1xf32> to vector<16x8x8xf32>
    %210 = arith.mulf %205, %209 : vector<16x8x8xf32>
    "tpu.trace_start"() <{level = 10 : i32, message = "bqk,bke->bqe"}> : () -> ()
    %cst_64 = arith.constant dense<0.000000e+00> : vector<16x8x8xf32>
    %211 = tpu.matmul %210, %197, %cst_64 {dimension_numbers = #tpu.dot_dimension_numbers<[2], [1], [1], [2], [0, 0, 0, 1, 1, 2], [0], [0]>} : vector<16x8x8xf32>, vector<16x8x8xf32>, vector<16x8x8xf32> -> vector<16x8x8xf32>
    "tpu.trace_stop"() : () -> ()
    %212 = vector.shape_cast %211 : vector<16x8x8xf32> to vector<128x8xf32>
    %213 = vector.extract_strided_slice %5 {offsets = [0, 0, 0, 0], sizes = [1, 1, 8, 32], strides = [1, 1, 1, 1]} : vector<2x4x8x32xf32> to vector<1x1x8x32xf32>
    %214 = vector.shape_cast %213 : vector<1x1x8x32xf32> to vector<8x32xf32>
    %cst_65 = arith.constant dense<0.000000e+00> : vector<128x32xf32>
    %215 = tpu.matmul %212, %214, %cst_65 {dimension_numbers = #tpu.dot_dimension_numbers<[1], [0], [0], [1], [0, 0, 1, 1], [], []>} : vector<128x8xf32>, vector<8x32xf32>, vector<128x32xf32> -> vector<128x32xf32>
    %216 = vector.extract_strided_slice %2 {offsets = [0, 1, 0, 0], sizes = [1, 1, 32, 8], strides = [1, 1, 1, 1]} : vector<2x4x32x8xf32> to vector<1x1x32x8xf32>
    %217 = vector.shape_cast %216 : vector<1x1x32x8xf32> to vector<32x8xf32>
    %cst_66 = arith.constant dense<0.000000e+00> : vector<128x8xf32>
    %218 = tpu.matmul %185, %217, %cst_66 {dimension_numbers = #tpu.dot_dimension_numbers<[1], [0], [0], [1], [0, 0, 1, 1], [], []>} : vector<128x32xf32>, vector<32x8xf32>, vector<128x8xf32> -> vector<128x8xf32>
    %219 = vector.extract_strided_slice %3 {offsets = [0, 1, 0, 0], sizes = [1, 1, 32, 8], strides = [1, 1, 1, 1]} : vector<2x4x32x8xf32> to vector<1x1x32x8xf32>
    %220 = vector.shape_cast %219 : vector<1x1x32x8xf32> to vector<32x8xf32>
    %cst_67 = arith.constant dense<0.000000e+00> : vector<128x8xf32>
    %221 = tpu.matmul %185, %220, %cst_67 {dimension_numbers = #tpu.dot_dimension_numbers<[1], [0], [0], [1], [0, 0, 1, 1], [], []>} : vector<128x32xf32>, vector<32x8xf32>, vector<128x8xf32> -> vector<128x8xf32>
    %222 = vector.extract_strided_slice %4 {offsets = [0, 1, 0, 0], sizes = [1, 1, 32, 8], strides = [1, 1, 1, 1]} : vector<2x4x32x8xf32> to vector<1x1x32x8xf32>
    %223 = vector.shape_cast %222 : vector<1x1x32x8xf32> to vector<32x8xf32>
    %cst_68 = arith.constant dense<0.000000e+00> : vector<128x8xf32>
    %224 = tpu.matmul %185, %223, %cst_68 {dimension_numbers = #tpu.dot_dimension_numbers<[1], [0], [0], [1], [0, 0, 1, 1], [], []>} : vector<128x32xf32>, vector<32x8xf32>, vector<128x8xf32> -> vector<128x8xf32>
    %225 = vector.shape_cast %218 : vector<128x8xf32> to vector<16x8x8xf32>
    %226 = vector.shape_cast %221 : vector<128x8xf32> to vector<16x8x8xf32>
    %227 = vector.shape_cast %224 : vector<128x8xf32> to vector<16x8x8xf32>
    "tpu.trace_start"() <{level = 10 : i32, message = "bqe,bke->bqk"}> : () -> ()
    %cst_69 = arith.constant dense<0.000000e+00> : vector<16x8x8xf32>
    %228 = tpu.matmul %225, %226, %cst_69 {dimension_numbers = #tpu.dot_dimension_numbers<[2], [2], [1], [1], [0, 0, 0, 1, 1, 1], [0], [0]>} : vector<16x8x8xf32>, vector<16x8x8xf32>, vector<16x8x8xf32> -> vector<16x8x8xf32>
    "tpu.trace_stop"() : () -> ()
    %cst_70 = arith.constant 0.353553385 : f32
    %229 = vector.broadcast %cst_70 : f32 to vector<16x8x8xf32>
    %230 = arith.mulf %228, %229 : vector<16x8x8xf32>
    %cst_71 = arith.constant dense<0xFF800000> : vector<16x8xf32>
    %231 = vector.multi_reduction <maximumf>, %230, %cst_71 [2] : vector<16x8x8xf32> to vector<16x8xf32>
    %232 = vector.shape_cast %231 : vector<16x8xf32> to vector<16x8x1xf32>
    %233 = vector.broadcast %232 : vector<16x8x1xf32> to vector<16x8x8xf32>
    %234 = arith.subf %230, %233 : vector<16x8x8xf32>
    %235 = math.exp %234 : vector<16x8x8xf32>
    %cst_72 = arith.constant dense<0.000000e+00> : vector<16x8xf32>
    %236 = vector.multi_reduction <add>, %235, %cst_72 [2] : vector<16x8x8xf32> to vector<16x8xf32>
    %237 = vector.shape_cast %236 : vector<16x8xf32> to vector<16x8x1xf32>
    %238 = tpu.reciprocal %237 {approx = true} : vector<16x8x1xf32> -> vector<16x8x1xf32>
    %239 = vector.broadcast %238 : vector<16x8x1xf32> to vector<16x8x8xf32>
    %240 = arith.mulf %235, %239 : vector<16x8x8xf32>
    "tpu.trace_start"() <{level = 10 : i32, message = "bqk,bke->bqe"}> : () -> ()
    %cst_73 = arith.constant dense<0.000000e+00> : vector<16x8x8xf32>
    %241 = tpu.matmul %240, %227, %cst_73 {dimension_numbers = #tpu.dot_dimension_numbers<[2], [1], [1], [2], [0, 0, 0, 1, 1, 2], [0], [0]>} : vector<16x8x8xf32>, vector<16x8x8xf32>, vector<16x8x8xf32> -> vector<16x8x8xf32>
    "tpu.trace_stop"() : () -> ()
    %242 = vector.shape_cast %241 : vector<16x8x8xf32> to vector<128x8xf32>
    %243 = vector.extract_strided_slice %5 {offsets = [0, 1, 0, 0], sizes = [1, 1, 8, 32], strides = [1, 1, 1, 1]} : vector<2x4x8x32xf32> to vector<1x1x8x32xf32>
    %244 = vector.shape_cast %243 : vector<1x1x8x32xf32> to vector<8x32xf32>
    %cst_74 = arith.constant dense<0.000000e+00> : vector<128x32xf32>
    %245 = tpu.matmul %242, %244, %cst_74 {dimension_numbers = #tpu.dot_dimension_numbers<[1], [0], [0], [1], [0, 0, 1, 1], [], []>} : vector<128x8xf32>, vector<8x32xf32>, vector<128x32xf32> -> vector<128x32xf32>
    %246 = arith.addf %215, %245 : vector<128x32xf32>
    %247 = vector.extract_strided_slice %2 {offsets = [0, 2, 0, 0], sizes = [1, 1, 32, 8], strides = [1, 1, 1, 1]} : vector<2x4x32x8xf32> to vector<1x1x32x8xf32>
    %248 = vector.shape_cast %247 : vector<1x1x32x8xf32> to vector<32x8xf32>
    %cst_75 = arith.constant dense<0.000000e+00> : vector<128x8xf32>
    %249 = tpu.matmul %185, %248, %cst_75 {dimension_numbers = #tpu.dot_dimension_numbers<[1], [0], [0], [1], [0, 0, 1, 1], [], []>} : vector<128x32xf32>, vector<32x8xf32>, vector<128x8xf32> -> vector<128x8xf32>
    %250 = vector.extract_strided_slice %3 {offsets = [0, 2, 0, 0], sizes = [1, 1, 32, 8], strides = [1, 1, 1, 1]} : vector<2x4x32x8xf32> to vector<1x1x32x8xf32>
    %251 = vector.shape_cast %250 : vector<1x1x32x8xf32> to vector<32x8xf32>
    %cst_76 = arith.constant dense<0.000000e+00> : vector<128x8xf32>
    %252 = tpu.matmul %185, %251, %cst_76 {dimension_numbers = #tpu.dot_dimension_numbers<[1], [0], [0], [1], [0, 0, 1, 1], [], []>} : vector<128x32xf32>, vector<32x8xf32>, vector<128x8xf32> -> vector<128x8xf32>
    %253 = vector.extract_strided_slice %4 {offsets = [0, 2, 0, 0], sizes = [1, 1, 32, 8], strides = [1, 1, 1, 1]} : vector<2x4x32x8xf32> to vector<1x1x32x8xf32>
    %254 = vector.shape_cast %253 : vector<1x1x32x8xf32> to vector<32x8xf32>
    %cst_77 = arith.constant dense<0.000000e+00> : vector<128x8xf32>
    %255 = tpu.matmul %185, %254, %cst_77 {dimension_numbers = #tpu.dot_dimension_numbers<[1], [0], [0], [1], [0, 0, 1, 1], [], []>} : vector<128x32xf32>, vector<32x8xf32>, vector<128x8xf32> -> vector<128x8xf32>
    %256 = vector.shape_cast %249 : vector<128x8xf32> to vector<16x8x8xf32>
    %257 = vector.shape_cast %252 : vector<128x8xf32> to vector<16x8x8xf32>
    %258 = vector.shape_cast %255 : vector<128x8xf32> to vector<16x8x8xf32>
    "tpu.trace_start"() <{level = 10 : i32, message = "bqe,bke->bqk"}> : () -> ()
    %cst_78 = arith.constant dense<0.000000e+00> : vector<16x8x8xf32>
    %259 = tpu.matmul %256, %257, %cst_78 {dimension_numbers = #tpu.dot_dimension_numbers<[2], [2], [1], [1], [0, 0, 0, 1, 1, 1], [0], [0]>} : vector<16x8x8xf32>, vector<16x8x8xf32>, vector<16x8x8xf32> -> vector<16x8x8xf32>
    "tpu.trace_stop"() : () -> ()
    %cst_79 = arith.constant 0.353553385 : f32
    %260 = vector.broadcast %cst_79 : f32 to vector<16x8x8xf32>
    %261 = arith.mulf %259, %260 : vector<16x8x8xf32>
    %cst_80 = arith.constant dense<0xFF800000> : vector<16x8xf32>
    %262 = vector.multi_reduction <maximumf>, %261, %cst_80 [2] : vector<16x8x8xf32> to vector<16x8xf32>
    %263 = vector.shape_cast %262 : vector<16x8xf32> to vector<16x8x1xf32>
    %264 = vector.broadcast %263 : vector<16x8x1xf32> to vector<16x8x8xf32>
    %265 = arith.subf %261, %264 : vector<16x8x8xf32>
    %266 = math.exp %265 : vector<16x8x8xf32>
    %cst_81 = arith.constant dense<0.000000e+00> : vector<16x8xf32>
    %267 = vector.multi_reduction <add>, %266, %cst_81 [2] : vector<16x8x8xf32> to vector<16x8xf32>
    %268 = vector.shape_cast %267 : vector<16x8xf32> to vector<16x8x1xf32>
    %269 = tpu.reciprocal %268 {approx = true} : vector<16x8x1xf32> -> vector<16x8x1xf32>
    %270 = vector.broadcast %269 : vector<16x8x1xf32> to vector<16x8x8xf32>
    %271 = arith.mulf %266, %270 : vector<16x8x8xf32>
    "tpu.trace_start"() <{level = 10 : i32, message = "bqk,bke->bqe"}> : () -> ()
    %cst_82 = arith.constant dense<0.000000e+00> : vector<16x8x8xf32>
    %272 = tpu.matmul %271, %258, %cst_82 {dimension_numbers = #tpu.dot_dimension_numbers<[2], [1], [1], [2], [0, 0, 0, 1, 1, 2], [0], [0]>} : vector<16x8x8xf32>, vector<16x8x8xf32>, vector<16x8x8xf32> -> vector<16x8x8xf32>
    "tpu.trace_stop"() : () -> ()
    %273 = vector.shape_cast %272 : vector<16x8x8xf32> to vector<128x8xf32>
    %274 = vector.extract_strided_slice %5 {offsets = [0, 2, 0, 0], sizes = [1, 1, 8, 32], strides = [1, 1, 1, 1]} : vector<2x4x8x32xf32> to vector<1x1x8x32xf32>
    %275 = vector.shape_cast %274 : vector<1x1x8x32xf32> to vector<8x32xf32>
    %cst_83 = arith.constant dense<0.000000e+00> : vector<128x32xf32>
    %276 = tpu.matmul %273, %275, %cst_83 {dimension_numbers = #tpu.dot_dimension_numbers<[1], [0], [0], [1], [0, 0, 1, 1], [], []>} : vector<128x8xf32>, vector<8x32xf32>, vector<128x32xf32> -> vector<128x32xf32>
    %277 = arith.addf %246, %276 : vector<128x32xf32>
    %278 = vector.extract_strided_slice %2 {offsets = [0, 3, 0, 0], sizes = [1, 1, 32, 8], strides = [1, 1, 1, 1]} : vector<2x4x32x8xf32> to vector<1x1x32x8xf32>
    %279 = vector.shape_cast %278 : vector<1x1x32x8xf32> to vector<32x8xf32>
    %cst_84 = arith.constant dense<0.000000e+00> : vector<128x8xf32>
    %280 = tpu.matmul %185, %279, %cst_84 {dimension_numbers = #tpu.dot_dimension_numbers<[1], [0], [0], [1], [0, 0, 1, 1], [], []>} : vector<128x32xf32>, vector<32x8xf32>, vector<128x8xf32> -> vector<128x8xf32>
    %281 = vector.extract_strided_slice %3 {offsets = [0, 3, 0, 0], sizes = [1, 1, 32, 8], strides = [1, 1, 1, 1]} : vector<2x4x32x8xf32> to vector<1x1x32x8xf32>
    %282 = vector.shape_cast %281 : vector<1x1x32x8xf32> to vector<32x8xf32>
    %cst_85 = arith.constant dense<0.000000e+00> : vector<128x8xf32>
    %283 = tpu.matmul %185, %282, %cst_85 {dimension_numbers = #tpu.dot_dimension_numbers<[1], [0], [0], [1], [0, 0, 1, 1], [], []>} : vector<128x32xf32>, vector<32x8xf32>, vector<128x8xf32> -> vector<128x8xf32>
    %284 = vector.extract_strided_slice %4 {offsets = [0, 3, 0, 0], sizes = [1, 1, 32, 8], strides = [1, 1, 1, 1]} : vector<2x4x32x8xf32> to vector<1x1x32x8xf32>
    %285 = vector.shape_cast %284 : vector<1x1x32x8xf32> to vector<32x8xf32>
    %cst_86 = arith.constant dense<0.000000e+00> : vector<128x8xf32>
    %286 = tpu.matmul %185, %285, %cst_86 {dimension_numbers = #tpu.dot_dimension_numbers<[1], [0], [0], [1], [0, 0, 1, 1], [], []>} : vector<128x32xf32>, vector<32x8xf32>, vector<128x8xf32> -> vector<128x8xf32>
    %287 = vector.shape_cast %280 : vector<128x8xf32> to vector<16x8x8xf32>
    %288 = vector.shape_cast %283 : vector<128x8xf32> to vector<16x8x8xf32>
    %289 = vector.shape_cast %286 : vector<128x8xf32> to vector<16x8x8xf32>
    "tpu.trace_start"() <{level = 10 : i32, message = "bqe,bke->bqk"}> : () -> ()
    %cst_87 = arith.constant dense<0.000000e+00> : vector<16x8x8xf32>
    %290 = tpu.matmul %287, %288, %cst_87 {dimension_numbers = #tpu.dot_dimension_numbers<[2], [2], [1], [1], [0, 0, 0, 1, 1, 1], [0], [0]>} : vector<16x8x8xf32>, vector<16x8x8xf32>, vector<16x8x8xf32> -> vector<16x8x8xf32>
    "tpu.trace_stop"() : () -> ()
    %cst_88 = arith.constant 0.353553385 : f32
    %291 = vector.broadcast %cst_88 : f32 to vector<16x8x8xf32>
    %292 = arith.mulf %290, %291 : vector<16x8x8xf32>
    %cst_89 = arith.constant dense<0xFF800000> : vector<16x8xf32>
    %293 = vector.multi_reduction <maximumf>, %292, %cst_89 [2] : vector<16x8x8xf32> to vector<16x8xf32>
    %294 = vector.shape_cast %293 : vector<16x8xf32> to vector<16x8x1xf32>
    %295 = vector.broadcast %294 : vector<16x8x1xf32> to vector<16x8x8xf32>
    %296 = arith.subf %292, %295 : vector<16x8x8xf32>
    %297 = math.exp %296 : vector<16x8x8xf32>
    %cst_90 = arith.constant dense<0.000000e+00> : vector<16x8xf32>
    %298 = vector.multi_reduction <add>, %297, %cst_90 [2] : vector<16x8x8xf32> to vector<16x8xf32>
    %299 = vector.shape_cast %298 : vector<16x8xf32> to vector<16x8x1xf32>
    %300 = tpu.reciprocal %299 {approx = true} : vector<16x8x1xf32> -> vector<16x8x1xf32>
    %301 = vector.broadcast %300 : vector<16x8x1xf32> to vector<16x8x8xf32>
    %302 = arith.mulf %297, %301 : vector<16x8x8xf32>
    "tpu.trace_start"() <{level = 10 : i32, message = "bqk,bke->bqe"}> : () -> ()
    %cst_91 = arith.constant dense<0.000000e+00> : vector<16x8x8xf32>
    %303 = tpu.matmul %302, %289, %cst_91 {dimension_numbers = #tpu.dot_dimension_numbers<[2], [1], [1], [2], [0, 0, 0, 1, 1, 2], [0], [0]>} : vector<16x8x8xf32>, vector<16x8x8xf32>, vector<16x8x8xf32> -> vector<16x8x8xf32>
    "tpu.trace_stop"() : () -> ()
    %304 = vector.shape_cast %303 : vector<16x8x8xf32> to vector<128x8xf32>
    %305 = vector.extract_strided_slice %5 {offsets = [0, 3, 0, 0], sizes = [1, 1, 8, 32], strides = [1, 1, 1, 1]} : vector<2x4x8x32xf32> to vector<1x1x8x32xf32>
    %306 = vector.shape_cast %305 : vector<1x1x8x32xf32> to vector<8x32xf32>
    %cst_92 = arith.constant dense<0.000000e+00> : vector<128x32xf32>
    %307 = tpu.matmul %304, %306, %cst_92 {dimension_numbers = #tpu.dot_dimension_numbers<[1], [0], [0], [1], [0, 0, 1, 1], [], []>} : vector<128x8xf32>, vector<8x32xf32>, vector<128x32xf32> -> vector<128x32xf32>
    %308 = arith.addf %277, %307 : vector<128x32xf32>
    %309 = vector.extract_strided_slice %6 {offsets = [0, 0, 0], sizes = [1, 1, 32], strides = [1, 1, 1]} : vector<2x1x32xf32> to vector<1x1x32xf32>
    %310 = vector.shape_cast %309 : vector<1x1x32xf32> to vector<1x32xf32>
    %311 = vector.broadcast %310 : vector<1x32xf32> to vector<128x32xf32>
    %312 = arith.addf %308, %311 : vector<128x32xf32>
    %313 = vector.shape_cast %312 : vector<128x32xf32> to vector<16x8x32xf32>
    %314 = vector.extract_strided_slice %313 {offsets = [0, 0, 0], sizes = [1, 8, 32], strides = [1, 1, 1]} : vector<16x8x32xf32> to vector<1x8x32xf32>
    %315 = vector.shape_cast %314 : vector<1x8x32xf32> to vector<8x32xf32>
    %316 = vector.extract_strided_slice %135 {offsets = [0, 0, 0], sizes = [8, 1, 32], strides = [1, 1, 1]} : vector<8x16x32xf32> to vector<8x1x32xf32>
    %317 = vector.shape_cast %316 : vector<8x1x32xf32> to vector<8x32xf32>
    %318 = arith.addf %315, %317 : vector<8x32xf32>
    %319 = vector.extract_strided_slice %313 {offsets = [1, 0, 0], sizes = [1, 8, 32], strides = [1, 1, 1]} : vector<16x8x32xf32> to vector<1x8x32xf32>
    %320 = vector.shape_cast %319 : vector<1x8x32xf32> to vector<8x32xf32>
    %321 = vector.extract_strided_slice %135 {offsets = [0, 1, 0], sizes = [8, 1, 32], strides = [1, 1, 1]} : vector<8x16x32xf32> to vector<8x1x32xf32>
    %322 = vector.shape_cast %321 : vector<8x1x32xf32> to vector<8x32xf32>
    %323 = arith.addf %320, %322 : vector<8x32xf32>
    %324 = vector.extract_strided_slice %313 {offsets = [2, 0, 0], sizes = [1, 8, 32], strides = [1, 1, 1]} : vector<16x8x32xf32> to vector<1x8x32xf32>
    %325 = vector.shape_cast %324 : vector<1x8x32xf32> to vector<8x32xf32>
    %326 = vector.extract_strided_slice %135 {offsets = [0, 2, 0], sizes = [8, 1, 32], strides = [1, 1, 1]} : vector<8x16x32xf32> to vector<8x1x32xf32>
    %327 = vector.shape_cast %326 : vector<8x1x32xf32> to vector<8x32xf32>
    %328 = arith.addf %325, %327 : vector<8x32xf32>
    %329 = vector.extract_strided_slice %313 {offsets = [3, 0, 0], sizes = [1, 8, 32], strides = [1, 1, 1]} : vector<16x8x32xf32> to vector<1x8x32xf32>
    %330 = vector.shape_cast %329 : vector<1x8x32xf32> to vector<8x32xf32>
    %331 = vector.extract_strided_slice %135 {offsets = [0, 3, 0], sizes = [8, 1, 32], strides = [1, 1, 1]} : vector<8x16x32xf32> to vector<8x1x32xf32>
    %332 = vector.shape_cast %331 : vector<8x1x32xf32> to vector<8x32xf32>
    %333 = arith.addf %330, %332 : vector<8x32xf32>
    %334 = vector.extract_strided_slice %313 {offsets = [4, 0, 0], sizes = [1, 8, 32], strides = [1, 1, 1]} : vector<16x8x32xf32> to vector<1x8x32xf32>
    %335 = vector.shape_cast %334 : vector<1x8x32xf32> to vector<8x32xf32>
    %336 = vector.extract_strided_slice %135 {offsets = [0, 4, 0], sizes = [8, 1, 32], strides = [1, 1, 1]} : vector<8x16x32xf32> to vector<8x1x32xf32>
    %337 = vector.shape_cast %336 : vector<8x1x32xf32> to vector<8x32xf32>
    %338 = arith.addf %335, %337 : vector<8x32xf32>
    %339 = vector.extract_strided_slice %313 {offsets = [5, 0, 0], sizes = [1, 8, 32], strides = [1, 1, 1]} : vector<16x8x32xf32> to vector<1x8x32xf32>
    %340 = vector.shape_cast %339 : vector<1x8x32xf32> to vector<8x32xf32>
    %341 = vector.extract_strided_slice %135 {offsets = [0, 5, 0], sizes = [8, 1, 32], strides = [1, 1, 1]} : vector<8x16x32xf32> to vector<8x1x32xf32>
    %342 = vector.shape_cast %341 : vector<8x1x32xf32> to vector<8x32xf32>
    %343 = arith.addf %340, %342 : vector<8x32xf32>
    %344 = vector.extract_strided_slice %313 {offsets = [6, 0, 0], sizes = [1, 8, 32], strides = [1, 1, 1]} : vector<16x8x32xf32> to vector<1x8x32xf32>
    %345 = vector.shape_cast %344 : vector<1x8x32xf32> to vector<8x32xf32>
    %346 = vector.extract_strided_slice %135 {offsets = [0, 6, 0], sizes = [8, 1, 32], strides = [1, 1, 1]} : vector<8x16x32xf32> to vector<8x1x32xf32>
    %347 = vector.shape_cast %346 : vector<8x1x32xf32> to vector<8x32xf32>
    %348 = arith.addf %345, %347 : vector<8x32xf32>
    %349 = vector.extract_strided_slice %313 {offsets = [7, 0, 0], sizes = [1, 8, 32], strides = [1, 1, 1]} : vector<16x8x32xf32> to vector<1x8x32xf32>
    %350 = vector.shape_cast %349 : vector<1x8x32xf32> to vector<8x32xf32>
    %351 = vector.extract_strided_slice %135 {offsets = [0, 7, 0], sizes = [8, 1, 32], strides = [1, 1, 1]} : vector<8x16x32xf32> to vector<8x1x32xf32>
    %352 = vector.shape_cast %351 : vector<8x1x32xf32> to vector<8x32xf32>
    %353 = arith.addf %350, %352 : vector<8x32xf32>
    %354 = vector.extract_strided_slice %313 {offsets = [8, 0, 0], sizes = [1, 8, 32], strides = [1, 1, 1]} : vector<16x8x32xf32> to vector<1x8x32xf32>
    %355 = vector.shape_cast %354 : vector<1x8x32xf32> to vector<8x32xf32>
    %356 = vector.extract_strided_slice %135 {offsets = [0, 8, 0], sizes = [8, 1, 32], strides = [1, 1, 1]} : vector<8x16x32xf32> to vector<8x1x32xf32>
    %357 = vector.shape_cast %356 : vector<8x1x32xf32> to vector<8x32xf32>
    %358 = arith.addf %355, %357 : vector<8x32xf32>
    %359 = vector.extract_strided_slice %313 {offsets = [9, 0, 0], sizes = [1, 8, 32], strides = [1, 1, 1]} : vector<16x8x32xf32> to vector<1x8x32xf32>
    %360 = vector.shape_cast %359 : vector<1x8x32xf32> to vector<8x32xf32>
    %361 = vector.extract_strided_slice %135 {offsets = [0, 9, 0], sizes = [8, 1, 32], strides = [1, 1, 1]} : vector<8x16x32xf32> to vector<8x1x32xf32>
    %362 = vector.shape_cast %361 : vector<8x1x32xf32> to vector<8x32xf32>
    %363 = arith.addf %360, %362 : vector<8x32xf32>
    %364 = vector.extract_strided_slice %313 {offsets = [10, 0, 0], sizes = [1, 8, 32], strides = [1, 1, 1]} : vector<16x8x32xf32> to vector<1x8x32xf32>
    %365 = vector.shape_cast %364 : vector<1x8x32xf32> to vector<8x32xf32>
    %366 = vector.extract_strided_slice %135 {offsets = [0, 10, 0], sizes = [8, 1, 32], strides = [1, 1, 1]} : vector<8x16x32xf32> to vector<8x1x32xf32>
    %367 = vector.shape_cast %366 : vector<8x1x32xf32> to vector<8x32xf32>
    %368 = arith.addf %365, %367 : vector<8x32xf32>
    %369 = vector.extract_strided_slice %313 {offsets = [11, 0, 0], sizes = [1, 8, 32], strides = [1, 1, 1]} : vector<16x8x32xf32> to vector<1x8x32xf32>
    %370 = vector.shape_cast %369 : vector<1x8x32xf32> to vector<8x32xf32>
    %371 = vector.extract_strided_slice %135 {offsets = [0, 11, 0], sizes = [8, 1, 32], strides = [1, 1, 1]} : vector<8x16x32xf32> to vector<8x1x32xf32>
    %372 = vector.shape_cast %371 : vector<8x1x32xf32> to vector<8x32xf32>
    %373 = arith.addf %370, %372 : vector<8x32xf32>
    %374 = vector.extract_strided_slice %313 {offsets = [12, 0, 0], sizes = [1, 8, 32], strides = [1, 1, 1]} : vector<16x8x32xf32> to vector<1x8x32xf32>
    %375 = vector.shape_cast %374 : vector<1x8x32xf32> to vector<8x32xf32>
    %376 = vector.extract_strided_slice %135 {offsets = [0, 12, 0], sizes = [8, 1, 32], strides = [1, 1, 1]} : vector<8x16x32xf32> to vector<8x1x32xf32>
    %377 = vector.shape_cast %376 : vector<8x1x32xf32> to vector<8x32xf32>
    %378 = arith.addf %375, %377 : vector<8x32xf32>
    %379 = vector.extract_strided_slice %313 {offsets = [13, 0, 0], sizes = [1, 8, 32], strides = [1, 1, 1]} : vector<16x8x32xf32> to vector<1x8x32xf32>
    %380 = vector.shape_cast %379 : vector<1x8x32xf32> to vector<8x32xf32>
    %381 = vector.extract_strided_slice %135 {offsets = [0, 13, 0], sizes = [8, 1, 32], strides = [1, 1, 1]} : vector<8x16x32xf32> to vector<8x1x32xf32>
    %382 = vector.shape_cast %381 : vector<8x1x32xf32> to vector<8x32xf32>
    %383 = arith.addf %380, %382 : vector<8x32xf32>
    %384 = vector.extract_strided_slice %313 {offsets = [14, 0, 0], sizes = [1, 8, 32], strides = [1, 1, 1]} : vector<16x8x32xf32> to vector<1x8x32xf32>
    %385 = vector.shape_cast %384 : vector<1x8x32xf32> to vector<8x32xf32>
    %386 = vector.extract_strided_slice %135 {offsets = [0, 14, 0], sizes = [8, 1, 32], strides = [1, 1, 1]} : vector<8x16x32xf32> to vector<8x1x32xf32>
    %387 = vector.shape_cast %386 : vector<8x1x32xf32> to vector<8x32xf32>
    %388 = arith.addf %385, %387 : vector<8x32xf32>
    %389 = vector.extract_strided_slice %313 {offsets = [15, 0, 0], sizes = [1, 8, 32], strides = [1, 1, 1]} : vector<16x8x32xf32> to vector<1x8x32xf32>
    %390 = vector.shape_cast %389 : vector<1x8x32xf32> to vector<8x32xf32>
    %391 = vector.extract_strided_slice %135 {offsets = [0, 15, 0], sizes = [8, 1, 32], strides = [1, 1, 1]} : vector<8x16x32xf32> to vector<8x1x32xf32>
    %392 = vector.shape_cast %391 : vector<8x1x32xf32> to vector<8x32xf32>
    %393 = arith.addf %390, %392 : vector<8x32xf32>
    %394 = tpu.concatenate %318, %323, %328, %333, %338, %343, %348, %353, %358, %363, %368, %373, %378, %383, %388, %393 in 1 : vector<8x32xf32>, vector<8x32xf32>, vector<8x32xf32>, vector<8x32xf32>, vector<8x32xf32>, vector<8x32xf32>, vector<8x32xf32>, vector<8x32xf32>, vector<8x32xf32>, vector<8x32xf32>, vector<8x32xf32>, vector<8x32xf32>, vector<8x32xf32>, vector<8x32xf32>, vector<8x32xf32>, vector<8x32xf32> -> vector<8x512xf32>
    %c0_93 = arith.constant 0 : index
    %c0_94 = arith.constant 0 : index
    %c0_95 = arith.constant 0 : index
    %395 = vector.load %arg7[%c0_93, %c0_94, %c0_95] : memref<1x8x512xf32, #tpu.memory_space<vmem>>, vector<1x8x512xf32>
    %396 = vector.shape_cast %395 : vector<1x8x512xf32> to vector<8x512xf32>
    %397 = vector.shape_cast %394 : vector<8x512xf32> to vector<1x8x512xf32>
    tpu.vector_store %arg7[%c0_93, %c0_94, %c0_95], %397 {strides = array<i32>} : memref<1x8x512xf32, #tpu.memory_space<vmem>>, vector<1x8x512xf32>,
    return
  }
  func.func @transform_0(%arg0: i32) -> (i32, i32, i32, i32) {
    %c0_i32 = arith.constant 0 : i32
    %c0_i32_0 = arith.constant 0 : i32
    %c0_i32_1 = arith.constant 0 : i32
    %c0_i32_2 = arith.constant 0 : i32
    return %arg0, %c0_i32, %c0_i32_0, %c0_i32_1 : i32, i32, i32, i32
  }
  func.func @transform_1(%arg0: i32) -> (i32, i32, i32, i32) {
    %c0_i32 = arith.constant 0 : i32
    %c0_i32_0 = arith.constant 0 : i32
    %c0_i32_1 = arith.constant 0 : i32
    %c0_i32_2 = arith.constant 0 : i32
    %c0_i32_3 = arith.constant 0 : i32
    return %c0_i32, %c0_i32_0, %c0_i32_1, %c0_i32_2 : i32, i32, i32, i32
  }
  func.func @transform_2(%arg0: i32) -> (i32, i32, i32, i32) {
    %c0_i32 = arith.constant 0 : i32
    %c0_i32_0 = arith.constant 0 : i32
    %c0_i32_1 = arith.constant 0 : i32
    %c0_i32_2 = arith.constant 0 : i32
    %c0_i32_3 = arith.constant 0 : i32
    return %c0_i32, %c0_i32_0, %c0_i32_1, %c0_i32_2 : i32, i32, i32, i32
  }
  func.func @transform_3(%arg0: i32) -> (i32, i32, i32, i32) {
    %c0_i32 = arith.constant 0 : i32
    %c0_i32_0 = arith.constant 0 : i32
    %c0_i32_1 = arith.constant 0 : i32
    %c0_i32_2 = arith.constant 0 : i32
    %c0_i32_3 = arith.constant 0 : i32
    return %c0_i32, %c0_i32_0, %c0_i32_1, %c0_i32_2 : i32, i32, i32, i32
  }
  func.func @transform_4(%arg0: i32) -> (i32, i32, i32, i32) {
    %c0_i32 = arith.constant 0 : i32
    %c0_i32_0 = arith.constant 0 : i32
    %c0_i32_1 = arith.constant 0 : i32
    %c0_i32_2 = arith.constant 0 : i32
    %c0_i32_3 = arith.constant 0 : i32
    return %c0_i32, %c0_i32_0, %c0_i32_1, %c0_i32_2 : i32, i32, i32, i32
  }
  func.func @transform_5(%arg0: i32) -> (i32, i32, i32) {
    %c0_i32 = arith.constant 0 : i32
    %c0_i32_0 = arith.constant 0 : i32
    %c0_i32_1 = arith.constant 0 : i32
    %c0_i32_2 = arith.constant 0 : i32
    return %c0_i32, %c0_i32_0, %c0_i32_1 : i32, i32, i32
  }
  func.func @transform_6(%arg0: i32) -> (i32, i32, i32) {
    %c0_i32 = arith.constant 0 : i32
    %c0_i32_0 = arith.constant 0 : i32
    %c0_i32_1 = arith.constant 0 : i32
    return %arg0, %c0_i32, %c0_i32_0 : i32, i32, i32
  }
}

</mosaic_0001>

<bundles_post_ra>
// kernel: tpu_custom_call.1
= control target key start
LH: loop header
LB: loop body
LE: loop exit
PB: predicated region body
PF: predicated region fallthrough
CT: control target
= control target key end

     0   :  { %11 = vsyncpa [#allocation3], 0  ;;  %s33109_s0 = inlined_call_operand.vmem [shape: f32[2,8,16,32], index: 0, kind: input, shape index: {}]   ;;  %s33110_s1 = inlined_call_operand.vmem [shape: f32[2,4,32,8], index: 1, kind: input, shape index: {}]   ;;  %s33111_s2 = inlined_call_operand.vmem [shape: f32[2,4,32,8], index: 2, kind: input, shape index: {}]   ;;  %s33112_s3 = inlined_call_operand.vmem [shape: f32[2,4,32,8], index: 3, kind: input, shape index: {}]   ;;  %s33113_s4 = inlined_call_operand.vmem [shape: f32[2,4,8,32], index: 4, kind: input, shape index: {}]   ;;  %s33114_s5 = inlined_call_operand.vmem [shape: f32[2,1,32], index: 5, kind: input, shape index: {}]   ;;  %s33115_s6 = inlined_call_operand.hbm [shape: f32[2,8,512], index: 6, kind: output, shape index: {}]  }
   0x1   :  { %13 = vsyncpa [#allocation3 + $0x1], 0  ;;  %s28283_s21 = smov 0   ;;  %s28285_s22 = smov 0  }
   0x2   :  { %s28287_s23 = smov 0   ;;  %s28289_s24 = smov 0  }
   0x3 LB: > { %s28304_s25 = sadd.s32 4294967295, %s28240_s24   ;;  %s22776_s26 = sadd.s32 4294967294, %s28240_s24   ;;  %s28240_s24 = sphi %s28289_s24, %s33247_s24   ;;  %s28236_s23 = sphi %s28287_s23, %s33246_s23   ;;  %s28232_s22 = sphi %s28285_s22, %s33245_s22   ;;  %s28228_s21 = sphi %s28283_s21, %s33244_s21  }
   0x4   : > { %s28308_s27 = sadd.s32 1, %s28240_s24   ;;  %s157_s28 = sadd.s32 1, %s28236_s23 }
   0x5   : > { %s154_s29 = ssub.s32 %s28240_s24, %s28308_s27  ;;  %p167_p0 = scmp.ne.s32.totalorder %s28236_s23, %s28232_s22 }
   0x6   : > { %p155_p1 = scmp.eq.s32.totalorder %s154_s29, 0  ;;  %p168_p2 = scmp.eq.s32.totalorder %s28304_s25, 1 }
   0x7   : > { %p173_p3 = scmp.ne.s32.totalorder %s28232_s22, %s28228_s21  ;;  %p174_p4 = scmp.eq.s32.totalorder %s22776_s26, 1 }
   0x8   : > { %s28319_s30 = scalar_select %p155_p1, %s28236_s23, %s157_s28  }
   0x9   : > { %p28321_p5 = por %p168_p2, %p167_p0  ;;  %p28325_p6 = por %p174_p4, %p173_p3 }
   0xa   : > { %p22779_p7 = scmp.ge.s32.totalorder %s28240_s24, 1  ;;  %p215_p8 = scmp.lt.s32.totalorder %s28240_s24, 3 }
   0xc   : > { %p216_p9 = pnand %p22779_p7, %p215_p8 }
   0xe   : > { %219 = sbr.rel (%p216_p9) target bundleno = 7824 (0x1e90), region = 44 }
  0x15   : > { %v314_v0 = vld [vmem:[%s33111_s2 + $0x80] sm:$0xff]  ;;  %v315_v1 = vld [vmem:[%s33111_s2 + $0x88] sm:$0xff]  ;;  %v316_v2 = vld [vmem:[%s33111_s2 + $0x90] sm:$0xff]  ;;  %p245_p10 = scmp.lt.s32.totalorder %s28304_s25, 1  ;;  %vm372_vm0 = vcmask 261120   ;;  %vm856_vm1 = vcmask 64512  }
  0x16   : > { %v26972_v3 = vpack.c.bf16 %v315_v1, %v314_v0  ;;  %v317_v4 = vld [vmem:[%s33111_s2 + $0x98] sm:$0xff]  ;;  %v282_v5 = vld [vmem:[%s33110_s1 + $0x80] sm:$0xff]  ;;  %v283_v6 = vld [vmem:[%s33110_s1 + $0x88] sm:$0xff]  ;;  %vm1569_vm3 = vcmask 130048   ;;  %vm9245_vm4 = vcmask 1041409   ;;  %vm9247_vm5 = vcmask 1042434  }
  0x17   : > { %v26976_v7 = vpack.c.bf16 %v317_v4, %v316_v2  ;;  %s246_s26 = scalar_select %p245_p10, %s28304_s25, 1  ;;  %v26964_v8 = vpack.c.bf16 %v283_v6, %v282_v5  ;;  %v284_v9 = vld [vmem:[%s33110_s1 + $0x90] sm:$0xff]  ;;  %v285_v10 = vld [vmem:[%s33110_s1 + $0x98] sm:$0xff]  ;;  %v346_v12 = vld [vmem:[%s33112_s3 + $0x80] sm:$0xff]  ;;  %vm9249_vm6 = vcmask 1043459   ;;  %vm9251_vm7 = vcmask 1044484  }
  0x18   : > { %26973 = vmatprep.subr.bf16.mxu1 %v26972_v3  ;;  %v26968_v11 = vpack.c.bf16 %v285_v10, %v284_v9  ;;  %v347_v13 = vld [vmem:[%s33112_s3 + $0x88] sm:$0xff]  ;;  %v348_v31 = vld [vmem:[%s33112_s3 + $0x90] sm:$0xff]  ;;  %v349_v32 = vld [vmem:[%s33112_s3 + $0x98] sm:$0xff]  ;;  %vm9253_vm8 = vcmask 1045509   ;;  %vm9255_vm9 = vcmask 1046534   ;;  %vm9257_vm10 = vcmask 1047559  }
  0x19   : > { %26975 = vmatpush3.bf16.msra.mxu1 %v26972_v3  ;;  %s23770_s15 = sshll.u32 %s246_s26, 7  ;;  %26965 = vmatprep.subr.bf16.mxu0 %v26964_v8  ;;  %v26980_v15 = vpack.c.bf16 %v347_v13, %v346_v12  ;;  %v26984_v33 = vpack.c.bf16 %v349_v32, %v348_v31  ;;  %vm28520_vm2 = vmpackc.low %vm856_vm1, %vm856_vm1  ;;  %vm28243_vm11 = vmmov 0   ;;  %s28244_s28 = smov 32   ;;  %vm22685_vm12 = vcmask 523264  }
  0x1a   : > { %26977 = vmatprep.subr.bf16.mxu1 %v26976_v7  ;;  %s28366_s18 = scalar_lea.vmem %s33109_s0, %s23770_s15  ;;  %26967 = vmatpush3.bf16.msra.mxu0 %v26964_v8  ;;  %s28245_s29 = smov 96   ;;  %vm22687_vm13 = vcmask 785408  }
  0x1b   : > { %v28369_v14 = vld [vmem:[%s28366_s18] sm:$0xff]  ;;  %26969 = vmatprep.subr.bf16.mxu0 %v26968_v11  ;;  %v28376_v16 = vld [vmem:[%s28366_s18 + $0x8] sm:$0xff]  ;;  %v28379_v17 = vld [vmem:[%s28366_s18 + $0x10] sm:$0xff]  ;;  %s28246_s9 = smov 64   ;;  %s242_s10 = sand.u32 1, %s28232_s22  }
  0x1c   : > { %24940 = vmatprep.mubr.msk.f32.mxu1 %vm372_vm0, %v28369_v14  ;;  %24908 = vmatprep.mubr.msk.f32.mxu0 %vm372_vm0, %v28369_v14  ;;  %v28386_v18 = vld [vmem:[%s28366_s18 + $0x18] sm:$0xff]  ;;  %v28391_v19 = vld [vmem:[%s28366_s18 + $0x20] sm:$0xff]  ;;  %v28400_v20 = vld [vmem:[%s28366_s18 + $0x28] sm:$0xff]  ;;  %s22780_s11 = sshll.u32 %s242_s10, 5  ;;  %s23771_s13 = sshll.u32 %s28304_s25, 9 }
  0x1d   : > { %26979 = vmatpush3.bf16.msra.mxu1 %v26976_v7  ;;  %v28405_v21 = vld [vmem:[%s28366_s18 + $0x30] sm:$0xff]  ;;  %v28414_v22 = vld [vmem:[%s28366_s18 + $0x38] sm:$0xff]  ;;  %v28419_v23 = vld [vmem:[%s28366_s18 + $0x40] sm:$0xff]  ;;  %s244_s12 = scalar_lea.vmem [#allocation2], %s22780_s11  ;;  %s33064_s16 = scalar_lea.hbm %s33115_s6, %s23771_s13 }
  0x1e   : > { %26971 = vmatpush3.bf16.msra.mxu0 %v26968_v11  ;;  %v28428_v24 = vld [vmem:[%s28366_s18 + $0x48] sm:$0xff]  ;;  %v28433_v25 = vld [vmem:[%s28366_s18 + $0x50] sm:$0xff]  ;;  %v28442_v26 = vld [vmem:[%s28366_s18 + $0x58] sm:$0xff]  ;;  %s22717_s14 = sshll.u32 %s244_s12, 4  ;;  %s22703_s25 = scalar_lea.sflag [#allocation3], %s242_s10  ;;  %s33066_s14 = int_to_ptr.vmem [resolvable:$true] %s22717_s14 }
  0x1f   : > { %26981 = vmatprep.subr.bf16.mxu0 %v26980_v15  ;;  %v28447_v27 = vld [vmem:[%s28366_s18 + $0x60] sm:$0xff]  ;;  %v28456_v28 = vld [vmem:[%s28366_s18 + $0x68] sm:$0xff]  ;;  %v28461_v29 = vld [vmem:[%s28366_s18 + $0x70] sm:$0xff]  ;;  %s28178_s17 = scalar_lea.vmem %s33066_s14, 512  ;;  %s28247_s19 = smov [#allocation2]  }
  0x20   : > { %24941 = vmatmul.mubr.msk.f32.vlgmr.msra.gmra.mrb[0].mxu1 %vm372_vm0, %v28376_v16  ;;  %v28470_v30 = vld [vmem:[%s28366_s18 + $0x78] sm:$0xff]  ;;  %p28179_p11 = scmp.ne.s32.totalorder %s33066_s14, %s28178_s17  ;;  %s28182_s20 = sshll.u32 %s28247_s19, 4  ;;  %s28183_s20 = int_to_ptr.vmem [resolvable:$false] %s28182_s20 }
  0x21   : > { %24943 = vmatprep.mubr.msk.f32.mxu1 %vm372_vm0, %v28379_v17  ;;  %24909 = vmatmul.mubr.msk.f32.vlgmr.msra.gmra.mrb[0].mxu0 %vm372_vm0, %v28376_v16  ;;  %s28184_s26 = scalar_lea.vmem %s28183_s20, 1024  ;;  %p28185_p0 = scmp.lt.s32.totalorder %s33066_s14, %s28183_s20 }
  0x22   : > { %24911 = vmatprep.mubr.msk.f32.mxu0 %vm372_vm0, %v28379_v17  ;;  %26983 = vmatpush3.bf16.msra.mxu0 %v26980_v15  ;;  %p28180_p12 = pnand %p28179_p11, %p28321_p5  ;;  %p28186_p1 = scmp.lt.s32.totalorder %s28184_s26, %s28178_s17 }
  0x23   : > { %26985 = vmatprep.subr.bf16.mxu0 %v26984_v33 }
  0x24   : > { %24944 = vmatmul.mubr.msk.f32.gmra.mrb[2].mxu1 %vm372_vm0, %v28386_v18  ;;  %p28181_p13 = pneg %p28180_p12  ;;  %p28187_p2 = por %p28186_p1, %p28185_p0 }
  0x25   : > { %24946 = vmatprep.mubr.msk.f32.mxu1 %vm372_vm0, %v28391_v19  ;;  %24912 = vmatmul.mubr.msk.f32.gmra.mrb[2].mxu0 %vm372_vm0, %v28386_v18 }
  0x26   : > { %24914 = vmatprep.mubr.msk.f32.mxu0 %vm372_vm0, %v28391_v19  ;;  %26987 = vmatpush3.bf16.msra.mxu0 %v26984_v33  ;;  %p28188_p3 = pnand %p28187_p2, %p28181_p13 }
  0x28   : > { %24947 = vmatmul.mubr.msk.f32.gmra.mrb[4].mxu1 %vm372_vm0, %v28400_v20 }
  0x29   : > { %24949 = vmatprep.mubr.msk.f32.mxu1 %vm372_vm0, %v28405_v21  ;;  %24915 = vmatmul.mubr.msk.f32.gmra.mrb[4].mxu0 %vm372_vm0, %v28400_v20 }
  0x2a   : > { %24917 = vmatprep.mubr.msk.f32.mxu0 %vm372_vm0, %v28405_v21 }
  0x2c   : > { %24950 = vmatmul.mubr.msk.f32.gmra.mrb[6].mxu1 %vm372_vm0, %v28414_v22 }
  0x2d   : > { %24952 = vmatprep.mubr.msk.f32.mxu1 %vm372_vm0, %v28419_v23  ;;  %24918 = vmatmul.mubr.msk.f32.gmra.mrb[6].mxu0 %vm372_vm0, %v28414_v22 }
  0x2e   : > { %24920 = vmatprep.mubr.msk.f32.mxu0 %vm372_vm0, %v28419_v23 }
  0x30   : > { %24953 = vmatmul.mubr.msk.f32.gmra.mrb[8].mxu1 %vm372_vm0, %v28428_v24 }
  0x31   : > { %24955 = vmatprep.mubr.msk.f32.mxu1 %vm372_vm0, %v28433_v25  ;;  %24921 = vmatmul.mubr.msk.f32.gmra.mrb[8].mxu0 %vm372_vm0, %v28428_v24 }
  0x32   : > { %24923 = vmatprep.mubr.msk.f32.mxu0 %vm372_vm0, %v28433_v25 }
  0x34   : > { %24956 = vmatmul.mubr.msk.f32.gmra.mrb[10].mxu1 %vm372_vm0, %v28442_v26 }
  0x35   : > { %24958 = vmatprep.mubr.msk.f32.mxu1 %vm372_vm0, %v28447_v27  ;;  %24924 = vmatmul.mubr.msk.f32.gmra.mrb[10].mxu0 %vm372_vm0, %v28442_v26 }
  0x36   : > { %24926 = vmatprep.mubr.msk.f32.mxu0 %vm372_vm0, %v28447_v27 }
  0x38   : > { %24959 = vmatmul.mubr.msk.f32.gmra.mrb[12].mxu1 %vm372_vm0, %v28456_v28 }
  0x39   : > { %24961 = vmatprep.mubr.msk.f32.mxu1 %vm372_vm0, %v28461_v29  ;;  %24927 = vmatmul.mubr.msk.f32.gmra.mrb[12].mxu0 %vm372_vm0, %v28456_v28 }
  0x3a   : > { %24929 = vmatprep.mubr.msk.f32.mxu0 %vm372_vm0, %v28461_v29 }
  0x3c   : > { %24962 = vmatmul.mubr.msk.f32.gmra.mrb[14].mxu1 %vm372_vm0, %v28470_v30 }
  0x3d   : > { %24930 = vmatmul.mubr.msk.f32.gmra.mrb[14].mxu0 %vm372_vm0, %v28470_v30 }
  0x3e   : > { %24972 = vmatprep.mubr.msk.f32.mxu0 %vm372_vm0, %v28369_v14 }
  0x41   : > { %24973 = vmatmul.mubr.msk.f32.vlgmr.msra.gmra.mrb[16].mxu0 %vm372_vm0, %v28376_v16 }
  0x42   : > { %24975 = vmatprep.mubr.msk.f32.mxu0 %vm372_vm0, %v28379_v17 }
  0x45   : > { %24976 = vmatmul.mubr.msk.f32.gmra.mrb[18].mxu0 %vm372_vm0, %v28386_v18 }
  0x46   : > { %24978 = vmatprep.mubr.msk.f32.mxu0 %vm372_vm0, %v28391_v19 }
  0x49   : > { %24979 = vmatmul.mubr.msk.f32.gmra.mrb[20].mxu0 %vm372_vm0, %v28400_v20 }
  0x4a   : > { %24981 = vmatprep.mubr.msk.f32.mxu0 %vm372_vm0, %v28405_v21 }
  0x4d   : > { %24982 = vmatmul.mubr.msk.f32.gmra.mrb[22].mxu0 %vm372_vm0, %v28414_v22 }
  0x4e   : > { %24984 = vmatprep.mubr.msk.f32.mxu0 %vm372_vm0, %v28419_v23 }
  0x51   : > { %24985 = vmatmul.mubr.msk.f32.gmra.mrb[24].mxu0 %vm372_vm0, %v28428_v24 }
  0x52   : > { %24987 = vmatprep.mubr.msk.f32.mxu0 %vm372_vm0, %v28433_v25 }
  0x55   : > { %24988 = vmatmul.mubr.msk.f32.gmra.mrb[26].mxu0 %vm372_vm0, %v28442_v26 }
  0x56   : > { %24990 = vmatprep.mubr.msk.f32.mxu0 %vm372_vm0, %v28447_v27 }
  0x59   : > { %24991 = vmatmul.mubr.msk.f32.gmra.mrb[28].mxu0 %vm372_vm0, %v28456_v28 }
  0x5a   : > { %24993 = vmatprep.mubr.msk.f32.mxu0 %vm372_vm0, %v28461_v29 }
  0x5d   : > { %24994 = vmatmul.mubr.msk.f32.gmra.mrb[30].mxu0 %vm372_vm0, %v28470_v30 }
  0xf3   : > { %v24942_v34 = vpop.f32.mrb[0].mxu1 }
  0xf4   : > { %v632_v35 = vpop.f32.mrb[1].mxu1  ;;  %v24910_v37 = vpop.f32.mrb[0].mxu0 }
  0xf5   : > { %v26988_v38 = vpack.c.bf16 %v24942_v34, %v632_v35  ;;  %v487_v39 = vpop.f32.mrb[1].mxu0 }
  0xf6   : > { %25000 = vmatprep.mubr.msk.f32.mxu1 %vm856_vm1, %v487_v39 }
  0xf7   : > { %26990 = vmatprep.subr.msk.bf16.mxu1 %vm28520_vm2, %v26988_v38  ;;  %v24945_v40 = vpop.f32.mrb[2].mxu1 }
  0xf8   : > { %26993 = vmatpush3.bf16.xpose.msk.msra.mxu1 %vm28520_vm2, %v26988_v38  ;;  %v642_v41 = vpop.f32.mrb[3].mxu1  ;;  %v24913_v42 = vpop.f32.mrb[2].mxu0 }
  0xf9   : > { %v26994_v43 = vpack.c.bf16 %v24945_v40, %v642_v41  ;;  %v497_v44 = vpop.f32.mrb[3].mxu0 }
  0xfb   : > { %26996 = vmatprep.subr.msk.bf16.mxu1 %vm28520_vm2, %v26994_v43  ;;  %v24948_v45 = vpop.f32.mrb[4].mxu1 }
  0xfc   : > { %v652_v46 = vpop.f32.mrb[5].mxu1  ;;  %v24916_v47 = vpop.f32.mrb[4].mxu0 }
  0xfd   : > { %v27000_v48 = vpack.c.bf16 %v24948_v45, %v652_v46  ;;  %v507_v49 = vpop.f32.mrb[5].mxu0 }
  0xff   : > { %25001 = vmatmul.mubr.msk.f32.vlgmr.msra.gmra.mrb[16].mxu1 %vm856_vm1, %v24910_v37  ;;  %v24951_v50 = vpop.f32.mrb[6].mxu1 }
 0x100   : > { %26999 = vmatpush3.bf16.xpose.msk.msra.mxu1 %vm28520_vm2, %v26994_v43  ;;  %25007 = vmatprep.mubr.msk.f32.mxu1 %vm856_vm1, %v497_v44  ;;  %v662_v51 = vpop.f32.mrb[7].mxu1  ;;  %v24919_v52 = vpop.f32.mrb[6].mxu0 }
 0x101   : > { %27002 = vmatprep.subr.msk.bf16.mxu1 %vm28520_vm2, %v27000_v48  ;;  %v27006_v53 = vpack.c.bf16 %v24951_v50, %v662_v51  ;;  %v517_v54 = vpop.f32.mrb[7].mxu0 }
 0x103   : > { %v24954_v55 = vpop.f32.mrb[8].mxu1 }
 0x104   : > { %v672_v56 = vpop.f32.mrb[9].mxu1  ;;  %v24922_v57 = vpop.f32.mrb[8].mxu0 }
 0x105   : > { %v27012_v58 = vpack.c.bf16 %v24954_v55, %v672_v56  ;;  %v527_v59 = vpop.f32.mrb[9].mxu0 }
 0x106   : > { %25028 = vmatprep.mubr.msk.f32.mxu0 %vm856_vm1, %v527_v59 }
 0x107   : > { %25008 = vmatmul.mubr.msk.f32.vlgmr.msra.gmra.mrb[18].mxu1 %vm856_vm1, %v24913_v42  ;;  %27014 = vmatprep.subr.msk.bf16.mxu0 %vm28520_vm2, %v27012_v58  ;;  %v24957_v60 = vpop.f32.mrb[10].mxu1 }
 0x108   : > { %27005 = vmatpush3.bf16.xpose.msk.msra.mxu1 %vm28520_vm2, %v27000_v48  ;;  %25014 = vmatprep.mubr.msk.f32.mxu1 %vm856_vm1, %v507_v49  ;;  %v682_v61 = vpop.f32.mrb[11].mxu1  ;;  %v24925_v62 = vpop.f32.mrb[10].mxu0 }
 0x109   : > { %27008 = vmatprep.subr.msk.bf16.mxu1 %vm28520_vm2, %v27006_v53  ;;  %27017 = vmatpush3.bf16.xpose.msk.msra.mxu0 %vm28520_vm2, %v27012_v58  ;;  %v27018_v63 = vpack.c.bf16 %v24957_v60, %v682_v61  ;;  %v537_v0 = vpop.f32.mrb[11].mxu0 }
 0x10b   : > { %v24960_v1 = vpop.f32.mrb[12].mxu1 }
 0x10c   : > { %v692_v2 = vpop.f32.mrb[13].mxu1  ;;  %v24928_v3 = vpop.f32.mrb[12].mxu0 }
 0x10d   : > { %v27024_v4 = vpack.c.bf16 %v24960_v1, %v692_v2  ;;  %v547_v5 = vpop.f32.mrb[13].mxu0 }
 0x10f   : > { %25015 = vmatmul.mubr.msk.f32.vlgmr.msra.gmra.mrb[20].mxu1 %vm856_vm1, %v24916_v47  ;;  %27026 = vmatprep.subr.msk.bf16.mxu0 %vm28520_vm2, %v27024_v4  ;;  %v24963_v6 = vpop.f32.mrb[14].mxu1 }
 0x110   : > { %27011 = vmatpush3.bf16.xpose.msk.msra.mxu1 %vm28520_vm2, %v27006_v53  ;;  %25021 = vmatprep.mubr.msk.f32.mxu1 %vm856_vm1, %v517_v54  ;;  %v702_v7 = vpop.f32.mrb[15].mxu1  ;;  %v24931_v8 = vpop.f32.mrb[14].mxu0 }
 0x111   : > { %27020 = vmatprep.subr.msk.bf16.mxu1 %vm28520_vm2, %v27018_v63  ;;  %25029 = vmatmul.mubr.msk.f32.vlgmr.msra.gmra.mrb[32].mxu0 %vm856_vm1, %v24922_v57  ;;  %v27030_v9 = vpack.c.bf16 %v24963_v6, %v702_v7  ;;  %v557_v10 = vpop.f32.mrb[15].mxu0 }
 0x112   : > { %27029 = vmatpush3.bf16.xpose.msk.msra.mxu0 %vm28520_vm2, %v27024_v4  ;;  %25042 = vmatprep.mubr.msk.f32.mxu0 %vm856_vm1, %v547_v5 }
 0x114   : > { %v24974_v11 = vpop.f32.mrb[16].mxu0 }
 0x115   : > { %v777_v12 = vpop.f32.mrb[17].mxu0 }
 0x116   : > { %v27036_v13 = vpack.c.bf16 %v24974_v11, %v777_v12 }
 0x117   : > { %25022 = vmatmul.mubr.msk.f32.vlgmr.msra.gmra.mrb[22].mxu1 %vm856_vm1, %v24919_v52 }
 0x118   : > { %27023 = vmatpush3.bf16.xpose.msk.msra.mxu1 %vm28520_vm2, %v27018_v63  ;;  %25035 = vmatprep.mubr.msk.f32.mxu1 %vm856_vm1, %v537_v0  ;;  %v24977_v15 = vpop.f32.mrb[18].mxu0 }
 0x119   : > { %27032 = vmatprep.subr.msk.bf16.mxu1 %vm28520_vm2, %v27030_v9  ;;  %25043 = vmatmul.mubr.msk.f32.vlgmr.msra.gmra.mrb[34].mxu0 %vm856_vm1, %v24928_v3  ;;  %v787_v31 = vpop.f32.mrb[19].mxu0 }
 0x11a   : > { %27037 = vmatprep.subr.bf16.mxu0 %v27036_v13  ;;  %v27040_v32 = vpack.c.bf16 %v24977_v15, %v787_v31 }
 0x11b   : > { %27039 = vmatpush3.bf16.msra.mxu0 %v27036_v13 }
 0x11c   : > { %v24980_v33 = vpop.f32.mrb[20].mxu0 }
 0x11d   : > { %v797_v34 = vpop.f32.mrb[21].mxu0 }
 0x11e   : > { %v28572_v35 = vpack.c.bf16 %v24980_v33, %v797_v34 }
 0x11f   : > { %25036 = vmatmul.mubr.msk.f32.vlgmr.msra.gmra.mrb[24].mxu1 %vm856_vm1, %v24925_v62 }
 0x120   : > { %27035 = vmatpush3.bf16.xpose.msk.msra.mxu1 %vm28520_vm2, %v27030_v9  ;;  %25049 = vmatprep.mubr.msk.f32.mxu1 %vm856_vm1, %v557_v10  ;;  %v24983_v37 = vpop.f32.mrb[22].mxu0 }
 0x121   : > { %27041 = vmatprep.subr.bf16.mxu1 %v27040_v32  ;;  %v807_v38 = vpop.f32.mrb[23].mxu0  ;;  %27045 = vmatprep.subr.bf16.mxu0 %v28572_v35 }
 0x122   : > { %v28574_v39 = vpack.c.bf16 %v24983_v37, %v807_v38 }
 0x124   : > { %v24986_v40 = vpop.f32.mrb[24].mxu0 }
 0x125   : > { %v817_v41 = vpop.f32.mrb[25].mxu0 }
 0x126   : > { %v28577_v42 = vpack.c.bf16 %v24986_v40, %v817_v41 }
 0x127   : > { %25050 = vmatmul.mubr.msk.f32.vlgmr.msra.gmra.mrb[26].mxu1 %vm856_vm1, %v24931_v8 }
 0x128   : > { %27043 = vmatpush3.bf16.msra.mxu1 %v27040_v32  ;;  %v24989_v43 = vpop.f32.mrb[26].mxu0 }
 0x129   : > { %27049 = vmatprep.subr.bf16.mxu1 %v28574_v39  ;;  %v827_v44 = vpop.f32.mrb[27].mxu0 }
 0x12a   : > { %v28580_v45 = vpack.c.bf16 %v24989_v43, %v827_v44 }
 0x12c   : > { %v24992_v46 = vpop.f32.mrb[28].mxu0 }
 0x12d   : > { %v837_v47 = vpop.f32.mrb[29].mxu0 }
 0x12e   : > { %v28582_v48 = vpack.c.bf16 %v24992_v46, %v837_v47 }
 0x130   : > { %v24995_v49 = vpop.f32.mrb[30].mxu0 }
 0x131   : > { %v847_v50 = vpop.f32.mrb[31].mxu0 }
 0x132   : > { %v28584_v51 = vpack.c.bf16 %v24995_v49, %v847_v50 }
 0x1d2   : > { %v25002_v52 = vpop.f32.mrb[16].mxu1 }
 0x1d3   : > { %v935_v53 = vpop.f32.mrb[17].mxu1  ;;  %v28586_v54 = vmul.f32 0.35355338, %v25002_v52 }
 0x1d4   : > { %v28598_v62 = vmul.f32 0.35355338, %v935_v53 }
 0x1d5   : > { %v1573_v55 = vsel %vm1569_vm3, %v28586_v54, -inf }
 0x1d6   : > { %1574 = vmax.xlane.f32.xlu1 %v1573_v55  ;;  %v1570_v2 = vsel %vm1569_vm3, %v28598_v62, -inf }
 0x1da   : > { %v25009_v56 = vpop.f32.mrb[18].mxu1 }
 0x1db   : > { %v1022_v57 = vpop.f32.mrb[19].mxu1  ;;  %v28590_v58 = vmul.f32 0.35355338, %v25009_v56 }
 0x1dc   : > { %v28594_v60 = vmul.f32 0.35355338, %v1022_v57 }
 0x1dd   : > { %v1579_v59 = vsel %vm1569_vm3, %v28590_v58, -inf }
 0x1de   : > { %1580 = vmax.xlane.f32.xlu0 %v1579_v59  ;;  %v1576_v61 = vsel %vm1569_vm3, %v28594_v60, -inf }
 0x1e2   : > { %1577 = vmax.xlane.f32.xlu0 %v1576_v61  ;;  %v25016_v63 = vpop.f32.mrb[20].mxu1 }
 0x1e3   : > { %v1109_v0 = vpop.f32.mrb[21].mxu1  ;;  %v28624_v43 = vmul.f32 0.35355338, %v25016_v63 }
 0x1e4   : > { %v25030_v1 = vpop.f32.mrb[32].mxu0  ;;  %v28628_v46 = vmul.f32 0.35355338, %v1109_v0 }
 0x1e5   : > { %v1283_v3 = vpop.f32.mrb[33].mxu0  ;;  %v1585_v47 = vsel %vm1569_vm3, %v28624_v43, -inf  ;;  %v28632_v49 = vmul.f32 0.35355338, %v25030_v1 }
 0x1e6   : > { %1571 = vmax.xlane.f32.xlu0 %v1570_v2  ;;  %v1582_v50 = vsel %vm1569_vm3, %v28628_v46, -inf  ;;  %v28636_v52 = vmul.f32 0.35355338, %v1283_v3 }
 0x1e7   : > { %v1597_v53 = vsel %vm1569_vm3, %v28632_v49, -inf }
 0x1e8   : > { %v1594_v56 = vsel %vm1569_vm3, %v28636_v52, -inf }
 0x1ea   : > { %v25023_v4 = vpop.f32.mrb[22].mxu1 }
 0x1eb   : > { %v1196_v5 = vpop.f32.mrb[23].mxu1  ;;  %v28602_v6 = vmul.f32 0.35355338, %v25023_v4 }
 0x1ec   : > { %v25044_v7 = vpop.f32.mrb[34].mxu0  ;;  %v28606_v9 = vmul.f32 0.35355338, %v1196_v5 }
 0x1ed   : > { %v1591_v8 = vsel %vm1569_vm3, %v28602_v6, -inf  ;;  %v1457_v10 = vpop.f32.mrb[35].mxu0  ;;  %v28640_v55 = vmul.f32 0.35355338, %v25044_v7 }
 0x1ee   : > { %1592 = vmax.xlane.f32.xlu1 %v1591_v8  ;;  %v1588_v11 = vsel %vm1569_vm3, %v28606_v9, -inf  ;;  %v28644_v57 = vmul.f32 0.35355338, %v1457_v10 }
 0x1ef   : > { %v1609_v59 = vsel %vm1569_vm3, %v28640_v55, -inf }
 0x1f0   : > { %v1606_v61 = vsel %vm1569_vm3, %v28644_v57, -inf }
 0x1f2   : > { %1589 = vmax.xlane.f32.xlu1 %v1588_v11  ;;  %v25037_v12 = vpop.f32.mrb[24].mxu1 }
 0x1f3   : > { %v1370_v13 = vpop.f32.mrb[25].mxu1  ;;  %v28610_v15 = vmul.f32 0.35355338, %v25037_v12 }
 0x1f4   : > { %v28612_v31 = vmul.f32 0.35355338, %v1370_v13 }
 0x1f5   : > { %v1603_v32 = vsel %vm1569_vm3, %v28610_v15, -inf }
 0x1f6   : > { %1604 = vmax.xlane.f32.xlu1 %v1603_v32  ;;  %v1600_v33 = vsel %vm1569_vm3, %v28612_v31, -inf }
 0x1f7   : > { %1601 = vmax.xlane.f32.xlu0 %v1600_v33 }
 0x1fa   : > { %v25051_v34 = vpop.f32.mrb[26].mxu1 }
 0x1fb   : > { %v1544_v37 = vpop.f32.mrb[27].mxu1  ;;  %v28618_v38 = vmul.f32 0.35355338, %v25051_v34 }
 0x1fc   : > { %v28620_v40 = vmul.f32 0.35355338, %v1544_v37 }
 0x1fd   : > { %v1615_v41 = vsel %vm1569_vm3, %v28618_v38, -inf }
 0x1fe   : > { %1616 = vmax.xlane.f32.xlu1 %v1615_v41  ;;  %v1612_v44 = vsel %vm1569_vm3, %v28620_v40, -inf }
 0x1ff   : > { %1613 = vmax.xlane.f32.xlu0 %v1612_v44 }
 0x202   : > { %1586 = vmax.xlane.f32.xlu1 %v1585_v47 }
 0x203   : > { %1583 = vmax.xlane.f32.xlu0 %v1582_v50 }
 0x206   : > { %1598 = vmax.xlane.f32.xlu1 %v1597_v53 }
 0x207   : > { %1595 = vmax.xlane.f32.xlu0 %v1594_v56 }
 0x20a   : > { %1610 = vmax.xlane.f32.xlu1 %v1609_v59 }
 0x20b   : > { %1607 = vmax.xlane.f32.xlu0 %v1606_v61 }
 0x263   : > { %v1575_v63 = vpop.xlane.xlu1 %1574 }
 0x264   : > { %v1619_v0 = vsub.f32 %v28586_v54, %v1575_v63 }
 0x266   : > { %v1636_v1 = vmul.f32 1.442695, %v1619_v0 }
 0x268   : > { %27618 = vpow2.f32 %v1636_v1 }
 0x26b   : > { %v1581_v2 = vpop.xlane.xlu0 %1580 }
 0x26c   : > { %v1621_v3 = vsub.f32 %v28590_v58, %v1581_v2 }
 0x26e   : > { %v1640_v4 = vmul.f32 1.442695, %v1621_v3 }
 0x26f   : > { %v1578_v5 = vpop.xlane.xlu0 %1577 }
 0x270   : > { %27620 = vpow2.f32 %v1640_v4  ;;  %v1620_v8 = vsub.f32 %v28594_v60, %v1578_v5 }
 0x272   : > { %v28652_v7 = vpop.eup %27618  ;;  %v1638_v54 = vmul.f32 1.442695, %v1620_v8 }
 0x273   : > { %v1572_v10 = vpop.xlane.xlu0 %1571  ;;  %v1669_v11 = vsel %vm1569_vm3, %v28652_v7, 0.0 }
 0x274   : > { %v1618_v12 = vsub.f32 %v28598_v62, %v1572_v10  ;;  %1670 = vadd.xlane.f32.xlu1 %v1669_v11 }
 0x276   : > { %v1634_v13 = vmul.f32 1.442695, %v1618_v12 }
 0x278   : > { %27622 = vpow2.f32 %v1634_v13 }
 0x279   : > { %27624 = vpow2.f32 %v1638_v54 }
 0x27a   : > { %v28658_v32 = vpop.eup %27620 }
 0x27b   : > { %v1593_v58 = vpop.xlane.xlu1 %1592  ;;  %v1675_v33 = vsel %vm1569_vm3, %v28658_v32, 0.0 }
 0x27c   : > { %v1625_v34 = vsub.f32 %v28602_v6, %v1593_v58  ;;  %1676 = vadd.xlane.f32.xlu1 %v1675_v33 }
 0x27e   : > { %v1648_v60 = vmul.f32 1.442695, %v1625_v34 }
 0x27f   : > { %v1590_v37 = vpop.xlane.xlu1 %1589 }
 0x280   : > { %27626 = vpow2.f32 %v1648_v60  ;;  %v1624_v41 = vsub.f32 %v28606_v9, %v1590_v37 }
 0x282   : > { %v28664_v62 = vpop.eup %27622  ;;  %v1646_v44 = vmul.f32 1.442695, %v1624_v41 }
 0x283   : > { %v1605_v47 = vpop.xlane.xlu1 %1604  ;;  %v1666_v50 = vsel %vm1569_vm3, %v28664_v62, 0.0  ;;  %v28668_v53 = vpop.eup %27624 }
 0x284   : > { %27628 = vpow2.f32 %v1646_v44  ;;  %v1629_v56 = vsub.f32 %v28610_v15, %v1605_v47  ;;  %v1602_v59 = vpop.xlane.xlu0 %1601  ;;  %1667 = vadd.xlane.f32.xlu0 %v1666_v50  ;;  %v1672_v9 = vsel %vm1569_vm3, %v28668_v53, 0.0 }
 0x285   : > { %v1628_v6 = vsub.f32 %v28612_v31, %v1602_v59 }
 0x286   : > { %v1656_v61 = vmul.f32 1.442695, %v1629_v56 }
 0x287   : > { %v1654_v63 = vmul.f32 1.442695, %v1628_v6 }
 0x288   : > { %27630 = vpow2.f32 %v1656_v61  ;;  %1673 = vadd.xlane.f32.xlu0 %v1672_v9 }
 0x289   : > { %27632 = vpow2.f32 %v1654_v63 }
 0x28a   : > { %v28674_v0 = vpop.eup %27626 }
 0x28b   : > { %v1617_v1 = vpop.xlane.xlu1 %1616  ;;  %v1687_v2 = vsel %vm1569_vm3, %v28674_v0, 0.0 }
 0x28c   : > { %v1633_v15 = vsub.f32 %v28618_v38, %v1617_v1  ;;  %v1614_v3 = vpop.xlane.xlu0 %1613  ;;  %1688 = vadd.xlane.f32.xlu1 %v1687_v2 }
 0x28d   : > { %v1632_v31 = vsub.f32 %v28620_v40, %v1614_v3 }
 0x28e   : > { %v28680_v4 = vpop.eup %27628  ;;  %v1664_v5 = vmul.f32 1.442695, %v1633_v15 }
 0x28f   : > { %v1662_v8 = vmul.f32 1.442695, %v1632_v31  ;;  %v1587_v10 = vpop.xlane.xlu1 %1586  ;;  %v1684_v11 = vsel %vm1569_vm3, %v28680_v4, 0.0 }
 0x290   : > { %27634 = vpow2.f32 %v1664_v5  ;;  %v1623_v12 = vsub.f32 %v28624_v43, %v1587_v10  ;;  %v1584_v54 = vpop.xlane.xlu0 %1583  ;;  %1685 = vadd.xlane.f32.xlu0 %v1684_v11 }
 0x291   : > { %27636 = vpow2.f32 %v1662_v8  ;;  %v1622_v38 = vsub.f32 %v28628_v46, %v1584_v54 }
 0x292   : > { %v28686_v13 = vpop.eup %27630  ;;  %v1644_v58 = vmul.f32 1.442695, %v1623_v12 }
 0x293   : > { %v28688_v40 = vpop.eup %27632  ;;  %v1642_v33 = vmul.f32 1.442695, %v1622_v38  ;;  %v1599_v34 = vpop.xlane.xlu1 %1598  ;;  %v1699_v60 = vsel %vm1569_vm3, %v28686_v13, 0.0 }
 0x294   : > { %27638 = vpow2.f32 %v1644_v58  ;;  %v1627_v37 = vsub.f32 %v28632_v49, %v1599_v34  ;;  %v1596_v41 = vpop.xlane.xlu0 %1595  ;;  %1700 = vadd.xlane.f32.xlu1 %v1699_v60  ;;  %v1696_v43 = vsel %vm1569_vm3, %v28688_v40, 0.0 }
 0x295   : > { %27640 = vpow2.f32 %v1642_v33  ;;  %v1626_v46 = vsub.f32 %v28636_v52, %v1596_v41  ;;  %1697 = vadd.xlane.f32.xlu0 %v1696_v43 }
 0x296   : > { %v1652_v44 = vmul.f32 1.442695, %v1627_v37 }
 0x297   : > { %v1650_v47 = vmul.f32 1.442695, %v1626_v46  ;;  %v1611_v50 = vpop.xlane.xlu1 %1610 }
 0x298   : > { %27642 = vpow2.f32 %v1652_v44  ;;  %v1631_v56 = vsub.f32 %v28640_v55, %v1611_v50  ;;  %v1608_v59 = vpop.xlane.xlu0 %1607 }
 0x299   : > { %27644 = vpow2.f32 %v1650_v47  ;;  %v1630_v6 = vsub.f32 %v28644_v57, %v1608_v59 }
 0x29a   : > { %v28698_v49 = vpop.eup %27634  ;;  %v1660_v61 = vmul.f32 1.442695, %v1631_v56 }
 0x29b   : > { %v28700_v63 = vpop.eup %27636  ;;  %v1658_v9 = vmul.f32 1.442695, %v1630_v6  ;;  %v1711_v52 = vsel %vm1569_vm3, %v28698_v49, 0.0 }
 0x29c   : > { %27646 = vpow2.f32 %v1660_v61  ;;  %1712 = vadd.xlane.f32.xlu1 %v1711_v52  ;;  %v1708_v1 = vsel %vm1569_vm3, %v28700_v63, 0.0 }
 0x29d   : > { %27648 = vpow2.f32 %v1658_v9  ;;  %1709 = vadd.xlane.f32.xlu0 %v1708_v1  ;;  %v319_v1 = vld [vmem:[%s33111_s2 + $0xa8] sm:$0xff] }
 0x29e   : > { %v28706_v55 = vpop.eup %27638 }
 0x29f   : > { %v28708_v2 = vpop.eup %27640  ;;  %v1681_v57 = vsel %vm1569_vm3, %v28706_v55, 0.0 }
 0x2a0   : > { %1682 = vadd.xlane.f32.xlu1 %v1681_v57  ;;  %v1678_v15 = vsel %vm1569_vm3, %v28708_v2, 0.0 }
 0x2a1   : > { %1679 = vadd.xlane.f32.xlu0 %v1678_v15 }
 0x2a2   : > { %v28714_v3 = vpop.eup %27642 }
 0x2a3   : > { %v28716_v31 = vpop.eup %27644  ;;  %v1693_v5 = vsel %vm1569_vm3, %v28714_v3, 0.0 }
 0x2a4   : > { %1694 = vadd.xlane.f32.xlu1 %v1693_v5  ;;  %v1690_v8 = vsel %vm1569_vm3, %v28716_v31, 0.0 }
 0x2a5   : > { %1691 = vadd.xlane.f32.xlu0 %v1690_v8 }
 0x2a6   : > { %v28722_v10 = vpop.eup %27646 }
 0x2a7   : > { %v28724_v11 = vpop.eup %27648  ;;  %v1705_v12 = vsel %vm1569_vm3, %v28722_v10, 0.0 }
 0x2a8   : > { %1706 = vadd.xlane.f32.xlu1 %v1705_v12  ;;  %v1702_v54 = vsel %vm1569_vm3, %v28724_v11, 0.0 }
 0x2a9   : > { %1703 = vadd.xlane.f32.xlu0 %v1702_v54 }
 0x301   : > { %v1671_v38 = vpop.xlane.xlu1 %1670 }
 0x302   : > { %27650 = vrcp.f32 %v1671_v38 }
 0x309   : > { %v1677_v33 = vpop.xlane.xlu1 %1676 }
 0x30c   : > { %v27651_v37 = vpop.eup %27650 }
 0x30d   : > { %v1731_v44 = vmul.f32 %v27651_v37, %v28652_v7 }
 0x311   : > { %v1668_v58 = vpop.xlane.xlu0 %1667 }
 0x312   : > { %27652 = vrcp.f32 %v1668_v58 }
 0x313   : > { %27654 = vrcp.f32 %v1677_v33 }
 0x315   : > { %v1674_v34 = vpop.xlane.xlu0 %1673 }
 0x316   : > { %27656 = vrcp.f32 %v1674_v34 }
 0x319   : > { %v1689_v60 = vpop.xlane.xlu1 %1688 }
 0x31a   : > { %27658 = vrcp.f32 %v1689_v60 }
 0x31c   : > { %v27653_v41 = vpop.eup %27652 }
 0x31d   : > { %v1686_v43 = vpop.xlane.xlu0 %1685  ;;  %v1730_v46 = vmul.f32 %v27653_v41, %v28664_v62  ;;  %v27655_v47 = vpop.eup %27654 }
 0x31e   : > { %27660 = vrcp.f32 %v1686_v43  ;;  %v1733_v62 = vmul.f32 %v27655_v47, %v28658_v32 }
 0x31f   : > { %25056 = vmatprep.mubr.msk.f32.mxu0 %vm1569_vm3, %v1730_v46 }
 0x320   : > { %v27657_v50 = vpop.eup %27656  ;;  %25057 = vmatmul.mubr.msk.f32.vlgmr.msra.gmra.mrb[36].mxu0 %vm1569_vm3, %v1731_v44  ;;  %v287_v44 = vld [vmem:[%s33110_s1 + $0xa8] sm:$0xff] }
 0x321   : > { %27047 = vmatpush3.bf16.msra.mxu0 %v28572_v35  ;;  %v1701_v56 = vpop.xlane.xlu1 %1700  ;;  %v1732_v59 = vmul.f32 %v27657_v50, %v28668_v53 }
 0x322   : > { %27662 = vrcp.f32 %v1701_v56  ;;  %27053 = vmatprep.subr.bf16.mxu0 %v28577_v42  ;;  %v1698_v6 = vpop.xlane.xlu0 %1697 }
 0x323   : > { %27664 = vrcp.f32 %v1698_v6  ;;  %25063 = vmatprep.mubr.msk.f32.mxu1 %vm1569_vm3, %v1732_v59  ;;  %v288_v59 = vld [vmem:[%s33110_s1 + $0xb0] sm:$0xff]  ;;  %v289_v6 = vld [vmem:[%s33110_s1 + $0xb8] sm:$0xff] }
 0x324   : > { %25064 = vmatmul.mubr.msk.f32.vlgmr.msra.gmra.mrb[28].mxu1 %vm1569_vm3, %v1733_v62  ;;  %v27659_v7 = vpop.eup %27658  ;;  %v27072_v62 = vpack.c.bf16 %v289_v6, %v288_v59 }
 0x325   : > { %27051 = vmatpush3.bf16.msra.mxu1 %v28574_v39  ;;  %v1737_v52 = vmul.f32 %v27659_v7, %v28674_v0  ;;  %v318_v39 = vld [vmem:[%s33111_s2 + $0xa0] sm:$0xff]  ;;  %v352_v7 = vld [vmem:[%s33112_s3 + $0xb0] sm:$0xff] }
 0x326   : > { %27057 = vmatprep.subr.bf16.mxu1 %v28580_v45  ;;  %v27076_v8 = vpack.c.bf16 %v319_v1, %v318_v39 }
 0x328   : > { %v27661_v35 = vpop.eup %27660 }
 0x329   : > { %v1713_v61 = vpop.xlane.xlu1 %1712  ;;  %v1736_v53 = vmul.f32 %v27661_v35, %v28680_v4  ;;  %v353_v35 = vld [vmem:[%s33112_s3 + $0xb8] sm:$0xff] }
 0x32a   : > { %27666 = vrcp.f32 %v1713_v61  ;;  %v1710_v9 = vpop.xlane.xlu0 %1709 }
 0x32b   : > { %27668 = vrcp.f32 %v1710_v9  ;;  %25077 = vmatprep.mubr.msk.f32.mxu1 %vm1569_vm3, %v1736_v53 }
 0x32c   : > { %v27663_v32 = vpop.eup %27662  ;;  %25078 = vmatmul.mubr.msk.f32.vlgmr.msra.gmra.mrb[30].mxu1 %vm1569_vm3, %v1737_v52 }
 0x32d   : > { %v27665_v57 = vpop.eup %27664  ;;  %27059 = vmatpush3.bf16.msra.mxu1 %v28580_v45  ;;  %v1683_v4 = vpop.xlane.xlu1 %1682  ;;  %v1741_v5 = vmul.f32 %v27663_v32, %v28686_v13  ;;  %v321_v13 = vld [vmem:[%s33111_s2 + $0xb8] sm:$0xff] }
 0x32e   : > { %27670 = vrcp.f32 %v1683_v4  ;;  %27065 = vmatprep.subr.bf16.mxu1 %v28584_v51  ;;  %v1680_v0 = vpop.xlane.xlu0 %1679  ;;  %v1740_v15 = vmul.f32 %v27665_v57, %v28688_v40  ;;  %v320_v40 = vld [vmem:[%s33111_s2 + $0xb0] sm:$0xff] }
 0x32f   : > { %27672 = vrcp.f32 %v1680_v0  ;;  %v27080_v60 = vpack.c.bf16 %v321_v13, %v320_v40 }
 0x330   : > { %25091 = vmatprep.mubr.msk.f32.mxu1 %vm1569_vm3, %v1740_v15 }
 0x331   : > { %v1695_v12 = vpop.xlane.xlu1 %1694  ;;  %25092 = vmatmul.mubr.msk.f32.vlgmr.msra.gmra.mrb[32].mxu1 %vm1569_vm3, %v1741_v5 }
 0x332   : > { %27674 = vrcp.f32 %v1695_v12  ;;  %27067 = vmatpush3.bf16.msra.mxu1 %v28584_v51  ;;  %v1692_v45 = vpop.xlane.xlu0 %1691 }
 0x333   : > { %27676 = vrcp.f32 %v1692_v45  ;;  %27077 = vmatprep.subr.bf16.mxu1 %v27076_v8 }
 0x334   : > { %v27667_v54 = vpop.eup %27666 }
 0x335   : > { %v27669_v38 = vpop.eup %27668  ;;  %v1707_v58 = vpop.xlane.xlu1 %1706  ;;  %v1745_v51 = vmul.f32 %v27667_v54, %v28698_v49  ;;  %v286_v49 = vld [vmem:[%s33110_s1 + $0xa0] sm:$0xff] }
 0x336   : > { %27678 = vrcp.f32 %v1707_v58  ;;  %v1704_v33 = vpop.xlane.xlu0 %1703  ;;  %v1744_v34 = vmul.f32 %v27669_v38, %v28700_v63  ;;  %v27068_v50 = vpack.c.bf16 %v287_v44, %v286_v49 }
 0x337   : > { %27680 = vrcp.f32 %v1704_v33 }
 0x338   : > { %v27671_v37 = vpop.eup %27670  ;;  %25105 = vmatprep.mubr.msk.f32.mxu1 %vm1569_vm3, %v1744_v34 }
 0x339   : > { %v27673_v41 = vpop.eup %27672  ;;  %25106 = vmatmul.mubr.msk.f32.vlgmr.msra.gmra.mrb[34].mxu1 %vm1569_vm3, %v1745_v51  ;;  %v1735_v46 = vmul.f32 %v27671_v37, %v28706_v55 }
 0x33a   : > { %27079 = vmatpush3.bf16.msra.mxu1 %v27076_v8  ;;  %v1734_v43 = vmul.f32 %v27673_v41, %v28708_v2  ;;  %25148 = vmatprep.mubr.msk.f32.mxu1 %vm372_vm0, %v28369_v14 }
 0x33b   : > { %27081 = vmatprep.subr.bf16.mxu1 %v27080_v60 }
 0x33c   : > { %v27675_v63 = vpop.eup %27674  ;;  %25070 = vmatprep.mubr.msk.f32.mxu0 %vm1569_vm3, %v1734_v43 }
 0x33d   : > { %v27677_v47 = vpop.eup %27676  ;;  %25071 = vmatmul.mubr.msk.f32.vlgmr.msra.gmra.mrb[38].mxu0 %vm1569_vm3, %v1735_v46  ;;  %v1739_v55 = vmul.f32 %v27675_v63, %v28714_v3 }
 0x33e   : > { %27055 = vmatpush3.bf16.msra.mxu0 %v28577_v42  ;;  %27083 = vmatpush3.bf16.msra.mxu1 %v27080_v60  ;;  %v1738_v2 = vmul.f32 %v27677_v47, %v28716_v31 }
 0x33f   : > { %27061 = vmatprep.subr.bf16.mxu0 %v28582_v48 }
 0x340   : > { %v27679_v56 = vpop.eup %27678  ;;  %25084 = vmatprep.mubr.msk.f32.mxu0 %vm1569_vm3, %v1738_v2 }
 0x341   : > { %v27681_v42 = vpop.eup %27680  ;;  %25149 = vmatmul.mubr.msk.f32.vlgmr.msra.gmra.mrb[36].mxu1 %vm372_vm0, %v28376_v16  ;;  %25085 = vmatmul.mubr.msk.f32.vlgmr.msra.gmra.mrb[40].mxu0 %vm1569_vm3, %v1739_v55  ;;  %v1743_v31 = vmul.f32 %v27679_v56, %v28722_v10  ;;  %v351_v10 = vld [vmem:[%s33112_s3 + $0xa8] sm:$0xff] }
 0x342   : > { %27063 = vmatpush3.bf16.msra.mxu0 %v28582_v48  ;;  %v1742_v3 = vmul.f32 %v27681_v42, %v28724_v11  ;;  %25151 = vmatprep.mubr.msk.f32.mxu1 %vm372_vm0, %v28379_v17  ;;  %v350_v48 = vld [vmem:[%s33112_s3 + $0xa0] sm:$0xff] }
 0x343   : > { %27069 = vmatprep.subr.bf16.mxu0 %v27068_v50  ;;  %v27084_v11 = vpack.c.bf16 %v351_v10, %v350_v48 }
 0x344   : > { %25098 = vmatprep.mubr.msk.f32.mxu0 %vm1569_vm3, %v1742_v3 }
 0x345   : > { %25099 = vmatmul.mubr.msk.f32.vlgmr.msra.gmra.mrb[42].mxu0 %vm1569_vm3, %v1743_v31  ;;  %25152 = vmatmul.mubr.msk.f32.gmra.mrb[38].mxu1 %vm372_vm0, %v28386_v18 }
 0x346   : > { %27071 = vmatpush3.bf16.msra.mxu0 %v27068_v50  ;;  %25116 = vmatprep.mubr.msk.f32.mxu0 %vm372_vm0, %v28369_v14 }
 0x347   : > { %27073 = vmatprep.subr.bf16.mxu0 %v27072_v62  ;;  %25154 = vmatprep.mubr.msk.f32.mxu1 %vm372_vm0, %v28391_v19 }
 0x349   : > { %25155 = vmatmul.mubr.msk.f32.gmra.mrb[40].mxu1 %vm372_vm0, %v28400_v20 }
 0x34a   : > { %27075 = vmatpush3.bf16.msra.mxu0 %v27072_v62  ;;  %25157 = vmatprep.mubr.msk.f32.mxu1 %vm372_vm0, %v28405_v21 }
 0x34b   : > { %27085 = vmatprep.subr.bf16.mxu0 %v27084_v11 }
 0x34d   : > { %25117 = vmatmul.mubr.msk.f32.vlgmr.msra.gmra.mrb[44].mxu0 %vm372_vm0, %v28376_v16  ;;  %25158 = vmatmul.mubr.msk.f32.gmra.mrb[42].mxu1 %vm372_vm0, %v28414_v22 }
 0x34e   : > { %25119 = vmatprep.mubr.msk.f32.mxu0 %vm372_vm0, %v28379_v17  ;;  %25160 = vmatprep.mubr.msk.f32.mxu1 %vm372_vm0, %v28419_v23 }
 0x34f   : > { %27087 = vmatpush3.bf16.msra.mxu0 %v27084_v11 }
 0x351   : > { %25120 = vmatmul.mubr.msk.f32.gmra.mrb[46].mxu0 %vm372_vm0, %v28386_v18  ;;  %25161 = vmatmul.mubr.msk.f32.gmra.mrb[44].mxu1 %vm372_vm0, %v28428_v24 }
 0x352   : > { %25122 = vmatprep.mubr.msk.f32.mxu0 %vm372_vm0, %v28391_v19  ;;  %25163 = vmatprep.mubr.msk.f32.mxu1 %vm372_vm0, %v28433_v25 }
 0x355   : > { %25123 = vmatmul.mubr.msk.f32.gmra.mrb[48].mxu0 %vm372_vm0, %v28400_v20  ;;  %25164 = vmatmul.mubr.msk.f32.gmra.mrb[46].mxu1 %vm372_vm0, %v28442_v26 }
 0x356   : > { %25125 = vmatprep.mubr.msk.f32.mxu0 %vm372_vm0, %v28405_v21  ;;  %25166 = vmatprep.mubr.msk.f32.mxu1 %vm372_vm0, %v28447_v27 }
 0x359   : > { %25126 = vmatmul.mubr.msk.f32.gmra.mrb[50].mxu0 %vm372_vm0, %v28414_v22  ;;  %25167 = vmatmul.mubr.msk.f32.gmra.mrb[48].mxu1 %vm372_vm0, %v28456_v28 }
 0x35a   : > { %25128 = vmatprep.mubr.msk.f32.mxu0 %vm372_vm0, %v28419_v23  ;;  %25169 = vmatprep.mubr.msk.f32.mxu1 %vm372_vm0, %v28461_v29 }
 0x35d   : > { %25129 = vmatmul.mubr.msk.f32.gmra.mrb[52].mxu0 %vm372_vm0, %v28428_v24  ;;  %25170 = vmatmul.mubr.msk.f32.gmra.mrb[50].mxu1 %vm372_vm0, %v28470_v30 }
 0x35e   : > { %25131 = vmatprep.mubr.msk.f32.mxu0 %vm372_vm0, %v28433_v25 }
 0x361   : > { %25132 = vmatmul.mubr.msk.f32.gmra.mrb[54].mxu0 %vm372_vm0, %v28442_v26 }
 0x362   : > { %25134 = vmatprep.mubr.msk.f32.mxu0 %vm372_vm0, %v28447_v27 }
 0x365   : > { %25135 = vmatmul.mubr.msk.f32.gmra.mrb[56].mxu0 %vm372_vm0, %v28456_v28 }
 0x366   : > { %25137 = vmatprep.mubr.msk.f32.mxu0 %vm372_vm0, %v28461_v29 }
 0x369   : > { %25138 = vmatmul.mubr.msk.f32.gmra.mrb[58].mxu0 %vm372_vm0, %v28470_v30 }
 0x36a   : > { %25180 = vmatprep.mubr.msk.f32.mxu0 %vm372_vm0, %v28369_v14  ;;  %v27088_v14 = vpack.c.bf16 %v353_v35, %v352_v7 }
 0x36c   : > { %27089 = vmatprep.subr.bf16.mxu0 %v27088_v14 }
 0x36d   : > { %27091 = vmatpush3.bf16.msra.mxu0 %v27088_v14 }
 0x370   : > { %25181 = vmatmul.mubr.msk.f32.vlgmr.msra.gmra.mrb[60].mxu0 %vm372_vm0, %v28376_v16 }
 0x371   : > { %25183 = vmatprep.mubr.msk.f32.mxu0 %vm372_vm0, %v28379_v17 }
 0x374   : > { %25184 = vmatmul.mubr.msk.f32.gmra.mrb[62].mxu0 %vm372_vm0, %v28386_v18 }
 0x375   : > { %25186 = vmatprep.mubr.msk.f32.mxu0 %vm372_vm0, %v28391_v19 }
 0x378   : > { %25187 = vmatmul.mubr.msk.f32.gmra.mrb[64].mxu0 %vm372_vm0, %v28400_v20 }
 0x379   : > { %25189 = vmatprep.mubr.msk.f32.mxu0 %vm372_vm0, %v28405_v21 }
 0x37c   : > { %25190 = vmatmul.mubr.msk.f32.gmra.mrb[66].mxu0 %vm372_vm0, %v28414_v22 }
 0x37d   : > { %25192 = vmatprep.mubr.msk.f32.mxu0 %vm372_vm0, %v28419_v23 }
 0x380   : > { %25193 = vmatmul.mubr.msk.f32.gmra.mrb[68].mxu0 %vm372_vm0, %v28428_v24 }
 0x381   : > { %25195 = vmatprep.mubr.msk.f32.mxu0 %vm372_vm0, %v28433_v25 }
 0x384   : > { %25196 = vmatmul.mubr.msk.f32.gmra.mrb[70].mxu0 %vm372_vm0, %v28442_v26 }
 0x385   : > { %25198 = vmatprep.mubr.msk.f32.mxu0 %vm372_vm0, %v28447_v27 }
 0x388   : > { %25199 = vmatmul.mubr.msk.f32.gmra.mrb[72].mxu0 %vm372_vm0, %v28456_v28 }
 0x389   : > { %25201 = vmatprep.mubr.msk.f32.mxu0 %vm372_vm0, %v28461_v29 }
 0x38c   : > { %25202 = vmatmul.mubr.msk.f32.gmra.mrb[74].mxu0 %vm372_vm0, %v28470_v30 }
 0x3f3   : > { %v28904_v16 = vpop.f32.mrb[36].mxu0 }
 0x3f4   : > { %v28906_v17 = vpop.f32.mrb[37].mxu0 }
 0x3f7   : > { %v28908_v18 = vpop.f32.mrb[28].mxu1 }
 0x3f8   : > { %v28910_v19 = vpop.f32.mrb[29].mxu1 }
 0x3ff   : > { %v28912_v20 = vpop.f32.mrb[30].mxu1 }
 0x400   : > { %v28914_v21 = vpop.f32.mrb[31].mxu1 }
 0x404   : > { %v28916_v22 = vpop.f32.mrb[32].mxu1 }
 0x405   : > { %v28918_v23 = vpop.f32.mrb[33].mxu1 }
 0x40c   : > { %v28920_v24 = vpop.f32.mrb[34].mxu1 }
 0x40d   : > { %v28922_v25 = vpop.f32.mrb[35].mxu1 }
 0x410   : > { %v28924_v26 = vpop.f32.mrb[38].mxu0 }
 0x411   : > { %v28926_v27 = vpop.f32.mrb[39].mxu0 }
 0x414   : > { %v25150_v28 = vpop.f32.mrb[36].mxu1  ;;  %v28928_v29 = vpop.f32.mrb[40].mxu0 }
 0x415   : > { %v2605_v30 = vpop.f32.mrb[37].mxu1  ;;  %v28930_v61 = vpop.f32.mrb[41].mxu0 }
 0x416   : > { %v27092_v53 = vpack.c.bf16 %v25150_v28, %v2605_v30 }
 0x418   : > { %27094 = vmatprep.subr.msk.bf16.mxu1 %vm28520_vm2, %v27092_v53  ;;  %v28934_v9 = vpop.f32.mrb[42].mxu0  ;;  %v25153_v52 = vpop.f32.mrb[38].mxu1 }
 0x419   : > { %27097 = vmatpush3.bf16.xpose.msk.msra.mxu1 %vm28520_vm2, %v27092_v53  ;;  %v28938_v32 = vpop.f32.mrb[43].mxu0  ;;  %v2615_v39 = vpop.f32.mrb[39].mxu1 }
 0x41a   : > { %v27098_v1 = vpack.c.bf16 %v25153_v52, %v2615_v39 }
 0x41c   : > { %27100 = vmatprep.subr.msk.bf16.mxu1 %vm28520_vm2, %v27098_v1  ;;  %v25156_v57 = vpop.f32.mrb[40].mxu1 }
 0x41d   : > { %v2625_v4 = vpop.f32.mrb[41].mxu1 }
 0x41e   : > { %v27104_v0 = vpack.c.bf16 %v25156_v57, %v2625_v4 }
 0x420   : > { %v25118_v15 = vpop.f32.mrb[44].mxu0  ;;  %v25159_v5 = vpop.f32.mrb[42].mxu1 }
 0x421   : > { %v2460_v8 = vpop.f32.mrb[45].mxu0  ;;  %v2635_v12 = vpop.f32.mrb[43].mxu1 }
 0x422   : > { %25208 = vmatprep.mubr.msk.f32.mxu1 %vm856_vm1, %v2460_v8  ;;  %v27110_v45 = vpack.c.bf16 %v25159_v5, %v2635_v12 }
 0x423   : > { %25209 = vmatmul.mubr.msk.f32.vlgmr.msra.gmra.mrb[52].mxu1 %vm856_vm1, %v25118_v15 }
 0x424   : > { %27103 = vmatpush3.bf16.xpose.msk.msra.mxu1 %vm28520_vm2, %v27098_v1  ;;  %v25121_v54 = vpop.f32.mrb[46].mxu0  ;;  %v25162_v40 = vpop.f32.mrb[44].mxu1 }
 0x425   : > { %v2470_v13 = vpop.f32.mrb[47].mxu0  ;;  %27106 = vmatprep.subr.msk.bf16.mxu1 %vm28520_vm2, %v27104_v0  ;;  %v2645_v38 = vpop.f32.mrb[45].mxu1 }
 0x426   : > { %25215 = vmatprep.mubr.msk.f32.mxu1 %vm856_vm1, %v2470_v13  ;;  %v27116_v58 = vpack.c.bf16 %v25162_v40, %v2645_v38 }
 0x428   : > { %27118 = vmatprep.subr.msk.bf16.mxu0 %vm28520_vm2, %v27116_v58  ;;  %v25124_v33 = vpop.f32.mrb[48].mxu0  ;;  %v25165_v34 = vpop.f32.mrb[46].mxu1 }
 0x429   : > { %27121 = vmatpush3.bf16.xpose.msk.msra.mxu0 %vm28520_vm2, %v27116_v58  ;;  %v2480_v51 = vpop.f32.mrb[49].mxu0  ;;  %v2655_v60 = vpop.f32.mrb[47].mxu1 }
 0x42a   : > { %v27122_v37 = vpack.c.bf16 %v25165_v34, %v2655_v60 }
 0x42b   : > { %25216 = vmatmul.mubr.msk.f32.vlgmr.msra.gmra.mrb[54].mxu1 %vm856_vm1, %v25121_v54 }
 0x42c   : > { %27109 = vmatpush3.bf16.xpose.msk.msra.mxu1 %vm28520_vm2, %v27104_v0  ;;  %v25127_v41 = vpop.f32.mrb[50].mxu0  ;;  %25222 = vmatprep.mubr.msk.f32.mxu1 %vm856_vm1, %v2480_v51  ;;  %v25168_v43 = vpop.f32.mrb[48].mxu1 }
 0x42d   : > { %27112 = vmatprep.subr.msk.bf16.mxu1 %vm28520_vm2, %v27110_v45  ;;  %v2490_v46 = vpop.f32.mrb[51].mxu0  ;;  %v2665_v63 = vpop.f32.mrb[49].mxu1 }
 0x42e   : > { %v27128_v49 = vpack.c.bf16 %v25168_v43, %v2665_v63 }
 0x430   : > { %v25130_v44 = vpop.f32.mrb[52].mxu0  ;;  %27130 = vmatprep.subr.msk.bf16.mxu0 %vm28520_vm2, %v27128_v49  ;;  %v25171_v47 = vpop.f32.mrb[50].mxu1 }
 0x431   : > { %v2500_v2 = vpop.f32.mrb[53].mxu0  ;;  %v2675_v55 = vpop.f32.mrb[51].mxu1 }
 0x432   : > { %25236 = vmatprep.mubr.msk.f32.mxu0 %vm856_vm1, %v2500_v2  ;;  %v27134_v50 = vpack.c.bf16 %v25171_v47, %v2675_v55 }
 0x433   : > { %25223 = vmatmul.mubr.msk.f32.vlgmr.msra.gmra.mrb[56].mxu1 %vm856_vm1, %v25124_v33  ;;  %25237 = vmatmul.mubr.msk.f32.vlgmr.msra.gmra.mrb[76].mxu0 %vm856_vm1, %v25130_v44 }
 0x434   : > { %27115 = vmatpush3.bf16.xpose.msk.msra.mxu1 %vm28520_vm2, %v27110_v45  ;;  %25229 = vmatprep.mubr.msk.f32.mxu1 %vm856_vm1, %v2490_v46  ;;  %v25133_v56 = vpop.f32.mrb[54].mxu0 }
 0x435   : > { %27124 = vmatprep.subr.msk.bf16.mxu1 %vm28520_vm2, %v27122_v37  ;;  %27133 = vmatpush3.bf16.xpose.msk.msra.mxu0 %vm28520_vm2, %v27128_v49  ;;  %v2510_v59 = vpop.f32.mrb[55].mxu0 }
 0x438   : > { %v25136_v6 = vpop.f32.mrb[56].mxu0 }
 0x439   : > { %v2520_v42 = vpop.f32.mrb[57].mxu0 }
 0x43a   : > { %25250 = vmatprep.mubr.msk.f32.mxu0 %vm856_vm1, %v2520_v42 }
 0x43b   : > { %25230 = vmatmul.mubr.msk.f32.vlgmr.msra.gmra.mrb[58].mxu1 %vm856_vm1, %v25127_v41 }
 0x43c   : > { %27127 = vmatpush3.bf16.xpose.msk.msra.mxu1 %vm28520_vm2, %v27122_v37  ;;  %25243 = vmatprep.mubr.msk.f32.mxu1 %vm856_vm1, %v2510_v59  ;;  %v25139_v3 = vpop.f32.mrb[58].mxu0 }
 0x43d   : > { %27136 = vmatprep.subr.msk.bf16.mxu1 %vm28520_vm2, %v27134_v50  ;;  %25251 = vmatmul.mubr.msk.f32.vlgmr.msra.gmra.mrb[78].mxu0 %vm856_vm1, %v25136_v6  ;;  %v2530_v31 = vpop.f32.mrb[59].mxu0 }
 0x443   : > { %25244 = vmatmul.mubr.msk.f32.vlgmr.msra.gmra.mrb[60].mxu1 %vm856_vm1, %v25133_v56  ;;  %v25182_v62 = vpop.f32.mrb[60].mxu0 }
 0x444   : > { %27139 = vmatpush3.bf16.xpose.msk.msra.mxu1 %vm28520_vm2, %v27134_v50  ;;  %25257 = vmatprep.mubr.msk.f32.mxu1 %vm856_vm1, %v2530_v31  ;;  %v2750_v48 = vpop.f32.mrb[61].mxu0 }
 0x445   : > { %v27140_v10 = vpack.c.bf16 %v25182_v62, %v2750_v48 }
 0x447   : > { %v25185_v11 = vpop.f32.mrb[62].mxu0  ;;  %27141 = vmatprep.subr.bf16.mxu0 %v27140_v10 }
 0x448   : > { %v2760_v7 = vpop.f32.mrb[63].mxu0  ;;  %27143 = vmatpush3.bf16.msra.mxu0 %v27140_v10 }
 0x449   : > { %v27144_v35 = vpack.c.bf16 %v25185_v11, %v2760_v7 }
 0x44b   : > { %25258 = vmatmul.mubr.msk.f32.vlgmr.msra.gmra.mrb[62].mxu1 %vm856_vm1, %v25139_v3  ;;  %27145 = vmatprep.subr.bf16.mxu1 %v27144_v35  ;;  %v25188_v14 = vpop.f32.mrb[64].mxu0 }
 0x44c   : > { %27147 = vmatpush3.bf16.msra.mxu1 %v27144_v35  ;;  %v2770_v28 = vpop.f32.mrb[65].mxu0 }
 0x44d   : > { %v28984_v30 = vpack.c.bf16 %v25188_v14, %v2770_v28 }
 0x44f   : > { %v25191_v53 = vpop.f32.mrb[66].mxu0  ;;  %27149 = vmatprep.subr.bf16.mxu0 %v28984_v30 }
 0x450   : > { %v2780_v52 = vpop.f32.mrb[67].mxu0 }
 0x451   : > { %v28987_v39 = vpack.c.bf16 %v25191_v53, %v2780_v52 }
 0x453   : > { %v25194_v1 = vpop.f32.mrb[68].mxu0  ;;  %27153 = vmatprep.subr.bf16.mxu1 %v28987_v39 }
 0x454   : > { %v2790_v57 = vpop.f32.mrb[69].mxu0 }
 0x455   : > { %v28990_v4 = vpack.c.bf16 %v25194_v1, %v2790_v57 }
 0x457   : > { %v25197_v0 = vpop.f32.mrb[70].mxu0 }
 0x458   : > { %v2800_v15 = vpop.f32.mrb[71].mxu0 }
 0x459   : > { %v28992_v5 = vpack.c.bf16 %v25197_v0, %v2800_v15 }
 0x45b   : > { %v25200_v8 = vpop.f32.mrb[72].mxu0 }
 0x45c   : > { %v2810_v12 = vpop.f32.mrb[73].mxu0 }
 0x45d   : > { %v28994_v45 = vpack.c.bf16 %v25200_v8, %v2810_v12 }
 0x45f   : > { %v25203_v54 = vpop.f32.mrb[74].mxu0 }
 0x460   : > { %v2820_v40 = vpop.f32.mrb[75].mxu0 }
 0x461   : > { %v28996_v13 = vpack.c.bf16 %v25203_v54, %v2820_v40 }
 0x4f6   : > { %v25210_v38 = vpop.f32.mrb[52].mxu1 }
 0x4f7   : > { %v2907_v58 = vpop.f32.mrb[53].mxu1  ;;  %v28998_v33 = vmul.f32 0.35355338, %v25210_v38 }
 0x4f8   : > { %v29000_v34 = vmul.f32 0.35355338, %v2907_v58 }
 0x4f9   : > { %v3544_v51 = vsel %vm1569_vm3, %v28998_v33, -inf }
 0x4fa   : > { %3545 = vmax.xlane.f32.xlu1 %v3544_v51  ;;  %v3541_v60 = vsel %vm1569_vm3, %v29000_v34, -inf }
 0x4fb   : > { %3542 = vmax.xlane.f32.xlu0 %v3541_v60 }
 0x4fe   : > { %v25217_v37 = vpop.f32.mrb[54].mxu1 }
 0x4ff   : > { %v2994_v41 = vpop.f32.mrb[55].mxu1  ;;  %v29006_v43 = vmul.f32 0.35355338, %v25217_v37 }
 0x500   : > { %v29008_v46 = vmul.f32 0.35355338, %v2994_v41 }
 0x501   : > { %v3550_v63 = vsel %vm1569_vm3, %v29006_v43, -inf }
 0x502   : > { %3551 = vmax.xlane.f32.xlu1 %v3550_v63  ;;  %v3547_v49 = vsel %vm1569_vm3, %v29008_v46, -inf }
 0x503   : > { %3548 = vmax.xlane.f32.xlu0 %v3547_v49 }
 0x506   : > { %v25224_v44 = vpop.f32.mrb[56].mxu1  ;;  %v25238_v47 = vpop.f32.mrb[76].mxu0 }
 0x507   : > { %v3081_v2 = vpop.f32.mrb[57].mxu1  ;;  %v29014_v55 = vmul.f32 0.35355338, %v25224_v44  ;;  %v3255_v50 = vpop.f32.mrb[77].mxu0  ;;  %v29034_v28 = vmul.f32 0.35355338, %v25238_v47 }
 0x508   : > { %v29016_v56 = vmul.f32 0.35355338, %v3081_v2  ;;  %v29018_v59 = vmul.f32 0.35355338, %v3255_v50 }
 0x509   : > { %v3556_v6 = vsel %vm1569_vm3, %v29014_v55, -inf  ;;  %v3568_v52 = vsel %vm1569_vm3, %v29034_v28, -inf }
 0x50a   : > { %3557 = vmax.xlane.f32.xlu1 %v3556_v6  ;;  %v3553_v42 = vsel %vm1569_vm3, %v29016_v56, -inf  ;;  %v3565_v3 = vsel %vm1569_vm3, %v29018_v59, -inf }
 0x50b   : > { %3554 = vmax.xlane.f32.xlu0 %v3553_v42 }
 0x50e   : > { %v25231_v31 = vpop.f32.mrb[58].mxu1 }
 0x50f   : > { %v3168_v62 = vpop.f32.mrb[59].mxu1  ;;  %3566 = vmax.xlane.f32.xlu0 %v3565_v3  ;;  %v29026_v48 = vmul.f32 0.35355338, %v25231_v31 }
 0x510   : > { %v29028_v10 = vmul.f32 0.35355338, %v3168_v62  ;;  %v25252_v11 = vpop.f32.mrb[78].mxu0 }
 0x511   : > { %v3562_v7 = vsel %vm1569_vm3, %v29026_v48, -inf  ;;  %v3429_v35 = vpop.f32.mrb[79].mxu0  ;;  %v29054_v60 = vmul.f32 0.35355338, %v25252_v11 }
 0x512   : > { %3563 = vmax.xlane.f32.xlu1 %v3562_v7  ;;  %v3559_v14 = vsel %vm1569_vm3, %v29028_v10, -inf  ;;  %v29056_v37 = vmul.f32 0.35355338, %v3429_v35 }
 0x513   : > { %3560 = vmax.xlane.f32.xlu0 %v3559_v14  ;;  %v3580_v41 = vsel %vm1569_vm3, %v29054_v60, -inf }
 0x514   : > { %v3577_v63 = vsel %vm1569_vm3, %v29056_v37, -inf }
 0x516   : > { %v25245_v53 = vpop.f32.mrb[60].mxu1 }
 0x517   : > { %v3342_v1 = vpop.f32.mrb[61].mxu1  ;;  %3569 = vmax.xlane.f32.xlu0 %v3568_v52  ;;  %v29042_v15 = vmul.f32 0.35355338, %v25245_v53 }
 0x518   : > { %v29038_v57 = vmul.f32 0.35355338, %v3342_v1 }
 0x519   : > { %v3574_v12 = vsel %vm1569_vm3, %v29042_v15, -inf }
 0x51a   : > { %v3571_v0 = vsel %vm1569_vm3, %v29038_v57, -inf }
 0x51b   : > { %3572 = vmax.xlane.f32.xlu1 %v3571_v0 }
 0x51e   : > { %v25259_v8 = vpop.f32.mrb[62].mxu1 }
 0x51f   : > { %3575 = vmax.xlane.f32.xlu1 %v3574_v12  ;;  %v3516_v54 = vpop.f32.mrb[63].mxu1  ;;  %v29046_v40 = vmul.f32 0.35355338, %v25259_v8 }
 0x520   : > { %v29048_v38 = vmul.f32 0.35355338, %v3516_v54 }
 0x521   : > { %v3586_v58 = vsel %vm1569_vm3, %v29046_v40, -inf }
 0x522   : > { %v3583_v51 = vsel %vm1569_vm3, %v29048_v38, -inf }
 0x523   : > { %3587 = vmax.xlane.f32.xlu1 %v3586_v58  ;;  %3584 = vmax.xlane.f32.xlu0 %v3583_v51 }
 0x527   : > { %3581 = vmax.xlane.f32.xlu1 %v3580_v41  ;;  %3578 = vmax.xlane.f32.xlu0 %v3577_v63 }
 0x587   : > { %v3546_v49 = vpop.xlane.xlu1 %3545 }
 0x588   : > { %v3590_v44 = vsub.f32 %v28998_v33, %v3546_v49  ;;  %v3543_v47 = vpop.xlane.xlu0 %3542 }
 0x589   : > { %v3589_v2 = vsub.f32 %v29000_v34, %v3543_v47 }
 0x58a   : > { %v3607_v50 = vmul.f32 1.442695, %v3590_v44 }
 0x58b   : > { %v3605_v6 = vmul.f32 1.442695, %v3589_v2 }
 0x58c   : > { %27682 = vpow2.f32 %v3607_v50 }
 0x58d   : > { %27684 = vpow2.f32 %v3605_v6 }
 0x58f   : > { %v3552_v42 = vpop.xlane.xlu1 %3551 }
 0x590   : > { %v3592_v3 = vsub.f32 %v29006_v43, %v3552_v42  ;;  %v3549_v31 = vpop.xlane.xlu0 %3548 }
 0x591   : > { %v3591_v62 = vsub.f32 %v29008_v46, %v3549_v31 }
 0x592   : > { %v3611_v11 = vmul.f32 1.442695, %v3592_v3 }
 0x593   : > { %v3609_v7 = vmul.f32 1.442695, %v3591_v62 }
 0x594   : > { %27686 = vpow2.f32 %v3611_v11 }
 0x595   : > { %27688 = vpow2.f32 %v3609_v7 }
 0x596   : > { %v29066_v35 = vpop.eup %27682 }
 0x597   : > { %v29068_v33 = vpop.eup %27684  ;;  %v3558_v14 = vpop.xlane.xlu1 %3557  ;;  %v3640_v34 = vsel %vm1569_vm3, %v29066_v35, 0.0 }
 0x598   : > { %v3594_v53 = vsub.f32 %v29014_v55, %v3558_v14  ;;  %v3555_v52 = vpop.xlane.xlu0 %3554  ;;  %3641 = vadd.xlane.f32.xlu1 %v3640_v34  ;;  %v3637_v43 = vsel %vm1569_vm3, %v29068_v33, 0.0 }
 0x599   : > { %v3593_v46 = vsub.f32 %v29016_v56, %v3555_v52  ;;  %3638 = vadd.xlane.f32.xlu0 %v3637_v43 }
 0x59a   : > { %v3615_v1 = vmul.f32 1.442695, %v3594_v53 }
 0x59b   : > { %v3613_v0 = vmul.f32 1.442695, %v3593_v46 }
 0x59c   : > { %27690 = vpow2.f32 %v3615_v1  ;;  %v3567_v8 = vpop.xlane.xlu0 %3566 }
 0x59d   : > { %27692 = vpow2.f32 %v3613_v0  ;;  %v3597_v12 = vsub.f32 %v29018_v59, %v3567_v8 }
 0x59e   : > { %v29077_v54 = vpop.eup %27686 }
 0x59f   : > { %v29079_v58 = vpop.eup %27688  ;;  %v3621_v55 = vmul.f32 1.442695, %v3597_v12  ;;  %v3564_v51 = vpop.xlane.xlu1 %3563  ;;  %v3646_v41 = vsel %vm1569_vm3, %v29077_v54, 0.0 }
 0x5a0   : > { %v3596_v63 = vsub.f32 %v29026_v48, %v3564_v51  ;;  %v3561_v56 = vpop.xlane.xlu0 %3560  ;;  %3647 = vadd.xlane.f32.xlu1 %v3646_v41  ;;  %v3643_v49 = vsel %vm1569_vm3, %v29079_v58, 0.0 }
 0x5a1   : > { %27694 = vpow2.f32 %v3621_v55  ;;  %v3595_v44 = vsub.f32 %v29028_v10, %v3561_v56  ;;  %3644 = vadd.xlane.f32.xlu0 %v3643_v49 }
 0x5a2   : > { %v3619_v59 = vmul.f32 1.442695, %v3596_v63 }
 0x5a3   : > { %v3617_v47 = vmul.f32 1.442695, %v3595_v44 }
 0x5a4   : > { %27696 = vpow2.f32 %v3619_v59  ;;  %v3570_v2 = vpop.xlane.xlu0 %3569 }
 0x5a5   : > { %27698 = vpow2.f32 %v3617_v47  ;;  %v3598_v50 = vsub.f32 %v29034_v28, %v3570_v2 }
 0x5a6   : > { %v29088_v6 = vpop.eup %27690 }
 0x5a7   : > { %v29090_v42 = vpop.eup %27692  ;;  %v3623_v48 = vmul.f32 1.442695, %v3598_v50  ;;  %v3652_v3 = vsel %vm1569_vm3, %v29088_v6, 0.0 }
 0x5a8   : > { %v3573_v31 = vpop.xlane.xlu1 %3572  ;;  %3653 = vadd.xlane.f32.xlu1 %v3652_v3  ;;  %v3649_v10 = vsel %vm1569_vm3, %v29090_v42, 0.0 }
 0x5a9   : > { %27700 = vpow2.f32 %v3623_v48  ;;  %v3599_v62 = vsub.f32 %v29038_v57, %v3573_v31  ;;  %3650 = vadd.xlane.f32.xlu0 %v3649_v10 }
 0x5ab   : > { %v29097_v11 = vpop.eup %27694  ;;  %v3625_v28 = vmul.f32 1.442695, %v3599_v62 }
 0x5ac   : > { %v3576_v7 = vpop.xlane.xlu1 %3575  ;;  %v3661_v14 = vsel %vm1569_vm3, %v29097_v11, 0.0 }
 0x5ad   : > { %27702 = vpow2.f32 %v3625_v28  ;;  %v3600_v34 = vsub.f32 %v29042_v15, %v3576_v7  ;;  %3662 = vadd.xlane.f32.xlu0 %v3661_v14 }
 0x5ae   : > { %v29102_v53 = vpop.eup %27696 }
 0x5af   : > { %v29104_v52 = vpop.eup %27698  ;;  %v3627_v43 = vmul.f32 1.442695, %v3600_v34  ;;  %v3658_v57 = vsel %vm1569_vm3, %v29102_v53, 0.0 }
 0x5b0   : > { %v3588_v46 = vpop.xlane.xlu1 %3587  ;;  %v3585_v1 = vpop.xlane.xlu0 %3584  ;;  %3659 = vadd.xlane.f32.xlu1 %v3658_v57  ;;  %v3655_v0 = vsel %vm1569_vm3, %v29104_v52, 0.0 }
 0x5b1   : > { %27704 = vpow2.f32 %v3627_v43  ;;  %v3604_v8 = vsub.f32 %v29046_v40, %v3588_v46  ;;  %v3603_v15 = vsub.f32 %v29048_v38, %v3585_v1  ;;  %3656 = vadd.xlane.f32.xlu0 %v3655_v0 }
 0x5b3   : > { %v29112_v12 = vpop.eup %27700  ;;  %v3635_v55 = vmul.f32 1.442695, %v3604_v8  ;;  %v3633_v51 = vmul.f32 1.442695, %v3603_v15 }
 0x5b4   : > { %v3582_v41 = vpop.xlane.xlu1 %3581  ;;  %v3579_v63 = vpop.xlane.xlu0 %3578  ;;  %v3664_v56 = vsel %vm1569_vm3, %v29112_v12, 0.0 }
 0x5b5   : > { %27706 = vpow2.f32 %v3635_v55  ;;  %v3602_v49 = vsub.f32 %v29054_v60, %v3582_v41  ;;  %v3601_v44 = vsub.f32 %v29056_v37, %v3579_v63  ;;  %3665 = vadd.xlane.f32.xlu0 %v3664_v56 }
 0x5b6   : > { %27708 = vpow2.f32 %v3633_v51 }
 0x5b7   : > { %v29118_v40 = vpop.eup %27702  ;;  %v3631_v38 = vmul.f32 1.442695, %v3602_v49  ;;  %v3629_v59 = vmul.f32 1.442695, %v3601_v44 }
 0x5b8   : > { %v3667_v47 = vsel %vm1569_vm3, %v29118_v40, 0.0 }
 0x5b9   : > { %27710 = vpow2.f32 %v3631_v38  ;;  %3668 = vadd.xlane.f32.xlu1 %v3667_v47 }
 0x5ba   : > { %27712 = vpow2.f32 %v3629_v59 }
 0x5bb   : > { %v29122_v2 = vpop.eup %27704 }
 0x5bc   : > { %v3670_v50 = vsel %vm1569_vm3, %v29122_v2, 0.0 }
 0x5bd   : > { %3671 = vadd.xlane.f32.xlu1 %v3670_v50 }
 0x5bf   : > { %v29126_v60 = vpop.eup %27706 }
 0x5c0   : > { %v29128_v37 = vpop.eup %27708  ;;  %v3682_v48 = vsel %vm1569_vm3, %v29126_v60, 0.0 }
 0x5c1   : > { %3683 = vadd.xlane.f32.xlu1 %v3682_v48  ;;  %v3679_v3 = vsel %vm1569_vm3, %v29128_v37, 0.0 }
 0x5c2   : > { %3680 = vadd.xlane.f32.xlu0 %v3679_v3 }
 0x5c3   : > { %v29134_v31 = vpop.eup %27710 }
 0x5c4   : > { %v29136_v10 = vpop.eup %27712  ;;  %v3676_v62 = vsel %vm1569_vm3, %v29134_v31, 0.0 }
 0x5c5   : > { %3677 = vadd.xlane.f32.xlu1 %v3676_v62  ;;  %v3673_v28 = vsel %vm1569_vm3, %v29136_v10, 0.0 }
 0x5c6   : > { %3674 = vadd.xlane.f32.xlu0 %v3673_v28 }
 0x625   : > { %v3642_v7 = vpop.xlane.xlu1 %3641 }
 0x626   : > { %27714 = vrcp.f32 %v3642_v7  ;;  %v3639_v14 = vpop.xlane.xlu0 %3638 }
 0x627   : > { %27716 = vrcp.f32 %v3639_v14 }
 0x62d   : > { %v3648_v34 = vpop.xlane.xlu1 %3647 }
 0x62e   : > { %27718 = vrcp.f32 %v3648_v34  ;;  %v3645_v43 = vpop.xlane.xlu0 %3644 }
 0x62f   : > { %27720 = vrcp.f32 %v3645_v43  ;;  %v292_v43 = vld [vmem:[%s33110_s1 + $0xd0] sm:$0xff] }
 0x630   : > { %v27715_v57 = vpop.eup %27714 }
 0x631   : > { %v27717_v46 = vpop.eup %27716  ;;  %v3702_v0 = vmul.f32 %v27715_v57, %v29066_v35  ;;  %v293_v57 = vld [vmem:[%s33110_s1 + $0xd8] sm:$0xff] }
 0x632   : > { %v3701_v1 = vmul.f32 %v27717_v46, %v29068_v33 }
 0x634   : > { %25264 = vmatprep.mubr.msk.f32.mxu0 %vm1569_vm3, %v3701_v1 }
 0x635   : > { %v3654_v8 = vpop.xlane.xlu1 %3653  ;;  %25265 = vmatmul.mubr.msk.f32.vlgmr.msra.gmra.mrb[80].mxu0 %vm1569_vm3, %v3702_v0  ;;  %v27176_v0 = vpack.c.bf16 %v293_v57, %v292_v43 }
 0x636   : > { %27722 = vrcp.f32 %v3654_v8  ;;  %27151 = vmatpush3.bf16.msra.mxu0 %v28984_v30  ;;  %v3651_v15 = vpop.xlane.xlu0 %3650 }
 0x637   : > { %27724 = vrcp.f32 %v3651_v15  ;;  %27157 = vmatprep.subr.bf16.mxu0 %v28990_v4  ;;  %v323_v15 = vld [vmem:[%s33111_s2 + $0xc8] sm:$0xff] }
 0x638   : > { %v27719_v55 = vpop.eup %27718 }
 0x639   : > { %v27721_v51 = vpop.eup %27720  ;;  %v3704_v35 = vmul.f32 %v27719_v55, %v29077_v54 }
 0x63a   : > { %v3663_v41 = vpop.xlane.xlu0 %3662  ;;  %v3703_v63 = vmul.f32 %v27721_v51, %v29079_v58  ;;  %v29201_v51 = vld [vmem:[%s28366_s18] sm:$0xff] }
 0x63b   : > { %27726 = vrcp.f32 %v3663_v41 }
 0x63c   : > { %25271 = vmatprep.mubr.msk.f32.mxu1 %vm1569_vm3, %v3703_v63  ;;  %v324_v63 = vld [vmem:[%s33111_s2 + $0xd0] sm:$0xff] }
 0x63d   : > { %v3660_v33 = vpop.xlane.xlu1 %3659  ;;  %25272 = vmatmul.mubr.msk.f32.vlgmr.msra.gmra.mrb[64].mxu1 %vm1569_vm3, %v3704_v35  ;;  %v29214_v35 = vld [vmem:[%s28366_s18 + $0x8] sm:$0xff] }
 0x63e   : > { %27728 = vrcp.f32 %v3660_v33  ;;  %27155 = vmatpush3.bf16.msra.mxu1 %v28987_v39  ;;  %v3657_v30 = vpop.xlane.xlu0 %3656  ;;  %v29219_v33 = vld [vmem:[%s28366_s18 + $0x10] sm:$0xff] }
 0x63f   : > { %27161 = vmatprep.subr.bf16.mxu1 %v28992_v5  ;;  %27730 = vrcp.f32 %v3657_v30  ;;  %v29224_v30 = vld [vmem:[%s28366_s18 + $0x18] sm:$0xff] }
 0x640   : > { %v27723_v56 = vpop.eup %27722 }
 0x641   : > { %v27725_v49 = vpop.eup %27724  ;;  %v3706_v54 = vmul.f32 %v27723_v56, %v29088_v6  ;;  %v29229_v56 = vld [vmem:[%s28366_s18 + $0x20] sm:$0xff] }
 0x642   : > { %v3666_v44 = vpop.xlane.xlu0 %3665  ;;  %v3705_v58 = vmul.f32 %v27725_v49, %v29090_v42  ;;  %v29234_v49 = vld [vmem:[%s28366_s18 + $0x28] sm:$0xff] }
 0x643   : > { %27732 = vrcp.f32 %v3666_v44  ;;  %v29239_v44 = vld [vmem:[%s28366_s18 + $0x30] sm:$0xff] }
 0x644   : > { %25278 = vmatprep.mubr.msk.f32.mxu0 %vm1569_vm3, %v3705_v58  ;;  %v29244_v58 = vld [vmem:[%s28366_s18 + $0x38] sm:$0xff] }
 0x645   : > { %v27727_v38 = vpop.eup %27726  ;;  %25279 = vmatmul.mubr.msk.f32.vlgmr.msra.gmra.mrb[82].mxu0 %vm1569_vm3, %v3706_v54  ;;  %v29249_v54 = vld [vmem:[%s28366_s18 + $0x40] sm:$0xff] }
 0x646   : > { %27159 = vmatpush3.bf16.msra.mxu0 %v28990_v4  ;;  %v3669_v39 = vpop.xlane.xlu1 %3668  ;;  %v3709_v59 = vmul.f32 %v27727_v38, %v29097_v11  ;;  %v29254_v38 = vld [vmem:[%s28366_s18 + $0x48] sm:$0xff] }
 0x647   : > { %27734 = vrcp.f32 %v3669_v39  ;;  %27165 = vmatprep.subr.bf16.mxu0 %v28994_v45  ;;  %v29259_v39 = vld [vmem:[%s28366_s18 + $0x50] sm:$0xff] }
 0x648   : > { %v27729_v47 = vpop.eup %27728  ;;  %25292 = vmatprep.mubr.msk.f32.mxu0 %vm1569_vm3, %v3709_v59  ;;  %v29264_v59 = vld [vmem:[%s28366_s18 + $0x58] sm:$0xff] }
 0x649   : > { %v27731_v42 = vpop.eup %27730  ;;  %v3708_v48 = vmul.f32 %v27729_v47, %v29102_v53  ;;  %v29269_v47 = vld [vmem:[%s28366_s18 + $0x60] sm:$0xff] }
 0x64a   : > { %v3672_v50 = vpop.xlane.xlu1 %3671  ;;  %v3707_v6 = vmul.f32 %v27731_v42, %v29104_v52  ;;  %v29274_v42 = vld [vmem:[%s28366_s18 + $0x68] sm:$0xff] }
 0x64b   : > { %27736 = vrcp.f32 %v3672_v50  ;;  %v29279_v50 = vld [vmem:[%s28366_s18 + $0x70] sm:$0xff] }
 0x64c   : > { %25285 = vmatprep.mubr.msk.f32.mxu1 %vm1569_vm3, %v3707_v6  ;;  %v29284_v6 = vld [vmem:[%s28366_s18 + $0x78] sm:$0xff] }
 0x64d   : > { %v27733_v3 = vpop.eup %27732  ;;  %25286 = vmatmul.mubr.msk.f32.vlgmr.msra.gmra.mrb[66].mxu1 %vm1569_vm3, %v3708_v48  ;;  %v367_v48 = vld [vmem:[%s33113_s4 + $0x28] sm:$0xff] }
 0x64e   : > { %27163 = vmatpush3.bf16.msra.mxu1 %v28992_v5  ;;  %v3684_v4 = vpop.xlane.xlu1 %3683  ;;  %v3710_v11 = vmul.f32 %v27733_v3, %v29112_v12  ;;  %v290_v5 = vld [vmem:[%s33110_s1 + $0xc0] sm:$0xff]  ;;  %v291_v12 = vld [vmem:[%s33110_s1 + $0xc8] sm:$0xff] }
 0x64f   : > { %27738 = vrcp.f32 %v3684_v4  ;;  %27169 = vmatprep.subr.bf16.mxu1 %v28996_v13  ;;  %v3681_v62 = vpop.xlane.xlu0 %3680  ;;  %v366_v3 = vld [vmem:[%s33113_s4 + $0x20] sm:$0xff] }
 0x650   : > { %27740 = vrcp.f32 %v3681_v62  ;;  %25293 = vmatmul.mubr.msk.f32.vlgmr.msra.gmra.mrb[84].mxu0 %vm1569_vm3, %v3710_v11  ;;  %v354_v4 = vld [vmem:[%s33112_s3 + $0xc0] sm:$0xff]  ;;  %v355_v11 = vld [vmem:[%s33112_s3 + $0xc8] sm:$0xff] }
 0x651   : > { %v27735_v52 = vpop.eup %27734  ;;  %27167 = vmatpush3.bf16.msra.mxu0 %v28994_v45  ;;  %v27172_v45 = vpack.c.bf16 %v291_v12, %v290_v5 }
 0x652   : > { %v3678_v53 = vpop.xlane.xlu1 %3677  ;;  %v3711_v28 = vmul.f32 %v27735_v52, %v29118_v40  ;;  %25316 = vmatprep.subr.mxu0 %v367_v48 }
 0x653   : > { %27742 = vrcp.f32 %v3678_v53  ;;  %v3675_v7 = vpop.xlane.xlu0 %3674  ;;  %v27188_v53 = vpack.c.bf16 %v355_v11, %v354_v4 }
 0x654   : > { %27744 = vrcp.f32 %v3675_v7  ;;  %25299 = vmatprep.mubr.msk.f32.mxu1 %vm1569_vm3, %v3711_v28 }
 0x655   : > { %v27737_v14 = vpop.eup %27736 }
 0x656   : > { %v3712_v34 = vmul.f32 %v27737_v14, %v29122_v2 }
 0x658   : > { %25300 = vmatmul.mubr.msk.f32.vlgmr.msra.gmra.mrb[68].mxu1 %vm1569_vm3, %v3712_v34 }
 0x659   : > { %v27739_v40 = vpop.eup %27738  ;;  %27171 = vmatpush3.bf16.msra.mxu1 %v28996_v13  ;;  %v322_v13 = vld [vmem:[%s33111_s2 + $0xc0] sm:$0xff] }
 0x65a   : > { %v27741_v46 = vpop.eup %27740  ;;  %27173 = vmatprep.subr.bf16.mxu1 %v27172_v45  ;;  %v3716_v1 = vmul.f32 %v27739_v40, %v29126_v60  ;;  %v27180_v41 = vpack.c.bf16 %v323_v15, %v322_v13  ;;  %v356_v15 = vld [vmem:[%s33112_s3 + $0xd0] sm:$0xff] }
 0x65b   : > { %v3715_v2 = vmul.f32 %v27741_v46, %v29128_v37 }
 0x65d   : > { %v27743_v8 = vpop.eup %27742  ;;  %25313 = vmatprep.mubr.msk.f32.mxu1 %vm1569_vm3, %v3715_v2 }
 0x65e   : > { %v27745_v55 = vpop.eup %27744  ;;  %25314 = vmatmul.mubr.msk.f32.vlgmr.msra.gmra.mrb[70].mxu1 %vm1569_vm3, %v3716_v1  ;;  %v3714_v60 = vmul.f32 %v27743_v8, %v29134_v31  ;;  %v325_v31 = vld [vmem:[%s33111_s2 + $0xd8] sm:$0xff] }
 0x65f   : > { %27175 = vmatpush3.bf16.msra.mxu1 %v27172_v45  ;;  %v3713_v37 = vmul.f32 %v27745_v55, %v29136_v10  ;;  %25376 = vmatprep.mubr.msk.f32.mxu1 %vm372_vm0, %v29201_v51  ;;  %v27184_v10 = vpack.c.bf16 %v325_v31, %v324_v63  ;;  %v357_v55 = vld [vmem:[%s33112_s3 + $0xd8] sm:$0xff] }
 0x660   : > { %27177 = vmatprep.subr.bf16.mxu1 %v27176_v0 }
 0x661   : > { %25306 = vmatprep.mubr.msk.f32.mxu0 %vm1569_vm3, %v3713_v37 }
 0x662   : > { %25307 = vmatmul.mubr.msk.f32.vlgmr.msra.gmra.mrb[86].mxu0 %vm1569_vm3, %v3714_v60 }
 0x663   : > { %27179 = vmatpush3.bf16.msra.mxu1 %v27176_v0  ;;  %25317 = vmatpush3.msra.mxu0 %v367_v48 }
 0x664   : > { %27181 = vmatprep.subr.bf16.mxu1 %v27180_v41  ;;  %25342 = vmatprep.subr.mxu0 %v366_v3 }
 0x666   : > { %25377 = vmatmul.mubr.msk.f32.vlgmr.msra.gmra.mrb[72].mxu1 %vm372_vm0, %v29214_v35 }
 0x667   : > { %25379 = vmatprep.mubr.msk.f32.mxu1 %vm372_vm0, %v29219_v33  ;;  %27183 = vmatpush3.bf16.msra.mxu1 %v27180_v41  ;;  %v27192_v41 = vpack.c.bf16 %v357_v55, %v356_v15 }
 0x668   : > { %27185 = vmatprep.subr.bf16.mxu1 %v27184_v10 }
 0x66a   : > { %25380 = vmatmul.mubr.msk.f32.gmra.mrb[74].mxu1 %vm372_vm0, %v29224_v30 }
 0x66b   : > { %25382 = vmatprep.mubr.msk.f32.mxu1 %vm372_vm0, %v29229_v56  ;;  %27187 = vmatpush3.bf16.msra.mxu1 %v27184_v10 }
 0x66e   : > { %25383 = vmatmul.mubr.msk.f32.gmra.mrb[76].mxu1 %vm372_vm0, %v29234_v49 }
 0x66f   : > { %25385 = vmatprep.mubr.msk.f32.mxu1 %vm372_vm0, %v29239_v44 }
 0x672   : > { %25386 = vmatmul.mubr.msk.f32.gmra.mrb[78].mxu1 %vm372_vm0, %v29244_v58 }
 0x673   : > { %25388 = vmatprep.mubr.msk.f32.mxu1 %vm372_vm0, %v29249_v54 }
 0x676   : > { %25389 = vmatmul.mubr.msk.f32.gmra.mrb[80].mxu1 %vm372_vm0, %v29254_v38 }
 0x677   : > { %25391 = vmatprep.mubr.msk.f32.mxu1 %vm372_vm0, %v29259_v39 }
 0x67a   : > { %25392 = vmatmul.mubr.msk.f32.gmra.mrb[82].mxu1 %vm372_vm0, %v29264_v59 }
 0x67b   : > { %25394 = vmatprep.mubr.msk.f32.mxu1 %vm372_vm0, %v29269_v47 }
 0x67e   : > { %25395 = vmatmul.mubr.msk.f32.gmra.mrb[84].mxu1 %vm372_vm0, %v29274_v42 }
 0x67f   : > { %25397 = vmatprep.mubr.msk.f32.mxu1 %vm372_vm0, %v29279_v50 }
 0x682   : > { %25398 = vmatmul.mubr.msk.f32.gmra.mrb[86].mxu1 %vm372_vm0, %v29284_v6 }
 0x683   : > { %25408 = vmatprep.mubr.msk.f32.mxu1 %vm372_vm0, %v29201_v51 }
 0x686   : > { %25409 = vmatmul.mubr.msk.f32.vlgmr.msra.gmra.mrb[88].mxu1 %vm372_vm0, %v29214_v35 }
 0x687   : > { %25411 = vmatprep.mubr.msk.f32.mxu1 %vm372_vm0, %v29219_v33 }
 0x68a   : > { %25412 = vmatmul.mubr.msk.f32.gmra.mrb[90].mxu1 %vm372_vm0, %v29224_v30 }
 0x68b   : > { %25414 = vmatprep.mubr.msk.f32.mxu1 %vm372_vm0, %v29229_v56 }
 0x68e   : > { %25415 = vmatmul.mubr.msk.f32.gmra.mrb[92].mxu1 %vm372_vm0, %v29234_v49 }
 0x68f   : > { %25417 = vmatprep.mubr.msk.f32.mxu1 %vm372_vm0, %v29239_v44 }
 0x692   : > { %25418 = vmatmul.mubr.msk.f32.gmra.mrb[94].mxu1 %vm372_vm0, %v29244_v58 }
 0x693   : > { %25420 = vmatprep.mubr.msk.f32.mxu1 %vm372_vm0, %v29249_v54 }
 0x696   : > { %25421 = vmatmul.mubr.msk.f32.gmra.mrb[96].mxu1 %vm372_vm0, %v29254_v38 }
 0x697   : > { %25423 = vmatprep.mubr.msk.f32.mxu1 %vm372_vm0, %v29259_v39 }
 0x69a   : > { %25424 = vmatmul.mubr.msk.f32.gmra.mrb[98].mxu1 %vm372_vm0, %v29264_v59 }
 0x69b   : > { %25426 = vmatprep.mubr.msk.f32.mxu1 %vm372_vm0, %v29269_v47 }
 0x69e   : > { %25427 = vmatmul.mubr.msk.f32.gmra.mrb[100].mxu1 %vm372_vm0, %v29274_v42 }
 0x69f   : > { %25429 = vmatprep.mubr.msk.f32.mxu1 %vm372_vm0, %v29279_v50 }
 0x6a2   : > { %25430 = vmatmul.mubr.msk.f32.gmra.mrb[102].mxu1 %vm372_vm0, %v29284_v6 }
 0x708   : > { %v25266_v62 = vpop.f32.mrb[80].mxu0 }
 0x709   : > { %v3789_v52 = vpop.f32.mrb[81].mxu0 }
 0x70a   : > { %25318 = vmatprep.mubr.msk.f32.mxu0 %vm856_vm1, %v3789_v52 }
 0x70b   : > { %25319 = vmatmul.mubr.msk.f32.vlgmr.msra.gmra.mrb[88].mxu0 %vm856_vm1, %v25266_v62 }
 0x70c   : > { %25343 = vmatpush3.msra.mxu0 %v366_v3 }
 0x70d   : > { %27189 = vmatprep.subr.bf16.mxu0 %v27188_v53 }
 0x710   : > { %v25273_v28 = vpop.f32.mrb[64].mxu1 }
 0x711   : > { %v3870_v7 = vpop.f32.mrb[65].mxu1 }
 0x712   : > { %25321 = vmatprep.mubr.msk.f32.mxu0 %vm856_vm1, %v3870_v7 }
 0x713   : > { %25322 = vmatmul.mubr.msk.f32.gmra.mrb[90].mxu0 %vm856_vm1, %v25273_v28 }
 0x718   : > { %v25280_v5 = vpop.f32.mrb[82].mxu0 }
 0x719   : > { %v3951_v12 = vpop.f32.mrb[83].mxu0 }
 0x71a   : > { %25324 = vmatprep.mubr.msk.f32.mxu0 %vm856_vm1, %v3951_v12 }
 0x71b   : > { %25325 = vmatmul.mubr.msk.f32.gmra.mrb[92].mxu0 %vm856_vm1, %v25280_v5 }
 0x720   : > { %v25287_v14 = vpop.f32.mrb[66].mxu1 }
 0x721   : > { %v4032_v34 = vpop.f32.mrb[67].mxu1 }
 0x722   : > { %25327 = vmatprep.mubr.msk.f32.mxu0 %vm856_vm1, %v4032_v34 }
 0x723   : > { %v25294_v45 = vpop.f32.mrb[84].mxu0  ;;  %25328 = vmatmul.mubr.msk.f32.gmra.mrb[94].mxu0 %vm856_vm1, %v25287_v14 }
 0x724   : > { %v4113_v40 = vpop.f32.mrb[85].mxu0 }
 0x725   : > { %25330 = vmatprep.mubr.msk.f32.mxu0 %vm856_vm1, %v4113_v40 }
 0x727   : > { %25331 = vmatmul.mubr.msk.f32.gmra.mrb[96].mxu0 %vm856_vm1, %v25294_v45 }
 0x72b   : > { %v25301_v43 = vpop.f32.mrb[68].mxu1 }
 0x72c   : > { %v4194_v57 = vpop.f32.mrb[69].mxu1 }
 0x72d   : > { %25333 = vmatprep.mubr.msk.f32.mxu0 %vm856_vm1, %v4194_v57 }
 0x72e   : > { %25334 = vmatmul.mubr.msk.f32.gmra.mrb[98].mxu0 %vm856_vm1, %v25301_v43 }
 0x731   : > { %v25315_v46 = vpop.f32.mrb[70].mxu1 }
 0x732   : > { %v4356_v1 = vpop.f32.mrb[71].mxu1 }
 0x735   : > { %v25308_v2 = vpop.f32.mrb[86].mxu0 }
 0x736   : > { %v4275_v0 = vpop.f32.mrb[87].mxu0 }
 0x737   : > { %25336 = vmatprep.mubr.msk.f32.mxu0 %vm856_vm1, %v4275_v0 }
 0x738   : > { %25337 = vmatmul.mubr.msk.f32.gmra.mrb[100].mxu0 %vm856_vm1, %v25308_v2 }
 0x739   : > { %v25378_v8 = vpop.f32.mrb[72].mxu1  ;;  %25339 = vmatprep.mubr.msk.f32.mxu0 %vm856_vm1, %v4356_v1 }
 0x73a   : > { %v4817_v13 = vpop.f32.mrb[73].mxu1 }
 0x73b   : > { %25468 = vmatprep.mubr.msk.f32.mxu1 %vm856_vm1, %v4817_v13 }
 0x73c   : > { %25340 = vmatmul.mubr.msk.f32.gmra.mrb[102].mxu0 %vm856_vm1, %v25315_v46 }
 0x73d   : > { %v29355_v60 = vpop.f32.mrb[74].mxu1  ;;  %25344 = vmatprep.mubr.msk.f32.mxu0 %vm856_vm1, %v28906_v17 }
 0x73e   : > { %v4827_v37 = vpop.f32.mrb[75].mxu1 }
 0x740   : > { %25345 = vmatmul.mubr.msk.f32.vlgmr.msra.gmra.mrb[88].mxu0 %vm856_vm1, %v28904_v16 }
 0x741   : > { %v29361_v63 = vpop.f32.mrb[76].mxu1  ;;  %25347 = vmatprep.mubr.msk.f32.mxu0 %vm856_vm1, %v28910_v19  ;;  %27191 = vmatpush3.bf16.msra.mxu0 %v27188_v53 }
 0x742   : > { %v4837_v31 = vpop.f32.mrb[77].mxu1  ;;  %27193 = vmatprep.subr.bf16.mxu0 %v27192_v41 }
 0x744   : > { %25348 = vmatmul.mubr.msk.f32.gmra.mrb[90].mxu0 %vm856_vm1, %v28908_v18 }
 0x745   : > { %v29367_v10 = vpop.f32.mrb[78].mxu1  ;;  %25350 = vmatprep.mubr.msk.f32.mxu0 %vm856_vm1, %v28926_v27  ;;  %27195 = vmatpush3.bf16.msra.mxu0 %v27192_v41 }
 0x746   : > { %v29371_v17 = vpop.f32.mrb[79].mxu1 }
 0x748   : > { %25351 = vmatmul.mubr.msk.f32.gmra.mrb[92].mxu0 %vm856_vm1, %v28924_v26 }
 0x749   : > { %v29375_v16 = vpop.f32.mrb[80].mxu1  ;;  %25353 = vmatprep.mubr.msk.f32.mxu0 %vm856_vm1, %v28914_v21 }
 0x74a   : > { %v29379_v19 = vpop.f32.mrb[81].mxu1 }
 0x74c   : > { %25354 = vmatmul.mubr.msk.f32.gmra.mrb[94].mxu0 %vm856_vm1, %v28912_v20 }
 0x74d   : > { %v29383_v18 = vpop.f32.mrb[82].mxu1  ;;  %25356 = vmatprep.mubr.msk.f32.mxu0 %vm856_vm1, %v28930_v61 }
 0x74e   : > { %v29387_v27 = vpop.f32.mrb[83].mxu1 }
 0x750   : > { %25357 = vmatmul.mubr.msk.f32.gmra.mrb[96].mxu0 %vm856_vm1, %v28928_v29 }
 0x751   : > { %v29391_v26 = vpop.f32.mrb[84].mxu1  ;;  %25359 = vmatprep.mubr.msk.f32.mxu0 %vm856_vm1, %v28918_v23 }
 0x752   : > { %v29395_v21 = vpop.f32.mrb[85].mxu1 }
 0x754   : > { %25360 = vmatmul.mubr.msk.f32.gmra.mrb[98].mxu0 %vm856_vm1, %v28916_v22 }
 0x755   : > { %v29399_v20 = vpop.f32.mrb[86].mxu1  ;;  %25362 = vmatprep.mubr.msk.f32.mxu0 %vm856_vm1, %v28938_v32 }
 0x756   : > { %v29403_v61 = vpop.f32.mrb[87].mxu1 }
 0x758   : > { %25363 = vmatmul.mubr.msk.f32.gmra.mrb[100].mxu0 %vm856_vm1, %v28934_v9 }
 0x759   : > { %v25410_v29 = vpop.f32.mrb[88].mxu1  ;;  %25365 = vmatprep.mubr.msk.f32.mxu0 %vm856_vm1, %v28922_v25 }
 0x75a   : > { %v4962_v23 = vpop.f32.mrb[89].mxu1 }
 0x75b   : > { %v27196_v48 = vpack.c.bf16 %v25410_v29, %v4962_v23 }
 0x75c   : > { %25366 = vmatmul.mubr.msk.f32.gmra.mrb[102].mxu0 %vm856_vm1, %v28920_v24 }
 0x75d   : > { %27198 = vmatprep.subr.msk.bf16.mxu1 %vm28520_vm2, %v27196_v48  ;;  %v25413_v22 = vpop.f32.mrb[90].mxu1  ;;  %25440 = vmatprep.mubr.msk.f32.mxu0 %vm372_vm0, %v29201_v51 }
 0x75e   : > { %27201 = vmatpush3.bf16.xpose.msk.msra.mxu1 %vm28520_vm2, %v27196_v48  ;;  %v4972_v9 = vpop.f32.mrb[91].mxu1 }
 0x75f   : > { %v27202_v32 = vpack.c.bf16 %v25413_v22, %v4972_v9 }
 0x760   : > { %25441 = vmatmul.mubr.msk.f32.vlgmr.msra.gmra.mrb[104].mxu0 %vm372_vm0, %v29214_v35 }
 0x761   : > { %25443 = vmatprep.mubr.msk.f32.mxu0 %vm372_vm0, %v29219_v33  ;;  %27204 = vmatprep.subr.msk.bf16.mxu1 %vm28520_vm2, %v27202_v32  ;;  %v25416_v24 = vpop.f32.mrb[92].mxu1 }
 0x762   : > { %v4982_v25 = vpop.f32.mrb[93].mxu1 }
 0x763   : > { %v27208_v3 = vpack.c.bf16 %v25416_v24, %v4982_v25 }
 0x764   : > { %25444 = vmatmul.mubr.msk.f32.gmra.mrb[106].mxu0 %vm372_vm0, %v29224_v30 }
 0x765   : > { %25469 = vmatmul.mubr.msk.f32.vlgmr.msra.gmra.mrb[104].mxu1 %vm856_vm1, %v25378_v8  ;;  %25446 = vmatprep.mubr.msk.f32.mxu0 %vm372_vm0, %v29229_v56  ;;  %v25419_v4 = vpop.f32.mrb[94].mxu1 }
 0x766   : > { %27207 = vmatpush3.bf16.xpose.msk.msra.mxu1 %vm28520_vm2, %v27202_v32  ;;  %25475 = vmatprep.mubr.msk.f32.mxu1 %vm856_vm1, %v4827_v37  ;;  %v4992_v11 = vpop.f32.mrb[95].mxu1 }
 0x767   : > { %27210 = vmatprep.subr.msk.bf16.mxu1 %vm28520_vm2, %v27208_v3  ;;  %v27214_v62 = vpack.c.bf16 %v25419_v4, %v4992_v11 }
 0x768   : > { %25447 = vmatmul.mubr.msk.f32.gmra.mrb[108].mxu0 %vm372_vm0, %v29234_v49 }
 0x769   : > { %25449 = vmatprep.mubr.msk.f32.mxu0 %vm372_vm0, %v29239_v44  ;;  %v25422_v52 = vpop.f32.mrb[96].mxu1 }
 0x76a   : > { %v5002_v53 = vpop.f32.mrb[97].mxu1 }
 0x76b   : > { %v27220_v28 = vpack.c.bf16 %v25422_v52, %v5002_v53 }
 0x76c   : > { %25450 = vmatmul.mubr.msk.f32.gmra.mrb[110].mxu0 %vm372_vm0, %v29244_v58 }
 0x76d   : > { %25476 = vmatmul.mubr.msk.f32.vlgmr.msra.gmra.mrb[106].mxu1 %vm856_vm1, %v29355_v60  ;;  %25452 = vmatprep.mubr.msk.f32.mxu0 %vm372_vm0, %v29249_v54  ;;  %v25425_v7 = vpop.f32.mrb[98].mxu1 }
 0x76e   : > { %27213 = vmatpush3.bf16.xpose.msk.msra.mxu1 %vm28520_vm2, %v27208_v3  ;;  %25482 = vmatprep.mubr.msk.f32.mxu1 %vm856_vm1, %v4837_v31  ;;  %v5012_v5 = vpop.f32.mrb[99].mxu1 }
 0x76f   : > { %27216 = vmatprep.subr.msk.bf16.mxu1 %vm28520_vm2, %v27214_v62  ;;  %27222 = vmatprep.subr.msk.bf16.mxu0 %vm28520_vm2, %v27220_v28  ;;  %v27226_v12 = vpack.c.bf16 %v25425_v7, %v5012_v5 }
 0x770   : > { %25453 = vmatmul.mubr.msk.f32.gmra.mrb[112].mxu0 %vm372_vm0, %v29254_v38 }
 0x771   : > { %25455 = vmatprep.mubr.msk.f32.mxu0 %vm372_vm0, %v29259_v39  ;;  %27225 = vmatpush3.bf16.xpose.msk.msra.mxu0 %vm28520_vm2, %v27220_v28  ;;  %v25428_v14 = vpop.f32.mrb[100].mxu1 }
 0x772   : > { %v5022_v34 = vpop.f32.mrb[101].mxu1 }
 0x773   : > { %v27232_v45 = vpack.c.bf16 %v25428_v14, %v5022_v34 }
 0x774   : > { %25456 = vmatmul.mubr.msk.f32.gmra.mrb[114].mxu0 %vm372_vm0, %v29264_v59 }
 0x775   : > { %25483 = vmatmul.mubr.msk.f32.vlgmr.msra.gmra.mrb[108].mxu1 %vm856_vm1, %v29361_v63  ;;  %25458 = vmatprep.mubr.msk.f32.mxu0 %vm372_vm0, %v29269_v47  ;;  %v25431_v40 = vpop.f32.mrb[102].mxu1 }
 0x776   : > { %27219 = vmatpush3.bf16.xpose.msk.msra.mxu1 %vm28520_vm2, %v27214_v62  ;;  %25489 = vmatprep.mubr.msk.f32.mxu1 %vm856_vm1, %v29371_v17  ;;  %v5032_v43 = vpop.f32.mrb[103].mxu1 }
 0x777   : > { %27228 = vmatprep.subr.msk.bf16.mxu1 %vm28520_vm2, %v27226_v12  ;;  %27234 = vmatprep.subr.msk.bf16.mxu0 %vm28520_vm2, %v27232_v45  ;;  %v27238_v57 = vpack.c.bf16 %v25431_v40, %v5032_v43 }
 0x778   : > { %25459 = vmatmul.mubr.msk.f32.gmra.mrb[116].mxu0 %vm372_vm0, %v29274_v42 }
 0x779   : > { %25461 = vmatprep.mubr.msk.f32.mxu0 %vm372_vm0, %v29279_v50 }
 0x77c   : > { %25462 = vmatmul.mubr.msk.f32.gmra.mrb[118].mxu0 %vm372_vm0, %v29284_v6 }
 0x77d   : > { %25490 = vmatmul.mubr.msk.f32.vlgmr.msra.gmra.mrb[110].mxu1 %vm856_vm1, %v29367_v10  ;;  %25496 = vmatprep.mubr.msk.f32.mxu0 %vm856_vm1, %v29379_v19 }
 0x77e   : > { %27231 = vmatpush3.bf16.xpose.msk.msra.mxu1 %vm28520_vm2, %v27226_v12  ;;  %25503 = vmatprep.mubr.msk.f32.mxu1 %vm856_vm1, %v29387_v27 }
 0x77f   : > { %27240 = vmatprep.subr.msk.bf16.mxu1 %vm28520_vm2, %v27238_v57 }
 0x780   : > { %25497 = vmatmul.mubr.msk.f32.vlgmr.msra.gmra.mrb[120].mxu0 %vm856_vm1, %v29375_v16 }
 0x781   : > { %27237 = vmatpush3.bf16.xpose.msk.msra.mxu0 %vm28520_vm2, %v27232_v45  ;;  %25510 = vmatprep.mubr.msk.f32.mxu0 %vm856_vm1, %v29395_v21 }
 0x785   : > { %25504 = vmatmul.mubr.msk.f32.vlgmr.msra.gmra.mrb[112].mxu1 %vm856_vm1, %v29383_v18 }
 0x786   : > { %27243 = vmatpush3.bf16.xpose.msk.msra.mxu1 %vm28520_vm2, %v27238_v57  ;;  %25517 = vmatprep.mubr.msk.f32.mxu1 %vm856_vm1, %v29403_v61 }
 0x788   : > { %25511 = vmatmul.mubr.msk.f32.vlgmr.msra.gmra.mrb[122].mxu0 %vm856_vm1, %v29391_v26 }
 0x78d   : > { %25518 = vmatmul.mubr.msk.f32.vlgmr.msra.gmra.mrb[114].mxu1 %vm856_vm1, %v29399_v20 }
 0x833   : > { %v25442_v46 = vpop.f32.mrb[104].mxu0 }
 0x834   : > { %v5107_v1 = vpop.f32.mrb[105].mxu0 }
 0x835   : > { %v27244_v2 = vpack.c.bf16 %v25442_v46, %v5107_v1 }
 0x837   : > { %v25445_v0 = vpop.f32.mrb[106].mxu0  ;;  %27245 = vmatprep.subr.bf16.mxu0 %v27244_v2 }
 0x838   : > { %v25470_v8 = vpop.f32.mrb[104].mxu1  ;;  %v5117_v13 = vpop.f32.mrb[107].mxu0  ;;  %27247 = vmatpush3.bf16.msra.mxu0 %v27244_v2 }
 0x839   : > { %v29502_v15 = vpack.c.bf16 %v25445_v0, %v5117_v13  ;;  %v5264_v55 = vpop.f32.mrb[105].mxu1  ;;  %v29504_v60 = vmul.f32 0.35355338, %v25470_v8 }
 0x83a   : > { %v29506_v37 = vmul.f32 0.35355338, %v5264_v55 }
 0x83b   : > { %v5901_v41 = vsel %vm1569_vm3, %v29504_v60, -inf  ;;  %v25448_v63 = vpop.f32.mrb[108].mxu0  ;;  %27249 = vmatprep.subr.bf16.mxu0 %v29502_v15 }
 0x83c   : > { %5902 = vmax.xlane.f32.xlu1 %v5901_v41  ;;  %v5898_v31 = vsel %vm1569_vm3, %v29506_v37, -inf  ;;  %v5127_v10 = vpop.f32.mrb[109].mxu0 }
 0x83d   : > { %5899 = vmax.xlane.f32.xlu0 %v5898_v31  ;;  %v27252_v17 = vpack.c.bf16 %v25448_v63, %v5127_v10 }
 0x83f   : > { %v25451_v16 = vpop.f32.mrb[110].mxu0  ;;  %27253 = vmatprep.subr.bf16.mxu1 %v27252_v17 }
 0x840   : > { %v25477_v19 = vpop.f32.mrb[106].mxu1  ;;  %v5137_v18 = vpop.f32.mrb[111].mxu0  ;;  %27255 = vmatpush3.bf16.msra.mxu1 %v27252_v17 }
 0x841   : > { %v29513_v27 = vpack.c.bf16 %v25451_v16, %v5137_v18  ;;  %v5351_v26 = vpop.f32.mrb[107].mxu1  ;;  %v29515_v21 = vmul.f32 0.35355338, %v25477_v19 }
 0x842   : > { %v29517_v20 = vmul.f32 0.35355338, %v5351_v26 }
 0x843   : > { %v5907_v61 = vsel %vm1569_vm3, %v29515_v21, -inf  ;;  %v25454_v29 = vpop.f32.mrb[112].mxu0 }
 0x844   : > { %5908 = vmax.xlane.f32.xlu1 %v5907_v61  ;;  %v5904_v23 = vsel %vm1569_vm3, %v29517_v20, -inf  ;;  %v5147_v48 = vpop.f32.mrb[113].mxu0 }
 0x845   : > { %5905 = vmax.xlane.f32.xlu0 %v5904_v23  ;;  %v29523_v22 = vpack.c.bf16 %v25454_v29, %v5147_v48 }
 0x847   : > { %v25457_v9 = vpop.f32.mrb[114].mxu0  ;;  %27261 = vmatprep.subr.bf16.mxu1 %v29523_v22 }
 0x848   : > { %v25484_v32 = vpop.f32.mrb[108].mxu1  ;;  %v5157_v24 = vpop.f32.mrb[115].mxu0 }
 0x849   : > { %v29526_v25 = vpack.c.bf16 %v25457_v9, %v5157_v24  ;;  %v5438_v3 = vpop.f32.mrb[109].mxu1  ;;  %v29528_v4 = vmul.f32 0.35355338, %v25484_v32 }
 0x84a   : > { %v29530_v11 = vmul.f32 0.35355338, %v5438_v3 }
 0x84b   : > { %v5913_v62 = vsel %vm1569_vm3, %v29528_v4, -inf  ;;  %v25460_v52 = vpop.f32.mrb[116].mxu0 }
 0x84c   : > { %5914 = vmax.xlane.f32.xlu1 %v5913_v62  ;;  %v5910_v53 = vsel %vm1569_vm3, %v29530_v11, -inf  ;;  %v5167_v28 = vpop.f32.mrb[117].mxu0 }
 0x84d   : > { %5911 = vmax.xlane.f32.xlu0 %v5910_v53  ;;  %v29536_v7 = vpack.c.bf16 %v25460_v52, %v5167_v28 }
 0x84f   : > { %v25463_v5 = vpop.f32.mrb[118].mxu0 }
 0x850   : > { %v25491_v12 = vpop.f32.mrb[110].mxu1  ;;  %v5177_v14 = vpop.f32.mrb[119].mxu0 }
 0x851   : > { %v29538_v34 = vpack.c.bf16 %v25463_v5, %v5177_v14  ;;  %v5525_v45 = vpop.f32.mrb[111].mxu1  ;;  %v29540_v40 = vmul.f32 0.35355338, %v25491_v12 }
 0x852   : > { %v29542_v43 = vmul.f32 0.35355338, %v5525_v45 }
 0x853   : > { %v5919_v57 = vsel %vm1569_vm3, %v29540_v40, -inf  ;;  %v25498_v46 = vpop.f32.mrb[120].mxu0 }
 0x854   : > { %5920 = vmax.xlane.f32.xlu1 %v5919_v57  ;;  %v5916_v1 = vsel %vm1569_vm3, %v29542_v43, -inf  ;;  %v5612_v2 = vpop.f32.mrb[121].mxu0  ;;  %v29548_v0 = vmul.f32 0.35355338, %v25498_v46 }
 0x855   : > { %5917 = vmax.xlane.f32.xlu0 %v5916_v1  ;;  %v29550_v8 = vmul.f32 0.35355338, %v5612_v2 }
 0x856   : > { %v5925_v13 = vsel %vm1569_vm3, %v29548_v0, -inf }
 0x857   : > { %v5922_v55 = vsel %vm1569_vm3, %v29550_v8, -inf }
 0x858   : > { %v25505_v41 = vpop.f32.mrb[112].mxu1  ;;  %5926 = vmax.xlane.f32.xlu1 %v5925_v13 }
 0x859   : > { %v5699_v63 = vpop.f32.mrb[113].mxu1  ;;  %5923 = vmax.xlane.f32.xlu0 %v5922_v55  ;;  %v29556_v31 = vmul.f32 0.35355338, %v25505_v41 }
 0x85a   : > { %v29558_v10 = vmul.f32 0.35355338, %v5699_v63 }
 0x85b   : > { %v25512_v17 = vpop.f32.mrb[122].mxu0  ;;  %v5931_v16 = vsel %vm1569_vm3, %v29556_v31, -inf }
 0x85c   : > { %5932 = vmax.xlane.f32.xlu1 %v5931_v16  ;;  %v5786_v19 = vpop.f32.mrb[123].mxu0  ;;  %v5928_v18 = vsel %vm1569_vm3, %v29558_v10, -inf  ;;  %v29564_v26 = vmul.f32 0.35355338, %v25512_v17 }
 0x85d   : > { %5929 = vmax.xlane.f32.xlu0 %v5928_v18  ;;  %v29566_v61 = vmul.f32 0.35355338, %v5786_v19 }
 0x85e   : > { %v5937_v29 = vsel %vm1569_vm3, %v29564_v26, -inf }
 0x85f   : > { %v5934_v23 = vsel %vm1569_vm3, %v29566_v61, -inf }
 0x860   : > { %v25519_v48 = vpop.f32.mrb[114].mxu1  ;;  %5938 = vmax.xlane.f32.xlu1 %v5937_v29 }
 0x861   : > { %v5873_v9 = vpop.f32.mrb[115].mxu1  ;;  %5935 = vmax.xlane.f32.xlu0 %v5934_v23  ;;  %v29572_v32 = vmul.f32 0.35355338, %v25519_v48 }
 0x862   : > { %v29574_v24 = vmul.f32 0.35355338, %v5873_v9 }
 0x863   : > { %v5943_v3 = vsel %vm1569_vm3, %v29572_v32, -inf }
 0x864   : > { %5944 = vmax.xlane.f32.xlu1 %v5943_v3  ;;  %v5940_v62 = vsel %vm1569_vm3, %v29574_v24, -inf }
 0x865   : > { %5941 = vmax.xlane.f32.xlu0 %v5940_v62 }
 0x8c9   : > { %v5903_v52 = vpop.xlane.xlu1 %5902 }
 0x8ca   : > { %v5947_v53 = vsub.f32 %v29504_v60, %v5903_v52  ;;  %v5900_v28 = vpop.xlane.xlu0 %5899 }
 0x8cb   : > { %v5946_v5 = vsub.f32 %v29506_v37, %v5900_v28 }
 0x8cc   : > { %v5964_v12 = vmul.f32 1.442695, %v5947_v53 }
 0x8cd   : > { %v5962_v14 = vmul.f32 1.442695, %v5946_v5 }
 0x8ce   : > { %27746 = vpow2.f32 %v5964_v12 }
 0x8cf   : > { %27748 = vpow2.f32 %v5962_v14 }
 0x8d1   : > { %v5909_v45 = vpop.xlane.xlu1 %5908 }
 0x8d2   : > { %v5949_v57 = vsub.f32 %v29515_v21, %v5909_v45  ;;  %v5906_v46 = vpop.xlane.xlu0 %5905 }
 0x8d3   : > { %v5948_v1 = vsub.f32 %v29517_v20, %v5906_v46 }
 0x8d4   : > { %v5968_v2 = vmul.f32 1.442695, %v5949_v57 }
 0x8d5   : > { %v5966_v13 = vmul.f32 1.442695, %v5948_v1 }
 0x8d6   : > { %27750 = vpow2.f32 %v5968_v2 }
 0x8d7   : > { %27752 = vpow2.f32 %v5966_v13 }
 0x8d8   : > { %v29584_v55 = vpop.eup %27746 }
 0x8d9   : > { %v29586_v60 = vpop.eup %27748  ;;  %v5915_v41 = vpop.xlane.xlu1 %5914  ;;  %v5997_v37 = vsel %vm1569_vm3, %v29584_v55, 0.0 }
 0x8da   : > { %v5951_v63 = vsub.f32 %v29528_v4, %v5915_v41  ;;  %5998 = vadd.xlane.f32.xlu1 %v5997_v37  ;;  %v5912_v17 = vpop.xlane.xlu0 %5911  ;;  %v5994_v21 = vsel %vm1569_vm3, %v29586_v60, 0.0 }
 0x8db   : > { %v5950_v20 = vsub.f32 %v29530_v11, %v5912_v17  ;;  %5995 = vadd.xlane.f32.xlu0 %v5994_v21 }
 0x8dc   : > { %v5972_v16 = vmul.f32 1.442695, %v5951_v63 }
 0x8dd   : > { %v5970_v19 = vmul.f32 1.442695, %v5950_v20 }
 0x8de   : > { %27754 = vpow2.f32 %v5972_v16 }
 0x8df   : > { %27756 = vpow2.f32 %v5970_v19 }
 0x8e0   : > { %v29594_v18 = vpop.eup %27750 }
 0x8e1   : > { %v29596_v29 = vpop.eup %27752  ;;  %v5921_v23 = vpop.xlane.xlu1 %5920  ;;  %v6003_v4 = vsel %vm1569_vm3, %v29594_v18, 0.0 }
 0x8e2   : > { %v5953_v48 = vsub.f32 %v29540_v40, %v5921_v23  ;;  %6004 = vadd.xlane.f32.xlu1 %v6003_v4  ;;  %v5918_v9 = vpop.xlane.xlu0 %5917  ;;  %v6000_v11 = vsel %vm1569_vm3, %v29596_v29, 0.0 }
 0x8e3   : > { %v5952_v3 = vsub.f32 %v29542_v43, %v5918_v9  ;;  %6001 = vadd.xlane.f32.xlu0 %v6000_v11 }
 0x8e4   : > { %v5976_v62 = vmul.f32 1.442695, %v5953_v48 }
 0x8e5   : > { %v5974_v52 = vmul.f32 1.442695, %v5952_v3  ;;  %v5927_v53 = vpop.xlane.xlu1 %5926 }
 0x8e6   : > { %27758 = vpow2.f32 %v5976_v62  ;;  %v5955_v28 = vsub.f32 %v29548_v0, %v5927_v53  ;;  %v5924_v5 = vpop.xlane.xlu0 %5923 }
 0x8e7   : > { %27760 = vpow2.f32 %v5974_v52  ;;  %v5954_v12 = vsub.f32 %v29550_v8, %v5924_v5 }
 0x8e8   : > { %v29606_v14 = vpop.eup %27754  ;;  %v5980_v40 = vmul.f32 1.442695, %v5955_v28 }
 0x8e9   : > { %v29608_v45 = vpop.eup %27756  ;;  %v5978_v57 = vmul.f32 1.442695, %v5954_v12  ;;  %v5933_v46 = vpop.xlane.xlu1 %5932  ;;  %v6009_v43 = vsel %vm1569_vm3, %v29606_v14, 0.0 }
 0x8ea   : > { %27762 = vpow2.f32 %v5980_v40  ;;  %v5957_v1 = vsub.f32 %v29556_v31, %v5933_v46  ;;  %6010 = vadd.xlane.f32.xlu1 %v6009_v43  ;;  %v5930_v2 = vpop.xlane.xlu0 %5929  ;;  %v6006_v0 = vsel %vm1569_vm3, %v29608_v45, 0.0 }
 0x8eb   : > { %27764 = vpow2.f32 %v5978_v57  ;;  %v5956_v8 = vsub.f32 %v29558_v10, %v5930_v2  ;;  %6007 = vadd.xlane.f32.xlu0 %v6006_v0 }
 0x8ec   : > { %v5984_v13 = vmul.f32 1.442695, %v5957_v1 }
 0x8ed   : > { %v5982_v41 = vmul.f32 1.442695, %v5956_v8  ;;  %v5939_v37 = vpop.xlane.xlu1 %5938 }
 0x8ee   : > { %27766 = vpow2.f32 %v5984_v13  ;;  %v5959_v63 = vsub.f32 %v29564_v26, %v5939_v37  ;;  %v5936_v17 = vpop.xlane.xlu0 %5935 }
 0x8ef   : > { %27768 = vpow2.f32 %v5982_v41  ;;  %v5958_v21 = vsub.f32 %v29566_v61, %v5936_v17 }
 0x8f0   : > { %v29618_v31 = vpop.eup %27758  ;;  %v5988_v20 = vmul.f32 1.442695, %v5959_v63 }
 0x8f1   : > { %v29620_v16 = vpop.eup %27760  ;;  %v5986_v19 = vmul.f32 1.442695, %v5958_v21  ;;  %v5945_v23 = vpop.xlane.xlu1 %5944  ;;  %v6015_v10 = vsel %vm1569_vm3, %v29618_v31, 0.0 }
 0x8f2   : > { %27770 = vpow2.f32 %v5988_v20  ;;  %v5961_v4 = vsub.f32 %v29572_v32, %v5945_v23  ;;  %6016 = vadd.xlane.f32.xlu1 %v6015_v10  ;;  %v5942_v48 = vpop.xlane.xlu0 %5941  ;;  %v6012_v26 = vsel %vm1569_vm3, %v29620_v16, 0.0 }
 0x8f3   : > { %27772 = vpow2.f32 %v5986_v19  ;;  %v5960_v61 = vsub.f32 %v29574_v24, %v5942_v48  ;;  %6013 = vadd.xlane.f32.xlu0 %v6012_v26 }
 0x8f4   : > { %v29628_v9 = vpop.eup %27762  ;;  %v5992_v11 = vmul.f32 1.442695, %v5961_v4 }
 0x8f5   : > { %v29630_v3 = vpop.eup %27764  ;;  %v5990_v62 = vmul.f32 1.442695, %v5960_v61  ;;  %v6021_v52 = vsel %vm1569_vm3, %v29628_v9, 0.0 }
 0x8f6   : > { %27774 = vpow2.f32 %v5992_v11  ;;  %6022 = vadd.xlane.f32.xlu1 %v6021_v52  ;;  %v6018_v32 = vsel %vm1569_vm3, %v29630_v3, 0.0 }
 0x8f7   : > { %27776 = vpow2.f32 %v5990_v62  ;;  %6019 = vadd.xlane.f32.xlu0 %v6018_v32 }
 0x8f8   : > { %v29636_v53 = vpop.eup %27766 }
 0x8f9   : > { %v29638_v24 = vpop.eup %27768  ;;  %v6027_v28 = vsel %vm1569_vm3, %v29636_v53, 0.0 }
 0x8fa   : > { %6028 = vadd.xlane.f32.xlu1 %v6027_v28  ;;  %v6024_v5 = vsel %vm1569_vm3, %v29638_v24, 0.0 }
 0x8fb   : > { %6025 = vadd.xlane.f32.xlu0 %v6024_v5 }
 0x8fc   : > { %v29644_v12 = vpop.eup %27770 }
 0x8fd   : > { %v29646_v40 = vpop.eup %27772  ;;  %v6033_v57 = vsel %vm1569_vm3, %v29644_v12, 0.0 }
 0x8fe   : > { %6034 = vadd.xlane.f32.xlu1 %v6033_v57  ;;  %v6030_v46 = vsel %vm1569_vm3, %v29646_v40, 0.0 }
 0x8ff   : > { %6031 = vadd.xlane.f32.xlu0 %v6030_v46 }
 0x900   : > { %v29652_v43 = vpop.eup %27774 }
 0x901   : > { %v29654_v1 = vpop.eup %27776  ;;  %v6039_v2 = vsel %vm1569_vm3, %v29652_v43, 0.0 }
 0x902   : > { %6040 = vadd.xlane.f32.xlu1 %v6039_v2  ;;  %v6036_v0 = vsel %vm1569_vm3, %v29654_v1, 0.0 }
 0x903   : > { %6037 = vadd.xlane.f32.xlu0 %v6036_v0 }
 0x967   : > { %v5999_v8 = vpop.xlane.xlu1 %5998 }
 0x968   : > { %27778 = vrcp.f32 %v5999_v8  ;;  %v5996_v13 = vpop.xlane.xlu0 %5995 }
 0x969   : > { %27780 = vrcp.f32 %v5996_v13 }
 0x96f   : > { %v6005_v41 = vpop.xlane.xlu1 %6004 }
 0x970   : > { %27782 = vrcp.f32 %v6005_v41  ;;  %v6002_v37 = vpop.xlane.xlu0 %6001 }
 0x971   : > { %27784 = vrcp.f32 %v6002_v37 }
 0x972   : > { %v27779_v63 = vpop.eup %27778 }
 0x973   : > { %v27781_v17 = vpop.eup %27780  ;;  %v6059_v20 = vmul.f32 %v27779_v63, %v29584_v55 }
 0x974   : > { %v6058_v21 = vmul.f32 %v27781_v17, %v29586_v60 }
 0x976   : > { %25524 = vmatprep.mubr.msk.f32.mxu0 %vm1569_vm3, %v6058_v21 }
 0x977   : > { %v6011_v19 = vpop.xlane.xlu1 %6010  ;;  %25525 = vmatmul.mubr.msk.f32.vlgmr.msra.gmra.mrb[124].mxu0 %vm1569_vm3, %v6059_v20  ;;  %v296_v20 = vld [vmem:[%s33110_s1 + $0xf0] sm:$0xff] }
 0x978   : > { %27786 = vrcp.f32 %v6011_v19  ;;  %27251 = vmatpush3.bf16.msra.mxu0 %v29502_v15  ;;  %v6008_v23 = vpop.xlane.xlu0 %6007  ;;  %v297_v19 = vld [vmem:[%s33110_s1 + $0xf8] sm:$0xff] }
 0x979   : > { %27257 = vmatprep.subr.bf16.mxu0 %v29513_v27  ;;  %27788 = vrcp.f32 %v6008_v23  ;;  %v27280_v23 = vpack.c.bf16 %v297_v19, %v296_v20 }
 0x97a   : > { %v27783_v10 = vpop.eup %27782 }
 0x97b   : > { %v27785_v4 = vpop.eup %27784  ;;  %v6061_v60 = vmul.f32 %v27783_v10, %v29594_v18  ;;  %v28155_v10 = vld [vmem:[%s28366_s18 + $0x48] sm:$0xff] }
 0x97c   : > { %v6060_v48 = vmul.f32 %v27785_v4, %v29596_v29  ;;  %v29818_v4 = vld [vmem:[%s28366_s18 + $0x50] sm:$0xff] }
 0x97e   : > { %25531 = vmatprep.mubr.msk.f32.mxu0 %vm1569_vm3, %v6060_v48  ;;  %v28157_v48 = vld [vmem:[%s28366_s18 + $0x58] sm:$0xff] }
 0x97f   : > { %v6017_v55 = vpop.xlane.xlu1 %6016  ;;  %25532 = vmatmul.mubr.msk.f32.vlgmr.msra.gmra.mrb[126].mxu0 %vm1569_vm3, %v6061_v60  ;;  %v29825_v60 = vld [vmem:[%s28366_s18 + $0x60] sm:$0xff] }
 0x980   : > { %27790 = vrcp.f32 %v6017_v55  ;;  %27259 = vmatpush3.bf16.msra.mxu0 %v29513_v27  ;;  %v6014_v26 = vpop.xlane.xlu0 %6013  ;;  %v28159_v55 = vld [vmem:[%s28366_s18 + $0x68] sm:$0xff] }
 0x981   : > { %27265 = vmatprep.subr.bf16.mxu0 %v29526_v25  ;;  %27792 = vrcp.f32 %v6014_v26  ;;  %v29832_v26 = vld [vmem:[%s28366_s18 + $0x70] sm:$0xff] }
 0x982   : > { %v27787_v15 = vpop.eup %27786 }
 0x983   : > { %v27789_v61 = vpop.eup %27788  ;;  %v6023_v11 = vpop.xlane.xlu1 %6022  ;;  %v6063_v18 = vmul.f32 %v27787_v15, %v29606_v14  ;;  %v28161_v15 = vld [vmem:[%s28366_s18 + $0x78] sm:$0xff] }
 0x984   : > { %27794 = vrcp.f32 %v6023_v11  ;;  %v6020_v62 = vpop.xlane.xlu0 %6019  ;;  %v6062_v29 = vmul.f32 %v27789_v61, %v29608_v45  ;;  %v328_v61 = vld [vmem:[%s33111_s2 + $0xf0] sm:$0xff]  ;;  %v329_v11 = vld [vmem:[%s33111_s2 + $0xf8] sm:$0xff] }
 0x985   : > { %27796 = vrcp.f32 %v6020_v62 }
 0x986   : > { %25538 = vmatprep.mubr.msk.f32.mxu1 %vm1569_vm3, %v6062_v29 }
 0x987   : > { %v6029_v52 = vpop.xlane.xlu1 %6028  ;;  %25539 = vmatmul.mubr.msk.f32.vlgmr.msra.gmra.mrb[116].mxu1 %vm1569_vm3, %v6063_v18  ;;  %v27288_v18 = vpack.c.bf16 %v329_v11, %v328_v61 }
 0x988   : > { %27798 = vrcp.f32 %v6029_v52  ;;  %27263 = vmatpush3.bf16.msra.mxu1 %v29523_v22  ;;  %v6026_v27 = vpop.xlane.xlu0 %6025 }
 0x989   : > { %27269 = vmatprep.subr.bf16.mxu1 %v29536_v7  ;;  %27800 = vrcp.f32 %v6026_v27 }
 0x98a   : > { %v27791_v32 = vpop.eup %27790 }
 0x98b   : > { %v27793_v28 = vpop.eup %27792  ;;  %v6035_v5 = vpop.xlane.xlu1 %6034  ;;  %v6065_v14 = vmul.f32 %v27791_v32, %v29618_v31 }
 0x98c   : > { %27802 = vrcp.f32 %v6035_v5  ;;  %v6032_v45 = vpop.xlane.xlu0 %6031  ;;  %v6064_v57 = vmul.f32 %v27793_v28, %v29620_v16 }
 0x98d   : > { %27804 = vrcp.f32 %v6032_v45 }
 0x98e   : > { %v27795_v46 = vpop.eup %27794  ;;  %25545 = vmatprep.mubr.msk.f32.mxu0 %vm1569_vm3, %v6064_v57 }
 0x98f   : > { %v27797_v2 = vpop.eup %27796  ;;  %v6041_v0 = vpop.xlane.xlu1 %6040  ;;  %25546 = vmatmul.mubr.msk.f32.vlgmr.msra.gmra.mrb[128].mxu0 %vm1569_vm3, %v6065_v14  ;;  %v6067_v16 = vmul.f32 %v27795_v46, %v29628_v9 }
 0x990   : > { %27806 = vrcp.f32 %v6041_v0  ;;  %27267 = vmatpush3.bf16.msra.mxu0 %v29526_v25  ;;  %v6038_v22 = vpop.xlane.xlu0 %6037  ;;  %v6066_v8 = vmul.f32 %v27797_v2, %v29630_v3 }
 0x991   : > { %27273 = vmatprep.subr.bf16.mxu0 %v29538_v34  ;;  %27808 = vrcp.f32 %v6038_v22 }
 0x992   : > { %v27799_v13 = vpop.eup %27798  ;;  %25552 = vmatprep.mubr.msk.f32.mxu1 %vm1569_vm3, %v6066_v8 }
 0x993   : > { %v27801_v31 = vpop.eup %27800  ;;  %25553 = vmatmul.mubr.msk.f32.vlgmr.msra.gmra.mrb[118].mxu1 %vm1569_vm3, %v6067_v16  ;;  %v6069_v25 = vmul.f32 %v27799_v13, %v29636_v53 }
 0x994   : > { %27271 = vmatpush3.bf16.msra.mxu1 %v29536_v7  ;;  %v6068_v41 = vmul.f32 %v27801_v31, %v29638_v24 }
 0x996   : > { %v27803_v37 = vpop.eup %27802  ;;  %25559 = vmatprep.mubr.msk.f32.mxu0 %vm1569_vm3, %v6068_v41 }
 0x997   : > { %v27805_v3 = vpop.eup %27804  ;;  %25560 = vmatmul.mubr.msk.f32.vlgmr.msra.gmra.mrb[130].mxu0 %vm1569_vm3, %v6069_v25  ;;  %v6071_v63 = vmul.f32 %v27803_v37, %v29644_v12  ;;  %v326_v12 = vld [vmem:[%s33111_s2 + $0xe0] sm:$0xff] }
 0x998   : > { %27275 = vmatpush3.bf16.msra.mxu0 %v29538_v34  ;;  %v6070_v9 = vmul.f32 %v27805_v3, %v29646_v40  ;;  %v368_v34 = vld [vmem:[%s33113_s4 + $0x30] sm:$0xff] }
 0x999   : > { %25576 = vmatprep.subr.mxu0 %v368_v34 }
 0x99a   : > { %v27807_v17 = vpop.eup %27806  ;;  %25566 = vmatprep.mubr.msk.f32.mxu1 %vm1569_vm3, %v6070_v9 }
 0x99b   : > { %v27809_v7 = vpop.eup %27808  ;;  %25567 = vmatmul.mubr.msk.f32.vlgmr.msra.gmra.mrb[120].mxu1 %vm1569_vm3, %v6071_v63  ;;  %v6073_v24 = vmul.f32 %v27807_v17, %v29652_v43  ;;  %v294_v43 = vld [vmem:[%s33110_s1 + $0xe0] sm:$0xff] }
 0x99c   : > { %v6072_v53 = vmul.f32 %v27809_v7, %v29654_v1  ;;  %25610 = vmatprep.mubr.msk.f32.mxu1 %vm372_vm0, %v29201_v51  ;;  %v327_v51 = vld [vmem:[%s33111_s2 + $0xe8] sm:$0xff] }
 0x99d   : > { %v29713_v40 = vpack.c.bf16 %v327_v51, %v326_v12  ;;  %v295_v1 = vld [vmem:[%s33110_s1 + $0xe8] sm:$0xff] }
 0x99e   : > { %25573 = vmatprep.mubr.msk.f32.mxu0 %vm1569_vm3, %v6072_v53  ;;  %v27276_v21 = vpack.c.bf16 %v295_v1, %v294_v43 }
 0x99f   : > { %25574 = vmatmul.mubr.msk.f32.vlgmr.msra.gmra.mrb[132].mxu0 %vm1569_vm3, %v6073_v24 }
 0x9a0   : > { %25577 = vmatpush3.msra.mxu0 %v368_v34  ;;  %27277 = vmatprep.subr.bf16.mxu1 %v27276_v21 }
 0x9a1   : > { %27285 = vmatprep.subr.bf16.mxu0 %v29713_v40  ;;  %27279 = vmatpush3.bf16.msra.mxu1 %v27276_v21 }
 0x9a2   : > { %27281 = vmatprep.subr.bf16.mxu1 %v27280_v23 }
 0x9a5   : > { %27283 = vmatpush3.bf16.msra.mxu1 %v27280_v23 }
 0x9a8   : > { %25611 = vmatmul.mubr.msk.f32.vlgmr.msra.gmra.mrb[122].mxu1 %vm372_vm0, %v29214_v35  ;;  %v358_v35 = vld [vmem:[%s33112_s3 + $0xe0] sm:$0xff] }
 0x9a9   : > { %25613 = vmatprep.mubr.msk.f32.mxu1 %vm372_vm0, %v29219_v33  ;;  %v359_v33 = vld [vmem:[%s33112_s3 + $0xe8] sm:$0xff] }
 0x9ac   : > { %25614 = vmatmul.mubr.msk.f32.gmra.mrb[124].mxu1 %vm372_vm0, %v29224_v30  ;;  %v360_v30 = vld [vmem:[%s33112_s3 + $0xf0] sm:$0xff] }
 0x9ad   : > { %25616 = vmatprep.mubr.msk.f32.mxu1 %vm372_vm0, %v29229_v56  ;;  %v27292_v56 = vpack.c.bf16 %v359_v33, %v358_v35 }
 0x9af   : > { %27293 = vmatprep.subr.bf16.mxu1 %v27292_v56 }
 0x9b0   : > { %25617 = vmatmul.mubr.msk.f32.gmra.mrb[126].mxu1 %vm372_vm0, %v29234_v49  ;;  %v361_v49 = vld [vmem:[%s33112_s3 + $0xf8] sm:$0xff] }
 0x9b1   : > { %25619 = vmatprep.mubr.msk.f32.mxu1 %vm372_vm0, %v29239_v44  ;;  %v27296_v44 = vpack.c.bf16 %v361_v49, %v360_v30  ;;  %27295 = vmatpush3.bf16.msra.mxu1 %v27292_v56 }
 0x9b3   : > { %27297 = vmatprep.subr.bf16.mxu1 %v27296_v44 }
 0x9b4   : > { %25620 = vmatmul.mubr.msk.f32.gmra.mrb[128].mxu1 %vm372_vm0, %v29244_v58  ;;  %v29771_v58 = vld [vmem:[%s28366_s18] sm:$0xff] }
 0x9b5   : > { %25622 = vmatprep.mubr.msk.f32.mxu1 %vm372_vm0, %v29249_v54  ;;  %27299 = vmatpush3.bf16.msra.mxu1 %v27296_v44  ;;  %v29776_v54 = vld [vmem:[%s28366_s18 + $0x8] sm:$0xff] }
 0x9b8   : > { %25623 = vmatmul.mubr.msk.f32.gmra.mrb[130].mxu1 %vm372_vm0, %v29254_v38  ;;  %v29781_v38 = vld [vmem:[%s28366_s18 + $0x10] sm:$0xff] }
 0x9b9   : > { %25625 = vmatprep.mubr.msk.f32.mxu1 %vm372_vm0, %v29259_v39  ;;  %v29786_v39 = vld [vmem:[%s28366_s18 + $0x18] sm:$0xff] }
 0x9bc   : > { %25626 = vmatmul.mubr.msk.f32.gmra.mrb[132].mxu1 %vm372_vm0, %v29264_v59  ;;  %v29791_v59 = vld [vmem:[%s28366_s18 + $0x20] sm:$0xff] }
 0x9bd   : > { %25628 = vmatprep.mubr.msk.f32.mxu1 %vm372_vm0, %v29269_v47  ;;  %v29796_v47 = vld [vmem:[%s28366_s18 + $0x28] sm:$0xff] }
 0x9c0   : > { %25629 = vmatmul.mubr.msk.f32.gmra.mrb[134].mxu1 %vm372_vm0, %v29274_v42  ;;  %v29801_v42 = vld [vmem:[%s28366_s18 + $0x30] sm:$0xff] }
 0x9c1   : > { %25631 = vmatprep.mubr.msk.f32.mxu1 %vm372_vm0, %v29279_v50  ;;  %v29806_v50 = vld [vmem:[%s28366_s18 + $0x38] sm:$0xff] }
 0x9c4   : > { %25632 = vmatmul.mubr.msk.f32.gmra.mrb[136].mxu1 %vm372_vm0, %v29284_v6  ;;  %v29811_v6 = vld [vmem:[%s28366_s18 + $0x40] sm:$0xff] }
 0x9c5   : > { %25674 = vmatprep.mubr.msk.f32.mxu1 %vm372_vm0, %v29771_v58 }
 0x9c8   : > { %25675 = vmatmul.mubr.msk.f32.vlgmr.msra.gmra.mrb[138].mxu1 %vm372_vm0, %v29776_v54 }
 0x9c9   : > { %25677 = vmatprep.mubr.msk.f32.mxu1 %vm372_vm0, %v29781_v38 }
 0x9cc   : > { %25678 = vmatmul.mubr.msk.f32.gmra.mrb[140].mxu1 %vm372_vm0, %v29786_v39 }
 0x9cd   : > { %25680 = vmatprep.mubr.msk.f32.mxu1 %vm372_vm0, %v29791_v59 }
 0x9d0   : > { %25681 = vmatmul.mubr.msk.f32.gmra.mrb[142].mxu1 %vm372_vm0, %v29796_v47 }
 0x9d1   : > { %25683 = vmatprep.mubr.msk.f32.mxu1 %vm372_vm0, %v29801_v42 }
 0x9d4   : > { %25684 = vmatmul.mubr.msk.f32.gmra.mrb[144].mxu1 %vm372_vm0, %v29806_v50 }
 0x9d5   : > { %25686 = vmatprep.mubr.msk.f32.mxu1 %vm372_vm0, %v29811_v6 }
 0x9d8   : > { %25687 = vmatmul.mubr.msk.f32.gmra.mrb[146].mxu1 %vm372_vm0, %v28155_v10 }
 0x9d9   : > { %25689 = vmatprep.mubr.msk.f32.mxu1 %vm372_vm0, %v29818_v4 }
 0x9dc   : > { %25690 = vmatmul.mubr.msk.f32.gmra.mrb[148].mxu1 %vm372_vm0, %v28157_v48 }
 0x9dd   : > { %25692 = vmatprep.mubr.msk.f32.mxu1 %vm372_vm0, %v29825_v60 }
 0x9e0   : > { %25693 = vmatmul.mubr.msk.f32.gmra.mrb[150].mxu1 %vm372_vm0, %v28159_v55 }
 0x9e1   : > { %25695 = vmatprep.mubr.msk.f32.mxu1 %vm372_vm0, %v29832_v26 }
 0x9e4   : > { %25696 = vmatmul.mubr.msk.f32.gmra.mrb[152].mxu1 %vm372_vm0, %v28161_v15 }
 0xa4a   : > { %v25526_v62 = vpop.f32.mrb[124].mxu0 }
 0xa4b   : > { %v6146_v29 = vpop.f32.mrb[125].mxu0 }
 0xa4c   : > { %25578 = vmatprep.mubr.msk.f32.mxu0 %vm856_vm1, %v6146_v29 }
 0xa4d   : > { %25579 = vmatmul.mubr.msk.f32.vlgmr.msra.gmra.mrb[88].mxu0 %vm856_vm1, %v25526_v62 }
 0xa4e   : > { %27287 = vmatpush3.bf16.msra.mxu0 %v29713_v40 }
 0xa4f   : > { %27289 = vmatprep.subr.bf16.mxu0 %v27288_v18 }
 0xa52   : > { %v25533_v52 = vpop.f32.mrb[126].mxu0  ;;  %27291 = vmatpush3.bf16.msra.mxu0 %v27288_v18 }
 0xa53   : > { %v6227_v27 = vpop.f32.mrb[127].mxu0 }
 0xa54   : > { %25581 = vmatprep.mubr.msk.f32.mxu0 %vm856_vm1, %v6227_v27 }
 0xa55   : > { %25582 = vmatmul.mubr.msk.f32.gmra.mrb[90].mxu0 %vm856_vm1, %v25533_v52 }
 0xa5a   : > { %v25540_v32 = vpop.f32.mrb[116].mxu1 }
 0xa5b   : > { %v6308_v28 = vpop.f32.mrb[117].mxu1 }
 0xa5c   : > { %25584 = vmatprep.mubr.msk.f32.mxu0 %vm856_vm1, %v6308_v28 }
 0xa5d   : > { %25585 = vmatmul.mubr.msk.f32.gmra.mrb[92].mxu0 %vm856_vm1, %v25540_v32 }
 0xa62   : > { %v25547_v5 = vpop.f32.mrb[128].mxu0 }
 0xa63   : > { %v6389_v45 = vpop.f32.mrb[129].mxu0 }
 0xa64   : > { %25587 = vmatprep.mubr.msk.f32.mxu0 %vm856_vm1, %v6389_v45 }
 0xa65   : > { %25588 = vmatmul.mubr.msk.f32.gmra.mrb[94].mxu0 %vm856_vm1, %v25547_v5 }
 0xa66   : > { %v25554_v57 = vpop.f32.mrb[118].mxu1 }
 0xa67   : > { %v6470_v14 = vpop.f32.mrb[119].mxu1 }
 0xa68   : > { %25590 = vmatprep.mubr.msk.f32.mxu0 %vm856_vm1, %v6470_v14 }
 0xa69   : > { %25591 = vmatmul.mubr.msk.f32.gmra.mrb[96].mxu0 %vm856_vm1, %v25554_v57 }
 0xa6a   : > { %v25561_v46 = vpop.f32.mrb[130].mxu0 }
 0xa6b   : > { %v6551_v2 = vpop.f32.mrb[131].mxu0 }
 0xa6c   : > { %25593 = vmatprep.mubr.msk.f32.mxu0 %vm856_vm1, %v6551_v2 }
 0xa6d   : > { %25594 = vmatmul.mubr.msk.f32.gmra.mrb[98].mxu0 %vm856_vm1, %v25561_v46 }
 0xa6e   : > { %v25568_v0 = vpop.f32.mrb[120].mxu1 }
 0xa6f   : > { %v6632_v22 = vpop.f32.mrb[121].mxu1 }
 0xa70   : > { %25596 = vmatprep.mubr.msk.f32.mxu0 %vm856_vm1, %v6632_v22 }
 0xa71   : > { %25597 = vmatmul.mubr.msk.f32.gmra.mrb[100].mxu0 %vm856_vm1, %v25568_v0 }
 0xa72   : > { %v25575_v8 = vpop.f32.mrb[132].mxu0 }
 0xa73   : > { %v6713_v16 = vpop.f32.mrb[133].mxu0 }
 0xa74   : > { %25599 = vmatprep.mubr.msk.f32.mxu0 %vm856_vm1, %v6713_v16 }
 0xa75   : > { %25600 = vmatmul.mubr.msk.f32.gmra.mrb[102].mxu0 %vm856_vm1, %v25575_v8 }
 0xa76   : > { %25642 = vmatprep.mubr.msk.f32.mxu0 %vm372_vm0, %v29771_v58 }
 0xa79   : > { %25643 = vmatmul.mubr.msk.f32.vlgmr.msra.gmra.mrb[134].mxu0 %vm372_vm0, %v29776_v54 }
 0xa7a   : > { %25645 = vmatprep.mubr.msk.f32.mxu0 %vm372_vm0, %v29781_v38 }
 0xa7b   : > { %v25612_v13 = vpop.f32.mrb[122].mxu1 }
 0xa7c   : > { %v6997_v31 = vpop.f32.mrb[123].mxu1 }
 0xa7d   : > { %25646 = vmatmul.mubr.msk.f32.gmra.mrb[136].mxu0 %vm372_vm0, %v29786_v39 }
 0xa7e   : > { %25648 = vmatprep.mubr.msk.f32.mxu0 %vm372_vm0, %v29791_v59 }
 0xa7f   : > { %v25615_v41 = vpop.f32.mrb[124].mxu1 }
 0xa80   : > { %v7007_v25 = vpop.f32.mrb[125].mxu1 }
 0xa81   : > { %25649 = vmatmul.mubr.msk.f32.gmra.mrb[138].mxu0 %vm372_vm0, %v29796_v47  ;;  %25709 = vmatprep.mubr.msk.f32.mxu1 %vm856_vm1, %v7007_v25 }
 0xa82   : > { %25651 = vmatprep.mubr.msk.f32.mxu0 %vm372_vm0, %v29801_v42 }
 0xa83   : > { %v29891_v37 = vpop.f32.mrb[126].mxu1 }
 0xa84   : > { %v7017_v3 = vpop.f32.mrb[127].mxu1 }
 0xa85   : > { %25652 = vmatmul.mubr.msk.f32.gmra.mrb[140].mxu0 %vm372_vm0, %v29806_v50 }
 0xa86   : > { %25654 = vmatprep.mubr.msk.f32.mxu0 %vm372_vm0, %v29811_v6 }
 0xa87   : > { %v29893_v9 = vpop.f32.mrb[128].mxu1 }
 0xa88   : > { %v7027_v63 = vpop.f32.mrb[129].mxu1 }
 0xa89   : > { %25655 = vmatmul.mubr.msk.f32.gmra.mrb[142].mxu0 %vm372_vm0, %v28155_v10 }
 0xa8a   : > { %25657 = vmatprep.mubr.msk.f32.mxu0 %vm372_vm0, %v29818_v4 }
 0xa8b   : > { %v29895_v17 = vpop.f32.mrb[130].mxu1 }
 0xa8c   : > { %v29897_v7 = vpop.f32.mrb[131].mxu1 }
 0xa8d   : > { %25658 = vmatmul.mubr.msk.f32.gmra.mrb[144].mxu0 %vm372_vm0, %v28157_v48 }
 0xa8e   : > { %25660 = vmatprep.mubr.msk.f32.mxu0 %vm372_vm0, %v29825_v60 }
 0xa8f   : > { %v29899_v53 = vpop.f32.mrb[132].mxu1 }
 0xa90   : > { %v29901_v24 = vpop.f32.mrb[133].mxu1 }
 0xa91   : > { %25661 = vmatmul.mubr.msk.f32.gmra.mrb[146].mxu0 %vm372_vm0, %v28159_v55 }
 0xa92   : > { %25663 = vmatprep.mubr.msk.f32.mxu0 %vm372_vm0, %v29832_v26 }
 0xa93   : > { %v29903_v34 = vpop.f32.mrb[134].mxu1 }
 0xa94   : > { %v29905_v12 = vpop.f32.mrb[135].mxu1 }
 0xa95   : > { %25664 = vmatmul.mubr.msk.f32.gmra.mrb[148].mxu0 %vm372_vm0, %v28161_v15 }
 0xa96   : > { %25702 = vmatprep.mubr.msk.f32.mxu0 %vm856_vm1, %v6997_v31 }
 0xa97   : > { %v29907_v51 = vpop.f32.mrb[136].mxu1 }
 0xa98   : > { %v29909_v40 = vpop.f32.mrb[137].mxu1 }
 0xa9b   : > { %v25676_v43 = vpop.f32.mrb[138].mxu1 }
 0xa9c   : > { %v7287_v1 = vpop.f32.mrb[139].mxu1 }
 0xa9d   : > { %v29911_v21 = vpack.c.bf16 %v25676_v43, %v7287_v1 }
 0xa9f   : > { %v25679_v20 = vpop.f32.mrb[140].mxu1 }
 0xaa0   : > { %v7297_v19 = vpop.f32.mrb[141].mxu1 }
 0xaa1   : > { %v29913_v23 = vpack.c.bf16 %v25679_v20, %v7297_v19 }
 0xaa3   : > { %v25682_v35 = vpop.f32.mrb[142].mxu1 }
 0xaa4   : > { %v7307_v33 = vpop.f32.mrb[143].mxu1 }
 0xaa5   : > { %v29915_v30 = vpack.c.bf16 %v25682_v35, %v7307_v33 }
 0xaa7   : > { %v25685_v56 = vpop.f32.mrb[144].mxu1 }
 0xaa8   : > { %v7317_v49 = vpop.f32.mrb[145].mxu1 }
 0xaa9   : > { %v29917_v44 = vpack.c.bf16 %v25685_v56, %v7317_v49 }
 0xaab   : > { %v25688_v54 = vpop.f32.mrb[146].mxu1 }
 0xaac   : > { %v7327_v39 = vpop.f32.mrb[147].mxu1 }
 0xaad   : > { %v29919_v47 = vpack.c.bf16 %v25688_v54, %v7327_v39 }
 0xaaf   : > { %v25691_v50 = vpop.f32.mrb[148].mxu1 }
 0xab0   : > { %v7337_v10 = vpop.f32.mrb[149].mxu1 }
 0xab1   : > { %v29921_v48 = vpack.c.bf16 %v25691_v50, %v7337_v10 }
 0xab3   : > { %v25694_v55 = vpop.f32.mrb[150].mxu1 }
 0xab4   : > { %v7347_v15 = vpop.f32.mrb[151].mxu1 }
 0xab5   : > { %v29923_v61 = vpack.c.bf16 %v25694_v55, %v7347_v15 }
 0xab7   : > { %v25697_v11 = vpop.f32.mrb[152].mxu1 }
 0xab8   : > { %v7357_v62 = vpop.f32.mrb[153].mxu1 }
 0xab9   : > { %v29925_v29 = vpack.c.bf16 %v25697_v11, %v7357_v62 }
 0xb4c   : > { %v25644_v18 = vpop.f32.mrb[134].mxu0 }
 0xb4d   : > { %v7142_v52 = vpop.f32.mrb[135].mxu0 }
 0xb4e   : > { %v27300_v27 = vpack.c.bf16 %v25644_v18, %v7142_v52 }
 0xb50   : > { %v25647_v32 = vpop.f32.mrb[136].mxu0  ;;  %27302 = vmatprep.subr.msk.bf16.mxu0 %vm28520_vm2, %v27300_v27 }
 0xb51   : > { %v7152_v28 = vpop.f32.mrb[137].mxu0  ;;  %27305 = vmatpush3.bf16.xpose.msk.msra.mxu0 %vm28520_vm2, %v27300_v27 }
 0xb52   : > { %v27306_v5 = vpack.c.bf16 %v25647_v32, %v7152_v28 }
 0xb54   : > { %v25650_v45 = vpop.f32.mrb[138].mxu0  ;;  %27308 = vmatprep.subr.msk.bf16.mxu1 %vm28520_vm2, %v27306_v5 }
 0xb55   : > { %v7162_v57 = vpop.f32.mrb[139].mxu0  ;;  %27311 = vmatpush3.bf16.xpose.msk.msra.mxu1 %vm28520_vm2, %v27306_v5 }
 0xb56   : > { %v27312_v14 = vpack.c.bf16 %v25650_v45, %v7162_v57 }
 0xb58   : > { %v25653_v46 = vpop.f32.mrb[140].mxu0  ;;  %25703 = vmatmul.mubr.msk.f32.vlgmr.msra.gmra.mrb[150].mxu0 %vm856_vm1, %v25612_v13  ;;  %27314 = vmatprep.subr.msk.bf16.mxu0 %vm28520_vm2, %v27312_v14 }
 0xb59   : > { %v7172_v2 = vpop.f32.mrb[141].mxu0  ;;  %27317 = vmatpush3.bf16.xpose.msk.msra.mxu0 %vm28520_vm2, %v27312_v14  ;;  %25716 = vmatprep.mubr.msk.f32.mxu0 %vm856_vm1, %v7017_v3 }
 0xb5a   : > { %v27318_v0 = vpack.c.bf16 %v25653_v46, %v7172_v2 }
 0xb5c   : > { %v25656_v22 = vpop.f32.mrb[142].mxu0  ;;  %25710 = vmatmul.mubr.msk.f32.vlgmr.msra.gmra.mrb[154].mxu1 %vm856_vm1, %v25615_v41  ;;  %27320 = vmatprep.subr.msk.bf16.mxu1 %vm28520_vm2, %v27318_v0 }
 0xb5d   : > { %v7182_v8 = vpop.f32.mrb[143].mxu0  ;;  %27323 = vmatpush3.bf16.xpose.msk.msra.mxu1 %vm28520_vm2, %v27318_v0  ;;  %25723 = vmatprep.mubr.msk.f32.mxu1 %vm856_vm1, %v7027_v63 }
 0xb5e   : > { %v27324_v16 = vpack.c.bf16 %v25656_v22, %v7182_v8 }
 0xb60   : > { %v25659_v13 = vpop.f32.mrb[144].mxu0  ;;  %25717 = vmatmul.mubr.msk.f32.vlgmr.msra.gmra.mrb[152].mxu0 %vm856_vm1, %v29891_v37  ;;  %27326 = vmatprep.subr.msk.bf16.mxu0 %vm28520_vm2, %v27324_v16 }
 0xb61   : > { %v7192_v31 = vpop.f32.mrb[145].mxu0  ;;  %27329 = vmatpush3.bf16.xpose.msk.msra.mxu0 %vm28520_vm2, %v27324_v16  ;;  %25730 = vmatprep.mubr.msk.f32.mxu0 %vm856_vm1, %v29897_v7 }
 0xb62   : > { %v27330_v41 = vpack.c.bf16 %v25659_v13, %v7192_v31 }
 0xb64   : > { %v25662_v25 = vpop.f32.mrb[146].mxu0  ;;  %25724 = vmatmul.mubr.msk.f32.vlgmr.msra.gmra.mrb[156].mxu1 %vm856_vm1, %v29893_v9  ;;  %27332 = vmatprep.subr.msk.bf16.mxu1 %vm28520_vm2, %v27330_v41 }
 0xb65   : > { %v7202_v3 = vpop.f32.mrb[147].mxu0  ;;  %27335 = vmatpush3.bf16.xpose.msk.msra.mxu1 %vm28520_vm2, %v27330_v41  ;;  %25737 = vmatprep.mubr.msk.f32.mxu1 %vm856_vm1, %v29901_v24 }
 0xb66   : > { %v27336_v37 = vpack.c.bf16 %v25662_v25, %v7202_v3 }
 0xb68   : > { %v25665_v63 = vpop.f32.mrb[148].mxu0  ;;  %25731 = vmatmul.mubr.msk.f32.vlgmr.msra.gmra.mrb[154].mxu0 %vm856_vm1, %v29895_v17  ;;  %27338 = vmatprep.subr.msk.bf16.mxu0 %vm28520_vm2, %v27336_v37 }
 0xb69   : > { %v7212_v7 = vpop.f32.mrb[149].mxu0  ;;  %27341 = vmatpush3.bf16.xpose.msk.msra.mxu0 %vm28520_vm2, %v27336_v37  ;;  %25744 = vmatprep.mubr.msk.f32.mxu0 %vm856_vm1, %v29905_v12 }
 0xb6a   : > { %v27342_v9 = vpack.c.bf16 %v25665_v63, %v7212_v7  ;;  %27349 = vmatprep.subr.bf16.mxu0 %v29911_v21 }
 0xb6c   : > { %25738 = vmatmul.mubr.msk.f32.vlgmr.msra.gmra.mrb[158].mxu1 %vm856_vm1, %v29899_v53  ;;  %27344 = vmatprep.subr.msk.bf16.mxu1 %vm28520_vm2, %v27342_v9 }
 0xb6d   : > { %27347 = vmatpush3.bf16.xpose.msk.msra.mxu1 %vm28520_vm2, %v27342_v9  ;;  %25751 = vmatprep.mubr.msk.f32.mxu1 %vm856_vm1, %v29909_v40 }
 0xb6e   : > { %27353 = vmatprep.subr.bf16.mxu1 %v29913_v23 }
 0xb70   : > { %25745 = vmatmul.mubr.msk.f32.vlgmr.msra.gmra.mrb[156].mxu0 %vm856_vm1, %v29903_v34 }
 0xb71   : > { %27351 = vmatpush3.bf16.msra.mxu0 %v29911_v21 }
 0xb72   : > { %27357 = vmatprep.subr.bf16.mxu0 %v29915_v30 }
 0xb74   : > { %25752 = vmatmul.mubr.msk.f32.vlgmr.msra.gmra.mrb[160].mxu1 %vm856_vm1, %v29907_v51 }
 0xb75   : > { %27355 = vmatpush3.bf16.msra.mxu1 %v29913_v23 }
 0xb76   : > { %27361 = vmatprep.subr.bf16.mxu1 %v29917_v44 }
 0xc2b   : > { %v25704_v36 = vpop.f32.mrb[150].mxu0 }
 0xc2c   : > { %v7444_v17 = vpop.f32.mrb[151].mxu0  ;;  %v29989_v53 = vmul.f32 0.35355338, %v25704_v36 }
 0xc2d   : > { %v29991_v24 = vmul.f32 0.35355338, %v7444_v17 }
 0xc2e   : > { %v8081_v34 = vsel %vm1569_vm3, %v29989_v53, -inf }
 0xc2f   : > { %v25711_v12 = vpop.f32.mrb[154].mxu1  ;;  %8082 = vmax.xlane.f32.xlu1 %v8081_v34  ;;  %v8078_v40 = vsel %vm1569_vm3, %v29991_v24, -inf }
 0xc30   : > { %v29997_v43 = vmul.f32 0.35355338, %v25711_v12  ;;  %v7531_v51 = vpop.f32.mrb[155].mxu1  ;;  %8079 = vmax.xlane.f32.xlu0 %v8078_v40 }
 0xc31   : > { %v29999_v1 = vmul.f32 0.35355338, %v7531_v51 }
 0xc32   : > { %v8087_v21 = vsel %vm1569_vm3, %v29997_v43, -inf }
 0xc33   : > { %8088 = vmax.xlane.f32.xlu1 %v8087_v21  ;;  %v25718_v20 = vpop.f32.mrb[152].mxu0  ;;  %v8084_v19 = vsel %vm1569_vm3, %v29999_v1, -inf }
 0xc34   : > { %v30005_v23 = vmul.f32 0.35355338, %v25718_v20  ;;  %8085 = vmax.xlane.f32.xlu0 %v8084_v19  ;;  %v7618_v35 = vpop.f32.mrb[153].mxu0 }
 0xc35   : > { %v30007_v33 = vmul.f32 0.35355338, %v7618_v35 }
 0xc36   : > { %v8093_v56 = vsel %vm1569_vm3, %v30005_v23, -inf }
 0xc37   : > { %v25725_v49 = vpop.f32.mrb[156].mxu1  ;;  %8094 = vmax.xlane.f32.xlu1 %v8093_v56  ;;  %v8090_v54 = vsel %vm1569_vm3, %v30007_v33, -inf }
 0xc38   : > { %v30013_v39 = vmul.f32 0.35355338, %v25725_v49  ;;  %v7705_v50 = vpop.f32.mrb[157].mxu1  ;;  %8091 = vmax.xlane.f32.xlu0 %v8090_v54 }
 0xc39   : > { %v30015_v10 = vmul.f32 0.35355338, %v7705_v50 }
 0xc3a   : > { %v8099_v55 = vsel %vm1569_vm3, %v30013_v39, -inf }
 0xc3b   : > { %8100 = vmax.xlane.f32.xlu1 %v8099_v55  ;;  %v25732_v15 = vpop.f32.mrb[154].mxu0  ;;  %v8096_v11 = vsel %vm1569_vm3, %v30015_v10, -inf }
 0xc3c   : > { %v30021_v62 = vmul.f32 0.35355338, %v25732_v15  ;;  %8097 = vmax.xlane.f32.xlu0 %v8096_v11  ;;  %v7792_v18 = vpop.f32.mrb[155].mxu0 }
 0xc3d   : > { %v30023_v52 = vmul.f32 0.35355338, %v7792_v18 }
 0xc3e   : > { %v8105_v27 = vsel %vm1569_vm3, %v30021_v62, -inf }
 0xc3f   : > { %v25739_v32 = vpop.f32.mrb[158].mxu1  ;;  %8106 = vmax.xlane.f32.xlu1 %v8105_v27  ;;  %v8102_v28 = vsel %vm1569_vm3, %v30023_v52, -inf }
 0xc40   : > { %v30029_v5 = vmul.f32 0.35355338, %v25739_v32  ;;  %v7879_v45 = vpop.f32.mrb[159].mxu1  ;;  %8103 = vmax.xlane.f32.xlu0 %v8102_v28 }
 0xc41   : > { %v30031_v57 = vmul.f32 0.35355338, %v7879_v45 }
 0xc42   : > { %v8111_v14 = vsel %vm1569_vm3, %v30029_v5, -inf }
 0xc43   : > { %8112 = vmax.xlane.f32.xlu1 %v8111_v14  ;;  %v25746_v46 = vpop.f32.mrb[156].mxu0  ;;  %v8108_v2 = vsel %vm1569_vm3, %v30031_v57, -inf }
 0xc44   : > { %v30037_v0 = vmul.f32 0.35355338, %v25746_v46  ;;  %8109 = vmax.xlane.f32.xlu0 %v8108_v2  ;;  %v7966_v22 = vpop.f32.mrb[157].mxu0 }
 0xc45   : > { %v30039_v8 = vmul.f32 0.35355338, %v7966_v22 }
 0xc46   : > { %v8117_v16 = vsel %vm1569_vm3, %v30037_v0, -inf }
 0xc47   : > { %v25753_v13 = vpop.f32.mrb[160].mxu1  ;;  %8118 = vmax.xlane.f32.xlu1 %v8117_v16  ;;  %v8114_v31 = vsel %vm1569_vm3, %v30039_v8, -inf }
 0xc48   : > { %v30045_v41 = vmul.f32 0.35355338, %v25753_v13  ;;  %v8053_v25 = vpop.f32.mrb[161].mxu1  ;;  %8115 = vmax.xlane.f32.xlu0 %v8114_v31 }
 0xc49   : > { %v30047_v3 = vmul.f32 0.35355338, %v8053_v25 }
 0xc4a   : > { %v8123_v37 = vsel %vm1569_vm3, %v30045_v41, -inf }
 0xc4b   : > { %8124 = vmax.xlane.f32.xlu1 %v8123_v37  ;;  %v8120_v63 = vsel %vm1569_vm3, %v30047_v3, -inf }
 0xc4c   : > { %8121 = vmax.xlane.f32.xlu0 %v8120_v63 }
 0xcbc   : > { %v8083_v7 = vpop.xlane.xlu1 %8082 }
 0xcbd   : > { %v8127_v9 = vsub.f32 %v29989_v53, %v8083_v7  ;;  %v8080_v36 = vpop.xlane.xlu0 %8079 }
 0xcbe   : > { %v8126_v17 = vsub.f32 %v29991_v24, %v8080_v36 }
 0xcbf   : > { %v8144_v34 = vmul.f32 1.442695, %v8127_v9 }
 0xcc0   : > { %v8142_v12 = vmul.f32 1.442695, %v8126_v17  ;;  %v8089_v40 = vpop.xlane.xlu1 %8088 }
 0xcc1   : > { %27810 = vpow2.f32 %v8144_v34  ;;  %v8129_v51 = vsub.f32 %v29997_v43, %v8089_v40  ;;  %v8086_v21 = vpop.xlane.xlu0 %8085 }
 0xcc2   : > { %27812 = vpow2.f32 %v8142_v12  ;;  %v8128_v20 = vsub.f32 %v29999_v1, %v8086_v21 }
 0xcc3   : > { %v8148_v19 = vmul.f32 1.442695, %v8129_v51 }
 0xcc4   : > { %v8146_v35 = vmul.f32 1.442695, %v8128_v20  ;;  %v8095_v56 = vpop.xlane.xlu1 %8094 }
 0xcc5   : > { %27814 = vpow2.f32 %v8148_v19  ;;  %v8131_v49 = vsub.f32 %v30005_v23, %v8095_v56  ;;  %v8092_v53 = vpop.xlane.xlu0 %8091 }
 0xcc6   : > { %27816 = vpow2.f32 %v8146_v35  ;;  %v8130_v24 = vsub.f32 %v30007_v33, %v8092_v53 }
 0xcc7   : > { %v8152_v54 = vmul.f32 1.442695, %v8131_v49 }
 0xcc8   : > { %v8150_v50 = vmul.f32 1.442695, %v8130_v24  ;;  %v8101_v55 = vpop.xlane.xlu1 %8100 }
 0xcc9   : > { %27818 = vpow2.f32 %v8152_v54  ;;  %v8133_v43 = vsub.f32 %v30013_v39, %v8101_v55  ;;  %v8098_v15 = vpop.xlane.xlu0 %8097 }
 0xcca   : > { %27820 = vpow2.f32 %v8150_v50  ;;  %v8132_v1 = vsub.f32 %v30015_v10, %v8098_v15 }
 0xccb   : > { %v30061_v11 = vpop.eup %27810  ;;  %v8156_v18 = vmul.f32 1.442695, %v8133_v43 }
 0xccc   : > { %v30063_v27 = vpop.eup %27812  ;;  %v8154_v23 = vmul.f32 1.442695, %v8132_v1  ;;  %v8107_v32 = vpop.xlane.xlu1 %8106  ;;  %v8177_v33 = vsel %vm1569_vm3, %v30061_v11, 0.0 }
 0xccd   : > { %27822 = vpow2.f32 %v8156_v18  ;;  %v8135_v28 = vsub.f32 %v30021_v62, %v8107_v32  ;;  %v8104_v45 = vpop.xlane.xlu0 %8103  ;;  %8178 = vadd.xlane.f32.xlu1 %v8177_v33  ;;  %v8174_v39 = vsel %vm1569_vm3, %v30063_v27, 0.0 }
 0xcce   : > { %27824 = vpow2.f32 %v8154_v23  ;;  %v8134_v10 = vsub.f32 %v30023_v52, %v8104_v45  ;;  %8175 = vadd.xlane.f32.xlu0 %v8174_v39 }
 0xccf   : > { %v30071_v14 = vpop.eup %27814  ;;  %v8160_v46 = vmul.f32 1.442695, %v8135_v28 }
 0xcd0   : > { %v30073_v2 = vpop.eup %27816  ;;  %v8158_v22 = vmul.f32 1.442695, %v8134_v10  ;;  %v8113_v16 = vpop.xlane.xlu1 %8112  ;;  %v8183_v13 = vsel %vm1569_vm3, %v30071_v14, 0.0 }
 0xcd1   : > { %27826 = vpow2.f32 %v8160_v46  ;;  %v8137_v62 = vsub.f32 %v30029_v5, %v8113_v16  ;;  %v8110_v31 = vpop.xlane.xlu0 %8109  ;;  %8184 = vadd.xlane.f32.xlu1 %v8183_v13  ;;  %v8180_v25 = vsel %vm1569_vm3, %v30073_v2, 0.0 }
 0xcd2   : > { %27828 = vpow2.f32 %v8158_v22  ;;  %v8136_v52 = vsub.f32 %v30031_v57, %v8110_v31  ;;  %8181 = vadd.xlane.f32.xlu0 %v8180_v25 }
 0xcd3   : > { %v30081_v37 = vpop.eup %27818  ;;  %v8164_v63 = vmul.f32 1.442695, %v8137_v62 }
 0xcd4   : > { %v30083_v7 = vpop.eup %27820  ;;  %v8162_v9 = vmul.f32 1.442695, %v8136_v52  ;;  %v8119_v36 = vpop.xlane.xlu1 %8118  ;;  %v8189_v17 = vsel %vm1569_vm3, %v30081_v37, 0.0 }
 0xcd5   : > { %27830 = vpow2.f32 %v8164_v63  ;;  %v8139_v5 = vsub.f32 %v30037_v0, %v8119_v36  ;;  %8190 = vadd.xlane.f32.xlu1 %v8189_v17  ;;  %v8116_v34 = vpop.xlane.xlu0 %8115  ;;  %v8186_v12 = vsel %vm1569_vm3, %v30083_v7, 0.0 }
 0xcd6   : > { %27832 = vpow2.f32 %v8162_v9  ;;  %v8138_v57 = vsub.f32 %v30039_v8, %v8116_v34  ;;  %8187 = vadd.xlane.f32.xlu0 %v8186_v12 }
 0xcd7   : > { %v30091_v40 = vpop.eup %27822  ;;  %v8168_v51 = vmul.f32 1.442695, %v8139_v5 }
 0xcd8   : > { %v30093_v21 = vpop.eup %27824  ;;  %v8166_v20 = vmul.f32 1.442695, %v8138_v57  ;;  %v8125_v19 = vpop.xlane.xlu1 %8124  ;;  %v8195_v35 = vsel %vm1569_vm3, %v30091_v40, 0.0 }
 0xcd9   : > { %27834 = vpow2.f32 %v8168_v51  ;;  %v8141_v0 = vsub.f32 %v30045_v41, %v8125_v19  ;;  %8196 = vadd.xlane.f32.xlu1 %v8195_v35  ;;  %v8122_v56 = vpop.xlane.xlu0 %8121  ;;  %v8192_v49 = vsel %vm1569_vm3, %v30093_v21, 0.0 }
 0xcda   : > { %27836 = vpow2.f32 %v8166_v20  ;;  %v8140_v8 = vsub.f32 %v30047_v3, %v8122_v56  ;;  %8193 = vadd.xlane.f32.xlu0 %v8192_v49 }
 0xcdb   : > { %v30101_v53 = vpop.eup %27826  ;;  %v8172_v24 = vmul.f32 1.442695, %v8141_v0 }
 0xcdc   : > { %v30103_v54 = vpop.eup %27828  ;;  %v8170_v50 = vmul.f32 1.442695, %v8140_v8  ;;  %v8201_v55 = vsel %vm1569_vm3, %v30101_v53, 0.0 }
 0xcdd   : > { %27838 = vpow2.f32 %v8172_v24  ;;  %8202 = vadd.xlane.f32.xlu1 %v8201_v55  ;;  %v8198_v41 = vsel %vm1569_vm3, %v30103_v54, 0.0 }
 0xcde   : > { %27840 = vpow2.f32 %v8170_v50  ;;  %8199 = vadd.xlane.f32.xlu0 %v8198_v41 }
 0xcdf   : > { %v30109_v43 = vpop.eup %27830 }
 0xce0   : > { %v30111_v3 = vpop.eup %27832  ;;  %v8207_v15 = vsel %vm1569_vm3, %v30109_v43, 0.0 }
 0xce1   : > { %8208 = vadd.xlane.f32.xlu1 %v8207_v15  ;;  %v8204_v1 = vsel %vm1569_vm3, %v30111_v3, 0.0 }
 0xce2   : > { %8205 = vadd.xlane.f32.xlu0 %v8204_v1 }
 0xce3   : > { %v30117_v18 = vpop.eup %27834 }
 0xce4   : > { %v30119_v23 = vpop.eup %27836  ;;  %v8213_v32 = vsel %vm1569_vm3, %v30117_v18, 0.0 }
 0xce5   : > { %8214 = vadd.xlane.f32.xlu1 %v8213_v32  ;;  %v8210_v33 = vsel %vm1569_vm3, %v30119_v23, 0.0 }
 0xce6   : > { %8211 = vadd.xlane.f32.xlu0 %v8210_v33 }
 0xce7   : > { %v30125_v28 = vpop.eup %27838 }
 0xce8   : > { %v30127_v45 = vpop.eup %27840  ;;  %v8219_v39 = vsel %vm1569_vm3, %v30125_v28, 0.0 }
 0xce9   : > { %8220 = vadd.xlane.f32.xlu1 %v8219_v39  ;;  %v8216_v10 = vsel %vm1569_vm3, %v30127_v45, 0.0  ;;  %v267_v39 = vld [vmem:[%s33110_s1 + $0x8] sm:$0xff] }
 0xcea   : > { %8217 = vadd.xlane.f32.xlu0 %v8216_v10  ;;  %v9175_v10 = vrot.slane %v29791_v59, 6 }
 0xd5a   : > { %v8179_v46 = vpop.xlane.xlu1 %8178 }
 0xd5b   : > { %27842 = vrcp.f32 %v8179_v46  ;;  %v8176_v22 = vpop.xlane.xlu0 %8175  ;;  %v9133_v46 = vrot.slane %v29771_v58, 1 }
 0xd5c   : > { %27844 = vrcp.f32 %v8176_v22 }
 0xd5e   : > { %v8185_v16 = vpop.xlane.xlu1 %8184 }
 0xd5f   : > { %27846 = vrcp.f32 %v8185_v16  ;;  %v8182_v13 = vpop.xlane.xlu0 %8181  ;;  %v9168_v16 = vrot.slane %v29801_v42, 5 }
 0xd60   : > { %27848 = vrcp.f32 %v8182_v13 }
 0xd62   : > { %v8191_v62 = vpop.xlane.xlu1 %8190 }
 0xd63   : > { %27850 = vrcp.f32 %v8191_v62  ;;  %v8188_v31 = vpop.xlane.xlu0 %8187  ;;  %v9161_v62 = vrot.slane %v29811_v6, 4 }
 0xd64   : > { %27852 = vrcp.f32 %v8188_v31 }
 0xd65   : > { %v27843_v25 = vpop.eup %27842 }
 0xd66   : > { %v27845_v52 = vpop.eup %27844  ;;  %v8197_v63 = vpop.xlane.xlu1 %8196  ;;  %v8239_v17 = vmul.f32 %v27843_v25, %v30061_v11  ;;  %v9154_v25 = vrot.slane %v29818_v4, 3 }
 0xd67   : > { %27854 = vrcp.f32 %v8197_v63  ;;  %v8194_v9 = vpop.xlane.xlu0 %8193  ;;  %v8238_v36 = vmul.f32 %v27845_v52, %v30063_v27  ;;  %v9260_v63 = vsel %vm9245_vm4, %v29781_v38, %v9133_v46 }
 0xd68   : > { %27856 = vrcp.f32 %v8194_v9  ;;  %v268_v9 = vld [vmem:[%s33110_s1 + $0x10] sm:$0xff] }
 0xd69   : > { %v27847_v5 = vpop.eup %27846  ;;  %25758 = vmatprep.mubr.msk.f32.mxu0 %vm1569_vm3, %v8238_v36  ;;  %v269_v36 = vld [vmem:[%s33110_s1 + $0x18] sm:$0xff] }
 0xd6a   : > { %v27849_v34 = vpop.eup %27848  ;;  %v8203_v12 = vpop.xlane.xlu1 %8202  ;;  %25759 = vmatmul.mubr.msk.f32.vlgmr.msra.gmra.mrb[158].mxu0 %vm1569_vm3, %v8239_v17  ;;  %v8241_v27 = vmul.f32 %v27847_v5, %v30071_v14  ;;  %v9140_v17 = vrot.slane %v29832_v26, 1  ;;  %v9147_v5 = vrot.slane %v29825_v60, 2 }
 0xd6b   : > { %27858 = vrcp.f32 %v8203_v12  ;;  %27359 = vmatpush3.bf16.msra.mxu0 %v29915_v30  ;;  %v8200_v57 = vpop.xlane.xlu0 %8199  ;;  %v8240_v51 = vmul.f32 %v27849_v34, %v30073_v2  ;;  %v27384_v12 = vpack.c.bf16 %v269_v36, %v268_v9 }
 0xd6c   : > { %27365 = vmatprep.subr.bf16.mxu0 %v29919_v47  ;;  %27860 = vrcp.f32 %v8200_v57 }
 0xd6d   : > { %v27851_v20 = vpop.eup %27850  ;;  %25765 = vmatprep.mubr.msk.f32.mxu1 %vm1569_vm3, %v8240_v51 }
 0xd6e   : > { %v27853_v11 = vpop.eup %27852  ;;  %v8209_v19 = vpop.xlane.xlu1 %8208  ;;  %25766 = vmatmul.mubr.msk.f32.vlgmr.msra.gmra.mrb[162].mxu1 %vm1569_vm3, %v8241_v27  ;;  %v8243_v2 = vmul.f32 %v27851_v20, %v30081_v37  ;;  %v23233_v27 = vrot.slane %v29791_v59, 7  ;;  %v23234_v20 = vrot.slane %v29801_v42, 6 }
 0xd6f   : > { %27862 = vrcp.f32 %v8209_v19  ;;  %27363 = vmatpush3.bf16.msra.mxu1 %v29917_v44  ;;  %v8206_v35 = vpop.xlane.xlu0 %8205  ;;  %v8242_v30 = vmul.f32 %v27853_v11, %v30083_v7  ;;  %v23235_v11 = vrot.slane %v29811_v6, 5 }
 0xd70   : > { %27369 = vmatprep.subr.bf16.mxu1 %v29921_v48  ;;  %27864 = vrcp.f32 %v8206_v35  ;;  %v23236_v35 = vrot.slane %v29818_v4, 4 }
 0xd71   : > { %v27855_v0 = vpop.eup %27854  ;;  %25772 = vmatprep.mubr.msk.f32.mxu0 %vm1569_vm3, %v8242_v30  ;;  %v23237_v30 = vrot.slane %v29825_v60, 3 }
 0xd72   : > { %v27857_v14 = vpop.eup %27856  ;;  %v8215_v56 = vpop.xlane.xlu1 %8214  ;;  %25773 = vmatmul.mubr.msk.f32.vlgmr.msra.gmra.mrb[160].mxu0 %vm1569_vm3, %v8243_v2  ;;  %v8245_v7 = vmul.f32 %v27855_v0, %v30091_v40  ;;  %v9271_v2 = vrot.slane %v9140_v17, 1  ;;  %v9262_v0 = vsel %vm9247_vm5, %v23233_v27, %v9260_v63  ;;  %v9307_v63 = vrot.slane %v9161_v62, 4 }
 0xd73   : > { %27866 = vrcp.f32 %v8215_v56  ;;  %27367 = vmatpush3.bf16.msra.mxu0 %v29919_v47  ;;  %v8212_v49 = vpop.xlane.xlu0 %8211  ;;  %v8244_v44 = vmul.f32 %v27857_v14, %v30093_v21  ;;  %v9141_v14 = vrot.slane %v29771_v58, 2  ;;  %v23238_v56 = vrot.slane %v29781_v38, 9 }
 0xd74   : > { %27373 = vmatprep.subr.bf16.mxu0 %v29923_v61  ;;  %27868 = vrcp.f32 %v8212_v49  ;;  %v23240_v49 = vrot.slane %v29801_v42, 7 }
 0xd75   : > { %v27859_v8 = vpop.eup %27858  ;;  %25779 = vmatprep.mubr.msk.f32.mxu1 %vm1569_vm3, %v8244_v44  ;;  %v9264_v44 = vsel %vm9249_vm6, %v23234_v20, %v9262_v0  ;;  %v9319_v0 = vrot.slane %v9168_v16, 5 }
 0xd76   : > { %v27861_v37 = vpop.eup %27860  ;;  %v8221_v24 = vpop.xlane.xlu1 %8220  ;;  %25780 = vmatmul.mubr.msk.f32.vlgmr.msra.gmra.mrb[164].mxu1 %vm1569_vm3, %v8245_v7  ;;  %v8247_v21 = vmul.f32 %v27859_v8, %v30101_v53  ;;  %v23241_v7 = vrot.slane %v29811_v6, 6  ;;  %v23242_v8 = vrot.slane %v29818_v4, 5 }
 0xd77   : > { %27870 = vrcp.f32 %v8221_v24  ;;  %27371 = vmatpush3.bf16.msra.mxu1 %v29921_v48  ;;  %v8218_v50 = vpop.xlane.xlu0 %8217  ;;  %v8246_v47 = vmul.f32 %v27861_v37, %v30103_v54  ;;  %v9283_v37 = vrot.slane %v9147_v5, 2  ;;  %v9266_v24 = vsel %vm9251_vm7, %v23235_v11, %v9264_v44 }
 0xd78   : > { %27377 = vmatprep.subr.bf16.mxu1 %v29925_v29  ;;  %27872 = vrcp.f32 %v8218_v50  ;;  %v9274_v50 = vsel %vm9245_vm4, %v23238_v56, %v9141_v14  ;;  %v28169_v14 = vld [vmem:[%s28366_s18 + $0x40] sm:$0xff] }
 0xd79   : > { %v27863_v55 = vpop.eup %27862  ;;  %25786 = vmatprep.mubr.msk.f32.mxu0 %vm1569_vm3, %v8246_v47  ;;  %v23243_v47 = vrot.slane %v29832_v26, 3  ;;  %v23258_v56 = vrot.slane %v28169_v14, 9 }
 0xd7a   : > { %v27865_v40 = vpop.eup %27864  ;;  %25787 = vmatmul.mubr.msk.f32.vlgmr.msra.gmra.mrb[162].mxu0 %vm1569_vm3, %v8247_v21  ;;  %v8249_v48 = vmul.f32 %v27863_v55, %v30109_v43  ;;  %v9149_v21 = vrot.slane %v29771_v58, 3  ;;  %v9268_v55 = vsel %vm9253_vm8, %v23236_v35, %v9266_v24 }
 0xd7b   : > { %27375 = vmatpush3.bf16.msra.mxu0 %v29923_v61  ;;  %v8248_v41 = vmul.f32 %v27865_v40, %v30111_v3  ;;  %v9276_v40 = vsel %vm9247_vm5, %v29791_v59, %v9274_v50  ;;  %v9270_v4 = vsel %vm9255_vm9, %v23237_v30, %v9268_v55 }
 0xd7d   : > { %v27867_v15 = vpop.eup %27866  ;;  %25793 = vmatprep.mubr.msk.f32.mxu1 %vm1569_vm3, %v8248_v41  ;;  %v23244_v41 = vrot.slane %v29781_v38, 10 }
 0xd7e   : > { %v27869_v54 = vpop.eup %27868  ;;  %25794 = vmatmul.mubr.msk.f32.vlgmr.msra.gmra.mrb[166].mxu1 %vm1569_vm3, %v8249_v48  ;;  %v8251_v1 = vmul.f32 %v27867_v15, %v30117_v18  ;;  %v298_v18 = vld [vmem:[%s33111_s2] sm:$0xff]  ;;  %v23245_v48 = vrot.slane %v29791_v59, 9  ;;  %v9278_v15 = vsel %vm9249_vm6, %v23240_v49, %v9276_v40  ;;  %v23264_v40 = vrot.slane %v28169_v14, 10 }
 0xd7f   : > { %27379 = vmatpush3.bf16.msra.mxu1 %v29925_v29  ;;  %v8250_v53 = vmul.f32 %v27869_v54, %v30119_v23  ;;  %v369_v29 = vld [vmem:[%s33113_s4 + $0x38] sm:$0xff]  ;;  %v299_v23 = vld [vmem:[%s33111_s2 + $0x8] sm:$0xff]  ;;  %v23247_v54 = vrot.slane %v29811_v6, 7 }
 0xd80   : > { %25810 = vmatprep.subr.mxu0 %v369_v29  ;;  %v30184_v33 = vpack.c.bf16 %v299_v23, %v298_v18  ;;  %v30265_v18 = vld [vmem:[%s28366_s18] sm:$0xff] }
 0xd81   : > { %v27871_v32 = vpop.eup %27870  ;;  %25800 = vmatprep.mubr.msk.f32.mxu0 %vm1569_vm3, %v8250_v53  ;;  %v9295_v53 = vrot.slane %v9154_v25, 3  ;;  %v9157_v23 = vrot.slane %v30265_v18, 4  ;;  %v9165_v27 = vrot.slane %v30265_v18, 5 }
 0xd82   : > { %v27873_v61 = vpop.eup %27872  ;;  %25801 = vmatmul.mubr.msk.f32.vlgmr.msra.gmra.mrb[164].mxu0 %vm1569_vm3, %v8251_v1  ;;  %v8253_v3 = vmul.f32 %v27871_v32, %v30125_v28  ;;  %v9182_v28 = vrot.slane %v29781_v38, 7  ;;  %v9280_v1 = vsel %vm9251_vm7, %v23241_v7, %v9278_v15  ;;  %v9288_v32 = vsel %vm9245_vm4, %v23244_v41, %v9149_v21 }
 0xd83   : > { %v8252_v43 = vmul.f32 %v27873_v61, %v30127_v45  ;;  %25811 = vmatpush3.msra.mxu0 %v369_v29  ;;  %v266_v45 = vld [vmem:[%s33110_s1] sm:$0xff]  ;;  %v23248_v61 = vrot.slane %v29825_v60, 5  ;;  %v23249_v29 = vrot.slane %v29832_v26, 4 }
 0xd84   : > { %27389 = vmatprep.subr.bf16.mxu0 %v30184_v33  ;;  %v27380_v22 = vpack.c.bf16 %v267_v39, %v266_v45  ;;  %v9246_v13 = vsel %vm9245_vm4, %v9182_v28, %v29771_v58  ;;  %v30254_v58 = vsel %vm9257_vm10, %v9271_v2, %v9270_v4  ;;  %v28163_v39 = vld [vmem:[%s28366_s18 + $0x10] sm:$0xff] }
 0xd85   : > { %25807 = vmatprep.mubr.msk.f32.mxu1 %vm1569_vm3, %v8252_v43  ;;  %v9248_v31 = vsel %vm9247_vm5, %v9175_v10, %v9246_v13  ;;  %v9282_v43 = vsel %vm9253_vm8, %v23242_v8, %v9280_v1  ;;  %v23250_v46 = vrot.slane %v28163_v39, 11  ;;  %v23256_v35 = vrot.slane %v28163_v39, 12 }
 0xd86   : > { %25808 = vmatmul.mubr.msk.f32.vlgmr.msra.gmra.mrb[168].mxu1 %vm1569_vm3, %v8253_v3  ;;  %27381 = vmatprep.subr.bf16.mxu1 %v27380_v22  ;;  %v9250_v52 = vsel %vm9249_vm6, %v9168_v16, %v9248_v31  ;;  %v9290_v3 = vsel %vm9247_vm5, %v23245_v48, %v9288_v32  ;;  %v9284_v45 = vsel %vm9255_vm9, %v9283_v37, %v9282_v43  ;;  %v9173_v37 = vrot.slane %v30265_v18, 6 }
 0xd87   : > { %27383 = vmatpush3.bf16.msra.mxu1 %v27380_v22  ;;  %v9252_v34 = vsel %vm9251_vm7, %v9161_v62, %v9250_v52  ;;  %v9292_v60 = vsel %vm9249_vm6, %v29801_v42, %v9290_v3  ;;  %v28164_v22 = vld [vmem:[%s28366_s18 + $0x20] sm:$0xff]  ;;  %v30274_v31 = vsel %vm9257_vm10, %v23243_v47, %v9284_v45  ;;  %v9302_v36 = vsel %vm9245_vm4, %v23250_v46, %v9157_v23  ;;  %v30295_v62 = vld [vmem:[%s28366_s18 + $0x70] sm:$0xff] }
 0xd88   : > { %v9254_v57 = vsel %vm9253_vm8, %v9154_v25, %v9252_v34  ;;  %27385 = vmatprep.subr.bf16.mxu1 %v27384_v12  ;;  %v23251_v13 = vrot.slane %v28164_v22, 10  ;;  %v9294_v26 = vsel %vm9251_vm7, %v23247_v54, %v9292_v60  ;;  %v28165_v25 = vld [vmem:[%s28366_s18 + $0x30] sm:$0xff]  ;;  %v30289_v34 = vld [vmem:[%s28366_s18 + $0x60] sm:$0xff]  ;;  %v23257_v30 = vrot.slane %v28164_v22, 11 }
 0xd89   : > { %v9256_v51 = vsel %vm9255_vm9, %v9147_v5, %v9254_v57  ;;  %v23252_v52 = vrot.slane %v28165_v25, 9  ;;  %v9296_v9 = vsel %vm9253_vm8, %v9295_v53, %v9294_v26  ;;  %v23260_v49 = vrot.slane %v30289_v34, 7  ;;  %v30355_v26 = vld [vmem:[%s28366_s18 + $0x68] sm:$0xff] }
 0xd8a   : > { %v30228_v19 = vsel %vm9257_vm10, %v9140_v17, %v9256_v51  ;;  %v30285_v17 = vld [vmem:[%s28366_s18 + $0x50] sm:$0xff]  ;;  %v9298_v57 = vsel %vm9255_vm9, %v23248_v61, %v9296_v9  ;;  %v9304_v6 = vsel %vm9247_vm5, %v23251_v13, %v9302_v36  ;;  %v23255_v51 = vrot.slane %v30295_v62, 5  ;;  %v30363_v9 = vld [vmem:[%s28366_s18 + $0x58] sm:$0xff] }
 0xd8b   : > { %27387 = vmatpush3.bf16.msra.mxu1 %v27384_v12  ;;  %25844 = vmatprep.mubr.msk.f32.mxu1 %vm372_vm0, %v30228_v19  ;;  %v23253_v5 = vrot.slane %v30285_v17, 7  ;;  %v23254_v12 = vrot.slane %v30289_v34, 6  ;;  %v30300_v20 = vsel %vm9257_vm10, %v23249_v29, %v9298_v57  ;;  %v9306_v11 = vsel %vm9249_vm6, %v23252_v52, %v9304_v6  ;;  %v30378_v6 = vld [vmem:[%s28366_s18 + $0x28] sm:$0xff] }
 0xd8c   : > { %v9308_v2 = vsel %vm9251_vm7, %v9307_v63, %v9306_v11  ;;  %v9316_v7 = vsel %vm9245_vm4, %v23256_v35, %v9165_v27  ;;  %v23261_v8 = vrot.slane %v30295_v62, 6  ;;  %v23262_v47 = vrot.slane %v28163_v39, 13  ;;  %v30382_v27 = vld [vmem:[%s28366_s18 + $0x18] sm:$0xff] }
 0xd8d   : > { %v9310_v44 = vsel %vm9253_vm8, %v23253_v5, %v9308_v2  ;;  %v9318_v50 = vsel %vm9247_vm5, %v23257_v30, %v9316_v7  ;;  %v9331_v42 = vrot.slane %v9175_v10, 6  ;;  %v23263_v55 = vrot.slane %v28165_v25, 11  ;;  %v30387_v30 = vld [vmem:[%s28366_s18 + $0x8] sm:$0xff] }
 0xd8e   : > { %25845 = vmatmul.mubr.msk.f32.vlgmr.msra.gmra.mrb[170].mxu1 %vm372_vm0, %v30254_v58  ;;  %v9312_v24 = vsel %vm9255_vm9, %v23254_v12, %v9310_v44  ;;  %v9320_v21 = vsel %vm9249_vm6, %v9319_v0, %v9318_v50  ;;  %v9330_v48 = vsel %vm9245_vm4, %v23262_v47, %v9173_v37  ;;  %v23265_v4 = vrot.slane %v30285_v17, 9  ;;  %v30374_v12 = vld [vmem:[%s28366_s18 + $0x38] sm:$0xff] }
 0xd8f   : > { %25847 = vmatprep.mubr.msk.f32.mxu1 %vm372_vm0, %v30274_v31  ;;  %v30319_v16 = vsel %vm9257_vm10, %v23255_v51, %v9312_v24  ;;  %v9322_v41 = vsel %vm9251_vm7, %v23258_v56, %v9320_v21  ;;  %v23267_v15 = vrot.slane %v30295_v62, 7  ;;  %v9332_v10 = vsel %vm9247_vm5, %v9331_v42, %v9330_v48 }
 0xd90   : > { %v9324_v59 = vsel %vm9253_vm8, %v30285_v17, %v9322_v41  ;;  %v9181_v54 = vrot.slane %v30265_v18, 7  ;;  %v9343_v53 = vrot.slane %v9182_v28, 7  ;;  %v9334_v32 = vsel %vm9249_vm6, %v23263_v55, %v9332_v10 }
 0xd91   : > { %v9326_v1 = vsel %vm9255_vm9, %v23260_v49, %v9324_v59  ;;  %v23268_v61 = vrot.slane %v28164_v22, 13  ;;  %v23269_v43 = vrot.slane %v28165_v25, 12  ;;  %v9336_v29 = vsel %vm9251_vm7, %v23264_v40, %v9334_v32  ;;  %v30351_v22 = vld [vmem:[%s28366_s18 + $0x78] sm:$0xff] }
 0xd92   : > { %25848 = vmatmul.mubr.msk.f32.gmra.mrb[172].mxu1 %vm372_vm0, %v30300_v20  ;;  %v30337_v3 = vsel %vm9257_vm10, %v23261_v8, %v9326_v1  ;;  %v9344_v23 = vsel %vm9245_vm4, %v9343_v53, %v9181_v54  ;;  %v23270_v18 = vrot.slane %v28169_v14, 11  ;;  %v9338_v38 = vsel %vm9253_vm8, %v23265_v4, %v9336_v29 }
 0xd93   : > { %25850 = vmatprep.mubr.msk.f32.mxu1 %vm372_vm0, %v30319_v16  ;;  %33144 = vst [vmem:[#allocation5_spill] sm:$0xff] %v30337_v3  ;;  %v9346_v28 = vsel %vm9247_vm5, %v23268_v61, %v9344_v23  ;;  %v23271_v45 = vrot.slane %v30285_v17, 10  ;;  %v23272_v60 = vrot.slane %v30289_v34, 9  ;;  %v9340_v39 = vsel %vm9255_vm9, %v30289_v34, %v9338_v38  ;;  %v30367_v17 = vld [vmem:[%s28366_s18 + $0x48] sm:$0xff] }
 0xd94   : > { %v9348_v46 = vsel %vm9249_vm6, %v23269_v43, %v9346_v28  ;;  %v9196_v13 = vrot.slane %v30351_v22, 1  ;;  %v9203_v25 = vrot.slane %v30355_v26, 2  ;;  %v30359_v52 = vsel %vm9257_vm10, %v23267_v15, %v9340_v39 }
 0xd95   : > { %33145 = vst [vmem:[#allocation6_spill] sm:$0xff] %v30359_v52  ;;  %v9350_v63 = vsel %vm9251_vm7, %v23270_v18, %v9348_v46  ;;  %v9210_v36 = vrot.slane %v30363_v9, 3  ;;  %v9217_v5 = vrot.slane %v30367_v17, 4  ;;  %v9224_v57 = vrot.slane %v30374_v12, 5 }
 0xd96   : > { %25851 = vmatmul.mubr.msk.f32.gmra.mrb[174].mxu1 %vm372_vm0, %v30337_v3  ;;  %v9352_v34 = vsel %vm9253_vm8, %v23271_v45, %v9350_v63  ;;  %v9231_v51 = vrot.slane %v30378_v6, 6  ;;  %v9238_v11 = vrot.slane %v30382_v27, 7  ;;  %v9189_v2 = vrot.slane %v30387_v30, 1 }
 0xd97   : > { %25853 = vmatprep.mubr.msk.f32.mxu1 %vm372_vm0, %v30359_v52  ;;  %v9354_v35 = vsel %vm9255_vm9, %v23272_v60, %v9352_v34  ;;  %v23275_v0 = vrot.slane %v30378_v6, 7  ;;  %v23276_v14 = vrot.slane %v30374_v12, 6  ;;  %v23277_v44 = vrot.slane %v30367_v17, 5 }
 0xd98   : > { %v30394_v56 = vsel %vm9257_vm10, %v30295_v62, %v9354_v35  ;;  %v9357_v49 = vsel %vm9245_vm4, %v9238_v11, %v30387_v30  ;;  %v23278_v7 = vrot.slane %v30363_v9, 4  ;;  %v9365_v62 = vsel %vm9245_vm4, %v30382_v27, %v9189_v2 }
 0xd99   : > { %33146 = vst [vmem:[#allocation7_spill] sm:$0xff] %v30394_v56  ;;  %v9358_v8 = vsel %vm9247_vm5, %v9231_v51, %v9357_v49  ;;  %v23279_v37 = vrot.slane %v30355_v26, 3  ;;  %v9376_v24 = vrot.slane %v9196_v13, 1  ;;  %v9367_v47 = vsel %vm9247_vm5, %v23275_v0, %v9365_v62 }
 0xd9a   : > { %25854 = vmatmul.mubr.msk.f32.gmra.mrb[176].mxu1 %vm372_vm0, %v30394_v56  ;;  %v9359_v50 = vsel %vm9249_vm6, %v9224_v57, %v9358_v8  ;;  %v9197_v42 = vrot.slane %v30387_v30, 2  ;;  %v23280_v21 = vrot.slane %v30382_v27, 9  ;;  %v9369_v40 = vsel %vm9249_vm6, %v23276_v14, %v9367_v47 }
 0xd9b   : > { %v9360_v55 = vsel %vm9251_vm7, %v9217_v5, %v9359_v50  ;;  %v23282_v41 = vrot.slane %v30374_v12, 7  ;;  %v23283_v48 = vrot.slane %v30367_v17, 6  ;;  %v9371_v15 = vsel %vm9251_vm7, %v23277_v44, %v9369_v40 }
 0xd9c   : > { %v9361_v4 = vsel %vm9253_vm8, %v9210_v36, %v9360_v55  ;;  %v9379_v59 = vsel %vm9245_vm4, %v23280_v21, %v9197_v42  ;;  %v23284_v10 = vrot.slane %v30363_v9, 5  ;;  %v9373_v53 = vsel %vm9253_vm8, %v23278_v7, %v9371_v15 }
 0xd9d   : > { %v9362_v54 = vsel %vm9255_vm9, %v9203_v25, %v9361_v4  ;;  %v9381_v1 = vsel %vm9247_vm5, %v30378_v6, %v9379_v59  ;;  %v9388_v32 = vrot.slane %v9203_v25, 2  ;;  %v9375_v43 = vsel %vm9255_vm9, %v23279_v37, %v9373_v53 }
 0xd9e   : > { %v30431_v61 = vsel %vm9257_vm10, %v9196_v13, %v9362_v54  ;;  %v9383_v29 = vsel %vm9249_vm6, %v23282_v41, %v9381_v1  ;;  %v23285_v23 = vrot.slane %v30351_v22, 3  ;;  %v30437_v18 = vsel %vm9257_vm10, %v9376_v24, %v9375_v43 }
 0xd9f   : > { %33147 = vst [vmem:[#allocation8_spill] sm:$0xff] %v30431_v61  ;;  %33148 = vst [vmem:[#allocation9_spill] sm:$0xff] %v30437_v18  ;;  %25856 = vmatprep.mubr.msk.f32.mxu1 %vm372_vm0, %v30431_v61  ;;  %v9385_v38 = vsel %vm9251_vm7, %v23283_v48, %v9383_v29  ;;  %v9205_v28 = vrot.slane %v30387_v30, 3  ;;  %v23286_v45 = vrot.slane %v30382_v27, 10  ;;  %v23287_v39 = vrot.slane %v30378_v6, 9 }
 0xda0   : > { %25857 = vmatmul.mubr.msk.f32.gmra.mrb[178].mxu1 %vm372_vm0, %v30437_v18  ;;  %v9387_v60 = vsel %vm9253_vm8, %v23284_v10, %v9385_v38  ;;  %v23289_v46 = vrot.slane %v30367_v17, 7  ;;  %v9400_v13 = vrot.slane %v9210_v36, 3  ;;  %v23290_v34 = vrot.slane %v30355_v26, 5 }
 0xda1   : > { %v9389_v25 = vsel %vm9255_vm9, %v9388_v32, %v9387_v60  ;;  %v9393_v63 = vsel %vm9245_vm4, %v23286_v45, %v9205_v28  ;;  %v23291_v35 = vrot.slane %v30351_v22, 4  ;;  %v9213_v14 = vrot.slane %v30387_v30, 4 }
 0xda2   : > { %v30454_v2 = vsel %vm9257_vm10, %v23285_v23, %v9389_v25  ;;  %v9395_v0 = vsel %vm9247_vm5, %v23287_v39, %v9393_v63  ;;  %v23292_v49 = vrot.slane %v30382_v27, 11  ;;  %v23293_v44 = vrot.slane %v30378_v6, 10 }
 0xda3   : > { %33149 = vst [vmem:[#allocation10_spill] sm:$0xff] %v30454_v2  ;;  %v9397_v36 = vsel %vm9249_vm6, %v30374_v12, %v9395_v0  ;;  %25859 = vmatprep.mubr.msk.f32.mxu1 %vm372_vm0, %v30454_v2  ;;  %v23294_v7 = vrot.slane %v30374_v12, 9  ;;  %v9412_v8 = vrot.slane %v9217_v5, 4  ;;  %v23295_v24 = vrot.slane %v30363_v9, 7 }
 0xda4   : > { %v9399_v62 = vsel %vm9251_vm7, %v23289_v46, %v9397_v36  ;;  %v9407_v37 = vsel %vm9245_vm4, %v23292_v49, %v9213_v14  ;;  %v23296_v50 = vrot.slane %v30355_v26, 6  ;;  %v23297_v21 = vrot.slane %v30351_v22, 5 }
 0xda5   : > { %v9401_v47 = vsel %vm9253_vm8, %v9400_v13, %v9399_v62  ;;  %v9409_v42 = vsel %vm9247_vm5, %v23293_v44, %v9407_v37  ;;  %v9221_v55 = vrot.slane %v30387_v30, 5  ;;  %v23298_v41 = vrot.slane %v30382_v27, 12 }
 0xda6   : > { %v9403_v40 = vsel %vm9255_vm9, %v23290_v34, %v9401_v47  ;;  %v9411_v5 = vsel %vm9249_vm6, %v23294_v7, %v9409_v42  ;;  %v23299_v48 = vrot.slane %v30378_v6, 11  ;;  %v9424_v59 = vrot.slane %v9224_v57, 5 }
 0xda7   : > { %v30480_v4 = vsel %vm9257_vm10, %v23291_v35, %v9403_v40  ;;  %v9413_v15 = vsel %vm9251_vm7, %v9412_v8, %v9411_v5  ;;  %v23300_v10 = vrot.slane %v30367_v17, 9  ;;  %v9421_v53 = vsel %vm9245_vm4, %v23298_v41, %v9221_v55 }
 0xda8   : > { %33150 = vst [vmem:[#allocation11_spill] sm:$0xff] %v30480_v4  ;;  %25860 = vmatmul.mubr.msk.f32.gmra.mrb[180].mxu1 %vm372_vm0, %v30480_v4  ;;  %v9415_v54 = vsel %vm9253_vm8, %v23295_v24, %v9413_v15  ;;  %v23302_v1 = vrot.slane %v30355_v26, 7  ;;  %v23303_v32 = vrot.slane %v30351_v22, 6  ;;  %v9423_v29 = vsel %vm9247_vm5, %v23299_v48, %v9421_v53 }
 0xda9   : > { %v9417_v43 = vsel %vm9255_vm9, %v23296_v50, %v9415_v54  ;;  %v9229_v23 = vrot.slane %v30387_v30, 6  ;;  %v23304_v57 = vrot.slane %v30382_v27, 13  ;;  %v9425_v28 = vsel %vm9249_vm6, %v9424_v59, %v9423_v29 }
 0xdaa   : > { %v30497_v38 = vsel %vm9257_vm10, %v23297_v21, %v9417_v43  ;;  %v9436_v45 = vrot.slane %v9231_v51, 6  ;;  %v23305_v60 = vrot.slane %v30374_v12, 11  ;;  %v9427_v39 = vsel %vm9251_vm7, %v23300_v10, %v9425_v28  ;;  %v301_v21 = vld [vmem:[%s33111_s2 + $0x18] sm:$0xff]  ;;  %v331_v28 = vld [vmem:[%s33112_s3 + $0x8] sm:$0xff] }
 0xdab   : > { %33151 = vst [vmem:[#allocation12_spill] sm:$0xff] %v30497_v38  ;;  %25862 = vmatprep.mubr.msk.f32.mxu1 %vm372_vm0, %v30497_v38  ;;  %v9435_v46 = vsel %vm9245_vm4, %v23304_v57, %v9229_v23  ;;  %v23306_v13 = vrot.slane %v30367_v17, 10  ;;  %v23307_v25 = vrot.slane %v30363_v9, 9  ;;  %v9429_v63 = vsel %vm9253_vm8, %v30363_v9, %v9427_v39  ;;  %v330_v57 = vld [vmem:[%s33112_s3] sm:$0xff]  ;;  %v333_v39 = vld [vmem:[%s33112_s3 + $0x18] sm:$0xff] }
 0xdac   : > { %v9437_v34 = vsel %vm9247_vm5, %v9436_v45, %v9435_v46  ;;  %v23309_v51 = vrot.slane %v30351_v22, 7  ;;  %v9237_v35 = vrot.slane %v30387_v30, 7  ;;  %v9431_v0 = vsel %vm9255_vm9, %v23302_v1, %v9429_v63 }
 0xdad   : > { %v9439_v14 = vsel %vm9249_vm6, %v23305_v60, %v9437_v34  ;;  %v9448_v49 = vrot.slane %v9238_v11, 7  ;;  %v23310_v36 = vrot.slane %v30378_v6, 13  ;;  %v30520_v44 = vsel %vm9257_vm10, %v23303_v32, %v9431_v0  ;;  %v332_v60 = vld [vmem:[%s33112_s3 + $0x10] sm:$0xff] }
 0xdae   : > { %33152 = vst [vmem:[#allocation13_spill] sm:$0xff] %v30520_v44  ;;  %v9441_v7 = vsel %vm9251_vm7, %v23306_v13, %v9439_v14  ;;  %v23311_v8 = vrot.slane %v30374_v12, 12  ;;  %v23312_v62 = vrot.slane %v30367_v17, 11  ;;  %25863 = vmatmul.mubr.msk.f32.gmra.mrb[182].mxu1 %vm372_vm0, %v30520_v44  ;;  %v23313_v27 = vrot.slane %v30363_v9, 10 }
 0xdaf   : > { %v9443_v30 = vsel %vm9253_vm8, %v23307_v25, %v9441_v7  ;;  %v9449_v37 = vsel %vm9245_vm4, %v9448_v49, %v9237_v35  ;;  %v23314_v24 = vrot.slane %v30355_v26, 9  ;;  %v27396_v45 = vpack.c.bf16 %v331_v28, %v330_v57 }
 0xdb0   : > { %v9445_v6 = vsel %vm9255_vm9, %v30355_v26, %v9443_v30  ;;  %v9451_v11 = vsel %vm9247_vm5, %v23310_v36, %v9449_v37  ;;  %v300_v26 = vld [vmem:[%s33111_s2 + $0x10] sm:$0xff]  ;;  %v27400_v46 = vpack.c.bf16 %v333_v39, %v332_v60  ;;  %v33116_v13 = vmov 0.0  }
 0xdb1   : > { %v30535_v12 = vsel %vm9257_vm10, %v23309_v51, %v9445_v6  ;;  %v9453_v17 = vsel %vm9249_vm6, %v23311_v8, %v9451_v11  ;;  %v27392_v5 = vpack.c.bf16 %v301_v21, %v300_v26  ;;  %27397 = vmatprep.subr.bf16.mxu1 %v27396_v45  ;;  %v30689_v11 = vld [vmem:[%s33114_s5 + $0x1] ss:$0 sm:$0xff] }
 0xdb2   : > { %33153 = vst [vmem:[#allocation14_spill] sm:$0xff] %v30535_v12  ;;  %v9455_v50 = vsel %vm9251_vm7, %v23312_v62, %v9453_v17  ;;  %25865 = vmatprep.mubr.msk.f32.mxu1 %vm372_vm0, %v30535_v12  ;;  %27399 = vmatpush3.bf16.msra.mxu1 %v27396_v45 }
 0xdb3   : > { %v9457_v47 = vsel %vm9253_vm8, %v23313_v27, %v9455_v50  ;;  %27401 = vmatprep.subr.bf16.mxu1 %v27400_v46 }
 0xdb4   : > { %v9459_v9 = vsel %vm9255_vm9, %v23314_v24, %v9457_v47 }
 0xdb5   : > { %v30545_v42 = vsel %vm9257_vm10, %v30351_v22, %v9459_v9 }
 0xdb6   : > { %33154 = vst [vmem:[#allocation15_spill] sm:$0xff] %v30545_v42  ;;  %25866 = vmatmul.mubr.msk.f32.gmra.mrb[184].mxu1 %vm372_vm0, %v30545_v42 }
 0xdb7   : > { %25908 = vmatprep.mubr.msk.f32.mxu1 %vm372_vm0, %v30228_v19  ;;  %27403 = vmatpush3.bf16.msra.mxu1 %v27400_v46 }
 0xdb8   : > { %25942 = vmatprep.subr.mxu1 %v33116_v13 }
 0xdba   : > { %25909 = vmatmul.mubr.msk.f32.vlgmr.msra.gmra.mrb[186].mxu1 %vm372_vm0, %v30254_v58 }
 0xdbb   : > { %25911 = vmatprep.mubr.msk.f32.mxu1 %vm372_vm0, %v30274_v31 }
 0xdbe   : > { %25912 = vmatmul.mubr.msk.f32.gmra.mrb[188].mxu1 %vm372_vm0, %v30300_v20 }
 0xdbf   : > { %25914 = vmatprep.mubr.msk.f32.mxu1 %vm372_vm0, %v30319_v16 }
 0xdc2   : > { %25915 = vmatmul.mubr.msk.f32.gmra.mrb[190].mxu1 %vm372_vm0, %v30337_v3 }
 0xdc3   : > { %25917 = vmatprep.mubr.msk.f32.mxu1 %vm372_vm0, %v30359_v52 }
 0xdc6   : > { %25918 = vmatmul.mubr.msk.f32.gmra.mrb[192].mxu1 %vm372_vm0, %v30394_v56 }
 0xdc7   : > { %25920 = vmatprep.mubr.msk.f32.mxu1 %vm372_vm0, %v30431_v61 }
 0xdca   : > { %25921 = vmatmul.mubr.msk.f32.gmra.mrb[194].mxu1 %vm372_vm0, %v30437_v18 }
 0xdcb   : > { %25923 = vmatprep.mubr.msk.f32.mxu1 %vm372_vm0, %v30454_v2 }
 0xdce   : > { %25924 = vmatmul.mubr.msk.f32.gmra.mrb[196].mxu1 %vm372_vm0, %v30480_v4 }
 0xdcf   : > { %25926 = vmatprep.mubr.msk.f32.mxu1 %vm372_vm0, %v30497_v38 }
 0xdd2   : > { %25927 = vmatmul.mubr.msk.f32.gmra.mrb[198].mxu1 %vm372_vm0, %v30520_v44 }
 0xdd3   : > { %25929 = vmatprep.mubr.msk.f32.mxu1 %vm372_vm0, %v30535_v12 }
 0xdd6   : > { %25930 = vmatmul.mubr.msk.f32.gmra.mrb[200].mxu1 %vm372_vm0, %v30545_v42 }
 0xdd7   : > { %25944 = vmatprep.mubr.msk.f32.mxu1 %vm28243_vm11, %v33116_v13 }
 0xe3d   : > { %v25760_v55 = vpop.f32.mrb[158].mxu0 }
 0xe3e   : > { %v8326_v40 = vpop.f32.mrb[159].mxu0 }
 0xe3f   : > { %25812 = vmatprep.mubr.msk.f32.mxu0 %vm856_vm1, %v8326_v40 }
 0xe40   : > { %25813 = vmatmul.mubr.msk.f32.vlgmr.msra.gmra.mrb[88].mxu0 %vm856_vm1, %v25760_v55 }
 0xe41   : > { %v25767_v22 = vpop.f32.mrb[162].mxu1  ;;  %27391 = vmatpush3.bf16.msra.mxu0 %v30184_v33 }
 0xe42   : > { %v8407_v41 = vpop.f32.mrb[163].mxu1  ;;  %27393 = vmatprep.subr.bf16.mxu0 %v27392_v5 }
 0xe43   : > { %25815 = vmatprep.mubr.msk.f32.mxu0 %vm856_vm1, %v8407_v41 }
 0xe44   : > { %25816 = vmatmul.mubr.msk.f32.gmra.mrb[90].mxu0 %vm856_vm1, %v25767_v22 }
 0xe45   : > { %v25774_v48 = vpop.f32.mrb[160].mxu0  ;;  %27395 = vmatpush3.bf16.msra.mxu0 %v27392_v5 }
 0xe46   : > { %v8488_v15 = vpop.f32.mrb[161].mxu0  ;;  %25932 = vmatprep.subr.mxu0 %v33116_v13 }
 0xe47   : > { %25818 = vmatprep.mubr.msk.f32.mxu0 %vm856_vm1, %v8488_v15 }
 0xe48   : > { %25819 = vmatmul.mubr.msk.f32.gmra.mrb[92].mxu0 %vm856_vm1, %v25774_v48 }
 0xe49   : > { %v25781_v59 = vpop.f32.mrb[164].mxu1 }
 0xe4a   : > { %v8569_v10 = vpop.f32.mrb[165].mxu1 }
 0xe4b   : > { %25821 = vmatprep.mubr.msk.f32.mxu0 %vm856_vm1, %v8569_v10 }
 0xe4c   : > { %25822 = vmatmul.mubr.msk.f32.gmra.mrb[94].mxu0 %vm856_vm1, %v25781_v59 }
 0xe4d   : > { %v25788_v33 = vpop.f32.mrb[162].mxu0 }
 0xe4e   : > { %v8650_v54 = vpop.f32.mrb[163].mxu0 }
 0xe4f   : > { %25824 = vmatprep.mubr.msk.f32.mxu0 %vm856_vm1, %v8650_v54 }
 0xe50   : > { %25825 = vmatmul.mubr.msk.f32.gmra.mrb[96].mxu0 %vm856_vm1, %v25788_v33 }
 0xe51   : > { %v25795_v53 = vpop.f32.mrb[166].mxu1 }
 0xe52   : > { %v8731_v1 = vpop.f32.mrb[167].mxu1 }
 0xe53   : > { %25827 = vmatprep.mubr.msk.f32.mxu0 %vm856_vm1, %v8731_v1 }
 0xe54   : > { %25828 = vmatmul.mubr.msk.f32.gmra.mrb[98].mxu0 %vm856_vm1, %v25795_v53 }
 0xe55   : > { %v25802_v32 = vpop.f32.mrb[164].mxu0 }
 0xe56   : > { %v8812_v43 = vpop.f32.mrb[165].mxu0 }
 0xe57   : > { %25830 = vmatprep.mubr.msk.f32.mxu0 %vm856_vm1, %v8812_v43 }
 0xe58   : > { %25831 = vmatmul.mubr.msk.f32.gmra.mrb[100].mxu0 %vm856_vm1, %v25802_v32 }
 0xe59   : > { %v25809_v29 = vpop.f32.mrb[168].mxu1 }
 0xe5a   : > { %v8893_v23 = vpop.f32.mrb[169].mxu1 }
 0xe5b   : > { %25833 = vmatprep.mubr.msk.f32.mxu0 %vm856_vm1, %v8893_v23 }
 0xe5c   : > { %25834 = vmatmul.mubr.msk.f32.gmra.mrb[102].mxu0 %vm856_vm1, %v25809_v29 }
 0xe5d   : > { %25876 = vmatprep.mubr.msk.f32.mxu0 %vm372_vm0, %v30228_v19 }
 0xe60   : > { %25877 = vmatmul.mubr.msk.f32.vlgmr.msra.gmra.mrb[166].mxu0 %vm372_vm0, %v30254_v58 }
 0xe61   : > { %25879 = vmatprep.mubr.msk.f32.mxu0 %vm372_vm0, %v30274_v31  ;;  %v30650_v25 = vpop.f32.mrb[170].mxu1 }
 0xe62   : > { %v30654_v63 = vpop.f32.mrb[171].mxu1 }
 0xe64   : > { %25880 = vmatmul.mubr.msk.f32.gmra.mrb[168].mxu0 %vm372_vm0, %v30300_v20 }
 0xe65   : > { %25882 = vmatprep.mubr.msk.f32.mxu0 %vm372_vm0, %v30319_v16  ;;  %v30658_v34 = vpop.f32.mrb[172].mxu1 }
 0xe66   : > { %v30660_v51 = vpop.f32.mrb[173].mxu1 }
 0xe68   : > { %25883 = vmatmul.mubr.msk.f32.gmra.mrb[170].mxu0 %vm372_vm0, %v30337_v3 }
 0xe69   : > { %25885 = vmatprep.mubr.msk.f32.mxu0 %vm372_vm0, %v30359_v52  ;;  %v30662_v35 = vpop.f32.mrb[174].mxu1 }
 0xe6a   : > { %v30664_v0 = vpop.f32.mrb[175].mxu1 }
 0xe6c   : > { %25886 = vmatmul.mubr.msk.f32.gmra.mrb[172].mxu0 %vm372_vm0, %v30394_v56 }
 0xe6d   : > { %25888 = vmatprep.mubr.msk.f32.mxu0 %vm372_vm0, %v30431_v61  ;;  %v30666_v14 = vpop.f32.mrb[176].mxu1 }
 0xe6e   : > { %v30668_v49 = vpop.f32.mrb[177].mxu1 }
 0xe70   : > { %25889 = vmatmul.mubr.msk.f32.gmra.mrb[174].mxu0 %vm372_vm0, %v30437_v18 }
 0xe71   : > { %25891 = vmatprep.mubr.msk.f32.mxu0 %vm372_vm0, %v30454_v2 }
 0xe73   : > { %v30670_v36 = vpop.f32.mrb[178].mxu1 }
 0xe74   : > { %25892 = vmatmul.mubr.msk.f32.gmra.mrb[176].mxu0 %vm372_vm0, %v30480_v4  ;;  %v30672_v7 = vpop.f32.mrb[179].mxu1 }
 0xe75   : > { %25894 = vmatprep.mubr.msk.f32.mxu0 %vm372_vm0, %v30497_v38 }
 0xe78   : > { %25895 = vmatmul.mubr.msk.f32.gmra.mrb[178].mxu0 %vm372_vm0, %v30520_v44 }
 0xe79   : > { %25897 = vmatprep.mubr.msk.f32.mxu0 %vm372_vm0, %v30535_v12 }
 0xe7b   : > { %v30674_v8 = vpop.f32.mrb[180].mxu1 }
 0xe7c   : > { %25898 = vmatmul.mubr.msk.f32.gmra.mrb[180].mxu0 %vm372_vm0, %v30545_v42  ;;  %v30676_v62 = vpop.f32.mrb[181].mxu1 }
 0xe7d   : > { %25934 = vmatprep.mubr.msk.f32.mxu0 %vm28243_vm11, %v33116_v13 }
 0xe81   : > { %v30678_v30 = vpop.f32.mrb[182].mxu1 }
 0xe82   : > { %v30680_v37 = vpop.f32.mrb[183].mxu1 }
 0xe89   : > { %v30682_v27 = vpop.f32.mrb[184].mxu1 }
 0xe8a   : > { %v30684_v6 = vpop.f32.mrb[185].mxu1 }
 0xf13   : > { %v25814_v24 = vpop.f32.mrb[88].mxu0 }
 0xf14   : > { %v30692_v17 = vadd.f32 %v25814_v24, %v30689_v11  ;;  %v9016_v50 = vpop.f32.mrb[89].mxu0 }
 0xf15   : > { %v9117_v47 = vadd.f32 %v30689_v11, %v9016_v50 }
 0xf16   : > { %v22524_v9 = vrot.slane %v30692_v17, 1 }
 0xf17   : > { %v25817_v40 = vpop.f32.mrb[90].mxu0  ;;  %v22388_v5 = vrot.slane %v9117_v47, 1  ;;  %v22420_v22 = vrot.slane %v9117_v47, 3  ;;  %v22404_v41 = vrot.slane %v9117_v47, 2  ;;  %v22452_v48 = vrot.slane %v9117_v47, 5 }
 0xf18   : > { %v30700_v15 = vadd.f32 %v25817_v40, %v30689_v11  ;;  %v9026_v59 = vpop.f32.mrb[91].mxu0  ;;  %v22436_v10 = vrot.slane %v9117_v47, 4  ;;  %v22484_v33 = vrot.slane %v9117_v47, 7  ;;  %v22468_v54 = vrot.slane %v9117_v47, 6 }
 0xf19   : > { %v9119_v53 = vadd.f32 %v30689_v11, %v9026_v59 }
 0xf1a   : > { %v30708_v29 = vsel %vm9245_vm4, %v30700_v15, %v22524_v9 }
 0xf1b   : > { %v25820_v45 = vpop.f32.mrb[92].mxu0  ;;  %v22389_v60 = vsel %vm9245_vm4, %v9119_v53, %v22388_v5  ;;  %v22372_v39 = vrot.slane %v9119_v53, 7  ;;  %v22421_v46 = vrot.slane %v9119_v53, 2  ;;  %v22405_v24 = vrot.slane %v9119_v53, 1 }
 0xf1c   : > { %v30715_v50 = vadd.f32 %v25820_v45, %v30689_v11  ;;  %v9036_v40 = vpop.f32.mrb[93].mxu0  ;;  %v22453_v59 = vrot.slane %v9119_v53, 4  ;;  %v22437_v43 = vrot.slane %v9119_v53, 3  ;;  %v22485_v9 = vrot.slane %v9119_v53, 6 }
 0xf1d   : > { %v30718_v32 = vadd.f32 %v30689_v11, %v9036_v40  ;;  %v22373_v1 = vsel %vm9245_vm4, %v22372_v39, %v9117_v47  ;;  %v22422_v55 = vsel %vm9245_vm4, %v22421_v46, %v22420_v22  ;;  %v22406_v28 = vsel %vm9245_vm4, %v22405_v24, %v22404_v41 }
 0xf1e   : > { %v22454_v5 = vsel %vm9245_vm4, %v22453_v59, %v22452_v48  ;;  %v22438_v21 = vsel %vm9245_vm4, %v22437_v43, %v22436_v10  ;;  %v22486_v45 = vsel %vm9245_vm4, %v22485_v9, %v22484_v33  ;;  %v22469_v57 = vrot.slane %v9119_v53, 5 }
 0xf1f   : > { %v25823_v26 = vpop.f32.mrb[94].mxu0  ;;  %v22390_v23 = vrot.slane %v30718_v32, 7  ;;  %v22374_v13 = vrot.slane %v30718_v32, 6  ;;  %v22423_v40 = vrot.slane %v30718_v32, 1  ;;  %v22407_v47 = vsel %vm9247_vm5, %v30718_v32, %v22406_v28 }
 0xf20   : > { %v30732_v22 = vadd.f32 %v25823_v26, %v30689_v11  ;;  %v9046_v41 = vpop.f32.mrb[95].mxu0  ;;  %v22455_v48 = vrot.slane %v30718_v32, 3  ;;  %v22439_v10 = vrot.slane %v30718_v32, 2  ;;  %v22487_v33 = vrot.slane %v30718_v32, 5 }
 0xf21   : > { %v30738_v53 = vadd.f32 %v30689_v11, %v9046_v41  ;;  %v22391_v43 = vsel %vm9247_vm5, %v22390_v23, %v22389_v60  ;;  %v22375_v39 = vsel %vm9247_vm5, %v22374_v13, %v22373_v1  ;;  %v22424_v46 = vsel %vm9247_vm5, %v22423_v40, %v22422_v55 }
 0xf22   : > { %v22456_v28 = vsel %vm9247_vm5, %v22455_v48, %v22454_v5  ;;  %v22440_v26 = vsel %vm9247_vm5, %v22439_v10, %v22438_v21  ;;  %v22488_v24 = vsel %vm9247_vm5, %v22487_v33, %v22486_v45  ;;  %v22470_v59 = vsel %vm9245_vm4, %v22469_v57, %v22468_v54 }
 0xf23   : > { %v25826_v9 = vpop.f32.mrb[96].mxu0  ;;  %v22392_v42 = vrot.slane %v30738_v53, 6  ;;  %v22376_v41 = vrot.slane %v30738_v53, 5  ;;  %v22425_v23 = vsel %vm9249_vm6, %v30738_v53, %v22424_v46  ;;  %v22408_v13 = vrot.slane %v30738_v53, 7 }
 0xf24   : > { %v30753_v55 = vadd.f32 %v25826_v9, %v30689_v11  ;;  %v9056_v1 = vpop.f32.mrb[97].mxu0  ;;  %v22457_v21 = vrot.slane %v30738_v53, 2  ;;  %v22441_v60 = vrot.slane %v30738_v53, 1  ;;  %v22489_v54 = vrot.slane %v30738_v53, 4 }
 0xf25   : > { %v30759_v57 = vadd.f32 %v30689_v11, %v9056_v1  ;;  %v22393_v5 = vsel %vm9249_vm6, %v22392_v42, %v22391_v43  ;;  %v22377_v45 = vsel %vm9249_vm6, %v22376_v41, %v22375_v39  ;;  %v22409_v40 = vsel %vm9249_vm6, %v22408_v13, %v22407_v47 }
 0xf26   : > { %v22458_v48 = vsel %vm9249_vm6, %v22457_v21, %v22456_v28  ;;  %v22442_v10 = vsel %vm9249_vm6, %v22441_v60, %v22440_v26  ;;  %v22490_v33 = vsel %vm9249_vm6, %v22489_v54, %v22488_v24  ;;  %v22471_v46 = vrot.slane %v30718_v32, 4 }
 0xf27   : > { %v25829_v9 = vpop.f32.mrb[98].mxu0  ;;  %v22394_v12 = vrot.slane %v30759_v57, 5  ;;  %v22378_v1 = vrot.slane %v30759_v57, 4  ;;  %v22426_v44 = vrot.slane %v30759_v57, 7  ;;  %v22410_v42 = vrot.slane %v30759_v57, 6 }
 0xf28   : > { %v30773_v43 = vadd.f32 %v25829_v9, %v30689_v11  ;;  %v9066_v47 = vpop.f32.mrb[99].mxu0  ;;  %v22459_v39 = vrot.slane %v30759_v57, 1  ;;  %v22443_v28 = vsel %vm9251_vm7, %v30759_v57, %v22442_v10  ;;  %v22491_v32 = vrot.slane %v30759_v57, 3 }
 0xf29   : > { %v30780_v26 = vadd.f32 %v30689_v11, %v9066_v47  ;;  %v22395_v24 = vsel %vm9251_vm7, %v22394_v12, %v22393_v5  ;;  %v22379_v41 = vsel %vm9251_vm7, %v22378_v1, %v22377_v45  ;;  %v22427_v13 = vsel %vm9251_vm7, %v22426_v44, %v22425_v23 }
 0xf2a   : > { %v22411_v21 = vsel %vm9251_vm7, %v22410_v42, %v22409_v40  ;;  %v22460_v60 = vsel %vm9251_vm7, %v22459_v39, %v22458_v48  ;;  %v22492_v54 = vsel %vm9251_vm7, %v22491_v32, %v22490_v33  ;;  %v22472_v9 = vsel %vm9247_vm5, %v22471_v46, %v22470_v59 }
 0xf2b   : > { %v25832_v10 = vpop.f32.mrb[100].mxu0  ;;  %v22396_v38 = vrot.slane %v30780_v26, 4  ;;  %v22380_v47 = vrot.slane %v30780_v26, 3  ;;  %v22428_v4 = vrot.slane %v30780_v26, 6  ;;  %v22412_v12 = vrot.slane %v30780_v26, 5 }
 0xf2c   : > { %v30794_v5 = vadd.f32 %v25832_v10, %v30689_v11  ;;  %v9076_v44 = vpop.f32.mrb[101].mxu0  ;;  %v22461_v23 = vsel %vm9253_vm8, %v30780_v26, %v22460_v60  ;;  %v22444_v45 = vrot.slane %v30780_v26, 7  ;;  %v22493_v59 = vrot.slane %v30780_v26, 2 }
 0xf2d   : > { %v30801_v40 = vadd.f32 %v30689_v11, %v9076_v44  ;;  %v22397_v48 = vsel %vm9253_vm8, %v22396_v38, %v22395_v24  ;;  %v22381_v33 = vsel %vm9253_vm8, %v22380_v47, %v22379_v41  ;;  %v22429_v46 = vsel %vm9253_vm8, %v22428_v4, %v22427_v13 }
 0xf2e   : > { %v22413_v1 = vsel %vm9253_vm8, %v22412_v12, %v22411_v21  ;;  %v22445_v42 = vsel %vm9253_vm8, %v22444_v45, %v22443_v28  ;;  %v22494_v39 = vsel %vm9253_vm8, %v22493_v59, %v22492_v54  ;;  %v22473_v32 = vrot.slane %v30738_v53, 3 }
 0xf2f   : > { %v25835_v60 = vpop.f32.mrb[102].mxu0  ;;  %v22398_v10 = vrot.slane %v30801_v40, 3  ;;  %v22382_v44 = vrot.slane %v30801_v40, 2  ;;  %v22430_v2 = vrot.slane %v30801_v40, 5  ;;  %v22414_v38 = vrot.slane %v30801_v40, 4 }
 0xf30   : > { %v30815_v24 = vadd.f32 %v25835_v60, %v30689_v11  ;;  %v9086_v4 = vpop.f32.mrb[103].mxu0  ;;  %v22462_v41 = vrot.slane %v30801_v40, 7  ;;  %v22446_v28 = vrot.slane %v30801_v40, 6  ;;  %v22495_v13 = vrot.slane %v30801_v40, 1 }
 0xf31   : > { %v9131_v53 = vadd.f32 %v30689_v11, %v9086_v4  ;;  %v22399_v21 = vsel %vm9255_vm9, %v22398_v10, %v22397_v48  ;;  %v22383_v54 = vsel %vm9255_vm9, %v22382_v44, %v22381_v33  ;;  %v22431_v47 = vsel %vm9255_vm9, %v22430_v2, %v22429_v46 }
 0xf32   : > { %v22415_v12 = vsel %vm9255_vm9, %v22414_v38, %v22413_v1  ;;  %v22463_v45 = vsel %vm9255_vm9, %v22462_v41, %v22461_v23  ;;  %v22447_v59 = vsel %vm9255_vm9, %v22446_v28, %v22445_v42  ;;  %v22496_v60 = vsel %vm9255_vm9, %v22495_v13, %v22494_v39 }
 0xf33   : > { %v25878_v18 = vpop.f32.mrb[166].mxu0  ;;  %v22400_v61 = vrot.slane %v9131_v53, 2  ;;  %v22384_v56 = vrot.slane %v9131_v53, 1  ;;  %v22432_v52 = vrot.slane %v9131_v53, 4  ;;  %v22416_v3 = vrot.slane %v9131_v53, 3 }
 0xf34   : > { %v9705_v11 = vpop.f32.mrb[167].mxu0  ;;  %v22464_v4 = vrot.slane %v9131_v53, 6  ;;  %v22448_v48 = vrot.slane %v9131_v53, 5  ;;  %v30829_v33 = vsel %vm9257_vm10, %v9131_v53, %v22496_v60  ;;  %v22474_v2 = vsel %vm9249_vm6, %v22473_v32, %v22472_v9 }
 0xf35   : > { %33155 = vst [vmem:[#allocation16_spill] sm:$0xff] %v30829_v33  ;;  %25933 = vmatpush3.xpose.msk.msra.mxu0 %vm856_vm1, %v9705_v11  ;;  %v30834_v23 = vsel %vm9257_vm10, %v22400_v61, %v22399_v21  ;;  %v30837_v46 = vsel %vm9257_vm10, %v22384_v56, %v22383_v54  ;;  %v30840_v1 = vsel %vm9257_vm10, %v22432_v52, %v22431_v47  ;;  %v33160_v39 = vmov 0.0  }
 0xf36   : > { %33156 = vst [vmem:[#allocation17_spill] sm:$0xff] %v30834_v23  ;;  %33157 = vst [vmem:[#allocation18_spill] sm:$0xff] %v30837_v46  ;;  %v30843_v42 = vsel %vm9257_vm10, %v22416_v3, %v22415_v12  ;;  %25937 = vmatprep.subr.mxu0 %v33160_v39  ;;  %v30847_v10 = vsel %vm9257_vm10, %v22464_v4, %v22463_v45  ;;  %v30850_v9 = vsel %vm9257_vm10, %v22448_v48, %v22447_v59 }
 0xf37   : > { %33158 = vst [vmem:[#allocation19_spill] sm:$0xff] %v30840_v1  ;;  %33159 = vst [vmem:[#allocation20_spill] sm:$0xff] %v30843_v42  ;;  %v22475_v61 = vrot.slane %v30759_v57, 2  ;;  %v22477_v32 = vrot.slane %v30780_v26, 1  ;;  %v25881_v56 = vpop.f32.mrb[168].mxu0  ;;  %v22480_v44 = vrot.slane %v9131_v53, 7 }
 0xf38   : > { %33161 = vst [vmem:[#allocation21_spill] sm:$0xff] %v30847_v10  ;;  %33162 = vst [vmem:[#allocation22_spill] sm:$0xff] %v30850_v9  ;;  %v22526_v52 = vrot.slane %v30715_v50, 7  ;;  %v22528_v38 = vrot.slane %v30732_v22, 6  ;;  %v22530_v3 = vrot.slane %v30753_v55, 5  ;;  %v9715_v41 = vpop.f32.mrb[169].mxu0  ;;  %25935 = vmatmul.mubr.msk.f32.vlgmr.msra.gmra.mrb[182].mxu0 %vm856_vm1, %v30654_v63 }
 0xf39   : > { %v22476_v28 = vsel %vm9251_vm7, %v22475_v61, %v22474_v2  ;;  %v22532_v13 = vrot.slane %v30773_v43, 4  ;;  %v22534_v57 = vrot.slane %v30794_v5, 3  ;;  %v22536_v26 = vrot.slane %v30815_v24, 2  ;;  %25938 = vmatpush3.xpose.msk.msra.mxu0 %vm856_vm1, %v25878_v18  ;;  %25943 = vmatpush3.xpose.msk.msra.mxu1 %vm856_vm1, %v9715_v41 }
 0xf3a   : > { %v22478_v53 = vsel %vm9253_vm8, %v22477_v32, %v22476_v28  ;;  %v22527_v21 = vsel %vm9247_vm5, %v22526_v52, %v30708_v29  ;;  %v33163_v63 = vrot.slane %v30700_v15, 7  ;;  %v22510_v47 = vrot.slane %v30715_v50, 6  ;;  %25939 = vmatprep.mubr.msk.f32.mxu0 %vm28243_vm11, %v33160_v39  ;;  %25947 = vmatprep.subr.mxu0 %v33160_v39 }
 0xf3b   : > { %v22479_v18 = vsel %vm9255_vm9, %v30801_v40, %v22478_v53  ;;  %v22529_v12 = vsel %vm9249_vm6, %v22528_v38, %v22527_v21  ;;  %v22512_v45 = vrot.slane %v30732_v22, 5  ;;  %v22514_v29 = vrot.slane %v30753_v55, 4  ;;  %v25884_v59 = vpop.f32.mrb[170].mxu0  ;;  %25952 = vmatprep.subr.mxu1 %v33160_v39 }
 0xf3c   : > { %v22509_v54 = vsel %vm9245_vm4, %v33163_v63, %v30692_v17  ;;  %v30883_v60 = vsel %vm9257_vm10, %v22480_v44, %v22479_v18  ;;  %v22531_v11 = vsel %vm9251_vm7, %v22530_v3, %v22529_v12  ;;  %v22516_v48 = vrot.slane %v30773_v43, 3  ;;  %v9725_v2 = vpop.f32.mrb[171].mxu0  ;;  %25940 = vmatmul.mubr.msk.f32.vlgmr.msra.gmra.mrb[184].mxu0 %vm856_vm1, %v30650_v25  ;;  %25945 = vmatmul.mubr.msk.f32.vlgmr.msra.gmra.mrb[202].mxu1 %vm856_vm1, %v30660_v51 }
 0xf3d   : > { %33164 = vst [vmem:[#allocation23_spill] sm:$0xff] %v30883_v60  ;;  %v22511_v4 = vsel %vm9247_vm5, %v22510_v47, %v22509_v54  ;;  %v22533_v40 = vsel %vm9253_vm8, %v22532_v13, %v22531_v11  ;;  %v22518_v32 = vrot.slane %v30794_v5, 2  ;;  %v22520_v44 = vrot.slane %v30815_v24, 1  ;;  %25948 = vmatpush3.xpose.msk.msra.mxu0 %vm856_vm1, %v25881_v56  ;;  %25953 = vmatpush3.xpose.msk.msra.mxu1 %vm856_vm1, %v9725_v2 }
 0xf3e   : > { %v22513_v61 = vsel %vm9249_vm6, %v22512_v45, %v22511_v4  ;;  %v22535_v52 = vsel %vm9255_vm9, %v22534_v57, %v22533_v40  ;;  %v33165_v25 = vrot.slane %v30692_v17, 3  ;;  %v33166_v51 = vrot.slane %v30700_v15, 2  ;;  %25949 = vmatprep.mubr.msk.f32.mxu0 %vm28243_vm11, %v33160_v39  ;;  %25954 = vmatprep.mubr.msk.f32.mxu1 %vm28243_vm11, %v33160_v39 }
 0xf3f   : > { %v22515_v38 = vsel %vm9251_vm7, %v22514_v29, %v22513_v61  ;;  %v22559_v41 = vrot.slane %v30715_v50, 1  ;;  %v30911_v56 = vsel %vm9257_vm10, %v22536_v26, %v22535_v52  ;;  %v22562_v13 = vrot.slane %v30753_v55, 7  ;;  %v25887_v53 = vpop.f32.mrb[172].mxu0  ;;  %25957 = vmatprep.subr.mxu0 %v33160_v39  ;;  %25962 = vmatprep.subr.mxu1 %v33160_v39 }
 0xf40   : > { %v22558_v3 = vsel %vm9245_vm4, %v33166_v51, %v33165_v25  ;;  %33167 = vst [vmem:[#allocation24_spill] sm:$0xff] %v30911_v56  ;;  %v22517_v28 = vsel %vm9253_vm8, %v22516_v48, %v22515_v38  ;;  %v22564_v57 = vrot.slane %v30773_v43, 6  ;;  %v22566_v54 = vrot.slane %v30794_v5, 5  ;;  %v9735_v47 = vpop.f32.mrb[173].mxu0  ;;  %25950 = vmatmul.mubr.msk.f32.vlgmr.msra.gmra.mrb[186].mxu0 %vm856_vm1, %v30658_v34  ;;  %25955 = vmatmul.mubr.msk.f32.vlgmr.msra.gmra.mrb[204].mxu1 %vm856_vm1, %v30664_v0 }
 0xf41   : > { %v22519_v21 = vsel %vm9255_vm9, %v22518_v32, %v22517_v28  ;;  %v22560_v63 = vsel %vm9247_vm5, %v22559_v41, %v22558_v3  ;;  %v22568_v26 = vrot.slane %v30815_v24, 4  ;;  %v33169_v45 = vrot.slane %v30692_v17, 2  ;;  %25958 = vmatpush3.xpose.msk.msra.mxu0 %vm856_vm1, %v25884_v59  ;;  %25963 = vmatpush3.xpose.msk.msra.mxu1 %vm856_vm1, %v9735_v47 }
 0xf42   : > { %v30927_v18 = vsel %vm9257_vm10, %v22520_v44, %v22519_v21  ;;  %v22561_v12 = vsel %vm9249_vm6, %v30732_v22, %v22560_v63  ;;  %v33170_v29 = vrot.slane %v30700_v15, 1  ;;  %v22544_v4 = vrot.slane %v30732_v22, 7  ;;  %25959 = vmatprep.mubr.msk.f32.mxu0 %vm28243_vm11, %v33160_v39  ;;  %25964 = vmatprep.mubr.msk.f32.mxu1 %vm28243_vm11, %v33160_v39 }
 0xf43   : > { %33168 = vst [vmem:[#allocation25_spill] sm:$0xff] %v30927_v18  ;;  %v22563_v34 = vsel %vm9251_vm7, %v22562_v13, %v22561_v12  ;;  %v22546_v48 = vrot.slane %v30753_v55, 6  ;;  %v22548_v2 = vrot.slane %v30773_v43, 5  ;;  %v22550_v61 = vrot.slane %v30794_v5, 4  ;;  %v25890_v44 = vpop.f32.mrb[174].mxu0  ;;  %25967 = vmatprep.subr.mxu0 %v33160_v39  ;;  %25972 = vmatprep.subr.mxu1 %v33160_v39 }
 0xf44   : > { %v22542_v11 = vsel %vm9245_vm4, %v33170_v29, %v33169_v45  ;;  %v22565_v40 = vsel %vm9253_vm8, %v22564_v57, %v22563_v34  ;;  %v22552_v32 = vrot.slane %v30815_v24, 3  ;;  %v22589_v25 = vrot.slane %v30700_v15, 4  ;;  %v9745_v3 = vpop.f32.mrb[175].mxu0  ;;  %25960 = vmatmul.mubr.msk.f32.vlgmr.msra.gmra.mrb[188].mxu0 %vm856_vm1, %v30662_v35  ;;  %25965 = vmatmul.mubr.msk.f32.vlgmr.msra.gmra.mrb[206].mxu1 %vm856_vm1, %v30668_v49 }
 0xf45   : > { %v22543_v0 = vsel %vm9247_vm5, %v30715_v50, %v22542_v11  ;;  %v22567_v52 = vsel %vm9255_vm9, %v22566_v54, %v22565_v40  ;;  %v22591_v51 = vrot.slane %v30715_v50, 3  ;;  %v22593_v13 = vrot.slane %v30732_v22, 2  ;;  %25968 = vmatpush3.xpose.msk.msra.mxu0 %vm856_vm1, %v25887_v53  ;;  %25973 = vmatpush3.xpose.msk.msra.mxu1 %vm856_vm1, %v9745_v3 }
 0xf46   : > { %v22545_v59 = vsel %vm9249_vm6, %v22544_v4, %v22543_v0  ;;  %v30963_v41 = vsel %vm9257_vm10, %v22568_v26, %v22567_v52  ;;  %v22595_v57 = vrot.slane %v30753_v55, 1  ;;  %v33172_v35 = vrot.slane %v30692_v17, 5  ;;  %25969 = vmatprep.mubr.msk.f32.mxu0 %vm28243_vm11, %v33160_v39  ;;  %25974 = vmatprep.mubr.msk.f32.mxu1 %vm28243_vm11, %v33160_v39 }
 0xf47   : > { %v22547_v38 = vsel %vm9251_vm7, %v22546_v48, %v22545_v59  ;;  %33171 = vst [vmem:[#allocation26_spill] sm:$0xff] %v30963_v41  ;;  %v22598_v49 = vrot.slane %v30794_v5, 7  ;;  %v22600_v54 = vrot.slane %v30815_v24, 6  ;;  %v22573_v47 = vrot.slane %v30700_v15, 3  ;;  %v25893_v45 = vpop.f32.mrb[176].mxu0  ;;  %25977 = vmatprep.subr.mxu0 %v33160_v39  ;;  %25982 = vmatprep.subr.mxu1 %v33160_v39 }
 0xf48   : > { %v22549_v28 = vsel %vm9253_vm8, %v22548_v2, %v22547_v38  ;;  %v22590_v63 = vsel %vm9245_vm4, %v22589_v25, %v33172_v35  ;;  %v22575_v12 = vrot.slane %v30715_v50, 2  ;;  %v22577_v11 = vrot.slane %v30732_v22, 1  ;;  %v9755_v0 = vpop.f32.mrb[177].mxu0  ;;  %25970 = vmatmul.mubr.msk.f32.vlgmr.msra.gmra.mrb[190].mxu0 %vm856_vm1, %v30666_v14  ;;  %25975 = vmatmul.mubr.msk.f32.vlgmr.msra.gmra.mrb[208].mxu1 %vm856_vm1, %v30672_v7 }
 0xf49   : > { %v22551_v21 = vsel %vm9255_vm9, %v22550_v61, %v22549_v28  ;;  %v22592_v26 = vsel %vm9247_vm5, %v22591_v51, %v22590_v63  ;;  %v22580_v4 = vrot.slane %v30773_v43, 7  ;;  %v22582_v34 = vrot.slane %v30794_v5, 6  ;;  %25978 = vmatpush3.xpose.msk.msra.mxu0 %vm856_vm1, %v25890_v44  ;;  %25983 = vmatpush3.xpose.msk.msra.mxu1 %vm856_vm1, %v9755_v0 }
 0xf4a   : > { %v30981_v53 = vsel %vm9257_vm10, %v22552_v32, %v22551_v21  ;;  %v22594_v29 = vsel %vm9249_vm6, %v22593_v13, %v22592_v26  ;;  %v33174_v2 = vrot.slane %v30692_v17, 4  ;;  %v22584_v59 = vrot.slane %v30815_v24, 5  ;;  %25979 = vmatprep.mubr.msk.f32.mxu0 %vm28243_vm11, %v33160_v39  ;;  %25984 = vmatprep.mubr.msk.f32.mxu1 %vm28243_vm11, %v33160_v39 }
 0xf4b   : > { %33173 = vst [vmem:[#allocation27_spill] sm:$0xff] %v30981_v53  ;;  %v22596_v48 = vsel %vm9251_vm7, %v22595_v57, %v22594_v29  ;;  %v22621_v61 = vrot.slane %v30700_v15, 6  ;;  %v22623_v7 = vrot.slane %v30715_v50, 5  ;;  %v22625_v52 = vrot.slane %v30732_v22, 4  ;;  %v25896_v28 = vpop.f32.mrb[178].mxu0  ;;  %25987 = vmatprep.subr.mxu0 %v33160_v39  ;;  %25992 = vmatprep.subr.mxu1 %v33160_v39 }
 0xf4c   : > { %v22574_v40 = vsel %vm9245_vm4, %v22573_v47, %v33174_v2  ;;  %v22597_v14 = vsel %vm9253_vm8, %v30773_v43, %v22596_v48  ;;  %v33175_v25 = vrot.slane %v30692_v17, 7  ;;  %v22627_v3 = vrot.slane %v30753_v55, 3  ;;  %v9765_v63 = vpop.f32.mrb[179].mxu0  ;;  %25980 = vmatmul.mubr.msk.f32.vlgmr.msra.gmra.mrb[192].mxu0 %vm856_vm1, %v30670_v36  ;;  %25985 = vmatmul.mubr.msk.f32.vlgmr.msra.gmra.mrb[210].mxu1 %vm856_vm1, %v30676_v62 }
 0xf4d   : > { %v22576_v32 = vsel %vm9247_vm5, %v22575_v12, %v22574_v40  ;;  %v22599_v38 = vsel %vm9255_vm9, %v22598_v49, %v22597_v14  ;;  %v22629_v35 = vrot.slane %v30773_v43, 2  ;;  %v22605_v47 = vrot.slane %v30700_v15, 5  ;;  %25988 = vmatpush3.xpose.msk.msra.mxu0 %vm856_vm1, %v25893_v45  ;;  %25993 = vmatpush3.xpose.msk.msra.mxu1 %vm856_vm1, %v9765_v63 }
 0xf4e   : > { %v22578_v44 = vsel %vm9249_vm6, %v22577_v11, %v22576_v32  ;;  %v22622_v51 = vsel %vm9245_vm4, %v22621_v61, %v33175_v25  ;;  %v31022_v13 = vsel %vm9257_vm10, %v22600_v54, %v22599_v38  ;;  %v22631_v54 = vrot.slane %v30794_v5, 1  ;;  %25989 = vmatprep.mubr.msk.f32.mxu0 %vm28243_vm11, %v33160_v39  ;;  %25994 = vmatprep.mubr.msk.f32.mxu1 %vm28243_vm11, %v33160_v39 }
 0xf4f   : > { %33176 = vst [vmem:[#allocation28_spill] sm:$0xff] %v31022_v13  ;;  %v22579_v57 = vsel %vm9251_vm7, %v30753_v55, %v22578_v44  ;;  %v22624_v21 = vsel %vm9247_vm5, %v22623_v7, %v22622_v51  ;;  %v22607_v36 = vrot.slane %v30715_v50, 4  ;;  %v22609_v62 = vrot.slane %v30732_v22, 3  ;;  %v25899_v50 = vpop.f32.mrb[180].mxu0  ;;  %25997 = vmatprep.subr.mxu0 %v33160_v39  ;;  %26002 = vmatprep.subr.mxu1 %v33160_v39 }
 0xf50   : > { %v22581_v49 = vsel %vm9253_vm8, %v22580_v4, %v22579_v57  ;;  %v22626_v26 = vsel %vm9249_vm6, %v22625_v52, %v22624_v21  ;;  %v33178_v11 = vrot.slane %v30692_v17, 6  ;;  %v22613_v48 = vrot.slane %v30773_v43, 1  ;;  %v9775_v2 = vpop.f32.mrb[181].mxu0  ;;  %25990 = vmatmul.mubr.msk.f32.vlgmr.msra.gmra.mrb[194].mxu0 %vm856_vm1, %v30674_v8  ;;  %25995 = vmatmul.mubr.msk.f32.vlgmr.msra.gmra.mrb[212].mxu1 %vm856_vm1, %v30680_v37 }
 0xf51   : > { %v22583_v12 = vsel %vm9255_vm9, %v22582_v34, %v22581_v49  ;;  %v22628_v29 = vsel %vm9251_vm7, %v22627_v3, %v22626_v26  ;;  %v22611_v34 = vrot.slane %v30753_v55, 2  ;;  %v22616_v40 = vrot.slane %v30815_v24, 7  ;;  %25998 = vmatpush3.xpose.msk.msra.mxu0 %vm856_vm1, %v25896_v28  ;;  %26003 = vmatpush3.xpose.msk.msra.mxu1 %vm856_vm1, %v9775_v2 }
 0xf52   : > { %v31047_v15 = vsel %vm9257_vm10, %v22584_v59, %v22583_v12  ;;  %v22630_v45 = vsel %vm9253_vm8, %v22629_v35, %v22628_v29  ;;  %v22606_v4 = vsel %vm9245_vm4, %v22605_v47, %v33178_v11  ;;  %25999 = vmatprep.mubr.msk.f32.mxu0 %vm28243_vm11, %v33160_v39  ;;  %26004 = vmatprep.mubr.msk.f32.mxu1 %vm28243_vm11, %v33160_v39 }
 0xf53   : > { %33177 = vst [vmem:[#allocation29_spill] sm:$0xff] %v31047_v15  ;;  %v22632_v22 = vsel %vm9255_vm9, %v22631_v54, %v22630_v45  ;;  %v22608_v0 = vsel %vm9247_vm5, %v22607_v36, %v22606_v4  ;;  %26007 = vmatprep.subr.mxu0 %v33160_v39  ;;  %26012 = vmatprep.subr.mxu1 %v33160_v39 }
 0xf54   : > { %v31065_v17 = vsel %vm9257_vm10, %v30815_v24, %v22632_v22  ;;  %v22610_v55 = vsel %vm9249_vm6, %v22609_v62, %v22608_v0  ;;  %26000 = vmatmul.mubr.msk.f32.vlgmr.msra.gmra.mrb[196].mxu0 %vm856_vm1, %v30678_v30  ;;  %26005 = vmatmul.mubr.msk.f32.vlgmr.msra.gmra.mrb[214].mxu1 %vm856_vm1, %v30684_v6  ;;  %v25910_v30 = vpop.f32.mrb[186].mxu1 }
 0xf55   : > { %33179 = vst [vmem:[#allocation30_spill] sm:$0xff] %v31065_v17  ;;  %v22612_v43 = vsel %vm9251_vm7, %v22611_v34, %v22610_v55  ;;  %26008 = vmatpush3.xpose.msk.msra.mxu0 %vm856_vm1, %v25899_v50  ;;  %26009 = vmatprep.mubr.msk.f32.mxu0 %vm28243_vm11, %v33160_v39  ;;  %v9850_v6 = vpop.f32.mrb[187].mxu1 }
 0xf56   : > { %v22614_v8 = vsel %vm9253_vm8, %v22613_v48, %v22612_v43  ;;  %26017 = vmatprep.subr.mxu0 %v33160_v39  ;;  %26014 = vmatprep.mubr.msk.f32.mxu1 %vm28243_vm11, %v33160_v39 }
 0xf57   : > { %v22615_v37 = vsel %vm9255_vm9, %v30794_v5, %v22614_v8  ;;  %26013 = vmatpush3.msra.mxu1 %v9850_v6  ;;  %v31100_v5 = vpop.f32.mrb[188].mxu1 }
 0xf58   : > { %v31086_v24 = vsel %vm9257_vm10, %v22616_v40, %v22615_v37  ;;  %26010 = vmatmul.mubr.msk.f32.vlgmr.msra.gmra.mrb[198].mxu0 %vm856_vm1, %v30682_v27  ;;  %26022 = vmatprep.subr.mxu1 %v33160_v39  ;;  %v31102_v59 = vpop.f32.mrb[189].mxu1 }
 0xf59   : > { %33180 = vst [vmem:[#allocation31_spill] sm:$0xff] %v31086_v24  ;;  %26019 = vmatprep.mubr.msk.f32.mxu0 %vm28243_vm11, %v33160_v39  ;;  %26018 = vmatpush3.msra.mxu0 %v25910_v30  ;;  %v31104_v61 = vpop.f32.mrb[190].mxu1 }
 0xf5a   : > { %26027 = vmatprep.subr.mxu0 %v33160_v39  ;;  %v31106_v14 = vpop.f32.mrb[191].mxu1 }
 0xf5b   : > { %v31108_v27 = vpop.f32.mrb[192].mxu1 }
 0xf5c   : > { %v31110_v32 = vpop.f32.mrb[193].mxu1 }
 0xf5d   : > { %v31112_v7 = vpop.f32.mrb[194].mxu1 }
 0xf5e   : > { %v31114_v52 = vpop.f32.mrb[195].mxu1 }
 0xf5f   : > { %v31116_v38 = vpop.f32.mrb[196].mxu1 }
 0xf60   : > { %v31118_v44 = vpop.f32.mrb[197].mxu1 }
 0xf61   : > { %v31120_v25 = vpop.f32.mrb[198].mxu1 }
 0xf62   : > { %v31122_v51 = vpop.f32.mrb[199].mxu1 }
 0xf63   : > { %v31124_v3 = vpop.f32.mrb[200].mxu1 }
 0xf64   : > { %v31126_v28 = vpop.f32.mrb[201].mxu1 }
0x100b   : > { %v10001_v57 = vpop.f32.mrb[182].mxu0 }
0x100c   : > { %v31128_v21 = vmul.f32 0.35355338, %v10001_v57  ;;  %v25936_v35 = vpop.f32.mrb[183].mxu0 }
0x100e   : > { %v11161_v63 = vsel %vm856_vm1, %v31128_v21, -inf }
0x100f   : > { %v10153_v49 = vpop.f32.mrb[202].mxu1  ;;  %11162 = vmax.xlane.f32.xlu1 %v11161_v63  ;;  %v10077_v26 = vpop.f32.mrb[184].mxu0 }
0x1010   : > { %v31132_v54 = vmul.f32 0.35355338, %v10153_v49  ;;  %v31134_v47 = vmul.f32 0.35355338, %v10077_v26  ;;  %v25941_v12 = vpop.f32.mrb[185].mxu0  ;;  %v25946_v29 = vpop.f32.mrb[203].mxu1 }
0x1012   : > { %v11167_v36 = vsel %vm856_vm1, %v31132_v54, -inf  ;;  %v11164_v62 = vsel %vm856_vm1, %v31134_v47, -inf }
0x1013   : > { %v10305_v45 = vpop.f32.mrb[204].mxu1  ;;  %11168 = vmax.xlane.f32.xlu1 %v11167_v36  ;;  %11165 = vmax.xlane.f32.xlu0 %v11164_v62  ;;  %v10229_v11 = vpop.f32.mrb[186].mxu0 }
0x1014   : > { %v31140_v4 = vmul.f32 0.35355338, %v10305_v45  ;;  %v31142_v34 = vmul.f32 0.35355338, %v10229_v11  ;;  %v25951_v50 = vpop.f32.mrb[187].mxu0  ;;  %v25956_v22 = vpop.f32.mrb[205].mxu1 }
0x1016   : > { %v11173_v0 = vsel %vm856_vm1, %v31140_v4, -inf  ;;  %v11170_v48 = vsel %vm856_vm1, %v31142_v34, -inf }
0x1017   : > { %v10457_v2 = vpop.f32.mrb[206].mxu1  ;;  %11174 = vmax.xlane.f32.xlu1 %v11173_v0  ;;  %11171 = vmax.xlane.f32.xlu0 %v11170_v48  ;;  %v10381_v55 = vpop.f32.mrb[188].mxu0 }
0x1018   : > { %v31148_v40 = vmul.f32 0.35355338, %v10457_v2  ;;  %v31150_v43 = vmul.f32 0.35355338, %v10381_v55  ;;  %v25961_v8 = vpop.f32.mrb[189].mxu0  ;;  %v25966_v37 = vpop.f32.mrb[207].mxu1 }
0x101a   : > { %v11179_v30 = vsel %vm856_vm1, %v31148_v40, -inf  ;;  %v11176_v6 = vsel %vm856_vm1, %v31150_v43, -inf }
0x101b   : > { %v10609_v57 = vpop.f32.mrb[208].mxu1  ;;  %11180 = vmax.xlane.f32.xlu1 %v11179_v30  ;;  %11177 = vmax.xlane.f32.xlu0 %v11176_v6  ;;  %v10533_v35 = vpop.f32.mrb[190].mxu0 }
0x101c   : > { %v31156_v63 = vmul.f32 0.35355338, %v10609_v57  ;;  %v31158_v49 = vmul.f32 0.35355338, %v10533_v35  ;;  %v25971_v26 = vpop.f32.mrb[191].mxu0  ;;  %v25976_v12 = vpop.f32.mrb[209].mxu1 }
0x101e   : > { %v11185_v29 = vsel %vm856_vm1, %v31156_v63, -inf  ;;  %v11182_v36 = vsel %vm856_vm1, %v31158_v49, -inf }
0x101f   : > { %v10761_v62 = vpop.f32.mrb[210].mxu1  ;;  %11186 = vmax.xlane.f32.xlu1 %v11185_v29  ;;  %11183 = vmax.xlane.f32.xlu0 %v11182_v36  ;;  %v10685_v45 = vpop.f32.mrb[192].mxu0 }
0x1020   : > { %v31164_v11 = vmul.f32 0.35355338, %v10761_v62  ;;  %v31166_v50 = vmul.f32 0.35355338, %v10685_v45  ;;  %v25981_v22 = vpop.f32.mrb[193].mxu0  ;;  %v25986_v0 = vpop.f32.mrb[211].mxu1 }
0x1022   : > { %v11191_v48 = vsel %vm856_vm1, %v31164_v11, -inf  ;;  %v11188_v2 = vsel %vm856_vm1, %v31166_v50, -inf }
0x1023   : > { %v10913_v55 = vpop.f32.mrb[212].mxu1  ;;  %11192 = vmax.xlane.f32.xlu1 %v11191_v48  ;;  %11189 = vmax.xlane.f32.xlu0 %v11188_v2  ;;  %v10837_v8 = vpop.f32.mrb[194].mxu0 }
0x1024   : > { %v31172_v37 = vmul.f32 0.35355338, %v10913_v55  ;;  %v31174_v30 = vmul.f32 0.35355338, %v10837_v8  ;;  %v25991_v6 = vpop.f32.mrb[195].mxu0  ;;  %v25996_v57 = vpop.f32.mrb[213].mxu1 }
0x1026   : > { %v11197_v35 = vsel %vm856_vm1, %v31172_v37, -inf  ;;  %v11194_v26 = vsel %vm856_vm1, %v31174_v30, -inf }
0x1027   : > { %v11065_v12 = vpop.f32.mrb[214].mxu1  ;;  %11198 = vmax.xlane.f32.xlu1 %v11197_v35  ;;  %11195 = vmax.xlane.f32.xlu0 %v11194_v26  ;;  %v10989_v29 = vpop.f32.mrb[196].mxu0 }
0x1028   : > { %v31180_v36 = vmul.f32 0.35355338, %v11065_v12  ;;  %v31182_v62 = vmul.f32 0.35355338, %v10989_v29  ;;  %v26001_v45 = vpop.f32.mrb[197].mxu0  ;;  %v26006_v22 = vpop.f32.mrb[215].mxu1 }
0x102a   : > { %v11203_v0 = vsel %vm856_vm1, %v31180_v36, -inf  ;;  %v11200_v48 = vsel %vm856_vm1, %v31182_v62, -inf }
0x102b   : > { %11204 = vmax.xlane.f32.xlu1 %v11203_v0  ;;  %11201 = vmax.xlane.f32.xlu0 %v11200_v48  ;;  %v11141_v2 = vpop.f32.mrb[198].mxu0 }
0x102c   : > { %v31188_v55 = vmul.f32 0.35355338, %v11141_v2  ;;  %v26011_v8 = vpop.f32.mrb[199].mxu0 }
0x102e   : > { %v11206_v6 = vsel %vm856_vm1, %v31188_v55, -inf }
0x102f   : > { %11207 = vmax.xlane.f32.xlu0 %v11206_v6 }
0x109c   : > { %v11163_v57 = vpop.xlane.xlu1 %11162 }
0x109d   : > { %v11209_v35 = vsub.f32 %v31128_v21, %v11163_v57 }
0x109f   : > { %v11225_v26 = vmul.f32 1.442695, %v11209_v35 }
0x10a0   : > { %v11169_v12 = vpop.xlane.xlu1 %11168  ;;  %v11166_v29 = vpop.xlane.xlu0 %11165 }
0x10a1   : > { %27874 = vpow2.f32 %v11225_v26  ;;  %v11211_v45 = vsub.f32 %v31132_v54, %v11169_v12  ;;  %v11210_v22 = vsub.f32 %v31134_v47, %v11166_v29 }
0x10a3   : > { %v11229_v0 = vmul.f32 1.442695, %v11211_v45  ;;  %v11227_v48 = vmul.f32 1.442695, %v11210_v22 }
0x10a4   : > { %v11175_v2 = vpop.xlane.xlu1 %11174  ;;  %v11172_v24 = vpop.xlane.xlu0 %11171 }
0x10a5   : > { %27876 = vpow2.f32 %v11229_v0  ;;  %v11213_v8 = vsub.f32 %v31140_v4, %v11175_v2  ;;  %v11212_v6 = vsub.f32 %v31142_v34, %v11172_v24 }
0x10a6   : > { %27878 = vpow2.f32 %v11227_v48 }
0x10a7   : > { %v11233_v17 = vmul.f32 1.442695, %v11213_v8  ;;  %v11231_v21 = vmul.f32 1.442695, %v11212_v6 }
0x10a8   : > { %v11181_v57 = vpop.xlane.xlu1 %11180  ;;  %v11178_v35 = vpop.xlane.xlu0 %11177 }
0x10a9   : > { %27880 = vpow2.f32 %v11233_v17  ;;  %v11215_v26 = vsub.f32 %v31148_v40, %v11181_v57  ;;  %v11214_v54 = vsub.f32 %v31150_v43, %v11178_v35 }
0x10aa   : > { %27882 = vpow2.f32 %v11231_v21 }
0x10ab   : > { %v31199_v47 = vpop.eup %27874  ;;  %v11237_v12 = vmul.f32 1.442695, %v11215_v26  ;;  %v11235_v29 = vmul.f32 1.442695, %v11214_v54 }
0x10ac   : > { %v11187_v45 = vpop.xlane.xlu1 %11186  ;;  %v11184_v22 = vpop.xlane.xlu0 %11183  ;;  %v11257_v24 = vsel %vm856_vm1, %v31199_v47, 0.0 }
0x10ad   : > { %27884 = vpow2.f32 %v11237_v12  ;;  %v11217_v4 = vsub.f32 %v31156_v63, %v11187_v45  ;;  %v11216_v34 = vsub.f32 %v31158_v49, %v11184_v22  ;;  %11258 = vadd.xlane.f32.xlu1 %v11257_v24 }
0x10ae   : > { %27886 = vpow2.f32 %v11235_v29 }
0x10af   : > { %v31205_v17 = vpop.eup %27876  ;;  %v11241_v40 = vmul.f32 1.442695, %v11217_v4  ;;  %v11239_v43 = vmul.f32 1.442695, %v11216_v34 }
0x10b0   : > { %v31207_v0 = vpop.eup %27878  ;;  %v11193_v48 = vpop.xlane.xlu1 %11192  ;;  %v11263_v8 = vsel %vm856_vm1, %v31205_v17, 0.0 }
0x10b1   : > { %v11190_v2 = vpop.xlane.xlu0 %11189  ;;  %27888 = vpow2.f32 %v11241_v40  ;;  %v11219_v6 = vsub.f32 %v31164_v11, %v11193_v48  ;;  %11264 = vadd.xlane.f32.xlu1 %v11263_v8  ;;  %v11260_v49 = vsel %vm856_vm1, %v31207_v0, 0.0 }
0x10b2   : > { %v11218_v63 = vsub.f32 %v31166_v50, %v11190_v2  ;;  %27890 = vpow2.f32 %v11239_v43  ;;  %11261 = vadd.xlane.f32.xlu0 %v11260_v49 }
0x10b3   : > { %v31215_v21 = vpop.eup %27880  ;;  %v11245_v57 = vmul.f32 1.442695, %v11219_v6 }
0x10b4   : > { %v11243_v35 = vmul.f32 1.442695, %v11218_v63  ;;  %v31217_v26 = vpop.eup %27882  ;;  %v11199_v54 = vpop.xlane.xlu1 %11198  ;;  %v11269_v29 = vsel %vm856_vm1, %v31215_v21, 0.0 }
0x10b5   : > { %v11196_v12 = vpop.xlane.xlu0 %11195  ;;  %27892 = vpow2.f32 %v11245_v57  ;;  %v11221_v11 = vsub.f32 %v31172_v37, %v11199_v54  ;;  %11270 = vadd.xlane.f32.xlu1 %v11269_v29  ;;  %v11266_v45 = vsel %vm856_vm1, %v31217_v26, 0.0 }
0x10b6   : > { %v11220_v50 = vsub.f32 %v31174_v30, %v11196_v12  ;;  %27894 = vpow2.f32 %v11243_v35  ;;  %11267 = vadd.xlane.f32.xlu0 %v11266_v45 }
0x10b7   : > { %v31225_v22 = vpop.eup %27884  ;;  %v11249_v24 = vmul.f32 1.442695, %v11221_v11 }
0x10b8   : > { %v11247_v4 = vmul.f32 1.442695, %v11220_v50  ;;  %v31227_v34 = vpop.eup %27886  ;;  %v11205_v40 = vpop.xlane.xlu1 %11204  ;;  %v11275_v48 = vsel %vm856_vm1, %v31225_v22, 0.0 }
0x10b9   : > { %v11202_v43 = vpop.xlane.xlu0 %11201  ;;  %27896 = vpow2.f32 %v11249_v24  ;;  %v11223_v37 = vsub.f32 %v31180_v36, %v11205_v40  ;;  %11276 = vadd.xlane.f32.xlu1 %v11275_v48  ;;  %v11272_v2 = vsel %vm856_vm1, %v31227_v34, 0.0 }
0x10ba   : > { %v11222_v30 = vsub.f32 %v31182_v62, %v11202_v43  ;;  %27898 = vpow2.f32 %v11247_v4  ;;  %11273 = vadd.xlane.f32.xlu0 %v11272_v2 }
0x10bb   : > { %v31235_v8 = vpop.eup %27888  ;;  %v11253_v6 = vmul.f32 1.442695, %v11223_v37 }
0x10bc   : > { %v11251_v63 = vmul.f32 1.442695, %v11222_v30  ;;  %v31237_v49 = vpop.eup %27890  ;;  %v11281_v35 = vsel %vm856_vm1, %v31235_v8, 0.0 }
0x10bd   : > { %v11208_v57 = vpop.xlane.xlu0 %11207  ;;  %27900 = vpow2.f32 %v11253_v6  ;;  %11282 = vadd.xlane.f32.xlu1 %v11281_v35  ;;  %v11278_v62 = vsel %vm856_vm1, %v31237_v49, 0.0 }
0x10be   : > { %v11224_v36 = vsub.f32 %v31188_v55, %v11208_v57  ;;  %27902 = vpow2.f32 %v11251_v63  ;;  %11279 = vadd.xlane.f32.xlu0 %v11278_v62 }
0x10bf   : > { %v31244_v54 = vpop.eup %27892 }
0x10c0   : > { %v11255_v12 = vmul.f32 1.442695, %v11224_v36  ;;  %v31246_v29 = vpop.eup %27894  ;;  %v11287_v11 = vsel %vm856_vm1, %v31244_v54, 0.0 }
0x10c1   : > { %11288 = vadd.xlane.f32.xlu1 %v11287_v11  ;;  %v11284_v50 = vsel %vm856_vm1, %v31246_v29, 0.0 }
0x10c2   : > { %27904 = vpow2.f32 %v11255_v12  ;;  %11285 = vadd.xlane.f32.xlu0 %v11284_v50 }
0x10c3   : > { %v31252_v55 = vpop.eup %27896 }
0x10c4   : > { %v31254_v45 = vpop.eup %27898  ;;  %v11293_v24 = vsel %vm856_vm1, %v31252_v55, 0.0 }
0x10c5   : > { %11294 = vadd.xlane.f32.xlu1 %v11293_v24  ;;  %v11290_v4 = vsel %vm856_vm1, %v31254_v45, 0.0 }
0x10c6   : > { %11291 = vadd.xlane.f32.xlu0 %v11290_v4 }
0x10c7   : > { %v31260_v40 = vpop.eup %27900 }
0x10c8   : > { %v31262_v43 = vpop.eup %27902  ;;  %v11299_v48 = vsel %vm856_vm1, %v31260_v40, 0.0 }
0x10c9   : > { %11300 = vadd.xlane.f32.xlu1 %v11299_v48  ;;  %v11296_v37 = vsel %vm856_vm1, %v31262_v43, 0.0 }
0x10ca   : > { %11297 = vadd.xlane.f32.xlu0 %v11296_v37 }
0x10cc   : > { %v31268_v30 = vpop.eup %27904 }
0x10cd   : > { %v11302_v2 = vsel %vm856_vm1, %v31268_v30, 0.0 }
0x10ce   : > { %11303 = vadd.xlane.f32.xlu0 %v11302_v2 }
0x113a   : > { %v11259_v6 = vpop.xlane.xlu1 %11258 }
0x113b   : > { %27906 = vrcp.f32 %v11259_v6 }
0x113e   : > { %v11265_v63 = vpop.xlane.xlu1 %11264 }
0x113f   : > { %27908 = vrcp.f32 %v11265_v63  ;;  %v11262_v57 = vpop.xlane.xlu0 %11261 }
0x1140   : > { %27910 = vrcp.f32 %v11262_v57 }
0x1142   : > { %v11271_v35 = vpop.xlane.xlu1 %11270 }
0x1143   : > { %27912 = vrcp.f32 %v11271_v35  ;;  %v11268_v36 = vpop.xlane.xlu0 %11267 }
0x1144   : > { %27914 = vrcp.f32 %v11268_v36 }
0x1145   : > { %v27907_v62 = vpop.eup %27906 }
0x1146   : > { %v11277_v12 = vpop.xlane.xlu1 %11276  ;;  %v11321_v11 = vmul.f32 %v27907_v62, %v31199_v47 }
0x1147   : > { %27916 = vrcp.f32 %v11277_v12  ;;  %v11274_v50 = vpop.xlane.xlu0 %11273 }
0x1148   : > { %27918 = vrcp.f32 %v11274_v50  ;;  %26015 = vmatmul.mubr.msk.f32.vlgmr.msra.gmra.mrb[216].mxu1 %vm856_vm1, %v11321_v11 }
0x1149   : > { %v27909_v24 = vpop.eup %27908  ;;  %26023 = vmatpush3.msra.mxu1 %v31102_v59  ;;  %26024 = vmatprep.mubr.msk.f32.mxu1 %vm28243_vm11, %v33160_v39 }
0x114a   : > { %v27911_v4 = vpop.eup %27910  ;;  %v11283_v48 = vpop.xlane.xlu1 %11282  ;;  %26032 = vmatprep.subr.mxu1 %v33160_v39  ;;  %v11323_v37 = vmul.f32 %v27909_v24, %v31205_v17  ;;  %v302_v24 = vld [vmem:[%s33111_s2 + $0x20] sm:$0xff] }
0x114b   : > { %27920 = vrcp.f32 %v11283_v48  ;;  %v11280_v2 = vpop.xlane.xlu0 %11279  ;;  %v11322_v47 = vmul.f32 %v27911_v4, %v31207_v0  ;;  %v272_v4 = vld [vmem:[%s33110_s1 + $0x30] sm:$0xff] }
0x114c   : > { %27922 = vrcp.f32 %v11280_v2  ;;  %26025 = vmatmul.mubr.msk.f32.vlgmr.msra.gmra.mrb[218].mxu1 %vm856_vm1, %v11323_v37 }
0x114d   : > { %v27913_v6 = vpop.eup %27912  ;;  %26020 = vmatmul.mubr.msk.f32.vlgmr.msra.gmra.mrb[200].mxu0 %vm856_vm1, %v11322_v47  ;;  %26033 = vmatpush3.msra.mxu1 %v31106_v14 }
0x114e   : > { %v27915_v59 = vpop.eup %27914  ;;  %26028 = vmatpush3.msra.mxu0 %v31100_v5  ;;  %v11289_v63 = vpop.xlane.xlu1 %11288  ;;  %26029 = vmatprep.mubr.msk.f32.mxu0 %vm28243_vm11, %v33160_v39  ;;  %v11325_v17 = vmul.f32 %v27913_v6, %v31215_v21 }
0x114f   : > { %27924 = vrcp.f32 %v11289_v63  ;;  %v11286_v57 = vpop.xlane.xlu0 %11285  ;;  %26034 = vmatprep.mubr.msk.f32.mxu1 %vm28243_vm11, %v33160_v39  ;;  %26037 = vmatprep.subr.mxu0 %v33160_v39  ;;  %v11324_v0 = vmul.f32 %v27915_v59, %v31217_v26 }
0x1150   : > { %27926 = vrcp.f32 %v11286_v57  ;;  %26042 = vmatprep.subr.mxu1 %v33160_v39  ;;  %26035 = vmatmul.mubr.msk.f32.vlgmr.msra.gmra.mrb[220].mxu1 %vm856_vm1, %v11325_v17  ;;  %v33183_v17 = vld [vmem:[#allocation7_spill] sm:$0xff]  ;;  %v33184_v57 = vld [vmem:[#allocation8_spill] sm:$0xff] }
0x1151   : > { %v27917_v5 = vpop.eup %27916  ;;  %26030 = vmatmul.mubr.msk.f32.vlgmr.msra.gmra.mrb[202].mxu0 %vm856_vm1, %v11324_v0  ;;  %26043 = vmatpush3.msra.mxu1 %v31110_v32  ;;  %v33185_v0 = vld [vmem:[#allocation9_spill] sm:$0xff] }
0x1152   : > { %v27919_v14 = vpop.eup %27918  ;;  %26038 = vmatpush3.msra.mxu0 %v31104_v61  ;;  %v11295_v21 = vpop.xlane.xlu1 %11294  ;;  %26039 = vmatprep.mubr.msk.f32.mxu0 %vm28243_vm11, %v33160_v39  ;;  %v11327_v35 = vmul.f32 %v27917_v5, %v31225_v22  ;;  %v33186_v5 = vld [vmem:[#allocation10_spill] sm:$0xff] }
0x1153   : > { %27928 = vrcp.f32 %v11295_v21  ;;  %v11292_v26 = vpop.xlane.xlu0 %11291  ;;  %26044 = vmatprep.mubr.msk.f32.mxu1 %vm28243_vm11, %v33160_v39  ;;  %26047 = vmatprep.subr.mxu0 %v33160_v39  ;;  %v11326_v36 = vmul.f32 %v27919_v14, %v31227_v34  ;;  %v33187_v14 = vld [vmem:[#allocation11_spill] sm:$0xff]  ;;  %v33188_v21 = vld [vmem:[#allocation12_spill] sm:$0xff] }
0x1154   : > { %27930 = vrcp.f32 %v11292_v26  ;;  %26052 = vmatprep.subr.mxu1 %v33160_v39  ;;  %26045 = vmatmul.mubr.msk.f32.vlgmr.msra.gmra.mrb[222].mxu1 %vm856_vm1, %v11327_v35  ;;  %v33189_v35 = vld [vmem:[#allocation13_spill] sm:$0xff]  ;;  %v33190_v26 = vld [vmem:[#allocation14_spill] sm:$0xff] }
0x1155   : > { %v27921_v61 = vpop.eup %27920  ;;  %26040 = vmatmul.mubr.msk.f32.vlgmr.msra.gmra.mrb[204].mxu0 %vm856_vm1, %v11326_v36  ;;  %26053 = vmatpush3.msra.mxu1 %v31114_v52  ;;  %v33191_v36 = vld [vmem:[#allocation15_spill] sm:$0xff] }
0x1156   : > { %v27923_v32 = vpop.eup %27922  ;;  %26048 = vmatpush3.msra.mxu0 %v31108_v27  ;;  %v11301_v22 = vpop.xlane.xlu1 %11300  ;;  %26049 = vmatprep.mubr.msk.f32.mxu0 %vm28243_vm11, %v33160_v39  ;;  %v11329_v62 = vmul.f32 %v27921_v61, %v31235_v8  ;;  %v334_v61 = vld [vmem:[%s33112_s3 + $0x20] sm:$0xff] }
0x1157   : > { %27932 = vrcp.f32 %v11301_v22  ;;  %v11298_v34 = vpop.xlane.xlu0 %11297  ;;  %26054 = vmatprep.mubr.msk.f32.mxu1 %vm28243_vm11, %v33160_v39  ;;  %26057 = vmatprep.subr.mxu0 %v33160_v39  ;;  %v11328_v12 = vmul.f32 %v27923_v32, %v31237_v49  ;;  %v335_v32 = vld [vmem:[%s33112_s3 + $0x28] sm:$0xff]  ;;  %v336_v22 = vld [vmem:[%s33112_s3 + $0x30] sm:$0xff] }
0x1158   : > { %27934 = vrcp.f32 %v11298_v34  ;;  %26062 = vmatprep.subr.mxu1 %v33160_v39  ;;  %26055 = vmatmul.mubr.msk.f32.vlgmr.msra.gmra.mrb[224].mxu1 %vm856_vm1, %v11329_v62  ;;  %v27420_v62 = vpack.c.bf16 %v335_v32, %v334_v61  ;;  %v337_v34 = vld [vmem:[%s33112_s3 + $0x38] sm:$0xff] }
0x1159   : > { %v27925_v27 = vpop.eup %27924  ;;  %26050 = vmatmul.mubr.msk.f32.vlgmr.msra.gmra.mrb[206].mxu0 %vm856_vm1, %v11328_v12  ;;  %26063 = vmatpush3.msra.mxu1 %v31118_v44  ;;  %v27424_v12 = vpack.c.bf16 %v337_v34, %v336_v22 }
0x115a   : > { %v27927_v52 = vpop.eup %27926  ;;  %26058 = vmatpush3.msra.mxu0 %v31112_v7  ;;  %26059 = vmatprep.mubr.msk.f32.mxu0 %vm28243_vm11, %v33160_v39  ;;  %v11331_v8 = vmul.f32 %v27925_v27, %v31244_v54  ;;  %v270_v7 = vld [vmem:[%s33110_s1 + $0x20] sm:$0xff]  ;;  %v271_v54 = vld [vmem:[%s33110_s1 + $0x28] sm:$0xff] }
0x115b   : > { %v11304_v11 = vpop.xlane.xlu0 %11303  ;;  %26064 = vmatprep.mubr.msk.f32.mxu1 %vm28243_vm11, %v33160_v39  ;;  %26067 = vmatprep.subr.mxu0 %v33160_v39  ;;  %v11330_v49 = vmul.f32 %v27927_v52, %v31246_v29 }
0x115c   : > { %27936 = vrcp.f32 %v11304_v11  ;;  %26072 = vmatprep.subr.mxu1 %v33160_v39  ;;  %26065 = vmatmul.mubr.msk.f32.vlgmr.msra.gmra.mrb[226].mxu1 %vm856_vm1, %v11331_v8 }
0x115d   : > { %v27929_v44 = vpop.eup %27928  ;;  %26060 = vmatmul.mubr.msk.f32.vlgmr.msra.gmra.mrb[208].mxu0 %vm856_vm1, %v11330_v49  ;;  %26073 = vmatpush3.msra.mxu1 %v31122_v51 }
0x115e   : > { %v27931_v50 = vpop.eup %27930  ;;  %26068 = vmatpush3.msra.mxu0 %v31116_v38  ;;  %26069 = vmatprep.mubr.msk.f32.mxu0 %vm28243_vm11, %v33160_v39  ;;  %v11333_v29 = vmul.f32 %v27929_v44, %v31252_v55  ;;  %v303_v38 = vld [vmem:[%s33111_s2 + $0x28] sm:$0xff]  ;;  %v27404_v55 = vpack.c.bf16 %v271_v54, %v270_v7 }
0x115f   : > { %26074 = vmatprep.mubr.msk.f32.mxu1 %vm28243_vm11, %v33160_v39  ;;  %26077 = vmatprep.subr.mxu0 %v33160_v39  ;;  %v11332_v51 = vmul.f32 %v27931_v50, %v31254_v45  ;;  %v273_v45 = vld [vmem:[%s33110_s1 + $0x38] sm:$0xff]  ;;  %v27412_v6 = vpack.c.bf16 %v303_v38, %v302_v24 }
0x1160   : > { %26082 = vmatprep.subr.mxu1 %v33160_v39  ;;  %26075 = vmatmul.mubr.msk.f32.vlgmr.msra.gmra.mrb[228].mxu1 %vm856_vm1, %v11333_v29  ;;  %v27408_v59 = vpack.c.bf16 %v273_v45, %v272_v4 }
0x1161   : > { %v27933_v48 = vpop.eup %27932  ;;  %26070 = vmatmul.mubr.msk.f32.vlgmr.msra.gmra.mrb[210].mxu0 %vm856_vm1, %v11332_v51  ;;  %26083 = vmatpush3.msra.mxu1 %v31126_v28  ;;  %v305_v28 = vld [vmem:[%s33111_s2 + $0x38] sm:$0xff] }
0x1162   : > { %v27935_v37 = vpop.eup %27934  ;;  %26078 = vmatpush3.msra.mxu0 %v31120_v25  ;;  %26079 = vmatprep.mubr.msk.f32.mxu0 %vm28243_vm11, %v33160_v39  ;;  %v11335_v2 = vmul.f32 %v27933_v48, %v31260_v40  ;;  %v304_v25 = vld [vmem:[%s33111_s2 + $0x30] sm:$0xff] }
0x1163   : > { %26084 = vmatprep.mubr.msk.f32.mxu1 %vm28243_vm11, %v33160_v39  ;;  %26087 = vmatprep.subr.mxu0 %v33160_v39  ;;  %v11334_v47 = vmul.f32 %v27935_v37, %v31262_v43  ;;  %v27416_v63 = vpack.c.bf16 %v305_v28, %v304_v25 }
0x1164   : > { %26085 = vmatmul.mubr.msk.f32.vlgmr.msra.gmra.mrb[230].mxu1 %vm856_vm1, %v11335_v2  ;;  %27405 = vmatprep.subr.bf16.mxu1 %v27404_v55 }
0x1165   : > { %26080 = vmatmul.mubr.msk.f32.vlgmr.msra.gmra.mrb[212].mxu0 %vm856_vm1, %v11334_v47  ;;  %27407 = vmatpush3.bf16.msra.mxu1 %v27404_v55 }
0x1166   : > { %v27937_v40 = vpop.eup %27936  ;;  %26088 = vmatpush3.msra.mxu0 %v31124_v3  ;;  %26089 = vmatprep.mubr.msk.f32.mxu0 %vm28243_vm11, %v33160_v39  ;;  %v33181_v3 = vld [vmem:[#allocation5_spill] sm:$0xff] }
0x1167   : > { %27413 = vmatprep.subr.bf16.mxu0 %v27412_v6  ;;  %v11336_v43 = vmul.f32 %v27937_v40, %v31268_v30  ;;  %27409 = vmatprep.subr.bf16.mxu1 %v27408_v59  ;;  %v33182_v30 = vld [vmem:[#allocation6_spill] sm:$0xff] }
0x1168   : > { %26100 = vmatprep.mubr.msk.f32.mxu1 %vm372_vm0, %v30228_v19 }
0x1169   : > { %26090 = vmatmul.mubr.msk.f32.vlgmr.msra.gmra.mrb[214].mxu0 %vm856_vm1, %v11336_v43  ;;  %27411 = vmatpush3.bf16.msra.mxu1 %v27408_v59 }
0x116a   : > { %27415 = vmatpush3.bf16.msra.mxu0 %v27412_v6  ;;  %26132 = vmatprep.mubr.msk.f32.mxu0 %vm372_vm0, %v30228_v19 }
0x116b   : > { %27417 = vmatprep.subr.bf16.mxu0 %v27416_v63  ;;  %27421 = vmatprep.subr.bf16.mxu1 %v27420_v62 }
0x116c   : > { %26101 = vmatmul.mubr.msk.f32.vlgmr.msra.gmra.mrb[232].mxu1 %vm372_vm0, %v30254_v58 }
0x116d   : > { %26103 = vmatprep.mubr.msk.f32.mxu1 %vm372_vm0, %v30274_v31  ;;  %27423 = vmatpush3.bf16.msra.mxu1 %v27420_v62 }
0x116e   : > { %27419 = vmatpush3.bf16.msra.mxu0 %v27416_v63  ;;  %27425 = vmatprep.subr.bf16.mxu1 %v27424_v12 }
0x116f   : > { %26188 = vmatprep.subr.mxu0 %v33160_v39 }
0x1170   : > { %26104 = vmatmul.mubr.msk.f32.gmra.mrb[234].mxu1 %vm372_vm0, %v30300_v20 }
0x1171   : > { %26133 = vmatmul.mubr.msk.f32.vlgmr.msra.gmra.mrb[216].mxu0 %vm372_vm0, %v30254_v58  ;;  %26106 = vmatprep.mubr.msk.f32.mxu1 %vm372_vm0, %v30319_v16 }
0x1172   : > { %26135 = vmatprep.mubr.msk.f32.mxu0 %vm372_vm0, %v30274_v31  ;;  %27427 = vmatpush3.bf16.msra.mxu1 %v27424_v12 }
0x1173   : > { %26228 = vmatprep.subr.mxu1 %v33160_v39 }
0x1174   : > { %26107 = vmatmul.mubr.msk.f32.gmra.mrb[236].mxu1 %vm372_vm0, %v33181_v3 }
0x1175   : > { %26136 = vmatmul.mubr.msk.f32.gmra.mrb[218].mxu0 %vm372_vm0, %v30300_v20  ;;  %26109 = vmatprep.mubr.msk.f32.mxu1 %vm372_vm0, %v33182_v30 }
0x1176   : > { %26138 = vmatprep.mubr.msk.f32.mxu0 %vm372_vm0, %v30319_v16 }
0x1178   : > { %26110 = vmatmul.mubr.msk.f32.gmra.mrb[238].mxu1 %vm372_vm0, %v33183_v17 }
0x1179   : > { %26139 = vmatmul.mubr.msk.f32.gmra.mrb[220].mxu0 %vm372_vm0, %v33181_v3  ;;  %26112 = vmatprep.mubr.msk.f32.mxu1 %vm372_vm0, %v33184_v57 }
0x117a   : > { %26141 = vmatprep.mubr.msk.f32.mxu0 %vm372_vm0, %v33182_v30 }
0x117c   : > { %26113 = vmatmul.mubr.msk.f32.gmra.mrb[240].mxu1 %vm372_vm0, %v33185_v0 }
0x117d   : > { %26142 = vmatmul.mubr.msk.f32.gmra.mrb[222].mxu0 %vm372_vm0, %v33183_v17  ;;  %26115 = vmatprep.mubr.msk.f32.mxu1 %vm372_vm0, %v33186_v5 }
0x117e   : > { %26144 = vmatprep.mubr.msk.f32.mxu0 %vm372_vm0, %v33184_v57 }
0x1180   : > { %26116 = vmatmul.mubr.msk.f32.gmra.mrb[242].mxu1 %vm372_vm0, %v33187_v14 }
0x1181   : > { %26145 = vmatmul.mubr.msk.f32.gmra.mrb[224].mxu0 %vm372_vm0, %v33185_v0  ;;  %26118 = vmatprep.mubr.msk.f32.mxu1 %vm372_vm0, %v33188_v21 }
0x1182   : > { %26147 = vmatprep.mubr.msk.f32.mxu0 %vm372_vm0, %v33186_v5 }
0x1184   : > { %26119 = vmatmul.mubr.msk.f32.gmra.mrb[244].mxu1 %vm372_vm0, %v33189_v35 }
0x1185   : > { %26148 = vmatmul.mubr.msk.f32.gmra.mrb[226].mxu0 %vm372_vm0, %v33187_v14  ;;  %26121 = vmatprep.mubr.msk.f32.mxu1 %vm372_vm0, %v33190_v26 }
0x1186   : > { %26150 = vmatprep.mubr.msk.f32.mxu0 %vm372_vm0, %v33188_v21 }
0x1188   : > { %26122 = vmatmul.mubr.msk.f32.gmra.mrb[246].mxu1 %vm372_vm0, %v33191_v36 }
0x1189   : > { %26151 = vmatmul.mubr.msk.f32.gmra.mrb[228].mxu0 %vm372_vm0, %v33189_v35  ;;  %26164 = vmatprep.mubr.msk.f32.mxu1 %vm372_vm0, %v30228_v19 }
0x118a   : > { %26153 = vmatprep.mubr.msk.f32.mxu0 %vm372_vm0, %v33190_v26 }
0x118c   : > { %26165 = vmatmul.mubr.msk.f32.vlgmr.msra.gmra.mrb[248].mxu1 %vm372_vm0, %v30254_v58 }
0x118d   : > { %26154 = vmatmul.mubr.msk.f32.gmra.mrb[230].mxu0 %vm372_vm0, %v33191_v36  ;;  %26167 = vmatprep.mubr.msk.f32.mxu1 %vm372_vm0, %v30274_v31 }
0x118e   : > { %26190 = vmatprep.mubr.msk.f32.mxu0 %vm28243_vm11, %v33160_v39 }
0x1190   : > { %26168 = vmatmul.mubr.msk.f32.gmra.mrb[250].mxu1 %vm372_vm0, %v30300_v20 }
0x1191   : > { %26170 = vmatprep.mubr.msk.f32.mxu1 %vm372_vm0, %v30319_v16 }
0x1194   : > { %26171 = vmatmul.mubr.msk.f32.gmra.mrb[252].mxu1 %vm372_vm0, %v33181_v3 }
0x1195   : > { %26173 = vmatprep.mubr.msk.f32.mxu1 %vm372_vm0, %v33182_v30 }
0x1198   : > { %26174 = vmatmul.mubr.msk.f32.gmra.mrb[254].mxu1 %vm372_vm0, %v33183_v17 }
0x1199   : > { %26176 = vmatprep.mubr.msk.f32.mxu1 %vm372_vm0, %v33184_v57 }
0x119c   : > { %26177 = vmatmul.mubr.msk.f32.gmra.mrb[0].mxu1 %vm372_vm0, %v33185_v0 }
0x119d   : > { %26179 = vmatprep.mubr.msk.f32.mxu1 %vm372_vm0, %v33186_v5 }
0x11a0   : > { %26180 = vmatmul.mubr.msk.f32.gmra.mrb[2].mxu1 %vm372_vm0, %v33187_v14 }
0x11a1   : > { %26182 = vmatprep.mubr.msk.f32.mxu1 %vm372_vm0, %v33188_v21 }
0x11a4   : > { %26183 = vmatmul.mubr.msk.f32.gmra.mrb[4].mxu1 %vm372_vm0, %v33189_v35 }
0x11a5   : > { %26185 = vmatprep.mubr.msk.f32.mxu1 %vm372_vm0, %v33190_v26 }
0x11a8   : > { %26186 = vmatmul.mubr.msk.f32.gmra.mrb[6].mxu1 %vm372_vm0, %v33191_v36 }
0x11a9   : > { %26230 = vmatprep.mubr.msk.f32.mxu1 %vm28243_vm11, %v33160_v39 }
0x121b   : > { %v31496_v27 = vpop.f32.mrb[216].mxu1 }
0x121c   : > { %v26016_v52 = vpop.f32.mrb[217].mxu1 }
0x121f   : > { %v31498_v8 = vpop.f32.mrb[218].mxu1 }
0x1220   : > { %v31500_v11 = vpop.f32.mrb[200].mxu0  ;;  %v26026_v49 = vpop.f32.mrb[219].mxu1 }
0x1221   : > { %v26021_v44 = vpop.f32.mrb[201].mxu0 }
0x1223   : > { %v31502_v7 = vpop.f32.mrb[220].mxu1 }
0x1224   : > { %33192 = vst [vmem:[#allocation5_spill] sm:$0xff] %v31502_v7  ;;  %v31504_v54 = vpop.f32.mrb[202].mxu0  ;;  %v26036_v50 = vpop.f32.mrb[221].mxu1 }
0x1225   : > { %33193 = vst [vmem:[#allocation6_spill] sm:$0xff] %v31504_v54  ;;  %v26031_v29 = vpop.f32.mrb[203].mxu0 }
0x1227   : > { %v31506_v51 = vpop.f32.mrb[222].mxu1 }
0x1228   : > { %33194 = vst [vmem:[#allocation7_spill] sm:$0xff] %v31506_v51  ;;  %v31508_v24 = vpop.f32.mrb[204].mxu0  ;;  %v26046_v38 = vpop.f32.mrb[223].mxu1 }
0x1229   : > { %33195 = vst [vmem:[#allocation8_spill] sm:$0xff] %v31508_v24  ;;  %v26041_v55 = vpop.f32.mrb[205].mxu0 }
0x122b   : > { %v31510_v4 = vpop.f32.mrb[224].mxu1 }
0x122c   : > { %33196 = vst [vmem:[#allocation9_spill] sm:$0xff] %v31510_v4  ;;  %v31512_v45 = vpop.f32.mrb[206].mxu0  ;;  %v26056_v48 = vpop.f32.mrb[225].mxu1 }
0x122d   : > { %33197 = vst [vmem:[#allocation10_spill] sm:$0xff] %v31512_v45  ;;  %v26051_v37 = vpop.f32.mrb[207].mxu0 }
0x122f   : > { %v31514_v2 = vpop.f32.mrb[226].mxu1 }
0x1230   : > { %33198 = vst [vmem:[#allocation11_spill] sm:$0xff] %v31514_v2  ;;  %v31516_v47 = vpop.f32.mrb[208].mxu0  ;;  %v26066_v6 = vpop.f32.mrb[227].mxu1 }
0x1231   : > { %33199 = vst [vmem:[#allocation12_spill] sm:$0xff] %v31516_v47  ;;  %v26061_v59 = vpop.f32.mrb[209].mxu0 }
0x1233   : > { %v31518_v25 = vpop.f32.mrb[228].mxu1 }
0x1234   : > { %33200 = vst [vmem:[#allocation13_spill] sm:$0xff] %v31518_v25  ;;  %v31520_v28 = vpop.f32.mrb[210].mxu0  ;;  %v26076_v40 = vpop.f32.mrb[229].mxu1 }
0x1235   : > { %33201 = vst [vmem:[#allocation14_spill] sm:$0xff] %v31520_v28  ;;  %v26071_v43 = vpop.f32.mrb[211].mxu0 }
0x1237   : > { %v31522_v63 = vpop.f32.mrb[230].mxu1 }
0x1238   : > { %33202 = vst [vmem:[#allocation15_spill] sm:$0xff] %v31522_v63  ;;  %v31524_v61 = vpop.f32.mrb[212].mxu0  ;;  %v26086_v32 = vpop.f32.mrb[231].mxu1 }
0x1239   : > { %33203 = vst [vmem:[#allocation32_spill] sm:$0xff] %v31524_v61  ;;  %v26081_v22 = vpop.f32.mrb[213].mxu0 }
0x123c   : > { %v31526_v62 = vpop.f32.mrb[214].mxu0 }
0x123d   : > { %33204 = vst [vmem:[#allocation33_spill] sm:$0xff] %v31526_v62  ;;  %v26091_v34 = vpop.f32.mrb[215].mxu0 }
0x123f   : > { %v26102_v12 = vpop.f32.mrb[232].mxu1 }
0x1240   : > { %v12571_v52 = vpop.f32.mrb[233].mxu1 }
0x1243   : > { %v26105_v49 = vpop.f32.mrb[234].mxu1 }
0x1244   : > { %v26134_v44 = vpop.f32.mrb[216].mxu0  ;;  %v12581_v50 = vpop.f32.mrb[235].mxu1 }
0x1245   : > { %v12716_v29 = vpop.f32.mrb[217].mxu0 }
0x1246   : > { %26189 = vmatpush3.xpose.msk.msra.mxu0 %vm856_vm1, %v12716_v29 }
0x1247   : > { %26193 = vmatprep.subr.mxu0 %v33160_v39  ;;  %v26108_v38 = vpop.f32.mrb[236].mxu1 }
0x1248   : > { %v26137_v55 = vpop.f32.mrb[218].mxu0  ;;  %v12591_v48 = vpop.f32.mrb[237].mxu1 }
0x1249   : > { %26191 = vmatmul.mubr.msk.f32.vlgmr.msra.gmra.mrb[232].mxu0 %vm856_vm1, %v12571_v52  ;;  %v12726_v37 = vpop.f32.mrb[219].mxu0 }
0x124a   : > { %26194 = vmatpush3.xpose.msk.msra.mxu0 %vm856_vm1, %v26134_v44  ;;  %26195 = vmatprep.mubr.msk.f32.mxu0 %vm28243_vm11, %v33160_v39 }
0x124b   : > { %26198 = vmatprep.subr.mxu0 %v33160_v39  ;;  %v26111_v6 = vpop.f32.mrb[238].mxu1 }
0x124c   : > { %v26140_v59 = vpop.f32.mrb[220].mxu0  ;;  %v12601_v40 = vpop.f32.mrb[239].mxu1 }
0x124d   : > { %26196 = vmatmul.mubr.msk.f32.vlgmr.msra.gmra.mrb[234].mxu0 %vm856_vm1, %v26102_v12  ;;  %v12736_v43 = vpop.f32.mrb[221].mxu0 }
0x124e   : > { %26199 = vmatpush3.xpose.msk.msra.mxu0 %vm856_vm1, %v12726_v37  ;;  %26200 = vmatprep.mubr.msk.f32.mxu0 %vm28243_vm11, %v33160_v39 }
0x124f   : > { %26203 = vmatprep.subr.mxu0 %v33160_v39  ;;  %v26114_v32 = vpop.f32.mrb[240].mxu1 }
0x1250   : > { %v26143_v22 = vpop.f32.mrb[222].mxu0  ;;  %v12611_v34 = vpop.f32.mrb[241].mxu1 }
0x1251   : > { %26201 = vmatmul.mubr.msk.f32.vlgmr.msra.gmra.mrb[236].mxu0 %vm856_vm1, %v12581_v50  ;;  %v12746_v52 = vpop.f32.mrb[223].mxu0 }
0x1252   : > { %26204 = vmatpush3.xpose.msk.msra.mxu0 %vm856_vm1, %v26137_v55  ;;  %26205 = vmatprep.mubr.msk.f32.mxu0 %vm28243_vm11, %v33160_v39 }
0x1253   : > { %26208 = vmatprep.subr.mxu0 %v33160_v39  ;;  %v26117_v12 = vpop.f32.mrb[242].mxu1 }
0x1254   : > { %v26146_v44 = vpop.f32.mrb[224].mxu0  ;;  %v12621_v29 = vpop.f32.mrb[243].mxu1 }
0x1255   : > { %26206 = vmatmul.mubr.msk.f32.vlgmr.msra.gmra.mrb[238].mxu0 %vm856_vm1, %v26105_v49  ;;  %v12756_v37 = vpop.f32.mrb[225].mxu0 }
0x1256   : > { %26209 = vmatpush3.xpose.msk.msra.mxu0 %vm856_vm1, %v12736_v43  ;;  %26210 = vmatprep.mubr.msk.f32.mxu0 %vm28243_vm11, %v33160_v39 }
0x1257   : > { %26213 = vmatprep.subr.mxu0 %v33160_v39  ;;  %26229 = vmatpush3.xpose.msk.msra.mxu1 %vm856_vm1, %v12756_v37  ;;  %v26120_v50 = vpop.f32.mrb[244].mxu1 }
0x1258   : > { %v26149_v55 = vpop.f32.mrb[226].mxu0  ;;  %26238 = vmatprep.subr.mxu1 %v33160_v39  ;;  %v12631_v15 = vpop.f32.mrb[245].mxu1 }
0x1259   : > { %26211 = vmatmul.mubr.msk.f32.vlgmr.msra.gmra.mrb[240].mxu0 %vm856_vm1, %v12591_v48  ;;  %v12766_v13 = vpop.f32.mrb[227].mxu0 }
0x125a   : > { %26214 = vmatpush3.xpose.msk.msra.mxu0 %vm856_vm1, %v26140_v59  ;;  %26215 = vmatprep.mubr.msk.f32.mxu0 %vm28243_vm11, %v33160_v39 }
0x125b   : > { %26218 = vmatprep.subr.mxu0 %v33160_v39  ;;  %26231 = vmatmul.mubr.msk.f32.vlgmr.msra.gmra.mrb[8].mxu1 %vm856_vm1, %v12611_v34  ;;  %v26123_v49 = vpop.f32.mrb[246].mxu1 }
0x125c   : > { %v26152_v43 = vpop.f32.mrb[228].mxu0  ;;  %26239 = vmatpush3.xpose.msk.msra.mxu1 %vm856_vm1, %v12766_v13  ;;  %26240 = vmatprep.mubr.msk.f32.mxu1 %vm28243_vm11, %v33160_v39  ;;  %v12641_v37 = vpop.f32.mrb[247].mxu1 }
0x125d   : > { %26216 = vmatmul.mubr.msk.f32.vlgmr.msra.gmra.mrb[242].mxu0 %vm856_vm1, %v26108_v38  ;;  %v12776_v48 = vpop.f32.mrb[229].mxu0  ;;  %26248 = vmatprep.subr.mxu1 %v33160_v39 }
0x125e   : > { %26219 = vmatpush3.xpose.msk.msra.mxu0 %vm856_vm1, %v12746_v52  ;;  %26220 = vmatprep.mubr.msk.f32.mxu0 %vm28243_vm11, %v33160_v39 }
0x125f   : > { %26223 = vmatprep.subr.mxu0 %v33160_v39  ;;  %26241 = vmatmul.mubr.msk.f32.vlgmr.msra.gmra.mrb[10].mxu1 %vm856_vm1, %v12621_v29 }
0x1260   : > { %v26155_v59 = vpop.f32.mrb[230].mxu0  ;;  %26249 = vmatpush3.xpose.msk.msra.mxu1 %vm856_vm1, %v12776_v48  ;;  %26250 = vmatprep.mubr.msk.f32.mxu1 %vm28243_vm11, %v33160_v39 }
0x1261   : > { %26221 = vmatmul.mubr.msk.f32.vlgmr.msra.gmra.mrb[244].mxu0 %vm856_vm1, %v12601_v40  ;;  %v12786_v13 = vpop.f32.mrb[231].mxu0  ;;  %26258 = vmatprep.subr.mxu1 %v33160_v39 }
0x1262   : > { %26224 = vmatpush3.xpose.msk.msra.mxu0 %vm856_vm1, %v26143_v22  ;;  %26225 = vmatprep.mubr.msk.f32.mxu0 %vm28243_vm11, %v33160_v39 }
0x1263   : > { %26233 = vmatprep.subr.mxu0 %v33160_v39  ;;  %26251 = vmatmul.mubr.msk.f32.vlgmr.msra.gmra.mrb[12].mxu1 %vm856_vm1, %v12631_v15 }
0x1264   : > { %26259 = vmatpush3.xpose.msk.msra.mxu1 %vm856_vm1, %v12786_v13  ;;  %26260 = vmatprep.mubr.msk.f32.mxu1 %vm28243_vm11, %v33160_v39 }
0x1265   : > { %26226 = vmatmul.mubr.msk.f32.vlgmr.msra.gmra.mrb[246].mxu0 %vm856_vm1, %v26111_v6  ;;  %26268 = vmatprep.subr.mxu1 %v33160_v39 }
0x1266   : > { %26234 = vmatpush3.xpose.msk.msra.mxu0 %vm856_vm1, %v26146_v44  ;;  %26235 = vmatprep.mubr.msk.f32.mxu0 %vm28243_vm11, %v33160_v39 }
0x1267   : > { %26243 = vmatprep.subr.mxu0 %v33160_v39  ;;  %26261 = vmatmul.mubr.msk.f32.vlgmr.msra.gmra.mrb[14].mxu1 %vm856_vm1, %v12641_v37 }
0x1268   : > { %26270 = vmatprep.mubr.msk.f32.mxu1 %vm28243_vm11, %v33160_v39 }
0x1269   : > { %26236 = vmatmul.mubr.msk.f32.vlgmr.msra.gmra.mrb[248].mxu0 %vm856_vm1, %v26114_v32 }
0x126a   : > { %26244 = vmatpush3.xpose.msk.msra.mxu0 %vm856_vm1, %v26149_v55  ;;  %26245 = vmatprep.mubr.msk.f32.mxu0 %vm28243_vm11, %v33160_v39 }
0x126b   : > { %26253 = vmatprep.subr.mxu0 %v33160_v39 }
0x126d   : > { %26246 = vmatmul.mubr.msk.f32.vlgmr.msra.gmra.mrb[250].mxu0 %vm856_vm1, %v26117_v12 }
0x126e   : > { %26254 = vmatpush3.xpose.msk.msra.mxu0 %vm856_vm1, %v26152_v43  ;;  %26255 = vmatprep.mubr.msk.f32.mxu0 %vm28243_vm11, %v33160_v39 }
0x126f   : > { %26263 = vmatprep.subr.mxu0 %v33160_v39 }
0x1271   : > { %26256 = vmatmul.mubr.msk.f32.vlgmr.msra.gmra.mrb[252].mxu0 %vm856_vm1, %v26120_v50 }
0x1272   : > { %26264 = vmatpush3.xpose.msk.msra.mxu0 %vm856_vm1, %v26155_v59  ;;  %26265 = vmatprep.mubr.msk.f32.mxu0 %vm28243_vm11, %v33160_v39 }
0x1273   : > { %26273 = vmatprep.subr.mxu0 %v33160_v39 }
0x1275   : > { %26266 = vmatmul.mubr.msk.f32.vlgmr.msra.gmra.mrb[254].mxu0 %vm856_vm1, %v26123_v49 }
0x1276   : > { %26275 = vmatprep.mubr.msk.f32.mxu0 %vm28243_vm11, %v33160_v39 }
0x131c   : > { %v13012_v15 = vpop.f32.mrb[232].mxu0 }
0x131d   : > { %v31608_v38 = vmul.f32 0.35355338, %v13012_v15  ;;  %v26192_v6 = vpop.f32.mrb[233].mxu0 }
0x131f   : > { %v14172_v40 = vsel %vm856_vm1, %v31608_v38, -inf }
0x1320   : > { %14173 = vmax.xlane.f32.xlu0 %v14172_v40  ;;  %v13088_v32 = vpop.f32.mrb[234].mxu0 }
0x1321   : > { %v31612_v22 = vmul.f32 0.35355338, %v13088_v32  ;;  %v26197_v34 = vpop.f32.mrb[235].mxu0 }
0x1323   : > { %v14175_v52 = vsel %vm856_vm1, %v31612_v22, -inf }
0x1324   : > { %14176 = vmax.xlane.f32.xlu1 %v14175_v52  ;;  %v13164_v12 = vpop.f32.mrb[236].mxu0 }
0x1325   : > { %v31616_v44 = vmul.f32 0.35355338, %v13164_v12  ;;  %v26202_v29 = vpop.f32.mrb[237].mxu0 }
0x1327   : > { %v14178_v50 = vsel %vm856_vm1, %v31616_v44, -inf }
0x1328   : > { %14179 = vmax.xlane.f32.xlu0 %v14178_v50  ;;  %v13240_v55 = vpop.f32.mrb[238].mxu0 }
0x1329   : > { %v31620_v49 = vmul.f32 0.35355338, %v13240_v55  ;;  %v26207_v43 = vpop.f32.mrb[239].mxu0 }
0x132b   : > { %v14181_v37 = vsel %vm856_vm1, %v31620_v49, -inf }
0x132c   : > { %14182 = vmax.xlane.f32.xlu1 %v14181_v37  ;;  %v13316_v48 = vpop.f32.mrb[240].mxu0 }
0x132d   : > { %v31624_v59 = vmul.f32 0.35355338, %v13316_v48  ;;  %v26212_v13 = vpop.f32.mrb[241].mxu0 }
0x132e   : > { %v26166_v13 = vpop.f32.mrb[248].mxu1 }
0x132f   : > { %v14184_v15 = vsel %vm856_vm1, %v31624_v59, -inf  ;;  %26274 = vmatpush3.msra.mxu0 %v26166_v13 }
0x1330   : > { %14185 = vmax.xlane.f32.xlu0 %v14184_v15  ;;  %v13392_v6 = vpop.f32.mrb[242].mxu0  ;;  %v12861_v15 = vpop.f32.mrb[249].mxu1  ;;  %26283 = vmatprep.subr.mxu0 %v33160_v39 }
0x1331   : > { %v31628_v40 = vmul.f32 0.35355338, %v13392_v6  ;;  %v26217_v32 = vpop.f32.mrb[243].mxu0  ;;  %v31640_v6 = vpop.f32.mrb[250].mxu1  ;;  %26269 = vmatpush3.msra.mxu1 %v12861_v15 }
0x1332   : > { %v31643_v32 = vpop.f32.mrb[251].mxu1  ;;  %26278 = vmatprep.subr.mxu1 %v33160_v39 }
0x1333   : > { %v14187_v34 = vsel %vm856_vm1, %v31628_v40, -inf }
0x1334   : > { %14188 = vmax.xlane.f32.xlu1 %v14187_v34  ;;  %v13468_v52 = vpop.f32.mrb[244].mxu0  ;;  %v31646_v34 = vpop.f32.mrb[252].mxu1 }
0x1335   : > { %v31632_v12 = vmul.f32 0.35355338, %v13468_v52  ;;  %v26222_v29 = vpop.f32.mrb[245].mxu0  ;;  %v31648_v52 = vpop.f32.mrb[253].mxu1 }
0x1336   : > { %v31650_v29 = vpop.f32.mrb[254].mxu1 }
0x1337   : > { %v14190_v50 = vsel %vm856_vm1, %v31632_v12, -inf }
0x1338   : > { %14191 = vmax.xlane.f32.xlu0 %v14190_v50  ;;  %v13544_v55 = vpop.f32.mrb[246].mxu0  ;;  %v31652_v50 = vpop.f32.mrb[255].mxu1 }
0x1339   : > { %v31636_v43 = vmul.f32 0.35355338, %v13544_v55  ;;  %v26227_v37 = vpop.f32.mrb[247].mxu0  ;;  %v31654_v55 = vpop.f32.mrb[0].mxu1 }
0x133b   : > { %v14193_v48 = vsel %vm856_vm1, %v31636_v43, -inf }
0x133c   : > { %14194 = vmax.xlane.f32.xlu1 %v14193_v48  ;;  %v31656_v37 = vpop.f32.mrb[248].mxu0  ;;  %v31658_v48 = vpop.f32.mrb[1].mxu1 }
0x133d   : > { %v26237_v13 = vpop.f32.mrb[249].mxu0  ;;  %v31660_v15 = vpop.f32.mrb[2].mxu1 }
0x133e   : > { %v31664_v41 = vpop.f32.mrb[3].mxu1 }
0x133f   : > { %v31666_v56 = vpop.f32.mrb[4].mxu1 }
0x1340   : > { %v31662_v53 = vpop.f32.mrb[250].mxu0  ;;  %v31670_v33 = vpop.f32.mrb[5].mxu1 }
0x1341   : > { %v26247_v18 = vpop.f32.mrb[251].mxu0  ;;  %v31672_v10 = vpop.f32.mrb[6].mxu1 }
0x1342   : > { %v31674_v42 = vpop.f32.mrb[7].mxu1 }
0x1343   : > { %v31676_v1 = vpop.f32.mrb[8].mxu1 }
0x1344   : > { %v31668_v60 = vpop.f32.mrb[252].mxu0  ;;  %v26232_v46 = vpop.f32.mrb[9].mxu1 }
0x1345   : > { %v26257_v9 = vpop.f32.mrb[253].mxu0  ;;  %v31680_v62 = vpop.f32.mrb[10].mxu1 }
0x1346   : > { %v26242_v18 = vpop.f32.mrb[11].mxu1 }
0x1347   : > { %v31682_v63 = vpop.f32.mrb[12].mxu1 }
0x1348   : > { %v31678_v13 = vpop.f32.mrb[254].mxu0  ;;  %v26252_v61 = vpop.f32.mrb[13].mxu1 }
0x1349   : > { %v26267_v23 = vpop.f32.mrb[255].mxu0  ;;  %v31684_v25 = vpop.f32.mrb[14].mxu1 }
0x134a   : > { %v26262_v28 = vpop.f32.mrb[15].mxu1 }
0x13ad   : > { %v14174_v9 = vpop.xlane.xlu0 %14173 }
0x13ae   : > { %v14220_v2 = vsub.f32 %v31608_v38, %v14174_v9 }
0x13b0   : > { %v14236_v47 = vmul.f32 1.442695, %v14220_v2 }
0x13b1   : > { %v14177_v4 = vpop.xlane.xlu1 %14176 }
0x13b2   : > { %27938 = vpow2.f32 %v14236_v47  ;;  %v14221_v45 = vsub.f32 %v31612_v22, %v14177_v4 }
0x13b4   : > { %v14238_v51 = vmul.f32 1.442695, %v14221_v45 }
0x13b5   : > { %v14180_v46 = vpop.xlane.xlu0 %14179 }
0x13b6   : > { %27940 = vpow2.f32 %v14238_v51  ;;  %v14222_v23 = vsub.f32 %v31616_v44, %v14180_v46 }
0x13b8   : > { %v14240_v18 = vmul.f32 1.442695, %v14222_v23 }
0x13b9   : > { %v14183_v24 = vpop.xlane.xlu1 %14182 }
0x13ba   : > { %27942 = vpow2.f32 %v14240_v18  ;;  %v14223_v61 = vsub.f32 %v31620_v49, %v14183_v24 }
0x13bc   : > { %v31690_v7 = vpop.eup %27938  ;;  %v14242_v28 = vmul.f32 1.442695, %v14223_v61 }
0x13bd   : > { %v14186_v54 = vpop.xlane.xlu0 %14185  ;;  %v14268_v2 = vsel %vm856_vm1, %v31690_v7, 0.0 }
0x13be   : > { %27944 = vpow2.f32 %v14242_v28  ;;  %v14224_v4 = vsub.f32 %v31624_v59, %v14186_v54  ;;  %14269 = vadd.xlane.f32.xlu0 %v14268_v2 }
0x13c0   : > { %v31695_v45 = vpop.eup %27940  ;;  %v14244_v51 = vmul.f32 1.442695, %v14224_v4 }
0x13c1   : > { %v14189_v47 = vpop.xlane.xlu1 %14188  ;;  %v14271_v38 = vsel %vm856_vm1, %v31695_v45, 0.0 }
0x13c2   : > { %27946 = vpow2.f32 %v14244_v51  ;;  %v14225_v24 = vsub.f32 %v31628_v40, %v14189_v47  ;;  %14272 = vadd.xlane.f32.xlu1 %v14271_v38  ;;  %v31719_v51 = vmul.f32 0.35355338, %v31656_v37  ;;  %v31726_v38 = vmul.f32 0.35355338, %v31662_v53 }
0x13c4   : > { %v31700_v22 = vpop.eup %27942  ;;  %v14246_v44 = vmul.f32 1.442695, %v14225_v24  ;;  %v14199_v24 = vsel %vm856_vm1, %v31719_v51, -inf  ;;  %v14205_v53 = vsel %vm856_vm1, %v31726_v38, -inf }
0x13c5   : > { %v14192_v49 = vpop.xlane.xlu0 %14191  ;;  %v14274_v9 = vsel %vm856_vm1, %v31700_v22, 0.0 }
0x13c6   : > { %27948 = vpow2.f32 %v14246_v44  ;;  %v14226_v54 = vsub.f32 %v31632_v12, %v14192_v49  ;;  %14275 = vadd.xlane.f32.xlu0 %v14274_v9  ;;  %v31731_v44 = vmul.f32 0.35355338, %v31668_v60  ;;  %v31738_v9 = vmul.f32 0.35355338, %v31676_v1 }
0x13c7   : > { %v31748_v60 = vmul.f32 0.35355338, %v31680_v62 }
0x13c8   : > { %v31705_v59 = vpop.eup %27944  ;;  %v14248_v46 = vmul.f32 1.442695, %v14226_v54  ;;  %v14211_v54 = vsel %vm856_vm1, %v31731_v44, -inf  ;;  %v14196_v1 = vsel %vm856_vm1, %v31738_v9, -inf }
0x13c9   : > { %v14195_v23 = vpop.xlane.xlu1 %14194  ;;  %v14277_v18 = vsel %vm856_vm1, %v31705_v59, 0.0 }
0x13ca   : > { %27950 = vpow2.f32 %v14248_v46  ;;  %v14227_v40 = vsub.f32 %v31636_v43, %v14195_v23  ;;  %14278 = vadd.xlane.f32.xlu1 %v14277_v18  ;;  %v31745_v46 = vmul.f32 0.35355338, %v31678_v13  ;;  %v31751_v23 = vmul.f32 0.35355338, %v31682_v63 }
0x13cb   : > { %v14202_v13 = vsel %vm856_vm1, %v31748_v60, -inf }
0x13cc   : > { %v31710_v61 = vpop.eup %27946  ;;  %v14250_v28 = vmul.f32 1.442695, %v14227_v40  ;;  %v14217_v18 = vsel %vm856_vm1, %v31745_v46, -inf  ;;  %v31758_v40 = vmul.f32 0.35355338, %v31684_v25  ;;  %v14208_v62 = vsel %vm856_vm1, %v31751_v23, -inf }
0x13cd   : > { %v14280_v2 = vsel %vm856_vm1, %v31710_v61, 0.0 }
0x13ce   : > { %27952 = vpow2.f32 %v14250_v28  ;;  %14281 = vadd.xlane.f32.xlu0 %v14280_v2  ;;  %v14214_v63 = vsel %vm856_vm1, %v31758_v40, -inf }
0x13d0   : > { %v31714_v12 = vpop.eup %27948 }
0x13d1   : > { %v14283_v4 = vsel %vm856_vm1, %v31714_v12, 0.0 }
0x13d2   : > { %14284 = vadd.xlane.f32.xlu1 %v14283_v4 }
0x13d4   : > { %v31721_v47 = vpop.eup %27950 }
0x13d5   : > { %v14286_v43 = vsel %vm856_vm1, %v31721_v47, 0.0 }
0x13d6   : > { %14287 = vadd.xlane.f32.xlu0 %v14286_v43 }
0x13d8   : > { %v31733_v49 = vpop.eup %27952 }
0x13d9   : > { %v14289_v37 = vsel %vm856_vm1, %v31733_v49, 0.0 }
0x13da   : > { %14290 = vadd.xlane.f32.xlu1 %v14289_v37  ;;  %14200 = vmax.xlane.f32.xlu0 %v14199_v24 }
0x13de   : > { %14206 = vmax.xlane.f32.xlu1 %v14205_v53  ;;  %14212 = vmax.xlane.f32.xlu0 %v14211_v54 }
0x13e2   : > { %14197 = vmax.xlane.f32.xlu1 %v14196_v1  ;;  %14218 = vmax.xlane.f32.xlu0 %v14217_v18 }
0x13e6   : > { %14203 = vmax.xlane.f32.xlu1 %v14202_v13  ;;  %14209 = vmax.xlane.f32.xlu0 %v14208_v62 }
0x13ea   : > { %14215 = vmax.xlane.f32.xlu1 %v14214_v63 }
0x144b   : > { %v14270_v28 = vpop.xlane.xlu0 %14269 }
0x144c   : > { %27954 = vrcp.f32 %v14270_v28 }
0x144f   : > { %v14273_v2 = vpop.xlane.xlu1 %14272 }
0x1450   : > { %27956 = vrcp.f32 %v14273_v2 }
0x1453   : > { %v14276_v4 = vpop.xlane.xlu0 %14275 }
0x1454   : > { %27958 = vrcp.f32 %v14276_v4 }
0x1456   : > { %v27955_v25 = vpop.eup %27954 }
0x1457   : > { %v14332_v43 = vmul.f32 %v27955_v25, %v31690_v7  ;;  %v14279_v24 = vpop.xlane.xlu1 %14278 }
0x1458   : > { %27960 = vrcp.f32 %v14279_v24 }
0x1459   : > { %26271 = vmatmul.mubr.msk.f32.vlgmr.msra.gmra.mrb[16].mxu1 %vm856_vm1, %v14332_v43 }
0x145a   : > { %v27957_v37 = vpop.eup %27956  ;;  %26279 = vmatpush3.msra.mxu1 %v31643_v32  ;;  %26280 = vmatprep.mubr.msk.f32.mxu1 %vm28243_vm11, %v33160_v39 }
0x145b   : > { %v14333_v53 = vmul.f32 %v27957_v37, %v31695_v45  ;;  %v14282_v54 = vpop.xlane.xlu0 %14281  ;;  %26288 = vmatprep.subr.mxu1 %v33160_v39 }
0x145c   : > { %27962 = vrcp.f32 %v14282_v54 }
0x145d   : > { %26276 = vmatmul.mubr.msk.f32.vlgmr.msra.gmra.mrb[0].mxu0 %vm856_vm1, %v14333_v53 }
0x145e   : > { %v27959_v1 = vpop.eup %27958  ;;  %26284 = vmatpush3.msra.mxu0 %v31640_v6  ;;  %26285 = vmatprep.mubr.msk.f32.mxu0 %vm28243_vm11, %v33160_v39 }
0x145f   : > { %v14334_v7 = vmul.f32 %v27959_v1, %v31700_v22  ;;  %v14285_v32 = vpop.xlane.xlu1 %14284  ;;  %26293 = vmatprep.subr.mxu0 %v33160_v39 }
0x1460   : > { %27964 = vrcp.f32 %v14285_v32 }
0x1461   : > { %26281 = vmatmul.mubr.msk.f32.vlgmr.msra.gmra.mrb[18].mxu1 %vm856_vm1, %v14334_v7 }
0x1462   : > { %v27961_v45 = vpop.eup %27960  ;;  %26289 = vmatpush3.msra.mxu1 %v31648_v52  ;;  %26290 = vmatprep.mubr.msk.f32.mxu1 %vm28243_vm11, %v33160_v39 }
0x1463   : > { %v14335_v18 = vmul.f32 %v27961_v45, %v31705_v59  ;;  %v14288_v6 = vpop.xlane.xlu0 %14287  ;;  %26298 = vmatprep.subr.mxu1 %v33160_v39 }
0x1464   : > { %27966 = vrcp.f32 %v14288_v6 }
0x1465   : > { %26286 = vmatmul.mubr.msk.f32.vlgmr.msra.gmra.mrb[2].mxu0 %vm856_vm1, %v14335_v18 }
0x1466   : > { %v27963_v22 = vpop.eup %27962  ;;  %26294 = vmatpush3.msra.mxu0 %v31646_v34  ;;  %26295 = vmatprep.mubr.msk.f32.mxu0 %vm28243_vm11, %v33160_v39 }
0x1467   : > { %v14336_v13 = vmul.f32 %v27963_v22, %v31710_v61  ;;  %v14291_v52 = vpop.xlane.xlu1 %14290  ;;  %v14201_v62 = vpop.xlane.xlu0 %14200  ;;  %26303 = vmatprep.subr.mxu0 %v33160_v39 }
0x1468   : > { %27968 = vrcp.f32 %v14291_v52  ;;  %v14229_v59 = vsub.f32 %v31719_v51, %v14201_v62 }
0x1469   : > { %26291 = vmatmul.mubr.msk.f32.vlgmr.msra.gmra.mrb[20].mxu1 %vm856_vm1, %v14336_v13 }
0x146a   : > { %v27965_v63 = vpop.eup %27964  ;;  %v14254_v28 = vmul.f32 1.442695, %v14229_v59  ;;  %26299 = vmatpush3.msra.mxu1 %v31652_v50  ;;  %26300 = vmatprep.mubr.msk.f32.mxu1 %vm28243_vm11, %v33160_v39 }
0x146b   : > { %v14337_v34 = vmul.f32 %v27965_v63, %v31714_v12  ;;  %v14207_v2 = vpop.xlane.xlu1 %14206  ;;  %v14213_v61 = vpop.xlane.xlu0 %14212  ;;  %26308 = vmatprep.subr.mxu1 %v33160_v39 }
0x146c   : > { %27970 = vpow2.f32 %v14254_v28  ;;  %v14231_v4 = vsub.f32 %v31726_v38, %v14207_v2  ;;  %v14233_v51 = vsub.f32 %v31731_v44, %v14213_v61 }
0x146d   : > { %26296 = vmatmul.mubr.msk.f32.vlgmr.msra.gmra.mrb[4].mxu0 %vm856_vm1, %v14337_v34 }
0x146e   : > { %v27967_v25 = vpop.eup %27966  ;;  %v14258_v43 = vmul.f32 1.442695, %v14231_v4  ;;  %v14262_v24 = vmul.f32 1.442695, %v14233_v51  ;;  %26304 = vmatpush3.msra.mxu0 %v31650_v29  ;;  %26305 = vmatprep.mubr.msk.f32.mxu0 %vm28243_vm11, %v33160_v39 }
0x146f   : > { %v14338_v50 = vmul.f32 %v27967_v25, %v31721_v47  ;;  %v14198_v12 = vpop.xlane.xlu1 %14197  ;;  %v14219_v37 = vpop.xlane.xlu0 %14218  ;;  %26313 = vmatprep.subr.mxu0 %v33160_v39 }
0x1470   : > { %27972 = vpow2.f32 %v14258_v43  ;;  %v14228_v38 = vsub.f32 %v31738_v9, %v14198_v12  ;;  %v14235_v44 = vsub.f32 %v31745_v46, %v14219_v37 }
0x1471   : > { %27974 = vpow2.f32 %v14262_v24  ;;  %26301 = vmatmul.mubr.msk.f32.vlgmr.msra.gmra.mrb[22].mxu1 %vm856_vm1, %v14338_v50 }
0x1472   : > { %v27969_v53 = vpop.eup %27968  ;;  %v14252_v54 = vmul.f32 1.442695, %v14228_v38  ;;  %v14266_v29 = vmul.f32 1.442695, %v14235_v44  ;;  %26309 = vmatpush3.msra.mxu1 %v31658_v48  ;;  %26310 = vmatprep.mubr.msk.f32.mxu1 %vm28243_vm11, %v33160_v39 }
0x1473   : > { %v14339_v47 = vmul.f32 %v27969_v53, %v31733_v49  ;;  %v14204_v1 = vpop.xlane.xlu1 %14203  ;;  %v14210_v7 = vpop.xlane.xlu0 %14209  ;;  %26318 = vmatprep.subr.mxu1 %v33160_v39 }
0x1474   : > { %27976 = vpow2.f32 %v14252_v54  ;;  %v14230_v9 = vsub.f32 %v31748_v60, %v14204_v1  ;;  %v14232_v46 = vsub.f32 %v31751_v23, %v14210_v7 }
0x1475   : > { %27978 = vpow2.f32 %v14266_v29  ;;  %26306 = vmatmul.mubr.msk.f32.vlgmr.msra.gmra.mrb[6].mxu0 %vm856_vm1, %v14339_v47 }
0x1476   : > { %v27971_v32 = vpop.eup %27970  ;;  %v14256_v45 = vmul.f32 1.442695, %v14230_v9  ;;  %v14260_v48 = vmul.f32 1.442695, %v14232_v46  ;;  %26314 = vmatpush3.msra.mxu0 %v31654_v55  ;;  %26315 = vmatprep.mubr.msk.f32.mxu0 %vm28243_vm11, %v33160_v39  ;;  %v363_v46 = vld [vmem:[%s33113_s4 + $0x8] sm:$0xff] }
0x1477   : > { %v14216_v49 = vpop.xlane.xlu1 %14215  ;;  %v14295_v18 = vsel %vm856_vm1, %v27971_v32, 0.0  ;;  %26323 = vmatprep.subr.mxu0 %v33160_v39 }
0x1478   : > { %27980 = vpow2.f32 %v14256_v45  ;;  %v14234_v60 = vsub.f32 %v31758_v40, %v14216_v49  ;;  %14296 = vadd.xlane.f32.xlu0 %v14295_v18 }
0x1479   : > { %27982 = vpow2.f32 %v14260_v48 }
0x147a   : > { %v27973_v23 = vpop.eup %27972  ;;  %v14264_v6 = vmul.f32 1.442695, %v14234_v60 }
0x147b   : > { %v27975_v22 = vpop.eup %27974  ;;  %v14301_v13 = vsel %vm856_vm1, %v27973_v23, 0.0 }
0x147c   : > { %27984 = vpow2.f32 %v14264_v6  ;;  %14302 = vadd.xlane.f32.xlu1 %v14301_v13  ;;  %v14307_v55 = vsel %vm856_vm1, %v27975_v22, 0.0  ;;  %v276_v6 = vld [vmem:[%s33110_s1 + $0x50] sm:$0xff] }
0x147d   : > { %14308 = vadd.xlane.f32.xlu0 %v14307_v55 }
0x147e   : > { %v27977_v52 = vpop.eup %27976 }
0x147f   : > { %v27979_v62 = vpop.eup %27978  ;;  %v14292_v59 = vsel %vm856_vm1, %v27977_v52, 0.0 }
0x1480   : > { %14293 = vadd.xlane.f32.xlu1 %v14292_v59  ;;  %v14313_v63 = vsel %vm856_vm1, %v27979_v62, 0.0 }
0x1481   : > { %14314 = vadd.xlane.f32.xlu0 %v14313_v63 }
0x1482   : > { %v27981_v40 = vpop.eup %27980 }
0x1483   : > { %v27983_v28 = vpop.eup %27982  ;;  %v14298_v34 = vsel %vm856_vm1, %v27981_v40, 0.0 }
0x1484   : > { %14299 = vadd.xlane.f32.xlu1 %v14298_v34  ;;  %v14304_v2 = vsel %vm856_vm1, %v27983_v28, 0.0 }
0x1485   : > { %14305 = vadd.xlane.f32.xlu0 %v14304_v2 }
0x1486   : > { %v31829_v61 = vpop.eup %27984 }
0x1487   : > { %v14310_v4 = vsel %vm856_vm1, %v31829_v61, 0.0 }
0x1488   : > { %14311 = vadd.xlane.f32.xlu1 %v14310_v4 }
0x1505   : > { %v14297_v51 = vpop.xlane.xlu0 %14296 }
0x1506   : > { %27986 = vrcp.f32 %v14297_v51 }
0x1509   : > { %v14303_v25 = vpop.xlane.xlu1 %14302 }
0x150a   : > { %27988 = vrcp.f32 %v14303_v25  ;;  %v14309_v43 = vpop.xlane.xlu0 %14308 }
0x150b   : > { %27990 = vrcp.f32 %v14309_v43 }
0x150d   : > { %v14294_v24 = vpop.xlane.xlu1 %14293 }
0x150e   : > { %27992 = vrcp.f32 %v14294_v24  ;;  %v14315_v50 = vpop.xlane.xlu0 %14314 }
0x150f   : > { %27994 = vrcp.f32 %v14315_v50 }
0x1510   : > { %v27987_v12 = vpop.eup %27986 }
0x1511   : > { %v14341_v37 = vmul.f32 %v27987_v12, %v27971_v32  ;;  %v14300_v38 = vpop.xlane.xlu1 %14299  ;;  %v275_v32 = vld [vmem:[%s33110_s1 + $0x48] sm:$0xff]  ;;  %v308_v12 = vld [vmem:[%s33111_s2 + $0x50] sm:$0xff] }
0x1512   : > { %27996 = vrcp.f32 %v14300_v38  ;;  %v14306_v44 = vpop.xlane.xlu0 %14305 }
0x1513   : > { %26316 = vmatmul.mubr.msk.f32.vlgmr.msra.gmra.mrb[8].mxu0 %vm856_vm1, %v14341_v37  ;;  %27998 = vrcp.f32 %v14306_v44  ;;  %v309_v37 = vld [vmem:[%s33111_s2 + $0x58] sm:$0xff] }
0x1514   : > { %v27989_v53 = vpop.eup %27988  ;;  %26324 = vmatpush3.msra.mxu0 %v31660_v15  ;;  %26325 = vmatprep.mubr.msk.f32.mxu0 %vm28243_vm11, %v33160_v39  ;;  %v27440_v44 = vpack.c.bf16 %v309_v37, %v308_v12 }
0x1515   : > { %v14343_v54 = vmul.f32 %v27989_v53, %v27973_v23  ;;  %v14312_v29 = vpop.xlane.xlu1 %14311  ;;  %26333 = vmatprep.subr.mxu0 %v33160_v39  ;;  %v27991_v47 = vpop.eup %27990  ;;  %v362_v53 = vld [vmem:[%s33113_s4] sm:$0xff] }
0x1516   : > { %28000 = vrcp.f32 %v14312_v29  ;;  %v14345_v7 = vmul.f32 %v27991_v47, %v27975_v22  ;;  %v277_v22 = vld [vmem:[%s33110_s1 + $0x58] sm:$0xff] }
0x1517   : > { %26326 = vmatmul.mubr.msk.f32.vlgmr.msra.gmra.mrb[10].mxu0 %vm856_vm1, %v14343_v54 }
0x1518   : > { %v27993_v1 = vpop.eup %27992  ;;  %26334 = vmatpush3.msra.mxu0 %v31666_v56  ;;  %26335 = vmatprep.mubr.msk.f32.mxu0 %vm28243_vm11, %v33160_v39  ;;  %v274_v56 = vld [vmem:[%s33110_s1 + $0x40] sm:$0xff] }
0x1519   : > { %v14340_v9 = vmul.f32 %v27993_v1, %v27977_v52  ;;  %26343 = vmatprep.subr.mxu0 %v33160_v39  ;;  %v27995_v15 = vpop.eup %27994  ;;  %v27428_v60 = vpack.c.bf16 %v275_v32, %v274_v56  ;;  %v306_v52 = vld [vmem:[%s33111_s2 + $0x40] sm:$0xff] }
0x151a   : > { %v14347_v48 = vmul.f32 %v27995_v15, %v27979_v62  ;;  %v307_v62 = vld [vmem:[%s33111_s2 + $0x48] sm:$0xff] }
0x151b   : > { %26311 = vmatmul.mubr.msk.f32.vlgmr.msra.gmra.mrb[24].mxu1 %vm856_vm1, %v14340_v9  ;;  %26336 = vmatmul.mubr.msk.f32.vlgmr.msra.gmra.mrb[12].mxu0 %vm856_vm1, %v14345_v7  ;;  %v27436_v63 = vpack.c.bf16 %v307_v62, %v306_v52  ;;  %v338_v7 = vld [vmem:[%s33112_s3 + $0x40] sm:$0xff]  ;;  %v339_v9 = vld [vmem:[%s33112_s3 + $0x48] sm:$0xff] }
0x151c   : > { %v27997_v45 = vpop.eup %27996  ;;  %26319 = vmatpush3.msra.mxu1 %v31664_v41  ;;  %26344 = vmatpush3.msra.mxu0 %v31672_v10  ;;  %v27444_v56 = vpack.c.bf16 %v339_v9, %v338_v7  ;;  %v33206_v62 = vld [vmem:[#allocation5_spill] sm:$0xff] }
0x151d   : > { %v14342_v49 = vmul.f32 %v27997_v45, %v27981_v40  ;;  %26320 = vmatprep.mubr.msk.f32.mxu1 %vm28243_vm11, %v33160_v39  ;;  %26328 = vmatprep.subr.mxu1 %v33160_v39  ;;  %v27999_v18 = vpop.eup %27998 }
0x151e   : > { %26345 = vmatprep.mubr.msk.f32.mxu0 %vm28243_vm11, %v33160_v39  ;;  %26348 = vmatprep.subr.mxu0 %v363_v46  ;;  %v14344_v10 = vmul.f32 %v27999_v18, %v27983_v28 }
0x151f   : > { %26321 = vmatmul.mubr.msk.f32.vlgmr.msra.gmra.mrb[26].mxu1 %vm856_vm1, %v14342_v49  ;;  %26346 = vmatmul.mubr.msk.f32.vlgmr.msra.gmra.mrb[14].mxu0 %vm856_vm1, %v14347_v48 }
0x1520   : > { %26329 = vmatpush3.msra.mxu1 %v31670_v33  ;;  %26330 = vmatprep.mubr.msk.f32.mxu1 %vm28243_vm11, %v33160_v39  ;;  %v28001_v41 = vpop.eup %28000 }
0x1521   : > { %26338 = vmatprep.subr.mxu1 %v33160_v39  ;;  %26349 = vmatpush3.msra.mxu0 %v363_v46  ;;  %v14346_v23 = vmul.f32 %v28001_v41, %v31829_v61 }
0x1522   : > { %27429 = vmatprep.subr.bf16.mxu0 %v27428_v60 }
0x1523   : > { %26331 = vmatmul.mubr.msk.f32.vlgmr.msra.gmra.mrb[28].mxu1 %vm856_vm1, %v14344_v10 }
0x1524   : > { %26339 = vmatpush3.msra.mxu1 %v31674_v42  ;;  %26340 = vmatprep.mubr.msk.f32.mxu1 %vm28243_vm11, %v33160_v39  ;;  %v27432_v42 = vpack.c.bf16 %v277_v22, %v276_v6  ;;  %v340_v6 = vld [vmem:[%s33112_s3 + $0x50] sm:$0xff]  ;;  %v341_v22 = vld [vmem:[%s33112_s3 + $0x58] sm:$0xff] }
0x1525   : > { %27476 = vmatprep.subr.mxu1 %v363_v46 }
0x1527   : > { %26341 = vmatmul.mubr.msk.f32.vlgmr.msra.gmra.mrb[30].mxu1 %vm856_vm1, %v14346_v23 }
0x1528   : > { %27477 = vmatpush3.msra.mxu1 %v363_v46 }
0x1529   : > { %26374 = vmatprep.subr.mxu1 %v362_v53 }
0x152c   : > { %v14417_v33 = vpop.f32.mrb[16].mxu1 }
0x152d   : > { %v26272_v13 = vpop.f32.mrb[17].mxu1  ;;  %26350 = vmatprep.mubr.msk.f32.mxu0 %vm856_vm1, %v14417_v33 }
0x152e   : > { %v27448_v13 = vpack.c.bf16 %v341_v22, %v340_v6 }
0x1530   : > { %v14490_v55 = vpop.f32.mrb[0].mxu0 }
0x1531   : > { %v26277_v59 = vpop.f32.mrb[1].mxu0  ;;  %26351 = vmatmul.mubr.msk.f32.vlgmr.msra.gmra.mrb[16].mxu0 %vm856_vm1, %v14490_v55  ;;  %v33205_v55 = vld [vmem:[#allocation6_spill] sm:$0xff] }
0x1532   : > { %27431 = vmatpush3.bf16.msra.mxu0 %v27428_v60  ;;  %v33209_v59 = vld [vmem:[#allocation10_spill] sm:$0xff] }
0x1533   : > { %27433 = vmatprep.subr.bf16.mxu0 %v27432_v42 }
0x1534   : > { %v14563_v40 = vpop.f32.mrb[18].mxu1 }
0x1535   : > { %v26282_v28 = vpop.f32.mrb[19].mxu1  ;;  %26353 = vmatprep.mubr.msk.f32.mxu0 %vm856_vm1, %v14563_v40  ;;  %v33211_v40 = vld [vmem:[#allocation9_spill] sm:$0xff] }
0x1536   : > { %27435 = vmatpush3.bf16.msra.mxu0 %v27432_v42  ;;  %v33212_v28 = vld [vmem:[#allocation12_spill] sm:$0xff] }
0x1537   : > { %27437 = vmatprep.subr.bf16.mxu0 %v27436_v63 }
0x1538   : > { %v14636_v34 = vpop.f32.mrb[2].mxu0 }
0x1539   : > { %v26287_v2 = vpop.f32.mrb[3].mxu0  ;;  %26354 = vmatmul.mubr.msk.f32.gmra.mrb[18].mxu0 %vm856_vm1, %v14636_v34  ;;  %v33213_v34 = vld [vmem:[#allocation11_spill] sm:$0xff] }
0x153c   : > { %v14709_v61 = vpop.f32.mrb[20].mxu1 }
0x153d   : > { %v26292_v4 = vpop.f32.mrb[21].mxu1  ;;  %26356 = vmatprep.mubr.msk.f32.mxu0 %vm856_vm1, %v14709_v61  ;;  %v33215_v61 = vld [vmem:[#allocation14_spill] sm:$0xff] }
0x1540   : > { %v14782_v51 = vpop.f32.mrb[4].mxu0 }
0x1541   : > { %v26297_v25 = vpop.f32.mrb[5].mxu0  ;;  %26357 = vmatmul.mubr.msk.f32.gmra.mrb[20].mxu0 %vm856_vm1, %v14782_v51  ;;  %v33217_v51 = vld [vmem:[#allocation13_spill] sm:$0xff] }
0x1542   : > { %v33218_v25 = vld [vmem:[#allocation32_spill] sm:$0xff] }
0x1544   : > { %v14855_v43 = vpop.f32.mrb[22].mxu1 }
0x1545   : > { %v26302_v24 = vpop.f32.mrb[23].mxu1  ;;  %26359 = vmatprep.mubr.msk.f32.mxu0 %vm856_vm1, %v14855_v43  ;;  %v33219_v43 = vld [vmem:[#allocation15_spill] sm:$0xff] }
0x1548   : > { %v14928_v50 = vpop.f32.mrb[6].mxu0 }
0x1549   : > { %v26307_v38 = vpop.f32.mrb[7].mxu0  ;;  %26360 = vmatmul.mubr.msk.f32.gmra.mrb[22].mxu0 %vm856_vm1, %v14928_v50  ;;  %v33221_v50 = vld [vmem:[#allocation33_spill] sm:$0xff] }
0x154a   : > { %26408 = vmatprep.mubr.msk.f32.mxu0 %vm372_vm0, %v30228_v19 }
0x154d   : > { %26409 = vmatmul.mubr.msk.f32.vlgmr.msra.gmra.mrb[24].mxu0 %vm372_vm0, %v30254_v58 }
0x154e   : > { %26411 = vmatprep.mubr.msk.f32.mxu0 %vm372_vm0, %v30274_v31  ;;  %27439 = vmatpush3.bf16.msra.mxu0 %v27436_v63 }
0x154f   : > { %27441 = vmatprep.subr.bf16.mxu0 %v27440_v44 }
0x1551   : > { %26412 = vmatmul.mubr.msk.f32.gmra.mrb[26].mxu0 %vm372_vm0, %v30300_v20 }
0x1552   : > { %26414 = vmatprep.mubr.msk.f32.mxu0 %vm372_vm0, %v30319_v16  ;;  %27443 = vmatpush3.bf16.msra.mxu0 %v27440_v44 }
0x1553   : > { %26496 = vmatprep.subr.mxu0 %v33160_v39 }
0x1555   : > { %26415 = vmatmul.mubr.msk.f32.gmra.mrb[28].mxu0 %vm372_vm0, %v33181_v3 }
0x1556   : > { %26417 = vmatprep.mubr.msk.f32.mxu0 %vm372_vm0, %v33182_v30 }
0x1559   : > { %26418 = vmatmul.mubr.msk.f32.gmra.mrb[30].mxu0 %vm372_vm0, %v33183_v17 }
0x155a   : > { %26420 = vmatprep.mubr.msk.f32.mxu0 %vm372_vm0, %v33184_v57 }
0x155d   : > { %26421 = vmatmul.mubr.msk.f32.gmra.mrb[32].mxu0 %vm372_vm0, %v33185_v0 }
0x155e   : > { %26423 = vmatprep.mubr.msk.f32.mxu0 %vm372_vm0, %v33186_v5 }
0x1561   : > { %26424 = vmatmul.mubr.msk.f32.gmra.mrb[34].mxu0 %vm372_vm0, %v33187_v14 }
0x1562   : > { %26426 = vmatprep.mubr.msk.f32.mxu0 %vm372_vm0, %v33188_v21 }
0x1565   : > { %26427 = vmatmul.mubr.msk.f32.gmra.mrb[36].mxu0 %vm372_vm0, %v33189_v35 }
0x1566   : > { %26429 = vmatprep.mubr.msk.f32.mxu0 %vm372_vm0, %v33190_v26 }
0x1569   : > { %26430 = vmatmul.mubr.msk.f32.gmra.mrb[38].mxu0 %vm372_vm0, %v33191_v36 }
0x156a   : > { %26440 = vmatprep.mubr.msk.f32.mxu0 %vm372_vm0, %v30228_v19 }
0x156d   : > { %26441 = vmatmul.mubr.msk.f32.vlgmr.msra.gmra.mrb[40].mxu0 %vm372_vm0, %v30254_v58 }
0x156e   : > { %26443 = vmatprep.mubr.msk.f32.mxu0 %vm372_vm0, %v30274_v31 }
0x1571   : > { %26444 = vmatmul.mubr.msk.f32.gmra.mrb[42].mxu0 %vm372_vm0, %v30300_v20 }
0x1572   : > { %26446 = vmatprep.mubr.msk.f32.mxu0 %vm372_vm0, %v30319_v16 }
0x1575   : > { %26447 = vmatmul.mubr.msk.f32.gmra.mrb[44].mxu0 %vm372_vm0, %v33181_v3 }
0x1576   : > { %26449 = vmatprep.mubr.msk.f32.mxu0 %vm372_vm0, %v33182_v30 }
0x1579   : > { %26450 = vmatmul.mubr.msk.f32.gmra.mrb[46].mxu0 %vm372_vm0, %v33183_v17 }
0x157a   : > { %26452 = vmatprep.mubr.msk.f32.mxu0 %vm372_vm0, %v33184_v57 }
0x157d   : > { %26453 = vmatmul.mubr.msk.f32.gmra.mrb[48].mxu0 %vm372_vm0, %v33185_v0 }
0x157e   : > { %26455 = vmatprep.mubr.msk.f32.mxu0 %vm372_vm0, %v33186_v5 }
0x1581   : > { %26456 = vmatmul.mubr.msk.f32.gmra.mrb[50].mxu0 %vm372_vm0, %v33187_v14 }
0x1582   : > { %26458 = vmatprep.mubr.msk.f32.mxu0 %vm372_vm0, %v33188_v21 }
0x1585   : > { %26459 = vmatmul.mubr.msk.f32.gmra.mrb[52].mxu0 %vm372_vm0, %v33189_v35 }
0x1586   : > { %26461 = vmatprep.mubr.msk.f32.mxu0 %vm372_vm0, %v33190_v26 }
0x1589   : > { %26462 = vmatmul.mubr.msk.f32.gmra.mrb[54].mxu0 %vm372_vm0, %v33191_v36 }
0x158a   : > { %26498 = vmatprep.mubr.msk.f32.mxu0 %vm28243_vm11, %v33160_v39 }
0x15e6   : > { %v15074_v54 = vpop.f32.mrb[8].mxu0 }
0x15e7   : > { %v26317_v29 = vpop.f32.mrb[9].mxu0 }
0x15ea   : > { %v15220_v47 = vpop.f32.mrb[10].mxu0 }
0x15eb   : > { %v26327_v1 = vpop.f32.mrb[11].mxu0 }
0x15ee   : > { %v15001_v15 = vpop.f32.mrb[24].mxu1  ;;  %v15366_v46 = vpop.f32.mrb[12].mxu0 }
0x15ef   : > { %v26312_v32 = vpop.f32.mrb[25].mxu1  ;;  %v26337_v45 = vpop.f32.mrb[13].mxu0  ;;  %26362 = vmatprep.mubr.msk.f32.mxu1 %vm856_vm1, %v15001_v15 }
0x15f0   : > { %26363 = vmatmul.mubr.msk.f32.vlgmr.msra.gmra.mrb[32].mxu1 %vm856_vm1, %v15074_v54 }
0x15f1   : > { %26375 = vmatpush3.msra.mxu1 %v362_v53 }
0x15f2   : > { %v15147_v48 = vpop.f32.mrb[26].mxu1  ;;  %v15512_v49 = vpop.f32.mrb[14].mxu0  ;;  %27445 = vmatprep.subr.bf16.mxu1 %v27444_v56 }
0x15f3   : > { %v26322_v18 = vpop.f32.mrb[27].mxu1  ;;  %v26347_v60 = vpop.f32.mrb[15].mxu0  ;;  %26365 = vmatprep.mubr.msk.f32.mxu1 %vm856_vm1, %v15147_v48 }
0x15f4   : > { %26366 = vmatmul.mubr.msk.f32.gmra.mrb[34].mxu1 %vm856_vm1, %v15220_v47 }
0x15f6   : > { %v15293_v10 = vpop.f32.mrb[28].mxu1 }
0x15f7   : > { %v26332_v41 = vpop.f32.mrb[29].mxu1  ;;  %26368 = vmatprep.mubr.msk.f32.mxu1 %vm856_vm1, %v15293_v10 }
0x15f8   : > { %26369 = vmatmul.mubr.msk.f32.gmra.mrb[36].mxu1 %vm856_vm1, %v15366_v46 }
0x15fa   : > { %v15439_v23 = vpop.f32.mrb[30].mxu1 }
0x15fb   : > { %v26342_v33 = vpop.f32.mrb[31].mxu1  ;;  %26371 = vmatprep.mubr.msk.f32.mxu1 %vm856_vm1, %v15439_v23 }
0x15fc   : > { %26372 = vmatmul.mubr.msk.f32.gmra.mrb[38].mxu1 %vm856_vm1, %v15512_v49 }
0x15fd   : > { %26376 = vmatprep.mubr.msk.f32.mxu1 %vm856_vm1, %v31496_v27  ;;  %v33207_v27 = vld [vmem:[#allocation8_spill] sm:$0xff] }
0x1600   : > { %26377 = vmatmul.mubr.msk.f32.vlgmr.msra.gmra.mrb[40].mxu1 %vm856_vm1, %v31500_v11  ;;  %v33208_v11 = vld [vmem:[#allocation7_spill] sm:$0xff] }
0x1601   : > { %26379 = vmatprep.mubr.msk.f32.mxu1 %vm856_vm1, %v31498_v8  ;;  %27447 = vmatpush3.bf16.msra.mxu1 %v27444_v56 }
0x1602   : > { %27449 = vmatprep.subr.bf16.mxu1 %v27448_v13 }
0x1604   : > { %v31995_v42 = vpop.f32.mrb[16].mxu0  ;;  %26380 = vmatmul.mubr.msk.f32.gmra.mrb[42].mxu1 %vm856_vm1, %v33205_v55 }
0x1605   : > { %v31999_v52 = vpop.f32.mrb[17].mxu0  ;;  %26382 = vmatprep.mubr.msk.f32.mxu1 %vm856_vm1, %v33206_v62  ;;  %27451 = vmatpush3.bf16.msra.mxu1 %v27448_v13 }
0x1606   : > { %26531 = vmatprep.subr.mxu1 %v33160_v39 }
0x1608   : > { %26383 = vmatmul.mubr.msk.f32.gmra.mrb[44].mxu1 %vm856_vm1, %v33207_v27 }
0x1609   : > { %26385 = vmatprep.mubr.msk.f32.mxu1 %vm856_vm1, %v33208_v11 }
0x160c   : > { %v32008_v8 = vpop.f32.mrb[18].mxu0  ;;  %26386 = vmatmul.mubr.msk.f32.gmra.mrb[46].mxu1 %vm856_vm1, %v33209_v59 }
0x160d   : > { %v32012_v63 = vpop.f32.mrb[19].mxu0  ;;  %26388 = vmatprep.mubr.msk.f32.mxu1 %vm856_vm1, %v33211_v40 }
0x160e   : > { %33210 = vst [vmem:[#allocation6_spill] sm:$0xff] %v32012_v63 }
0x1610   : > { %26389 = vmatmul.mubr.msk.f32.gmra.mrb[32].mxu1 %vm856_vm1, %v33212_v28 }
0x1611   : > { %26391 = vmatprep.mubr.msk.f32.mxu1 %vm856_vm1, %v33213_v34 }
0x1614   : > { %v32020_v2 = vpop.f32.mrb[20].mxu0  ;;  %26392 = vmatmul.mubr.msk.f32.gmra.mrb[34].mxu1 %vm856_vm1, %v33215_v61 }
0x1615   : > { %33214 = vst [vmem:[#allocation5_spill] sm:$0xff] %v32020_v2  ;;  %v32024_v4 = vpop.f32.mrb[21].mxu0  ;;  %26394 = vmatprep.mubr.msk.f32.mxu1 %vm856_vm1, %v33217_v51 }
0x1616   : > { %33216 = vst [vmem:[#allocation8_spill] sm:$0xff] %v32024_v4 }
0x1618   : > { %26395 = vmatmul.mubr.msk.f32.gmra.mrb[36].mxu1 %vm856_vm1, %v33218_v25 }
0x1619   : > { %26397 = vmatprep.mubr.msk.f32.mxu1 %vm856_vm1, %v33219_v43 }
0x161c   : > { %v32032_v24 = vpop.f32.mrb[22].mxu0  ;;  %26398 = vmatmul.mubr.msk.f32.gmra.mrb[38].mxu1 %vm856_vm1, %v33221_v50 }
0x161d   : > { %33220 = vst [vmem:[#allocation7_spill] sm:$0xff] %v32032_v24  ;;  %v32036_v12 = vpop.f32.mrb[23].mxu0  ;;  %26472 = vmatprep.mubr.msk.f32.mxu1 %vm372_vm0, %v30228_v19 }
0x161e   : > { %33222 = vst [vmem:[#allocation10_spill] sm:$0xff] %v32036_v12 }
0x1620   : > { %v26410_v37 = vpop.f32.mrb[24].mxu0  ;;  %26473 = vmatmul.mubr.msk.f32.vlgmr.msra.gmra.mrb[48].mxu1 %vm372_vm0, %v30254_v58 }
0x1621   : > { %v15968_v38 = vpop.f32.mrb[25].mxu0  ;;  %26475 = vmatprep.mubr.msk.f32.mxu1 %vm372_vm0, %v30274_v31 }
0x1624   : > { %v26413_v44 = vpop.f32.mrb[26].mxu0  ;;  %26476 = vmatmul.mubr.msk.f32.gmra.mrb[50].mxu1 %vm372_vm0, %v30300_v20 }
0x1625   : > { %v15978_v53 = vpop.f32.mrb[27].mxu0  ;;  %26478 = vmatprep.mubr.msk.f32.mxu1 %vm372_vm0, %v30319_v16 }
0x1628   : > { %v32048_v54 = vpop.f32.mrb[28].mxu0  ;;  %26479 = vmatmul.mubr.msk.f32.gmra.mrb[52].mxu1 %vm372_vm0, %v33181_v3 }
0x1629   : > { %v15988_v29 = vpop.f32.mrb[29].mxu0  ;;  %26481 = vmatprep.mubr.msk.f32.mxu1 %vm372_vm0, %v33182_v30 }
0x162c   : > { %v26419_v47 = vpop.f32.mrb[30].mxu0  ;;  %26482 = vmatmul.mubr.msk.f32.gmra.mrb[54].mxu1 %vm372_vm0, %v33183_v17 }
0x162d   : > { %v32056_v1 = vpop.f32.mrb[31].mxu0  ;;  %26484 = vmatprep.mubr.msk.f32.mxu1 %vm372_vm0, %v33184_v57 }
0x1630   : > { %v26422_v7 = vpop.f32.mrb[32].mxu0  ;;  %26485 = vmatmul.mubr.msk.f32.gmra.mrb[56].mxu1 %vm372_vm0, %v33185_v0 }
0x1631   : > { %v32062_v9 = vpop.f32.mrb[33].mxu0  ;;  %26487 = vmatprep.mubr.msk.f32.mxu1 %vm372_vm0, %v33186_v5 }
0x1634   : > { %v26425_v15 = vpop.f32.mrb[34].mxu0  ;;  %26488 = vmatmul.mubr.msk.f32.gmra.mrb[58].mxu1 %vm372_vm0, %v33187_v14 }
0x1635   : > { %v32068_v46 = vpop.f32.mrb[35].mxu0  ;;  %26490 = vmatprep.mubr.msk.f32.mxu1 %vm372_vm0, %v33188_v21 }
0x1638   : > { %v26428_v56 = vpop.f32.mrb[36].mxu0  ;;  %26491 = vmatmul.mubr.msk.f32.gmra.mrb[60].mxu1 %vm372_vm0, %v33189_v35 }
0x1639   : > { %v32074_v32 = vpop.f32.mrb[37].mxu0  ;;  %26493 = vmatprep.mubr.msk.f32.mxu1 %vm372_vm0, %v33190_v26 }
0x163c   : > { %v32078_v45 = vpop.f32.mrb[38].mxu0  ;;  %26494 = vmatmul.mubr.msk.f32.gmra.mrb[62].mxu1 %vm372_vm0, %v33191_v36 }
0x163d   : > { %v32082_v48 = vpop.f32.mrb[39].mxu0  ;;  %26533 = vmatprep.mubr.msk.f32.mxu1 %vm28243_vm11, %v33160_v39 }
0x1640   : > { %v26442_v49 = vpop.f32.mrb[40].mxu0 }
0x1641   : > { %v16113_v18 = vpop.f32.mrb[41].mxu0 }
0x1642   : > { %26497 = vmatpush3.xpose.msk.msra.mxu0 %vm856_vm1, %v16113_v18 }
0x1643   : > { %26501 = vmatprep.subr.mxu0 %v33160_v39 }
0x1644   : > { %v26445_v60 = vpop.f32.mrb[42].mxu0 }
0x1645   : > { %26499 = vmatmul.mubr.msk.f32.vlgmr.msra.gmra.mrb[56].mxu0 %vm856_vm1, %v15968_v38  ;;  %v16123_v10 = vpop.f32.mrb[43].mxu0 }
0x1646   : > { %26502 = vmatpush3.xpose.msk.msra.mxu0 %vm856_vm1, %v26442_v49  ;;  %26503 = vmatprep.mubr.msk.f32.mxu0 %vm28243_vm11, %v33160_v39 }
0x1647   : > { %26506 = vmatprep.subr.mxu0 %v33160_v39 }
0x1648   : > { %v26448_v41 = vpop.f32.mrb[44].mxu0 }
0x1649   : > { %26504 = vmatmul.mubr.msk.f32.vlgmr.msra.gmra.mrb[58].mxu0 %vm856_vm1, %v26410_v37  ;;  %v16133_v23 = vpop.f32.mrb[45].mxu0 }
0x164a   : > { %26507 = vmatpush3.xpose.msk.msra.mxu0 %vm856_vm1, %v16123_v10  ;;  %26508 = vmatprep.mubr.msk.f32.mxu0 %vm28243_vm11, %v33160_v39 }
0x164b   : > { %26511 = vmatprep.subr.mxu0 %v33160_v39 }
0x164c   : > { %v26451_v33 = vpop.f32.mrb[46].mxu0 }
0x164d   : > { %26509 = vmatmul.mubr.msk.f32.vlgmr.msra.gmra.mrb[60].mxu0 %vm856_vm1, %v15978_v53  ;;  %26532 = vmatpush3.xpose.msk.msra.mxu1 %vm856_vm1, %v26451_v33  ;;  %v16143_v6 = vpop.f32.mrb[47].mxu0 }
0x164e   : > { %26512 = vmatpush3.xpose.msk.msra.mxu0 %vm856_vm1, %v26445_v60  ;;  %26513 = vmatprep.mubr.msk.f32.mxu0 %vm28243_vm11, %v33160_v39 }
0x164f   : > { %26541 = vmatprep.subr.mxu1 %v33160_v39  ;;  %26516 = vmatprep.subr.mxu0 %v33160_v39 }
0x1650   : > { %v26454_v22 = vpop.f32.mrb[48].mxu0  ;;  %26534 = vmatmul.mubr.msk.f32.vlgmr.msra.gmra.mrb[64].mxu1 %vm856_vm1, %v26419_v47 }
0x1651   : > { %26514 = vmatmul.mubr.msk.f32.vlgmr.msra.gmra.mrb[62].mxu0 %vm856_vm1, %v26413_v44  ;;  %26542 = vmatpush3.xpose.msk.msra.mxu1 %vm856_vm1, %v26454_v22  ;;  %v16153_v13 = vpop.f32.mrb[49].mxu0 }
0x1652   : > { %26517 = vmatpush3.xpose.msk.msra.mxu0 %vm856_vm1, %v16133_v23  ;;  %26543 = vmatprep.mubr.msk.f32.mxu1 %vm28243_vm11, %v33160_v39 }
0x1653   : > { %26518 = vmatprep.mubr.msk.f32.mxu0 %vm28243_vm11, %v33160_v39  ;;  %26551 = vmatprep.subr.mxu1 %v33160_v39 }
0x1654   : > { %v26457_v55 = vpop.f32.mrb[50].mxu0  ;;  %26544 = vmatmul.mubr.msk.f32.vlgmr.msra.gmra.mrb[66].mxu1 %vm856_vm1, %v26422_v7  ;;  %26521 = vmatprep.subr.mxu0 %v33160_v39 }
0x1655   : > { %26519 = vmatmul.mubr.msk.f32.vlgmr.msra.gmra.mrb[64].mxu0 %vm856_vm1, %v15988_v29  ;;  %26552 = vmatpush3.xpose.msk.msra.mxu1 %vm856_vm1, %v26457_v55  ;;  %v16163_v62 = vpop.f32.mrb[51].mxu0 }
0x1656   : > { %26522 = vmatpush3.xpose.msk.msra.mxu0 %vm856_vm1, %v26448_v41  ;;  %26553 = vmatprep.mubr.msk.f32.mxu1 %vm28243_vm11, %v33160_v39 }
0x1657   : > { %26523 = vmatprep.mubr.msk.f32.mxu0 %vm28243_vm11, %v33160_v39  ;;  %26561 = vmatprep.subr.mxu1 %v33160_v39 }
0x1658   : > { %v26460_v27 = vpop.f32.mrb[52].mxu0  ;;  %26554 = vmatmul.mubr.msk.f32.vlgmr.msra.gmra.mrb[68].mxu1 %vm856_vm1, %v26425_v15  ;;  %26526 = vmatprep.subr.mxu0 %v33160_v39 }
0x1659   : > { %26524 = vmatmul.mubr.msk.f32.vlgmr.msra.gmra.mrb[66].mxu0 %vm856_vm1, %v32048_v54  ;;  %26562 = vmatpush3.xpose.msk.msra.mxu1 %vm856_vm1, %v26460_v27  ;;  %v16173_v11 = vpop.f32.mrb[53].mxu0 }
0x165a   : > { %26527 = vmatpush3.xpose.msk.msra.mxu0 %vm856_vm1, %v16143_v6  ;;  %26563 = vmatprep.mubr.msk.f32.mxu1 %vm28243_vm11, %v33160_v39 }
0x165b   : > { %26528 = vmatprep.mubr.msk.f32.mxu0 %vm28243_vm11, %v33160_v39  ;;  %26571 = vmatprep.subr.mxu1 %v33160_v39 }
0x165c   : > { %v26463_v59 = vpop.f32.mrb[54].mxu0  ;;  %26564 = vmatmul.mubr.msk.f32.vlgmr.msra.gmra.mrb[70].mxu1 %vm856_vm1, %v26428_v56  ;;  %26536 = vmatprep.subr.mxu0 %v33160_v39 }
0x165d   : > { %26529 = vmatmul.mubr.msk.f32.vlgmr.msra.gmra.mrb[68].mxu0 %vm856_vm1, %v32056_v1  ;;  %26572 = vmatpush3.xpose.msk.msra.mxu1 %vm856_vm1, %v26463_v59  ;;  %v16183_v40 = vpop.f32.mrb[55].mxu0 }
0x165e   : > { %26537 = vmatpush3.xpose.msk.msra.mxu0 %vm856_vm1, %v16153_v13  ;;  %26573 = vmatprep.mubr.msk.f32.mxu1 %vm28243_vm11, %v33160_v39 }
0x165f   : > { %26538 = vmatprep.mubr.msk.f32.mxu0 %vm28243_vm11, %v33160_v39  ;;  %26546 = vmatprep.subr.mxu0 %v33160_v39 }
0x1660   : > { %26574 = vmatmul.mubr.msk.f32.vlgmr.msra.gmra.mrb[72].mxu1 %vm856_vm1, %v32078_v45  ;;  %26581 = vmatprep.subr.mxu1 %v33160_v39 }
0x1661   : > { %26539 = vmatmul.mubr.msk.f32.vlgmr.msra.gmra.mrb[70].mxu0 %vm856_vm1, %v32062_v9  ;;  %26583 = vmatprep.mubr.msk.f32.mxu1 %vm28243_vm11, %v33160_v39 }
0x1662   : > { %26547 = vmatpush3.xpose.msk.msra.mxu0 %vm856_vm1, %v16163_v62  ;;  %26548 = vmatprep.mubr.msk.f32.mxu0 %vm28243_vm11, %v33160_v39 }
0x1663   : > { %26556 = vmatprep.subr.mxu0 %v33160_v39 }
0x1665   : > { %26549 = vmatmul.mubr.msk.f32.vlgmr.msra.gmra.mrb[72].mxu0 %vm856_vm1, %v32068_v46 }
0x1666   : > { %26557 = vmatpush3.xpose.msk.msra.mxu0 %vm856_vm1, %v16173_v11  ;;  %26558 = vmatprep.mubr.msk.f32.mxu0 %vm28243_vm11, %v33160_v39 }
0x1667   : > { %26566 = vmatprep.subr.mxu0 %v33160_v39 }
0x1669   : > { %26559 = vmatmul.mubr.msk.f32.vlgmr.msra.gmra.mrb[74].mxu0 %vm856_vm1, %v32074_v32 }
0x166a   : > { %26567 = vmatpush3.xpose.msk.msra.mxu0 %vm856_vm1, %v16183_v40  ;;  %26568 = vmatprep.mubr.msk.f32.mxu0 %vm28243_vm11, %v33160_v39 }
0x166b   : > { %26576 = vmatprep.subr.mxu0 %v33160_v39 }
0x166d   : > { %26569 = vmatmul.mubr.msk.f32.vlgmr.msra.gmra.mrb[76].mxu0 %vm856_vm1, %v32082_v48 }
0x166e   : > { %26578 = vmatprep.mubr.msk.f32.mxu0 %vm28243_vm11, %v33160_v39 }
0x16f3   : > { %v26474_v28 = vpop.f32.mrb[48].mxu1 }
0x16f4   : > { %v16258_v34 = vpop.f32.mrb[49].mxu1  ;;  %26582 = vmatpush3.msra.mxu1 %v26474_v28 }
0x16f5   : > { %26577 = vmatpush3.msra.mxu0 %v16258_v34  ;;  %26591 = vmatprep.subr.mxu1 %v33160_v39 }
0x16f6   : > { %26586 = vmatprep.subr.mxu0 %v33160_v39 }
0x16f7   : > { %v32175_v61 = vpop.f32.mrb[50].mxu1 }
0x16f8   : > { %v32177_v51 = vpop.f32.mrb[51].mxu1 }
0x16fb   : > { %v32179_v25 = vpop.f32.mrb[52].mxu1 }
0x16fc   : > { %v32181_v43 = vpop.f32.mrb[53].mxu1 }
0x16ff   : > { %v32183_v50 = vpop.f32.mrb[54].mxu1 }
0x1700   : > { %v32185_v37 = vpop.f32.mrb[55].mxu1 }
0x1703   : > { %v32187_v38 = vpop.f32.mrb[56].mxu1 }
0x1704   : > { %v32189_v44 = vpop.f32.mrb[57].mxu1 }
0x1707   : > { %v32191_v53 = vpop.f32.mrb[58].mxu1 }
0x1708   : > { %v32193_v54 = vpop.f32.mrb[59].mxu1 }
0x170b   : > { %v32195_v29 = vpop.f32.mrb[60].mxu1 }
0x170c   : > { %v32197_v47 = vpop.f32.mrb[61].mxu1 }
0x170f   : > { %v32199_v1 = vpop.f32.mrb[62].mxu1 }
0x1710   : > { %v32201_v7 = vpop.f32.mrb[63].mxu1 }
0x1718   : > { %v16409_v9 = vpop.f32.mrb[56].mxu0 }
0x1719   : > { %v32203_v15 = vmul.f32 0.35355338, %v16409_v9  ;;  %v26500_v46 = vpop.f32.mrb[57].mxu0 }
0x171b   : > { %v17569_v56 = vsel %vm856_vm1, %v32203_v15, -inf }
0x171c   : > { %17570 = vmax.xlane.f32.xlu0 %v17569_v56  ;;  %v16485_v32 = vpop.f32.mrb[58].mxu0 }
0x171d   : > { %v32207_v45 = vmul.f32 0.35355338, %v16485_v32  ;;  %v26505_v48 = vpop.f32.mrb[59].mxu0 }
0x171f   : > { %v17572_v49 = vsel %vm856_vm1, %v32207_v45, -inf }
0x1720   : > { %17573 = vmax.xlane.f32.xlu1 %v17572_v49  ;;  %v16561_v18 = vpop.f32.mrb[60].mxu0 }
0x1721   : > { %v32211_v60 = vmul.f32 0.35355338, %v16561_v18  ;;  %v26510_v10 = vpop.f32.mrb[61].mxu0 }
0x1723   : > { %v16941_v41 = vpop.f32.mrb[64].mxu1  ;;  %v17575_v23 = vsel %vm856_vm1, %v32211_v60, -inf }
0x1724   : > { %v26535_v33 = vpop.f32.mrb[65].mxu1  ;;  %17576 = vmax.xlane.f32.xlu0 %v17575_v23  ;;  %v16637_v6 = vpop.f32.mrb[62].mxu0  ;;  %v32225_v48 = vmul.f32 0.35355338, %v16941_v41 }
0x1725   : > { %v32215_v22 = vmul.f32 0.35355338, %v16637_v6  ;;  %v26515_v13 = vpop.f32.mrb[63].mxu0 }
0x1727   : > { %v17093_v55 = vpop.f32.mrb[66].mxu1  ;;  %v17578_v62 = vsel %vm856_vm1, %v32215_v22, -inf }
0x1728   : > { %v26545_v27 = vpop.f32.mrb[67].mxu1  ;;  %17579 = vmax.xlane.f32.xlu1 %v17578_v62  ;;  %v16713_v11 = vpop.f32.mrb[64].mxu0  ;;  %v32231_v13 = vmul.f32 0.35355338, %v17093_v55 }
0x1729   : > { %v32219_v59 = vmul.f32 0.35355338, %v16713_v11  ;;  %v26520_v40 = vpop.f32.mrb[65].mxu0  ;;  %v17590_v27 = vsel %vm856_vm1, %v32225_v48, -inf }
0x172a   : > { %v17596_v55 = vsel %vm856_vm1, %v32231_v13, -inf }
0x172b   : > { %v17245_v28 = vpop.f32.mrb[68].mxu1  ;;  %v17581_v34 = vsel %vm856_vm1, %v32219_v59, -inf }
0x172c   : > { %v26555_v9 = vpop.f32.mrb[69].mxu1  ;;  %17582 = vmax.xlane.f32.xlu0 %v17581_v34  ;;  %v16789_v46 = vpop.f32.mrb[66].mxu0 }
0x172d   : > { %v32223_v56 = vmul.f32 0.35355338, %v16789_v46  ;;  %v26525_v32 = vpop.f32.mrb[67].mxu0  ;;  %v32239_v46 = vmul.f32 0.35355338, %v17245_v28 }
0x172f   : > { %v17397_v49 = vpop.f32.mrb[70].mxu1  ;;  %v17584_v18 = vsel %vm856_vm1, %v32223_v56, -inf }
0x1730   : > { %v26565_v10 = vpop.f32.mrb[71].mxu1  ;;  %17585 = vmax.xlane.f32.xlu1 %v17584_v18  ;;  %v16865_v23 = vpop.f32.mrb[68].mxu0 }
0x1731   : > { %v32229_v33 = vmul.f32 0.35355338, %v16865_v23  ;;  %v26530_v6 = vpop.f32.mrb[69].mxu0 }
0x1732   : > { %v32247_v6 = vmul.f32 0.35355338, %v17397_v49 }
0x1733   : > { %v17549_v62 = vpop.f32.mrb[72].mxu1  ;;  %v17587_v41 = vsel %vm856_vm1, %v32229_v33, -inf }
0x1734   : > { %v26575_v11 = vpop.f32.mrb[73].mxu1  ;;  %17591 = vmax.xlane.f32.xlu1 %v17590_v27  ;;  %17588 = vmax.xlane.f32.xlu0 %v17587_v41  ;;  %v17017_v40 = vpop.f32.mrb[70].mxu0  ;;  %v17602_v27 = vsel %vm856_vm1, %v32239_v46, -inf }
0x1735   : > { %v32237_v34 = vmul.f32 0.35355338, %v17017_v40  ;;  %v26540_v9 = vpop.f32.mrb[71].mxu0 }
0x1736   : > { %v32255_v9 = vmul.f32 0.35355338, %v17549_v62 }
0x1737   : > { %v17593_v32 = vsel %vm856_vm1, %v32237_v34, -inf }
0x1738   : > { %17597 = vmax.xlane.f32.xlu1 %v17596_v55  ;;  %17594 = vmax.xlane.f32.xlu0 %v17593_v32  ;;  %v17169_v18 = vpop.f32.mrb[72].mxu0  ;;  %v17608_v55 = vsel %vm856_vm1, %v32247_v6, -inf }
0x1739   : > { %v32245_v10 = vmul.f32 0.35355338, %v17169_v18  ;;  %v26550_v23 = vpop.f32.mrb[73].mxu0 }
0x173b   : > { %v17599_v28 = vsel %vm856_vm1, %v32245_v10, -inf }
0x173c   : > { %17603 = vmax.xlane.f32.xlu1 %v17602_v27  ;;  %17600 = vmax.xlane.f32.xlu0 %v17599_v28  ;;  %v17321_v41 = vpop.f32.mrb[74].mxu0  ;;  %v17614_v27 = vsel %vm856_vm1, %v32255_v9, -inf }
0x173d   : > { %v32253_v11 = vmul.f32 0.35355338, %v17321_v41  ;;  %v26560_v40 = vpop.f32.mrb[75].mxu0 }
0x173f   : > { %v17605_v49 = vsel %vm856_vm1, %v32253_v11, -inf }
0x1740   : > { %17609 = vmax.xlane.f32.xlu1 %v17608_v55  ;;  %17606 = vmax.xlane.f32.xlu0 %v17605_v49  ;;  %v17473_v32 = vpop.f32.mrb[76].mxu0 }
0x1741   : > { %v32261_v18 = vmul.f32 0.35355338, %v17473_v32  ;;  %v26570_v23 = vpop.f32.mrb[77].mxu0 }
0x1743   : > { %v17611_v28 = vsel %vm856_vm1, %v32261_v18, -inf }
0x1744   : > { %17615 = vmax.xlane.f32.xlu1 %v17614_v27  ;;  %17612 = vmax.xlane.f32.xlu0 %v17611_v28 }
0x17a9   : > { %v17571_v62 = vpop.xlane.xlu0 %17570 }
0x17aa   : > { %v17617_v41 = vsub.f32 %v32203_v15, %v17571_v62 }
0x17ac   : > { %v17633_v40 = vmul.f32 1.442695, %v17617_v41 }
0x17ad   : > { %v17574_v12 = vpop.xlane.xlu1 %17573 }
0x17ae   : > { %28002 = vpow2.f32 %v17633_v40  ;;  %v17618_v55 = vsub.f32 %v32207_v45, %v17574_v12 }
0x17b0   : > { %v17635_v49 = vmul.f32 1.442695, %v17618_v55 }
0x17b1   : > { %v17577_v32 = vpop.xlane.xlu0 %17576 }
0x17b2   : > { %28004 = vpow2.f32 %v17635_v49  ;;  %v17619_v23 = vsub.f32 %v32211_v60, %v17577_v32 }
0x17b4   : > { %v17637_v24 = vmul.f32 1.442695, %v17619_v23 }
0x17b5   : > { %v17580_v4 = vpop.xlane.xlu1 %17579 }
0x17b6   : > { %28006 = vpow2.f32 %v17637_v24  ;;  %v17620_v2 = vsub.f32 %v32215_v22, %v17580_v4 }
0x17b8   : > { %v32271_v27 = vpop.eup %28002  ;;  %v17639_v28 = vmul.f32 1.442695, %v17620_v2 }
0x17b9   : > { %v17583_v63 = vpop.xlane.xlu0 %17582  ;;  %v17665_v15 = vsel %vm856_vm1, %v32271_v27, 0.0 }
0x17ba   : > { %28008 = vpow2.f32 %v17639_v28  ;;  %v17621_v12 = vsub.f32 %v32219_v59, %v17583_v63  ;;  %17666 = vadd.xlane.f32.xlu0 %v17665_v15 }
0x17bc   : > { %v32276_v45 = vpop.eup %28004  ;;  %v17641_v62 = vmul.f32 1.442695, %v17621_v12 }
0x17bd   : > { %v17586_v60 = vpop.xlane.xlu1 %17585  ;;  %v17668_v24 = vsel %vm856_vm1, %v32276_v45, 0.0 }
0x17be   : > { %28010 = vpow2.f32 %v17641_v62  ;;  %v17622_v4 = vsub.f32 %v32223_v56, %v17586_v60  ;;  %17669 = vadd.xlane.f32.xlu1 %v17668_v24 }
0x17c0   : > { %v32281_v2 = vpop.eup %28006  ;;  %v17643_v22 = vmul.f32 1.442695, %v17622_v4 }
0x17c1   : > { %v17592_v41 = vpop.xlane.xlu1 %17591  ;;  %v17589_v40 = vpop.xlane.xlu0 %17588  ;;  %v17671_v63 = vsel %vm856_vm1, %v32281_v2, 0.0 }
0x17c2   : > { %28012 = vpow2.f32 %v17643_v22  ;;  %v17624_v59 = vsub.f32 %v32225_v48, %v17592_v41  ;;  %v17623_v55 = vsub.f32 %v32229_v33, %v17589_v40  ;;  %17672 = vadd.xlane.f32.xlu0 %v17671_v63 }
0x17c4   : > { %v32287_v49 = vpop.eup %28008  ;;  %v17647_v32 = vmul.f32 1.442695, %v17624_v59  ;;  %v17645_v23 = vmul.f32 1.442695, %v17623_v55 }
0x17c5   : > { %v17598_v56 = vpop.xlane.xlu1 %17597  ;;  %v17595_v28 = vpop.xlane.xlu0 %17594  ;;  %v17674_v15 = vsel %vm856_vm1, %v32287_v49, 0.0 }
0x17c6   : > { %28014 = vpow2.f32 %v17647_v32  ;;  %v17626_v12 = vsub.f32 %v32231_v13, %v17598_v56  ;;  %v17625_v62 = vsub.f32 %v32237_v34, %v17595_v28  ;;  %17675 = vadd.xlane.f32.xlu1 %v17674_v15 }
0x17c7   : > { %28016 = vpow2.f32 %v17645_v23 }
0x17c8   : > { %v32293_v48 = vpop.eup %28010  ;;  %v17651_v33 = vmul.f32 1.442695, %v17626_v12  ;;  %v17649_v60 = vmul.f32 1.442695, %v17625_v62 }
0x17c9   : > { %v17604_v24 = vpop.xlane.xlu1 %17603  ;;  %v17601_v4 = vpop.xlane.xlu0 %17600  ;;  %v17677_v22 = vsel %vm856_vm1, %v32293_v48, 0.0 }
0x17ca   : > { %28018 = vpow2.f32 %v17651_v33  ;;  %v17628_v41 = vsub.f32 %v32239_v46, %v17604_v24  ;;  %v17627_v40 = vsub.f32 %v32245_v10, %v17601_v4  ;;  %17678 = vadd.xlane.f32.xlu0 %v17677_v22 }
0x17cb   : > { %28020 = vpow2.f32 %v17649_v60 }
0x17cc   : > { %v32299_v13 = vpop.eup %28012  ;;  %v17655_v34 = vmul.f32 1.442695, %v17628_v41  ;;  %v17653_v63 = vmul.f32 1.442695, %v17627_v40 }
0x17cd   : > { %v17610_v59 = vpop.xlane.xlu1 %17609  ;;  %v17607_v55 = vpop.xlane.xlu0 %17606  ;;  %v17680_v32 = vsel %vm856_vm1, %v32299_v13, 0.0 }
0x17ce   : > { %28022 = vpow2.f32 %v17655_v34  ;;  %v17630_v23 = vsub.f32 %v32247_v6, %v17610_v59  ;;  %v17629_v56 = vsub.f32 %v32253_v11, %v17607_v55  ;;  %17681 = vadd.xlane.f32.xlu1 %v17680_v32 }
0x17cf   : > { %28024 = vpow2.f32 %v17653_v63 }
0x17d0   : > { %v32305_v46 = vpop.eup %28014  ;;  %v17659_v10 = vmul.f32 1.442695, %v17630_v23  ;;  %v17657_v28 = vmul.f32 1.442695, %v17629_v56 }
0x17d1   : > { %v32307_v15 = vpop.eup %28016  ;;  %v17616_v12 = vpop.xlane.xlu1 %17615  ;;  %v17686_v33 = vsel %vm856_vm1, %v32305_v46, 0.0 }
0x17d2   : > { %v17613_v62 = vpop.xlane.xlu0 %17612  ;;  %28026 = vpow2.f32 %v17659_v10  ;;  %v17632_v60 = vsub.f32 %v32255_v9, %v17616_v12  ;;  %17687 = vadd.xlane.f32.xlu1 %v17686_v33  ;;  %v17683_v11 = vsel %vm856_vm1, %v32307_v15, 0.0 }
0x17d3   : > { %v17631_v6 = vsub.f32 %v32261_v18, %v17613_v62  ;;  %28028 = vpow2.f32 %v17657_v28  ;;  %17684 = vadd.xlane.f32.xlu0 %v17683_v11 }
0x17d4   : > { %v32315_v24 = vpop.eup %28018  ;;  %v17663_v4 = vmul.f32 1.442695, %v17632_v60 }
0x17d5   : > { %v17661_v22 = vmul.f32 1.442695, %v17631_v6  ;;  %v32317_v41 = vpop.eup %28020  ;;  %v17692_v40 = vsel %vm856_vm1, %v32315_v24, 0.0 }
0x17d6   : > { %28030 = vpow2.f32 %v17663_v4  ;;  %17693 = vadd.xlane.f32.xlu1 %v17692_v40  ;;  %v17689_v9 = vsel %vm856_vm1, %v32317_v41, 0.0 }
0x17d7   : > { %28032 = vpow2.f32 %v17661_v22  ;;  %17690 = vadd.xlane.f32.xlu0 %v17689_v9 }
0x17d8   : > { %v32323_v18 = vpop.eup %28022 }
0x17d9   : > { %v32325_v34 = vpop.eup %28024  ;;  %v17698_v63 = vsel %vm856_vm1, %v32323_v18, 0.0 }
0x17da   : > { %17699 = vadd.xlane.f32.xlu1 %v17698_v63  ;;  %v17695_v59 = vsel %vm856_vm1, %v32325_v34, 0.0 }
0x17db   : > { %17696 = vadd.xlane.f32.xlu0 %v17695_v59 }
0x17dc   : > { %v32331_v55 = vpop.eup %28026 }
0x17dd   : > { %v32333_v32 = vpop.eup %28028  ;;  %v17704_v23 = vsel %vm856_vm1, %v32331_v55, 0.0 }
0x17de   : > { %17705 = vadd.xlane.f32.xlu1 %v17704_v23  ;;  %v17701_v56 = vsel %vm856_vm1, %v32333_v32, 0.0 }
0x17df   : > { %17702 = vadd.xlane.f32.xlu0 %v17701_v56 }
0x17e0   : > { %v32339_v10 = vpop.eup %28030 }
0x17e1   : > { %v32341_v28 = vpop.eup %28032  ;;  %v17710_v12 = vsel %vm856_vm1, %v32339_v10, 0.0 }
0x17e2   : > { %17711 = vadd.xlane.f32.xlu1 %v17710_v12  ;;  %v17707_v62 = vsel %vm856_vm1, %v32341_v28, 0.0 }
0x17e3   : > { %17708 = vadd.xlane.f32.xlu0 %v17707_v62 }
0x1847   : > { %v17667_v33 = vpop.xlane.xlu0 %17666 }
0x1848   : > { %28034 = vrcp.f32 %v17667_v33 }
0x184b   : > { %v17670_v60 = vpop.xlane.xlu1 %17669 }
0x184c   : > { %28036 = vrcp.f32 %v17670_v60 }
0x184f   : > { %v17673_v6 = vpop.xlane.xlu0 %17672 }
0x1850   : > { %28038 = vrcp.f32 %v17673_v6 }
0x1852   : > { %v28035_v11 = vpop.eup %28034 }
0x1853   : > { %v17729_v4 = vmul.f32 %v28035_v11, %v32271_v27  ;;  %v17676_v22 = vpop.xlane.xlu1 %17675 }
0x1854   : > { %28040 = vrcp.f32 %v17676_v22 }
0x1855   : > { %26579 = vmatmul.mubr.msk.f32.vlgmr.msra.gmra.mrb[78].mxu0 %vm856_vm1, %v17729_v4 }
0x1856   : > { %v28037_v40 = vpop.eup %28036  ;;  %26587 = vmatpush3.msra.mxu0 %v32177_v51  ;;  %26588 = vmatprep.mubr.msk.f32.mxu0 %vm28243_vm11, %v33160_v39 }
0x1857   : > { %v17730_v9 = vmul.f32 %v28037_v40, %v32276_v45  ;;  %v17679_v63 = vpop.xlane.xlu0 %17678  ;;  %26596 = vmatprep.subr.mxu0 %v33160_v39 }
0x1858   : > { %28042 = vrcp.f32 %v17679_v63  ;;  %v278_v63 = vld [vmem:[%s33110_s1 + $0x60] sm:$0xff] }
0x1859   : > { %26584 = vmatmul.mubr.msk.f32.vlgmr.msra.gmra.mrb[74].mxu1 %vm856_vm1, %v17730_v9 }
0x185a   : > { %v28039_v59 = vpop.eup %28038  ;;  %26592 = vmatpush3.msra.mxu1 %v32175_v61  ;;  %26593 = vmatprep.mubr.msk.f32.mxu1 %vm28243_vm11, %v33160_v39 }
0x185b   : > { %v17731_v27 = vmul.f32 %v28039_v59, %v32281_v2  ;;  %v17682_v51 = vpop.xlane.xlu1 %17681  ;;  %26601 = vmatprep.subr.mxu1 %v33160_v39  ;;  %v279_v59 = vld [vmem:[%s33110_s1 + $0x68] sm:$0xff] }
0x185c   : > { %28044 = vrcp.f32 %v17682_v51  ;;  %v280_v51 = vld [vmem:[%s33110_s1 + $0x70] sm:$0xff] }
0x185d   : > { %26589 = vmatmul.mubr.msk.f32.vlgmr.msra.gmra.mrb[80].mxu0 %vm856_vm1, %v17731_v27  ;;  %v27452_v27 = vpack.c.bf16 %v279_v59, %v278_v63 }
0x185e   : > { %v28041_v45 = vpop.eup %28040  ;;  %26597 = vmatpush3.msra.mxu0 %v32181_v43  ;;  %26598 = vmatprep.mubr.msk.f32.mxu0 %vm28243_vm11, %v33160_v39 }
0x185f   : > { %v17732_v23 = vmul.f32 %v28041_v45, %v32287_v49  ;;  %v17688_v61 = vpop.xlane.xlu1 %17687  ;;  %26606 = vmatprep.subr.mxu0 %v33160_v39  ;;  %v281_v45 = vld [vmem:[%s33110_s1 + $0x78] sm:$0xff] }
0x1860   : > { %28046 = vrcp.f32 %v17688_v61  ;;  %v17685_v56 = vpop.xlane.xlu0 %17684  ;;  %v342_v61 = vld [vmem:[%s33112_s3 + $0x60] sm:$0xff] }
0x1861   : > { %28048 = vrcp.f32 %v17685_v56  ;;  %26594 = vmatmul.mubr.msk.f32.vlgmr.msra.gmra.mrb[76].mxu1 %vm856_vm1, %v17732_v23  ;;  %v27456_v23 = vpack.c.bf16 %v281_v45, %v280_v51  ;;  %v343_v56 = vld [vmem:[%s33112_s3 + $0x68] sm:$0xff] }
0x1862   : > { %v28043_v2 = vpop.eup %28042  ;;  %26602 = vmatpush3.msra.mxu1 %v32179_v25  ;;  %26603 = vmatprep.mubr.msk.f32.mxu1 %vm28243_vm11, %v33160_v39 }
0x1863   : > { %v17733_v43 = vmul.f32 %v28043_v2, %v32293_v48  ;;  %v17694_v12 = vpop.xlane.xlu1 %17693  ;;  %26611 = vmatprep.subr.mxu1 %v33160_v39  ;;  %v344_v2 = vld [vmem:[%s33112_s3 + $0x70] sm:$0xff] }
0x1864   : > { %28050 = vrcp.f32 %v17694_v12  ;;  %v17691_v49 = vpop.xlane.xlu0 %17690  ;;  %v345_v12 = vld [vmem:[%s33112_s3 + $0x78] sm:$0xff] }
0x1865   : > { %28052 = vrcp.f32 %v17691_v49  ;;  %26599 = vmatmul.mubr.msk.f32.vlgmr.msra.gmra.mrb[82].mxu0 %vm856_vm1, %v17733_v43  ;;  %v27468_v43 = vpack.c.bf16 %v343_v56, %v342_v61  ;;  %v27472_v49 = vpack.c.bf16 %v345_v12, %v344_v2 }
0x1866   : > { %v28045_v62 = vpop.eup %28044  ;;  %26607 = vmatpush3.msra.mxu0 %v32185_v37  ;;  %26608 = vmatprep.mubr.msk.f32.mxu0 %vm28243_vm11, %v33160_v39 }
0x1867   : > { %v17734_v25 = vmul.f32 %v28045_v62, %v32299_v13  ;;  %v17700_v33 = vpop.xlane.xlu1 %17699  ;;  %26616 = vmatprep.subr.mxu0 %v33160_v39 }
0x1868   : > { %28054 = vrcp.f32 %v17700_v33  ;;  %v17697_v48 = vpop.xlane.xlu0 %17696  ;;  %v313_v33 = vld [vmem:[%s33111_s2 + $0x78] sm:$0xff] }
0x1869   : > { %28056 = vrcp.f32 %v17697_v48  ;;  %26604 = vmatmul.mubr.msk.f32.vlgmr.msra.gmra.mrb[78].mxu1 %vm856_vm1, %v17734_v25  ;;  %v312_v25 = vld [vmem:[%s33111_s2 + $0x70] sm:$0xff] }
0x186a   : > { %v28047_v60 = vpop.eup %28046  ;;  %26612 = vmatpush3.msra.mxu1 %v32183_v50  ;;  %26613 = vmatprep.mubr.msk.f32.mxu1 %vm28243_vm11, %v33160_v39 }
0x186b   : > { %v28049_v37 = vpop.eup %28048  ;;  %v17736_v6 = vmul.f32 %v28047_v60, %v32305_v46  ;;  %v17706_v11 = vpop.xlane.xlu1 %17705  ;;  %26621 = vmatprep.subr.mxu1 %v33160_v39  ;;  %v27464_v60 = vpack.c.bf16 %v313_v33, %v312_v25 }
0x186c   : > { %v17735_v13 = vmul.f32 %v28049_v37, %v32307_v15  ;;  %28058 = vrcp.f32 %v17706_v11  ;;  %v17703_v4 = vpop.xlane.xlu0 %17702 }
0x186d   : > { %28060 = vrcp.f32 %v17703_v4  ;;  %26614 = vmatmul.mubr.msk.f32.vlgmr.msra.gmra.mrb[80].mxu1 %vm856_vm1, %v17736_v6 }
0x186e   : > { %v28051_v22 = vpop.eup %28050  ;;  %26609 = vmatmul.mubr.msk.f32.vlgmr.msra.gmra.mrb[84].mxu0 %vm856_vm1, %v17735_v13  ;;  %26622 = vmatpush3.msra.mxu1 %v32187_v38 }
0x186f   : > { %v28053_v50 = vpop.eup %28052  ;;  %v17738_v40 = vmul.f32 %v28051_v22, %v32315_v24  ;;  %26617 = vmatpush3.msra.mxu0 %v32189_v44  ;;  %v17712_v46 = vpop.xlane.xlu1 %17711  ;;  %26618 = vmatprep.mubr.msk.f32.mxu0 %vm28243_vm11, %v33160_v39 }
0x1870   : > { %v17737_v15 = vmul.f32 %v28053_v50, %v32317_v41  ;;  %28062 = vrcp.f32 %v17712_v46  ;;  %v17709_v9 = vpop.xlane.xlu0 %17708  ;;  %26623 = vmatprep.mubr.msk.f32.mxu1 %vm28243_vm11, %v33160_v39  ;;  %26626 = vmatprep.subr.mxu0 %v33160_v39 }
0x1871   : > { %28064 = vrcp.f32 %v17709_v9  ;;  %26631 = vmatprep.subr.mxu1 %v33160_v39  ;;  %26624 = vmatmul.mubr.msk.f32.vlgmr.msra.gmra.mrb[82].mxu1 %vm856_vm1, %v17738_v40 }
0x1872   : > { %v28055_v38 = vpop.eup %28054  ;;  %26619 = vmatmul.mubr.msk.f32.vlgmr.msra.gmra.mrb[86].mxu0 %vm856_vm1, %v17737_v15  ;;  %26632 = vmatpush3.msra.mxu1 %v32191_v53 }
0x1873   : > { %v28057_v44 = vpop.eup %28056  ;;  %v17740_v24 = vmul.f32 %v28055_v38, %v32323_v18  ;;  %26627 = vmatpush3.msra.mxu0 %v32193_v54  ;;  %26628 = vmatprep.mubr.msk.f32.mxu0 %vm28243_vm11, %v33160_v39 }
0x1874   : > { %v17739_v41 = vmul.f32 %v28057_v44, %v32325_v34  ;;  %26633 = vmatprep.mubr.msk.f32.mxu1 %vm28243_vm11, %v33160_v39  ;;  %26636 = vmatprep.subr.mxu0 %v33160_v39 }
0x1875   : > { %26641 = vmatprep.subr.mxu1 %v33160_v39  ;;  %26634 = vmatmul.mubr.msk.f32.vlgmr.msra.gmra.mrb[84].mxu1 %vm856_vm1, %v17740_v24 }
0x1876   : > { %v28059_v53 = vpop.eup %28058  ;;  %26629 = vmatmul.mubr.msk.f32.vlgmr.msra.gmra.mrb[104].mxu0 %vm856_vm1, %v17739_v41  ;;  %26642 = vmatpush3.msra.mxu1 %v32195_v29 }
0x1877   : > { %v28061_v54 = vpop.eup %28060  ;;  %v17742_v18 = vmul.f32 %v28059_v53, %v32331_v55  ;;  %26637 = vmatpush3.msra.mxu0 %v32197_v47  ;;  %26638 = vmatprep.mubr.msk.f32.mxu0 %vm28243_vm11, %v33160_v39 }
0x1878   : > { %v17741_v34 = vmul.f32 %v28061_v54, %v32333_v32  ;;  %26643 = vmatprep.mubr.msk.f32.mxu1 %vm28243_vm11, %v33160_v39  ;;  %26646 = vmatprep.subr.mxu0 %v33160_v39 }
0x1879   : > { %26651 = vmatprep.subr.mxu1 %v33160_v39  ;;  %26644 = vmatmul.mubr.msk.f32.vlgmr.msra.gmra.mrb[86].mxu1 %vm856_vm1, %v17742_v18 }
0x187a   : > { %v28063_v29 = vpop.eup %28062  ;;  %26639 = vmatmul.mubr.msk.f32.vlgmr.msra.gmra.mrb[106].mxu0 %vm856_vm1, %v17741_v34  ;;  %26652 = vmatpush3.msra.mxu1 %v32199_v1  ;;  %v364_v1 = vld [vmem:[%s33113_s4 + $0x10] sm:$0xff] }
0x187b   : > { %v28065_v47 = vpop.eup %28064  ;;  %v17744_v55 = vmul.f32 %v28063_v29, %v32339_v10  ;;  %26647 = vmatpush3.msra.mxu0 %v32201_v7  ;;  %26648 = vmatprep.mubr.msk.f32.mxu0 %vm28243_vm11, %v33160_v39  ;;  %v310_v7 = vld [vmem:[%s33111_s2 + $0x60] sm:$0xff]  ;;  %v311_v10 = vld [vmem:[%s33111_s2 + $0x68] sm:$0xff] }
0x187c   : > { %v17743_v32 = vmul.f32 %v28065_v47, %v32341_v28  ;;  %26653 = vmatprep.mubr.msk.f32.mxu1 %vm28243_vm11, %v33160_v39  ;;  %26656 = vmatprep.subr.mxu1 %v364_v1  ;;  %v32444_v28 = vpack.c.bf16 %v311_v10, %v310_v7 }
0x187d   : > { %26654 = vmatmul.mubr.msk.f32.vlgmr.msra.gmra.mrb[88].mxu1 %vm856_vm1, %v17744_v55  ;;  %27453 = vmatprep.subr.bf16.mxu0 %v27452_v27 }
0x187e   : > { %26649 = vmatmul.mubr.msk.f32.vlgmr.msra.gmra.mrb[108].mxu0 %vm856_vm1, %v17743_v32  ;;  %26657 = vmatpush3.msra.mxu1 %v364_v1 }
0x187f   : > { %26690 = vmatprep.mubr.msk.f32.mxu0 %vm372_vm0, %v30228_v19  ;;  %27461 = vmatprep.subr.bf16.mxu1 %v32444_v28 }
0x1880   : > { %27455 = vmatpush3.bf16.msra.mxu0 %v27452_v27 }
0x1881   : > { %27457 = vmatprep.subr.bf16.mxu0 %v27456_v23 }
0x1884   : > { %27459 = vmatpush3.bf16.msra.mxu0 %v27456_v23 }
0x1885   : > { %27469 = vmatprep.subr.bf16.mxu0 %v27468_v43 }
0x1887   : > { %26691 = vmatmul.mubr.msk.f32.vlgmr.msra.gmra.mrb[110].mxu0 %vm372_vm0, %v30254_v58 }
0x1888   : > { %26693 = vmatprep.mubr.msk.f32.mxu0 %vm372_vm0, %v30274_v31  ;;  %27471 = vmatpush3.bf16.msra.mxu0 %v27468_v43 }
0x1889   : > { %27473 = vmatprep.subr.bf16.mxu0 %v27472_v49 }
0x188b   : > { %26694 = vmatmul.mubr.msk.f32.gmra.mrb[112].mxu0 %vm372_vm0, %v30300_v20 }
0x188c   : > { %26696 = vmatprep.mubr.msk.f32.mxu0 %vm372_vm0, %v30319_v16  ;;  %27475 = vmatpush3.bf16.msra.mxu0 %v27472_v49 }
0x188d   : > { %26783 = vmatprep.subr.mxu0 %v33160_v39 }
0x188f   : > { %26697 = vmatmul.mubr.msk.f32.gmra.mrb[114].mxu0 %vm372_vm0, %v33181_v3 }
0x1890   : > { %26699 = vmatprep.mubr.msk.f32.mxu0 %vm372_vm0, %v33182_v30 }
0x1893   : > { %26700 = vmatmul.mubr.msk.f32.gmra.mrb[116].mxu0 %vm372_vm0, %v33183_v17 }
0x1894   : > { %26702 = vmatprep.mubr.msk.f32.mxu0 %vm372_vm0, %v33184_v57 }
0x1897   : > { %26703 = vmatmul.mubr.msk.f32.gmra.mrb[118].mxu0 %vm372_vm0, %v33185_v0 }
0x1898   : > { %26705 = vmatprep.mubr.msk.f32.mxu0 %vm372_vm0, %v33186_v5 }
0x189b   : > { %26706 = vmatmul.mubr.msk.f32.gmra.mrb[120].mxu0 %vm372_vm0, %v33187_v14 }
0x189c   : > { %26708 = vmatprep.mubr.msk.f32.mxu0 %vm372_vm0, %v33188_v21 }
0x189f   : > { %26709 = vmatmul.mubr.msk.f32.gmra.mrb[122].mxu0 %vm372_vm0, %v33189_v35 }
0x18a0   : > { %26711 = vmatprep.mubr.msk.f32.mxu0 %vm372_vm0, %v33190_v26 }
0x18a3   : > { %26712 = vmatmul.mubr.msk.f32.gmra.mrb[124].mxu0 %vm372_vm0, %v33191_v36 }
0x18a4   : > { %26754 = vmatprep.mubr.msk.f32.mxu0 %vm372_vm0, %v30228_v19 }
0x18a7   : > { %26755 = vmatmul.mubr.msk.f32.vlgmr.msra.gmra.mrb[126].mxu0 %vm372_vm0, %v30254_v58 }
0x18a8   : > { %26757 = vmatprep.mubr.msk.f32.mxu0 %vm372_vm0, %v30274_v31 }
0x18ab   : > { %26758 = vmatmul.mubr.msk.f32.gmra.mrb[128].mxu0 %vm372_vm0, %v30300_v20 }
0x18ac   : > { %26760 = vmatprep.mubr.msk.f32.mxu0 %vm372_vm0, %v30319_v16 }
0x18af   : > { %26761 = vmatmul.mubr.msk.f32.gmra.mrb[130].mxu0 %vm372_vm0, %v33181_v3 }
0x18b0   : > { %26763 = vmatprep.mubr.msk.f32.mxu0 %vm372_vm0, %v33182_v30 }
0x18b3   : > { %26764 = vmatmul.mubr.msk.f32.gmra.mrb[132].mxu0 %vm372_vm0, %v33183_v17 }
0x18b4   : > { %26766 = vmatprep.mubr.msk.f32.mxu0 %vm372_vm0, %v33184_v57 }
0x18b7   : > { %26767 = vmatmul.mubr.msk.f32.gmra.mrb[134].mxu0 %vm372_vm0, %v33185_v0 }
0x18b8   : > { %26769 = vmatprep.mubr.msk.f32.mxu0 %vm372_vm0, %v33186_v5 }
0x18bb   : > { %26770 = vmatmul.mubr.msk.f32.gmra.mrb[136].mxu0 %vm372_vm0, %v33187_v14 }
0x18bc   : > { %26772 = vmatprep.mubr.msk.f32.mxu0 %vm372_vm0, %v33188_v21 }
0x18bf   : > { %26773 = vmatmul.mubr.msk.f32.gmra.mrb[138].mxu0 %vm372_vm0, %v33189_v35 }
0x18c0   : > { %26775 = vmatprep.mubr.msk.f32.mxu0 %vm372_vm0, %v33190_v26 }
0x18c3   : > { %26776 = vmatmul.mubr.msk.f32.gmra.mrb[140].mxu0 %vm372_vm0, %v33191_v36 }
0x18c4   : > { %26785 = vmatprep.mubr.msk.f32.mxu0 %vm28243_vm11, %v33160_v39 }
0x1928   : > { %v17814_v62 = vpop.f32.mrb[78].mxu0 }
0x1929   : > { %v26580_v48 = vpop.f32.mrb[79].mxu0  ;;  %26658 = vmatprep.mubr.msk.f32.mxu1 %vm856_vm1, %v17814_v62 }
0x192c   : > { %v17887_v37 = vpop.f32.mrb[74].mxu1 }
0x192d   : > { %v26585_v6 = vpop.f32.mrb[75].mxu1  ;;  %26659 = vmatmul.mubr.msk.f32.vlgmr.msra.gmra.mrb[40].mxu1 %vm856_vm1, %v17887_v37 }
0x192e   : > { %27463 = vmatpush3.bf16.msra.mxu1 %v32444_v28 }
0x192f   : > { %27465 = vmatprep.subr.bf16.mxu1 %v27464_v60 }
0x1930   : > { %v17960_v11 = vpop.f32.mrb[80].mxu0 }
0x1931   : > { %v26590_v13 = vpop.f32.mrb[81].mxu0  ;;  %26661 = vmatprep.mubr.msk.f32.mxu1 %vm856_vm1, %v17960_v11 }
0x1932   : > { %27467 = vmatpush3.bf16.msra.mxu1 %v27464_v60 }
0x1933   : > { %26778 = vmatprep.subr.mxu1 %v33160_v39 }
0x1934   : > { %v18033_v4 = vpop.f32.mrb[76].mxu1 }
0x1935   : > { %v26595_v22 = vpop.f32.mrb[77].mxu1  ;;  %26662 = vmatmul.mubr.msk.f32.gmra.mrb[42].mxu1 %vm856_vm1, %v18033_v4 }
0x1938   : > { %v18106_v50 = vpop.f32.mrb[82].mxu0 }
0x1939   : > { %v26600_v40 = vpop.f32.mrb[83].mxu0  ;;  %26664 = vmatprep.mubr.msk.f32.mxu1 %vm856_vm1, %v18106_v50 }
0x193c   : > { %v18179_v46 = vpop.f32.mrb[78].mxu1 }
0x193d   : > { %v26605_v15 = vpop.f32.mrb[79].mxu1  ;;  %26665 = vmatmul.mubr.msk.f32.gmra.mrb[44].mxu1 %vm856_vm1, %v18179_v46 }
0x1940   : > { %v18325_v9 = vpop.f32.mrb[80].mxu1 }
0x1941   : > { %v18252_v38 = vpop.f32.mrb[84].mxu0  ;;  %v26615_v44 = vpop.f32.mrb[81].mxu1 }
0x1942   : > { %v26610_v24 = vpop.f32.mrb[85].mxu0  ;;  %26667 = vmatprep.mubr.msk.f32.mxu1 %vm856_vm1, %v18252_v38 }
0x1943   : > { %26668 = vmatmul.mubr.msk.f32.gmra.mrb[46].mxu1 %vm856_vm1, %v18325_v9 }
0x1944   : > { %v18471_v41 = vpop.f32.mrb[82].mxu1 }
0x1945   : > { %v18398_v53 = vpop.f32.mrb[86].mxu0  ;;  %v26625_v54 = vpop.f32.mrb[83].mxu1 }
0x1946   : > { %v26620_v18 = vpop.f32.mrb[87].mxu0  ;;  %26670 = vmatprep.mubr.msk.f32.mxu1 %vm856_vm1, %v18398_v53 }
0x1947   : > { %26671 = vmatmul.mubr.msk.f32.gmra.mrb[32].mxu1 %vm856_vm1, %v18471_v41 }
0x1948   : > { %v18617_v34 = vpop.f32.mrb[84].mxu1 }
0x1949   : > { %v18544_v29 = vpop.f32.mrb[104].mxu0  ;;  %v26635_v47 = vpop.f32.mrb[85].mxu1 }
0x194a   : > { %v26630_v55 = vpop.f32.mrb[105].mxu0  ;;  %26673 = vmatprep.mubr.msk.f32.mxu1 %vm856_vm1, %v18544_v29 }
0x194b   : > { %26674 = vmatmul.mubr.msk.f32.gmra.mrb[34].mxu1 %vm856_vm1, %v18617_v34 }
0x194c   : > { %v18763_v32 = vpop.f32.mrb[86].mxu1 }
0x194d   : > { %v18690_v1 = vpop.f32.mrb[106].mxu0  ;;  %v26645_v7 = vpop.f32.mrb[87].mxu1 }
0x194e   : > { %v26640_v10 = vpop.f32.mrb[107].mxu0  ;;  %26676 = vmatprep.mubr.msk.f32.mxu1 %vm856_vm1, %v18690_v1 }
0x194f   : > { %26677 = vmatmul.mubr.msk.f32.gmra.mrb[36].mxu1 %vm856_vm1, %v18763_v32 }
0x1950   : > { %v18909_v28 = vpop.f32.mrb[88].mxu1 }
0x1951   : > { %v18836_v63 = vpop.f32.mrb[108].mxu0  ;;  %v26655_v59 = vpop.f32.mrb[89].mxu1 }
0x1952   : > { %v26650_v27 = vpop.f32.mrb[109].mxu0  ;;  %26679 = vmatprep.mubr.msk.f32.mxu1 %vm856_vm1, %v18836_v63 }
0x1953   : > { %26680 = vmatmul.mubr.msk.f32.gmra.mrb[38].mxu1 %vm856_vm1, %v18909_v28 }
0x1954   : > { %26722 = vmatprep.mubr.msk.f32.mxu1 %vm372_vm0, %v30228_v19 }
0x1957   : > { %26723 = vmatmul.mubr.msk.f32.vlgmr.msra.gmra.mrb[90].mxu1 %vm372_vm0, %v30254_v58 }
0x1958   : > { %26725 = vmatprep.mubr.msk.f32.mxu1 %vm372_vm0, %v30274_v31 }
0x195a   : > { %v26692_v19 = vpop.f32.mrb[110].mxu0 }
0x195b   : > { %26726 = vmatmul.mubr.msk.f32.gmra.mrb[92].mxu1 %vm372_vm0, %v30300_v20  ;;  %v19188_v58 = vpop.f32.mrb[111].mxu0 }
0x195c   : > { %26728 = vmatprep.mubr.msk.f32.mxu1 %vm372_vm0, %v30319_v16 }
0x195e   : > { %v26695_v31 = vpop.f32.mrb[112].mxu0 }
0x195f   : > { %26729 = vmatmul.mubr.msk.f32.gmra.mrb[94].mxu1 %vm372_vm0, %v33181_v3  ;;  %v19198_v20 = vpop.f32.mrb[113].mxu0 }
0x1960   : > { %26731 = vmatprep.mubr.msk.f32.mxu1 %vm372_vm0, %v33182_v30 }
0x1962   : > { %v26698_v16 = vpop.f32.mrb[114].mxu0 }
0x1963   : > { %26732 = vmatmul.mubr.msk.f32.gmra.mrb[96].mxu1 %vm372_vm0, %v33183_v17  ;;  %v19208_v3 = vpop.f32.mrb[115].mxu0 }
0x1964   : > { %26734 = vmatprep.mubr.msk.f32.mxu1 %vm372_vm0, %v33184_v57 }
0x1966   : > { %v26701_v30 = vpop.f32.mrb[116].mxu0 }
0x1967   : > { %26735 = vmatmul.mubr.msk.f32.gmra.mrb[98].mxu1 %vm372_vm0, %v33185_v0  ;;  %v32594_v17 = vpop.f32.mrb[117].mxu0 }
0x1968   : > { %26737 = vmatprep.mubr.msk.f32.mxu1 %vm372_vm0, %v33186_v5 }
0x196a   : > { %v32596_v57 = vpop.f32.mrb[118].mxu0 }
0x196b   : > { %26738 = vmatmul.mubr.msk.f32.gmra.mrb[100].mxu1 %vm372_vm0, %v33187_v14  ;;  %v32598_v0 = vpop.f32.mrb[119].mxu0 }
0x196c   : > { %26740 = vmatprep.mubr.msk.f32.mxu1 %vm372_vm0, %v33188_v21 }
0x196e   : > { %v32600_v5 = vpop.f32.mrb[120].mxu0 }
0x196f   : > { %26741 = vmatmul.mubr.msk.f32.gmra.mrb[102].mxu1 %vm372_vm0, %v33189_v35  ;;  %v32602_v14 = vpop.f32.mrb[121].mxu0 }
0x1970   : > { %26743 = vmatprep.mubr.msk.f32.mxu1 %vm372_vm0, %v33190_v26 }
0x1972   : > { %v32604_v21 = vpop.f32.mrb[122].mxu0 }
0x1973   : > { %26744 = vmatmul.mubr.msk.f32.gmra.mrb[104].mxu1 %vm372_vm0, %v33191_v36  ;;  %v32606_v35 = vpop.f32.mrb[123].mxu0 }
0x1974   : > { %26780 = vmatprep.mubr.msk.f32.mxu1 %vm28243_vm11, %v33160_v39 }
0x1976   : > { %v32608_v26 = vpop.f32.mrb[124].mxu0 }
0x1977   : > { %v32610_v36 = vpop.f32.mrb[125].mxu0 }
0x197a   : > { %v32612_v51 = vpop.f32.mrb[126].mxu0 }
0x197b   : > { %v32614_v45 = vpop.f32.mrb[127].mxu0 }
0x197e   : > { %v32616_v23 = vpop.f32.mrb[128].mxu0 }
0x197f   : > { %v32618_v61 = vpop.f32.mrb[129].mxu0 }
0x1982   : > { %v32620_v56 = vpop.f32.mrb[130].mxu0 }
0x1983   : > { %v32622_v2 = vpop.f32.mrb[131].mxu0 }
0x1986   : > { %v32624_v43 = vpop.f32.mrb[132].mxu0 }
0x1987   : > { %v32626_v12 = vpop.f32.mrb[133].mxu0 }
0x198a   : > { %v32628_v49 = vpop.f32.mrb[134].mxu0 }
0x198b   : > { %v32630_v62 = vpop.f32.mrb[135].mxu0 }
0x198e   : > { %v32632_v25 = vpop.f32.mrb[136].mxu0 }
0x198f   : > { %v32634_v33 = vpop.f32.mrb[137].mxu0 }
0x1992   : > { %v32636_v48 = vpop.f32.mrb[138].mxu0 }
0x1993   : > { %v32638_v60 = vpop.f32.mrb[139].mxu0 }
0x1996   : > { %v32640_v37 = vpop.f32.mrb[140].mxu0 }
0x1997   : > { %v32642_v6 = vpop.f32.mrb[141].mxu0 }
0x1a2a   : > { %v26724_v11 = vpop.f32.mrb[90].mxu1 }
0x1a2b   : > { %v19333_v13 = vpop.f32.mrb[91].mxu1  ;;  %26784 = vmatpush3.xpose.msk.msra.mxu0 %vm856_vm1, %v26724_v11 }
0x1a2c   : > { %26779 = vmatpush3.xpose.msk.msra.mxu1 %vm856_vm1, %v19333_v13  ;;  %26793 = vmatprep.subr.mxu0 %v33160_v39 }
0x1a2d   : > { %26788 = vmatprep.subr.mxu1 %v33160_v39 }
0x1a2e   : > { %v26727_v4 = vpop.f32.mrb[92].mxu1  ;;  %26786 = vmatmul.mubr.msk.f32.vlgmr.msra.gmra.mrb[142].mxu0 %vm856_vm1, %v26692_v19 }
0x1a2f   : > { %v19343_v22 = vpop.f32.mrb[93].mxu1  ;;  %26781 = vmatmul.mubr.msk.f32.vlgmr.msra.gmra.mrb[106].mxu1 %vm856_vm1, %v19188_v58  ;;  %26794 = vmatpush3.xpose.msk.msra.mxu0 %vm856_vm1, %v26727_v4 }
0x1a30   : > { %26789 = vmatpush3.xpose.msk.msra.mxu1 %vm856_vm1, %v19343_v22  ;;  %26795 = vmatprep.mubr.msk.f32.mxu0 %vm28243_vm11, %v33160_v39 }
0x1a31   : > { %26790 = vmatprep.mubr.msk.f32.mxu1 %vm28243_vm11, %v33160_v39  ;;  %26803 = vmatprep.subr.mxu0 %v33160_v39 }
0x1a32   : > { %v26730_v50 = vpop.f32.mrb[94].mxu1  ;;  %26796 = vmatmul.mubr.msk.f32.vlgmr.msra.gmra.mrb[144].mxu0 %vm856_vm1, %v26695_v31  ;;  %26798 = vmatprep.subr.mxu1 %v33160_v39 }
0x1a33   : > { %v19353_v40 = vpop.f32.mrb[95].mxu1  ;;  %26791 = vmatmul.mubr.msk.f32.vlgmr.msra.gmra.mrb[108].mxu1 %vm856_vm1, %v19198_v20  ;;  %26804 = vmatpush3.xpose.msk.msra.mxu0 %vm856_vm1, %v26730_v50 }
0x1a34   : > { %26799 = vmatpush3.xpose.msk.msra.mxu1 %vm856_vm1, %v19353_v40  ;;  %26805 = vmatprep.mubr.msk.f32.mxu0 %vm28243_vm11, %v33160_v39 }
0x1a35   : > { %26800 = vmatprep.mubr.msk.f32.mxu1 %vm28243_vm11, %v33160_v39  ;;  %26813 = vmatprep.subr.mxu0 %v33160_v39 }
0x1a36   : > { %v26733_v46 = vpop.f32.mrb[96].mxu1  ;;  %26806 = vmatmul.mubr.msk.f32.vlgmr.msra.gmra.mrb[146].mxu0 %vm856_vm1, %v26698_v16  ;;  %26808 = vmatprep.subr.mxu1 %v33160_v39 }
0x1a37   : > { %v19363_v15 = vpop.f32.mrb[97].mxu1  ;;  %26801 = vmatmul.mubr.msk.f32.vlgmr.msra.gmra.mrb[110].mxu1 %vm856_vm1, %v19208_v3  ;;  %26814 = vmatpush3.xpose.msk.msra.mxu0 %vm856_vm1, %v26733_v46 }
0x1a38   : > { %26809 = vmatpush3.xpose.msk.msra.mxu1 %vm856_vm1, %v19363_v15  ;;  %26815 = vmatprep.mubr.msk.f32.mxu0 %vm28243_vm11, %v33160_v39 }
0x1a39   : > { %26810 = vmatprep.mubr.msk.f32.mxu1 %vm28243_vm11, %v33160_v39  ;;  %26823 = vmatprep.subr.mxu0 %v33160_v39 }
0x1a3a   : > { %v26736_v9 = vpop.f32.mrb[98].mxu1  ;;  %26816 = vmatmul.mubr.msk.f32.vlgmr.msra.gmra.mrb[148].mxu0 %vm856_vm1, %v26701_v30  ;;  %26818 = vmatprep.subr.mxu1 %v33160_v39 }
0x1a3b   : > { %v19373_v38 = vpop.f32.mrb[99].mxu1  ;;  %26811 = vmatmul.mubr.msk.f32.vlgmr.msra.gmra.mrb[112].mxu1 %vm856_vm1, %v32594_v17  ;;  %26824 = vmatpush3.xpose.msk.msra.mxu0 %vm856_vm1, %v26736_v9 }
0x1a3c   : > { %26819 = vmatpush3.xpose.msk.msra.mxu1 %vm856_vm1, %v19373_v38  ;;  %26825 = vmatprep.mubr.msk.f32.mxu0 %vm28243_vm11, %v33160_v39 }
0x1a3d   : > { %26820 = vmatprep.mubr.msk.f32.mxu1 %vm28243_vm11, %v33160_v39  ;;  %26833 = vmatprep.subr.mxu0 %v33160_v39 }
0x1a3e   : > { %v26739_v44 = vpop.f32.mrb[100].mxu1  ;;  %26826 = vmatmul.mubr.msk.f32.vlgmr.msra.gmra.mrb[150].mxu0 %vm856_vm1, %v32596_v57  ;;  %26828 = vmatprep.subr.mxu1 %v33160_v39 }
0x1a3f   : > { %v19383_v24 = vpop.f32.mrb[101].mxu1  ;;  %26821 = vmatmul.mubr.msk.f32.vlgmr.msra.gmra.mrb[114].mxu1 %vm856_vm1, %v32598_v0  ;;  %26834 = vmatpush3.xpose.msk.msra.mxu0 %vm856_vm1, %v26739_v44 }
0x1a40   : > { %26829 = vmatpush3.xpose.msk.msra.mxu1 %vm856_vm1, %v19383_v24  ;;  %26835 = vmatprep.mubr.msk.f32.mxu0 %vm28243_vm11, %v33160_v39 }
0x1a41   : > { %26830 = vmatprep.mubr.msk.f32.mxu1 %vm28243_vm11, %v33160_v39  ;;  %26843 = vmatprep.subr.mxu0 %v33160_v39 }
0x1a42   : > { %v26742_v41 = vpop.f32.mrb[102].mxu1  ;;  %26836 = vmatmul.mubr.msk.f32.vlgmr.msra.gmra.mrb[152].mxu0 %vm856_vm1, %v32600_v5  ;;  %26838 = vmatprep.subr.mxu1 %v33160_v39 }
0x1a43   : > { %v19393_v53 = vpop.f32.mrb[103].mxu1  ;;  %26831 = vmatmul.mubr.msk.f32.vlgmr.msra.gmra.mrb[116].mxu1 %vm856_vm1, %v32602_v14  ;;  %26844 = vmatpush3.xpose.msk.msra.mxu0 %vm856_vm1, %v26742_v41 }
0x1a44   : > { %26839 = vmatpush3.xpose.msk.msra.mxu1 %vm856_vm1, %v19393_v53  ;;  %26845 = vmatprep.mubr.msk.f32.mxu0 %vm28243_vm11, %v33160_v39 }
0x1a45   : > { %26840 = vmatprep.mubr.msk.f32.mxu1 %vm28243_vm11, %v33160_v39  ;;  %26853 = vmatprep.subr.mxu0 %v33160_v39 }
0x1a46   : > { %v26745_v54 = vpop.f32.mrb[104].mxu1  ;;  %26846 = vmatmul.mubr.msk.f32.vlgmr.msra.gmra.mrb[154].mxu0 %vm856_vm1, %v32604_v21  ;;  %26848 = vmatprep.subr.mxu1 %v33160_v39 }
0x1a47   : > { %v19403_v18 = vpop.f32.mrb[105].mxu1  ;;  %26841 = vmatmul.mubr.msk.f32.vlgmr.msra.gmra.mrb[118].mxu1 %vm856_vm1, %v32606_v35  ;;  %26854 = vmatpush3.xpose.msk.msra.mxu0 %vm856_vm1, %v26745_v54 }
0x1a48   : > { %26849 = vmatpush3.xpose.msk.msra.mxu1 %vm856_vm1, %v19403_v18  ;;  %26855 = vmatprep.mubr.msk.f32.mxu0 %vm28243_vm11, %v33160_v39 }
0x1a49   : > { %26850 = vmatprep.mubr.msk.f32.mxu1 %vm28243_vm11, %v33160_v39  ;;  %26858 = vmatprep.subr.mxu1 %v33160_v39 }
0x1a4a   : > { %26856 = vmatmul.mubr.msk.f32.vlgmr.msra.gmra.mrb[156].mxu0 %vm856_vm1, %v32608_v26  ;;  %26863 = vmatprep.subr.mxu0 %v33160_v39 }
0x1a4b   : > { %26851 = vmatmul.mubr.msk.f32.vlgmr.msra.gmra.mrb[120].mxu1 %vm856_vm1, %v32610_v36  ;;  %26864 = vmatpush3.msra.mxu0 %v32612_v51 }
0x1a4c   : > { %26859 = vmatpush3.msra.mxu1 %v32614_v45  ;;  %26865 = vmatprep.mubr.msk.f32.mxu0 %vm28243_vm11, %v33160_v39 }
0x1a4d   : > { %26873 = vmatprep.subr.mxu0 %v33160_v39  ;;  %26860 = vmatprep.mubr.msk.f32.mxu1 %vm28243_vm11, %v33160_v39 }
0x1a4e   : > { %26868 = vmatprep.subr.mxu1 %v33160_v39 }
0x1b01   : > { %v19705_v34 = vpop.f32.mrb[142].mxu0 }
0x1b02   : > { %v32737_v29 = vmul.f32 0.35355338, %v19705_v34  ;;  %v19629_v47 = vpop.f32.mrb[106].mxu1  ;;  %v26787_v55 = vpop.f32.mrb[143].mxu0 }
0x1b03   : > { %v32739_v32 = vmul.f32 0.35355338, %v19629_v47  ;;  %v26782_v1 = vpop.f32.mrb[107].mxu1 }
0x1b04   : > { %v20792_v7 = vsel %vm856_vm1, %v32737_v29, -inf }
0x1b05   : > { %20793 = vmax.xlane.f32.xlu1 %v20792_v7  ;;  %v19857_v10 = vpop.f32.mrb[144].mxu0  ;;  %v20789_v28 = vsel %vm856_vm1, %v32739_v32, -inf }
0x1b06   : > { %v32745_v63 = vmul.f32 0.35355338, %v19857_v10  ;;  %20790 = vmax.xlane.f32.xlu0 %v20789_v28  ;;  %v19781_v59 = vpop.f32.mrb[108].mxu1  ;;  %v26797_v27 = vpop.f32.mrb[145].mxu0 }
0x1b07   : > { %v32747_v19 = vmul.f32 0.35355338, %v19781_v59  ;;  %v26792_v58 = vpop.f32.mrb[109].mxu1 }
0x1b08   : > { %v20798_v31 = vsel %vm856_vm1, %v32745_v63, -inf }
0x1b09   : > { %20799 = vmax.xlane.f32.xlu1 %v20798_v31  ;;  %v20009_v20 = vpop.f32.mrb[146].mxu0  ;;  %v20795_v16 = vsel %vm856_vm1, %v32747_v19, -inf }
0x1b0a   : > { %v32753_v3 = vmul.f32 0.35355338, %v20009_v20  ;;  %20796 = vmax.xlane.f32.xlu0 %v20795_v16  ;;  %v19933_v30 = vpop.f32.mrb[110].mxu1  ;;  %v26807_v17 = vpop.f32.mrb[147].mxu0 }
0x1b0b   : > { %v32755_v57 = vmul.f32 0.35355338, %v19933_v30  ;;  %v26802_v0 = vpop.f32.mrb[111].mxu1 }
0x1b0c   : > { %v20804_v5 = vsel %vm856_vm1, %v32753_v3, -inf }
0x1b0d   : > { %20805 = vmax.xlane.f32.xlu1 %v20804_v5  ;;  %v20161_v14 = vpop.f32.mrb[148].mxu0  ;;  %v20801_v21 = vsel %vm856_vm1, %v32755_v57, -inf }
0x1b0e   : > { %v32761_v35 = vmul.f32 0.35355338, %v20161_v14  ;;  %20802 = vmax.xlane.f32.xlu0 %v20801_v21  ;;  %v20085_v26 = vpop.f32.mrb[112].mxu1  ;;  %v26817_v36 = vpop.f32.mrb[149].mxu0 }
0x1b0f   : > { %v32763_v51 = vmul.f32 0.35355338, %v20085_v26  ;;  %v26812_v45 = vpop.f32.mrb[113].mxu1 }
0x1b10   : > { %v20810_v11 = vsel %vm856_vm1, %v32761_v35, -inf }
0x1b11   : > { %20811 = vmax.xlane.f32.xlu1 %v20810_v11  ;;  %v20313_v13 = vpop.f32.mrb[150].mxu0  ;;  %v20807_v4 = vsel %vm856_vm1, %v32763_v51, -inf }
0x1b12   : > { %v32769_v22 = vmul.f32 0.35355338, %v20313_v13  ;;  %20808 = vmax.xlane.f32.xlu0 %v20807_v4  ;;  %v20237_v50 = vpop.f32.mrb[114].mxu1  ;;  %v26827_v40 = vpop.f32.mrb[151].mxu0 }
0x1b13   : > { %v32771_v46 = vmul.f32 0.35355338, %v20237_v50  ;;  %v26822_v15 = vpop.f32.mrb[115].mxu1 }
0x1b14   : > { %v20816_v9 = vsel %vm856_vm1, %v32769_v22, -inf }
0x1b15   : > { %20817 = vmax.xlane.f32.xlu1 %v20816_v9  ;;  %v20465_v38 = vpop.f32.mrb[152].mxu0  ;;  %v20813_v44 = vsel %vm856_vm1, %v32771_v46, -inf }
0x1b16   : > { %v32777_v24 = vmul.f32 0.35355338, %v20465_v38  ;;  %20814 = vmax.xlane.f32.xlu0 %v20813_v44  ;;  %v20389_v41 = vpop.f32.mrb[116].mxu1  ;;  %v26837_v53 = vpop.f32.mrb[153].mxu0 }
0x1b17   : > { %v32779_v54 = vmul.f32 0.35355338, %v20389_v41  ;;  %v26832_v18 = vpop.f32.mrb[117].mxu1 }
0x1b18   : > { %v20822_v34 = vsel %vm856_vm1, %v32777_v24, -inf }
0x1b19   : > { %20823 = vmax.xlane.f32.xlu1 %v20822_v34  ;;  %v20617_v47 = vpop.f32.mrb[154].mxu0  ;;  %v20819_v55 = vsel %vm856_vm1, %v32779_v54, -inf }
0x1b1a   : > { %v32785_v1 = vmul.f32 0.35355338, %v20617_v47  ;;  %20820 = vmax.xlane.f32.xlu0 %v20819_v55  ;;  %v20541_v7 = vpop.f32.mrb[118].mxu1  ;;  %v26847_v10 = vpop.f32.mrb[155].mxu0 }
0x1b1b   : > { %v32787_v28 = vmul.f32 0.35355338, %v20541_v7  ;;  %v26842_v59 = vpop.f32.mrb[119].mxu1 }
0x1b1c   : > { %v20828_v27 = vsel %vm856_vm1, %v32785_v1, -inf }
0x1b1d   : > { %20829 = vmax.xlane.f32.xlu1 %v20828_v27  ;;  %v20769_v58 = vpop.f32.mrb[156].mxu0  ;;  %v20825_v31 = vsel %vm856_vm1, %v32787_v28, -inf }
0x1b1e   : > { %v32793_v20 = vmul.f32 0.35355338, %v20769_v58  ;;  %20826 = vmax.xlane.f32.xlu0 %v20825_v31  ;;  %v20693_v16 = vpop.f32.mrb[120].mxu1  ;;  %v26857_v30 = vpop.f32.mrb[157].mxu0 }
0x1b1f   : > { %v32795_v17 = vmul.f32 0.35355338, %v20693_v16  ;;  %v26852_v0 = vpop.f32.mrb[121].mxu1 }
0x1b20   : > { %v20834_v5 = vsel %vm856_vm1, %v32793_v20, -inf }
0x1b21   : > { %20835 = vmax.xlane.f32.xlu1 %v20834_v5  ;;  %v20831_v14 = vsel %vm856_vm1, %v32795_v17, -inf }
0x1b22   : > { %20832 = vmax.xlane.f32.xlu0 %v20831_v14 }
0x1b92   : > { %v20794_v21 = vpop.xlane.xlu1 %20793 }
0x1b93   : > { %v20838_v26 = vsub.f32 %v32737_v29, %v20794_v21  ;;  %v20791_v36 = vpop.xlane.xlu0 %20790 }
0x1b94   : > { %v20837_v45 = vsub.f32 %v32739_v32, %v20791_v36 }
0x1b95   : > { %v20855_v11 = vmul.f32 1.442695, %v20838_v26 }
0x1b96   : > { %v20853_v13 = vmul.f32 1.442695, %v20837_v45  ;;  %v20800_v4 = vpop.xlane.xlu1 %20799 }
0x1b97   : > { %28066 = vpow2.f32 %v20855_v11  ;;  %v20840_v50 = vsub.f32 %v32745_v63, %v20800_v4  ;;  %v20797_v40 = vpop.xlane.xlu0 %20796 }
0x1b98   : > { %28068 = vpow2.f32 %v20853_v13  ;;  %v20839_v15 = vsub.f32 %v32747_v19, %v20797_v40 }
0x1b99   : > { %v20859_v9 = vmul.f32 1.442695, %v20840_v50 }
0x1b9a   : > { %v20857_v38 = vmul.f32 1.442695, %v20839_v15  ;;  %v20806_v44 = vpop.xlane.xlu1 %20805 }
0x1b9b   : > { %28070 = vpow2.f32 %v20859_v9  ;;  %v20842_v41 = vsub.f32 %v32753_v3, %v20806_v44  ;;  %v20803_v29 = vpop.xlane.xlu0 %20802 }
0x1b9c   : > { %28072 = vpow2.f32 %v20857_v38  ;;  %v20841_v32 = vsub.f32 %v32755_v57, %v20803_v29 }
0x1b9d   : > { %v20863_v53 = vmul.f32 1.442695, %v20842_v41 }
0x1b9e   : > { %v20861_v18 = vmul.f32 1.442695, %v20841_v32  ;;  %v20812_v34 = vpop.xlane.xlu1 %20811 }
0x1b9f   : > { %28074 = vpow2.f32 %v20863_v53  ;;  %v20844_v63 = vsub.f32 %v32761_v35, %v20812_v34  ;;  %v20809_v47 = vpop.xlane.xlu0 %20808 }
0x1ba0   : > { %28076 = vpow2.f32 %v20861_v18  ;;  %v20843_v19 = vsub.f32 %v32763_v51, %v20809_v47 }
0x1ba1   : > { %v32809_v55 = vpop.eup %28066  ;;  %v20867_v7 = vmul.f32 1.442695, %v20844_v63 }
0x1ba2   : > { %v32811_v10 = vpop.eup %28068  ;;  %v20865_v3 = vmul.f32 1.442695, %v20843_v19  ;;  %v20818_v59 = vpop.xlane.xlu1 %20817  ;;  %v20888_v57 = vsel %vm856_vm1, %v32809_v55, 0.0 }
0x1ba3   : > { %28078 = vpow2.f32 %v20867_v7  ;;  %v20846_v27 = vsub.f32 %v32769_v22, %v20818_v59  ;;  %v20815_v58 = vpop.xlane.xlu0 %20814  ;;  %20889 = vadd.xlane.f32.xlu1 %v20888_v57  ;;  %v20885_v35 = vsel %vm856_vm1, %v32811_v10, 0.0 }
0x1ba4   : > { %28080 = vpow2.f32 %v20865_v3  ;;  %v20845_v51 = vsub.f32 %v32771_v46, %v20815_v58  ;;  %20886 = vadd.xlane.f32.xlu0 %v20885_v35 }
0x1ba5   : > { %v32819_v31 = vpop.eup %28070  ;;  %v20871_v16 = vmul.f32 1.442695, %v20846_v27 }
0x1ba6   : > { %v32821_v30 = vpop.eup %28072  ;;  %v20869_v0 = vmul.f32 1.442695, %v20845_v51  ;;  %v20824_v5 = vpop.xlane.xlu1 %20823  ;;  %v20894_v14 = vsel %vm856_vm1, %v32819_v31, 0.0 }
0x1ba7   : > { %28082 = vpow2.f32 %v20871_v16  ;;  %v20848_v22 = vsub.f32 %v32777_v24, %v20824_v5  ;;  %v20821_v21 = vpop.xlane.xlu0 %20820  ;;  %20895 = vadd.xlane.f32.xlu1 %v20894_v14  ;;  %v20891_v26 = vsel %vm856_vm1, %v32821_v30, 0.0 }
0x1ba8   : > { %28084 = vpow2.f32 %v20869_v0  ;;  %v20847_v46 = vsub.f32 %v32779_v54, %v20821_v21  ;;  %20892 = vadd.xlane.f32.xlu0 %v20891_v26 }
0x1ba9   : > { %v32829_v36 = vpop.eup %28074  ;;  %v20875_v45 = vmul.f32 1.442695, %v20848_v22 }
0x1baa   : > { %v32831_v11 = vpop.eup %28076  ;;  %v20873_v13 = vmul.f32 1.442695, %v20847_v46  ;;  %v20830_v4 = vpop.xlane.xlu1 %20829  ;;  %v20900_v50 = vsel %vm856_vm1, %v32829_v36, 0.0 }
0x1bab   : > { %28086 = vpow2.f32 %v20875_v45  ;;  %v20850_v24 = vsub.f32 %v32785_v1, %v20830_v4  ;;  %v20827_v40 = vpop.xlane.xlu0 %20826  ;;  %20901 = vadd.xlane.f32.xlu1 %v20900_v50  ;;  %v20897_v15 = vsel %vm856_vm1, %v32831_v11, 0.0 }
0x1bac   : > { %28088 = vpow2.f32 %v20873_v13  ;;  %v20849_v54 = vsub.f32 %v32787_v28, %v20827_v40  ;;  %20898 = vadd.xlane.f32.xlu0 %v20897_v15 }
0x1bad   : > { %v32839_v9 = vpop.eup %28078  ;;  %v20879_v38 = vmul.f32 1.442695, %v20850_v24 }
0x1bae   : > { %v32841_v44 = vpop.eup %28080  ;;  %v20877_v41 = vmul.f32 1.442695, %v20849_v54  ;;  %v20836_v29 = vpop.xlane.xlu1 %20835  ;;  %v20906_v32 = vsel %vm856_vm1, %v32839_v9, 0.0 }
0x1baf   : > { %28090 = vpow2.f32 %v20879_v38  ;;  %v20852_v1 = vsub.f32 %v32793_v20, %v20836_v29  ;;  %v20833_v53 = vpop.xlane.xlu0 %20832  ;;  %20907 = vadd.xlane.f32.xlu1 %v20906_v32  ;;  %v20903_v18 = vsel %vm856_vm1, %v32841_v44, 0.0 }
0x1bb0   : > { %28092 = vpow2.f32 %v20877_v41  ;;  %v20851_v28 = vsub.f32 %v32795_v17, %v20833_v53  ;;  %20904 = vadd.xlane.f32.xlu0 %v20903_v18 }
0x1bb1   : > { %v32849_v34 = vpop.eup %28082  ;;  %v20883_v63 = vmul.f32 1.442695, %v20852_v1 }
0x1bb2   : > { %v32851_v47 = vpop.eup %28084  ;;  %v20881_v19 = vmul.f32 1.442695, %v20851_v28  ;;  %v20912_v7 = vsel %vm856_vm1, %v32849_v34, 0.0 }
0x1bb3   : > { %28094 = vpow2.f32 %v20883_v63  ;;  %20913 = vadd.xlane.f32.xlu1 %v20912_v7  ;;  %v20909_v20 = vsel %vm856_vm1, %v32851_v47, 0.0 }
0x1bb4   : > { %28096 = vpow2.f32 %v20881_v19  ;;  %20910 = vadd.xlane.f32.xlu0 %v20909_v20 }
0x1bb5   : > { %v32857_v3 = vpop.eup %28086 }
0x1bb6   : > { %v32859_v17 = vpop.eup %28088  ;;  %v20918_v59 = vsel %vm856_vm1, %v32857_v3, 0.0 }
0x1bb7   : > { %20919 = vadd.xlane.f32.xlu1 %v20918_v59  ;;  %v20915_v57 = vsel %vm856_vm1, %v32859_v17, 0.0 }
0x1bb8   : > { %20916 = vadd.xlane.f32.xlu0 %v20915_v57 }
0x1bb9   : > { %v32865_v27 = vpop.eup %28090 }
0x1bba   : > { %v32867_v58 = vpop.eup %28092  ;;  %v20924_v35 = vsel %vm856_vm1, %v32865_v27, 0.0 }
0x1bbb   : > { %20925 = vadd.xlane.f32.xlu1 %v20924_v35  ;;  %v20921_v51 = vsel %vm856_vm1, %v32867_v58, 0.0 }
0x1bbc   : > { %20922 = vadd.xlane.f32.xlu0 %v20921_v51 }
0x1bbd   : > { %v32873_v16 = vpop.eup %28094 }
0x1bbe   : > { %v32875_v0 = vpop.eup %28096  ;;  %v20930_v5 = vsel %vm856_vm1, %v32873_v16, 0.0 }
0x1bbf   : > { %20931 = vadd.xlane.f32.xlu1 %v20930_v5  ;;  %v20927_v14 = vsel %vm856_vm1, %v32875_v0, 0.0 }
0x1bc0   : > { %20928 = vadd.xlane.f32.xlu0 %v20927_v14 }
0x1c30   : > { %v20890_v22 = vpop.xlane.xlu1 %20889 }
0x1c31   : > { %28098 = vrcp.f32 %v20890_v22  ;;  %v20887_v21 = vpop.xlane.xlu0 %20886 }
0x1c32   : > { %28100 = vrcp.f32 %v20887_v21 }
0x1c34   : > { %v20896_v26 = vpop.xlane.xlu1 %20895 }
0x1c35   : > { %28102 = vrcp.f32 %v20896_v26  ;;  %v20893_v46 = vpop.xlane.xlu0 %20892 }
0x1c36   : > { %28104 = vrcp.f32 %v20893_v46 }
0x1c38   : > { %v20902_v45 = vpop.xlane.xlu1 %20901 }
0x1c39   : > { %28106 = vrcp.f32 %v20902_v45  ;;  %v20899_v13 = vpop.xlane.xlu0 %20898 }
0x1c3a   : > { %28108 = vrcp.f32 %v20899_v13 }
0x1c3b   : > { %v28099_v4 = vpop.eup %28098 }
0x1c3c   : > { %v28101_v50 = vpop.eup %28100  ;;  %v20950_v24 = vmul.f32 %v28099_v4, %v32809_v55  ;;  %v20908_v40 = vpop.xlane.xlu1 %20907 }
0x1c3d   : > { %v20949_v15 = vmul.f32 %v28101_v50, %v32811_v10  ;;  %28110 = vrcp.f32 %v20908_v40  ;;  %v20905_v54 = vpop.xlane.xlu0 %20904 }
0x1c3e   : > { %28112 = vrcp.f32 %v20905_v54  ;;  %26866 = vmatmul.mubr.msk.f32.vlgmr.msra.gmra.mrb[158].mxu0 %vm856_vm1, %v20950_v24 }
0x1c3f   : > { %v28103_v38 = vpop.eup %28102  ;;  %26874 = vmatpush3.msra.mxu0 %v32616_v23  ;;  %26861 = vmatmul.mubr.msk.f32.vlgmr.msra.gmra.mrb[122].mxu1 %vm856_vm1, %v20949_v15 }
0x1c40   : > { %v28105_v41 = vpop.eup %28104  ;;  %v20952_v29 = vmul.f32 %v28103_v38, %v32819_v31  ;;  %26869 = vmatpush3.msra.mxu1 %v32618_v61  ;;  %v20914_v32 = vpop.xlane.xlu1 %20913  ;;  %26875 = vmatprep.mubr.msk.f32.mxu0 %vm28243_vm11, %v33160_v39 }
0x1c41   : > { %v20951_v55 = vmul.f32 %v28105_v41, %v32821_v30  ;;  %28114 = vrcp.f32 %v20914_v32  ;;  %v20911_v10 = vpop.xlane.xlu0 %20910  ;;  %26883 = vmatprep.subr.mxu0 %v33160_v39  ;;  %26870 = vmatprep.mubr.msk.f32.mxu1 %vm28243_vm11, %v33160_v39 }
0x1c42   : > { %28116 = vrcp.f32 %v20911_v10  ;;  %26876 = vmatmul.mubr.msk.f32.vlgmr.msra.gmra.mrb[160].mxu0 %vm856_vm1, %v20952_v29  ;;  %26878 = vmatprep.subr.mxu1 %v33160_v39 }
0x1c43   : > { %v28107_v23 = vpop.eup %28106  ;;  %26884 = vmatpush3.msra.mxu0 %v32620_v56  ;;  %26871 = vmatmul.mubr.msk.f32.vlgmr.msra.gmra.mrb[124].mxu1 %vm856_vm1, %v20951_v55 }
0x1c44   : > { %v28109_v61 = vpop.eup %28108  ;;  %v20954_v31 = vmul.f32 %v28107_v23, %v32829_v36  ;;  %26879 = vmatpush3.msra.mxu1 %v32622_v2  ;;  %v20920_v30 = vpop.xlane.xlu1 %20919  ;;  %26885 = vmatprep.mubr.msk.f32.mxu0 %vm28243_vm11, %v33160_v39 }
0x1c45   : > { %v20953_v1 = vmul.f32 %v28109_v61, %v32831_v11  ;;  %28118 = vrcp.f32 %v20920_v30  ;;  %v20917_v53 = vpop.xlane.xlu0 %20916  ;;  %26893 = vmatprep.subr.mxu0 %v33160_v39  ;;  %26880 = vmatprep.mubr.msk.f32.mxu1 %vm28243_vm11, %v33160_v39 }
0x1c46   : > { %28120 = vrcp.f32 %v20917_v53  ;;  %26886 = vmatmul.mubr.msk.f32.vlgmr.msra.gmra.mrb[162].mxu0 %vm856_vm1, %v20954_v31  ;;  %26888 = vmatprep.subr.mxu1 %v33160_v39  ;;  %v32989_v31 = vld [vmem:[%s33114_s5] ss:$0 sm:$0xff] }
0x1c47   : > { %v28111_v56 = vpop.eup %28110  ;;  %26894 = vmatpush3.msra.mxu0 %v32624_v43  ;;  %26881 = vmatmul.mubr.msk.f32.vlgmr.msra.gmra.mrb[126].mxu1 %vm856_vm1, %v20953_v1 }
0x1c48   : > { %v28113_v2 = vpop.eup %28112  ;;  %v20956_v36 = vmul.f32 %v28111_v56, %v32839_v9  ;;  %26889 = vmatpush3.msra.mxu1 %v32626_v12  ;;  %v20926_v11 = vpop.xlane.xlu1 %20925  ;;  %26895 = vmatprep.mubr.msk.f32.mxu0 %vm28243_vm11, %v33160_v39 }
0x1c49   : > { %v20955_v18 = vmul.f32 %v28113_v2, %v32841_v44  ;;  %28122 = vrcp.f32 %v20926_v11  ;;  %v20923_v28 = vpop.xlane.xlu0 %20922  ;;  %26903 = vmatprep.subr.mxu0 %v33160_v39  ;;  %26890 = vmatprep.mubr.msk.f32.mxu1 %vm28243_vm11, %v33160_v39 }
0x1c4a   : > { %28124 = vrcp.f32 %v20923_v28  ;;  %26896 = vmatmul.mubr.msk.f32.vlgmr.msra.gmra.mrb[164].mxu0 %vm856_vm1, %v20956_v36  ;;  %26898 = vmatprep.subr.mxu1 %v33160_v39 }
0x1c4b   : > { %v28115_v43 = vpop.eup %28114  ;;  %26904 = vmatpush3.msra.mxu0 %v32628_v49  ;;  %26891 = vmatmul.mubr.msk.f32.vlgmr.msra.gmra.mrb[128].mxu1 %vm856_vm1, %v20955_v18  ;;  %v33223_v18 = vld [vmem:[#allocation17_spill] sm:$0xff] }
0x1c4c   : > { %v28117_v12 = vpop.eup %28116  ;;  %v20958_v9 = vmul.f32 %v28115_v43, %v32849_v34  ;;  %26899 = vmatpush3.msra.mxu1 %v32630_v62  ;;  %v20932_v44 = vpop.xlane.xlu1 %20931  ;;  %26905 = vmatprep.mubr.msk.f32.mxu0 %vm28243_vm11, %v33160_v39 }
0x1c4d   : > { %v20957_v63 = vmul.f32 %v28117_v12, %v32851_v47  ;;  %28126 = vrcp.f32 %v20932_v44  ;;  %v20929_v19 = vpop.xlane.xlu0 %20928  ;;  %26913 = vmatprep.subr.mxu0 %v33160_v39  ;;  %26900 = vmatprep.mubr.msk.f32.mxu1 %vm28243_vm11, %v33160_v39 }
0x1c4e   : > { %28128 = vrcp.f32 %v20929_v19  ;;  %26906 = vmatmul.mubr.msk.f32.vlgmr.msra.gmra.mrb[88].mxu0 %vm856_vm1, %v20958_v9  ;;  %26908 = vmatprep.subr.mxu1 %v33160_v39  ;;  %v33224_v9 = vld [vmem:[#allocation18_spill] sm:$0xff] }
0x1c4f   : > { %v28119_v49 = vpop.eup %28118  ;;  %26914 = vmatpush3.msra.mxu0 %v32632_v25  ;;  %26901 = vmatmul.mubr.msk.f32.vlgmr.msra.gmra.mrb[130].mxu1 %vm856_vm1, %v20957_v63  ;;  %v33225_v63 = vld [vmem:[#allocation6_spill] sm:$0xff] }
0x1c50   : > { %v28121_v62 = vpop.eup %28120  ;;  %v20960_v34 = vmul.f32 %v28119_v49, %v32857_v3  ;;  %26909 = vmatpush3.msra.mxu1 %v32634_v33  ;;  %26915 = vmatprep.mubr.msk.f32.mxu0 %vm28243_vm11, %v33160_v39 }
0x1c51   : > { %v20959_v47 = vmul.f32 %v28121_v62, %v32859_v17  ;;  %26923 = vmatprep.subr.mxu0 %v33160_v39  ;;  %26910 = vmatprep.mubr.msk.f32.mxu1 %vm28243_vm11, %v33160_v39  ;;  %v33226_v62 = vld [vmem:[#allocation19_spill] sm:$0xff] }
0x1c52   : > { %26916 = vmatmul.mubr.msk.f32.vlgmr.msra.gmra.mrb[90].mxu0 %vm856_vm1, %v20960_v34  ;;  %26918 = vmatprep.subr.mxu1 %v33160_v39 }
0x1c53   : > { %v28123_v25 = vpop.eup %28122  ;;  %26924 = vmatpush3.msra.mxu0 %v32636_v48  ;;  %26911 = vmatmul.mubr.msk.f32.vlgmr.msra.gmra.mrb[132].mxu1 %vm856_vm1, %v20959_v47  ;;  %v33227_v47 = vld [vmem:[#allocation5_spill] sm:$0xff] }
0x1c54   : > { %v28125_v33 = vpop.eup %28124  ;;  %v20962_v7 = vmul.f32 %v28123_v25, %v32865_v27  ;;  %26919 = vmatpush3.msra.mxu1 %v32638_v60  ;;  %26925 = vmatprep.mubr.msk.f32.mxu0 %vm28243_vm11, %v33160_v39 }
0x1c55   : > { %v20961_v20 = vmul.f32 %v28125_v33, %v32867_v58  ;;  %26933 = vmatprep.subr.mxu0 %v33160_v39  ;;  %26920 = vmatprep.mubr.msk.f32.mxu1 %vm28243_vm11, %v33160_v39 }
0x1c56   : > { %26926 = vmatmul.mubr.msk.f32.vlgmr.msra.gmra.mrb[92].mxu0 %vm856_vm1, %v20962_v7  ;;  %26928 = vmatprep.subr.mxu1 %v33160_v39 }
0x1c57   : > { %v28127_v48 = vpop.eup %28126  ;;  %26934 = vmatpush3.msra.mxu0 %v32640_v37  ;;  %26921 = vmatmul.mubr.msk.f32.vlgmr.msra.gmra.mrb[134].mxu1 %vm856_vm1, %v20961_v20  ;;  %v365_v37 = vld [vmem:[%s33113_s4 + $0x18] sm:$0xff] }
0x1c58   : > { %v28129_v60 = vpop.eup %28128  ;;  %v20964_v3 = vmul.f32 %v28127_v48, %v32873_v16  ;;  %26929 = vmatpush3.msra.mxu1 %v32642_v6  ;;  %26935 = vmatprep.mubr.msk.f32.mxu0 %vm28243_vm11, %v33160_v39  ;;  %v33229_v20 = vld [vmem:[#allocation8_spill] sm:$0xff] }
0x1c59   : > { %v20963_v17 = vmul.f32 %v28129_v60, %v32875_v0  ;;  %26930 = vmatprep.mubr.msk.f32.mxu1 %vm28243_vm11, %v33160_v39  ;;  %26938 = vmatprep.subr.mxu1 %v365_v37 }
0x1c5a   : > { %26936 = vmatmul.mubr.msk.f32.vlgmr.msra.gmra.mrb[94].mxu0 %vm856_vm1, %v20964_v3 }
0x1c5b   : > { %26931 = vmatmul.mubr.msk.f32.vlgmr.msra.gmra.mrb[136].mxu1 %vm856_vm1, %v20963_v17 }
0x1c5c   : > { %26939 = vmatpush3.msra.mxu1 %v365_v37  ;;  %v33230_v37 = vld [vmem:[#allocation21_spill] sm:$0xff] }
0x1d11   : > { %v21107_v59 = vpop.f32.mrb[158].mxu0 }
0x1d12   : > { %v21034_v6 = vpop.f32.mrb[122].mxu1  ;;  %v26867_v57 = vpop.f32.mrb[159].mxu0 }
0x1d13   : > { %v26862_v27 = vpop.f32.mrb[123].mxu1  ;;  %26940 = vmatprep.mubr.msk.f32.mxu1 %vm856_vm1, %v21034_v6  ;;  %v33231_v6 = vld [vmem:[#allocation7_spill] sm:$0xff] }
0x1d14   : > { %26941 = vmatmul.mubr.msk.f32.vlgmr.msra.gmra.mrb[40].mxu1 %vm856_vm1, %v21107_v59 }
0x1d15   : > { %v21253_v58 = vpop.f32.mrb[160].mxu0 }
0x1d16   : > { %v21180_v39 = vpop.f32.mrb[124].mxu1  ;;  %v26877_v35 = vpop.f32.mrb[161].mxu0 }
0x1d17   : > { %v26872_v51 = vpop.f32.mrb[125].mxu1  ;;  %26943 = vmatprep.mubr.msk.f32.mxu1 %vm856_vm1, %v21180_v39  ;;  %v33233_v35 = vld [vmem:[#allocation10_spill] sm:$0xff] }
0x1d18   : > { %26944 = vmatmul.mubr.msk.f32.gmra.mrb[42].mxu1 %vm856_vm1, %v21253_v58  ;;  %v33232_v58 = vld [vmem:[#allocation22_spill] sm:$0xff] }
0x1d19   : > { %v21399_v16 = vpop.f32.mrb[162].mxu0 }
0x1d1a   : > { %v21326_v0 = vpop.f32.mrb[126].mxu1  ;;  %v26887_v5 = vpop.f32.mrb[163].mxu0 }
0x1d1b   : > { %v26882_v14 = vpop.f32.mrb[127].mxu1  ;;  %26946 = vmatprep.mubr.msk.f32.mxu1 %vm856_vm1, %v21326_v0 }
0x1d1c   : > { %26947 = vmatmul.mubr.msk.f32.gmra.mrb[44].mxu1 %vm856_vm1, %v21399_v16  ;;  %v33234_v14 = vld [vmem:[#allocation16_spill] sm:$0xff] }
0x1d1d   : > { %v21545_v22 = vpop.f32.mrb[164].mxu0 }
0x1d1e   : > { %v21472_v21 = vpop.f32.mrb[128].mxu1  ;;  %v26897_v26 = vpop.f32.mrb[165].mxu0 }
0x1d1f   : > { %v26892_v46 = vpop.f32.mrb[129].mxu1  ;;  %26949 = vmatprep.mubr.msk.f32.mxu1 %vm856_vm1, %v21472_v21 }
0x1d20   : > { %26950 = vmatmul.mubr.msk.f32.gmra.mrb[46].mxu1 %vm856_vm1, %v21545_v22  ;;  %v33235_v46 = vld [vmem:[#allocation23_spill] sm:$0xff] }
0x1d21   : > { %v21691_v45 = vpop.f32.mrb[88].mxu0 }
0x1d22   : > { %v21618_v13 = vpop.f32.mrb[130].mxu1  ;;  %v26907_v4 = vpop.f32.mrb[89].mxu0 }
0x1d23   : > { %v26902_v50 = vpop.f32.mrb[131].mxu1  ;;  %26952 = vmatprep.mubr.msk.f32.mxu1 %vm856_vm1, %v21618_v13  ;;  %v33236_v4 = vld [vmem:[#allocation24_spill] sm:$0xff] }
0x1d24   : > { %26953 = vmatmul.mubr.msk.f32.gmra.mrb[32].mxu1 %vm856_vm1, %v21691_v45 }
0x1d25   : > { %v21837_v24 = vpop.f32.mrb[90].mxu0 }
0x1d26   : > { %v21764_v40 = vpop.f32.mrb[132].mxu1  ;;  %v26917_v15 = vpop.f32.mrb[91].mxu0 }
0x1d27   : > { %v26912_v54 = vpop.f32.mrb[133].mxu1  ;;  %26955 = vmatprep.mubr.msk.f32.mxu1 %vm856_vm1, %v21764_v40 }
0x1d28   : > { %26956 = vmatmul.mubr.msk.f32.gmra.mrb[34].mxu1 %vm856_vm1, %v21837_v24  ;;  %v33237_v24 = vld [vmem:[#allocation25_spill] sm:$0xff] }
0x1d29   : > { %v21983_v38 = vpop.f32.mrb[92].mxu0 }
0x1d2a   : > { %v21910_v41 = vpop.f32.mrb[134].mxu1  ;;  %v26927_v29 = vpop.f32.mrb[93].mxu0 }
0x1d2b   : > { %v26922_v32 = vpop.f32.mrb[135].mxu1  ;;  %26958 = vmatprep.mubr.msk.f32.mxu1 %vm856_vm1, %v21910_v41  ;;  %v33238_v29 = vld [vmem:[#allocation26_spill] sm:$0xff] }
0x1d2c   : > { %26959 = vmatmul.mubr.msk.f32.gmra.mrb[36].mxu1 %vm856_vm1, %v21983_v38 }
0x1d2d   : > { %v22129_v55 = vpop.f32.mrb[94].mxu0 }
0x1d2e   : > { %v22056_v10 = vpop.f32.mrb[136].mxu1  ;;  %v26937_v23 = vpop.f32.mrb[95].mxu0 }
0x1d2f   : > { %v26932_v61 = vpop.f32.mrb[137].mxu1  ;;  %26961 = vmatprep.mubr.msk.f32.mxu1 %vm856_vm1, %v22056_v10 }
0x1d30   : > { %26962 = vmatmul.mubr.msk.f32.gmra.mrb[38].mxu1 %vm856_vm1, %v22129_v55  ;;  %v33239_v55 = vld [vmem:[#allocation27_spill] sm:$0xff] }
0x1de7   : > { %v26942_v30 = vpop.f32.mrb[40].mxu1 }
0x1de8   : > { %v27478_v1 = vadd.f32 %v26942_v30, %v31995_v42  ;;  %v22247_v53 = vpop.f32.mrb[41].mxu1 }
0x1de9   : > { %v27479_v56 = vadd.f32 %v22247_v53, %v31999_v52  ;;  %v33240_v53 = vld [vmem:[#allocation28_spill] sm:$0xff] }
0x1dea   : > { %v22349_v2 = vadd.f32 %v27478_v1, %v32989_v31 }
0x1deb   : > { %v22348_v36 = vadd.f32 %v27479_v56, %v32989_v31  ;;  %v26945_v11 = vpop.f32.mrb[42].mxu1 }
0x1dec   : > { %v22403_v28 = vadd.f32 %v33223_v18, %v22349_v2  ;;  %v27480_v43 = vadd.f32 %v26945_v11, %v32008_v8  ;;  %v22257_v12 = vpop.f32.mrb[43].mxu1  ;;  %v33228_v8 = vld [vmem:[#allocation20_spill] sm:$0xff]  ;;  %v33241_v2 = vld [vmem:[#allocation29_spill] sm:$0xff] }
0x1ded   : > { %v32998_v44 = vadd.f32 %v33224_v9, %v22348_v36  ;;  %v27481_v19 = vadd.f32 %v22257_v12, %v33225_v63  ;;  %v33242_v12 = vld [vmem:[#allocation30_spill] sm:$0xff]  ;;  %v33243_v63 = vld [vmem:[#allocation31_spill] sm:$0xff] }
0x1dee   : > { %v22351_v42 = vadd.f32 %v27480_v43, %v32989_v31  ;;  %22637 = vrot.lane.b32.xlu0 %v22403_v28, %s28244_s28 }
0x1def   : > { %v22350_v52 = vadd.f32 %v27481_v19, %v32989_v31  ;;  %v26948_v49 = vpop.f32.mrb[44].mxu1 }
0x1df0   : > { %v22435_v34 = vadd.f32 %v33226_v62, %v22351_v42  ;;  %v27482_v25 = vadd.f32 %v26948_v49, %v33227_v47  ;;  %v22267_v33 = vpop.f32.mrb[45].mxu1 }
0x1df1   : > { %v22419_v7 = vadd.f32 %v33228_v8, %v22350_v52  ;;  %v27483_v48 = vadd.f32 %v22267_v33, %v33229_v20 }
0x1df2   : > { %v22353_v60 = vadd.f32 %v27482_v25, %v32989_v31  ;;  %22645 = vrot.lane.b32.xlu0 %v22435_v34, %s28245_s29 }
0x1df3   : > { %v22352_v3 = vadd.f32 %v27483_v48, %v32989_v31  ;;  %v26951_v17 = vpop.f32.mrb[46].mxu1 }
0x1df4   : > { %v22467_v59 = vadd.f32 %v33230_v37, %v22353_v60  ;;  %v27484_v57 = vadd.f32 %v26951_v17, %v33231_v6  ;;  %v22277_v27 = vpop.f32.mrb[47].mxu1 }
0x1df5   : > { %v22451_v39 = vadd.f32 %v33232_v58, %v22352_v3  ;;  %v27485_v51 = vadd.f32 %v22277_v27, %v33233_v35 }
0x1df6   : > { %v22355_v16 = vadd.f32 %v27484_v57, %v32989_v31  ;;  %22649 = vrot.lane.b32.xlu1 %v22467_v59, %s28244_s28  ;;  %22641 = vrot.lane.b32.xlu0 %v22419_v7, %s28246_s9 }
0x1df7   : > { %v22354_v0 = vadd.f32 %v27485_v51, %v32989_v31  ;;  %v26954_v5 = vpop.f32.mrb[32].mxu1 }
0x1df8   : > { %v22499_v22 = vadd.f32 %v33234_v14, %v22355_v16  ;;  %v22357_v21 = vadd.f32 %v26954_v5, %v32989_v31  ;;  %v22287_v26 = vpop.f32.mrb[33].mxu1 }
0x1df9   : > { %v22483_v45 = vadd.f32 %v33235_v46, %v22354_v0  ;;  %v22356_v13 = vadd.f32 %v32989_v31, %v22287_v26 }
0x1dfa   : > { %v22539_v50 = vadd.f32 %v33236_v4, %v22357_v21  ;;  %22657 = vrot.lane.b32.xlu1 %v22499_v22, %s28245_s29 }
0x1dfb   : > { %v22523_v40 = vadd.f32 %v33237_v24, %v22356_v13  ;;  %v26957_v15 = vpop.f32.mrb[34].mxu1 }
0x1dfc   : > { %v22359_v54 = vadd.f32 %v26957_v15, %v32989_v31  ;;  %v22297_v38 = vpop.f32.mrb[35].mxu1 }
0x1dfd   : > { %v22358_v41 = vadd.f32 %v32989_v31, %v22297_v38 }
0x1dfe   : > { %v22571_v32 = vadd.f32 %v33238_v29, %v22359_v54  ;;  %22653 = vrot.lane.b32.xlu1 %v22483_v45, %s28246_s9 }
0x1dff   : > { %v22555_v10 = vadd.f32 %v33239_v55, %v22358_v41  ;;  %v26960_v23 = vpop.f32.mrb[36].mxu1 }
0x1e00   : > { %v22361_v61 = vadd.f32 %v26960_v23, %v32989_v31  ;;  %v22307_v30 = vpop.f32.mrb[37].mxu1 }
0x1e01   : > { %v22360_v1 = vadd.f32 %v32989_v31, %v22307_v30  ;;  %22665 = vrot.lane.b32.xlu0 %v22555_v10, %s28246_s9 }
0x1e02   : > { %v22603_v56 = vadd.f32 %v33240_v53, %v22361_v61  ;;  %22661 = vrot.lane.b32.xlu1 %v22539_v50, %s28244_s28 }
0x1e03   : > { %v22587_v36 = vadd.f32 %v33241_v2, %v22360_v1  ;;  %v26963_v11 = vpop.f32.mrb[38].mxu1 }
0x1e04   : > { %v22363_v18 = vadd.f32 %v26963_v11, %v32989_v31  ;;  %v22317_v28 = vpop.f32.mrb[39].mxu1 }
0x1e05   : > { %v22362_v43 = vadd.f32 %v32989_v31, %v22317_v28  ;;  %22669 = vrot.lane.b32.xlu0 %v22571_v32, %s28245_s29 }
0x1e06   : > { %v22635_v9 = vadd.f32 %v33242_v12, %v22363_v18  ;;  %22673 = vrot.lane.b32.xlu1 %v22603_v56, %s28244_s28 }
0x1e07   : > { %v22619_v19 = vadd.f32 %v33243_v63, %v22362_v43 }
0x1e0a   : > { %22677 = vrot.lane.b32.xlu1 %v22619_v19, %s28246_s9 }
0x1e0e   : > { %22681 = vrot.lane.b32.xlu1 %v22635_v9, %s28245_s29 }
0x1e60   : > { %v22638_v42 = vpop.permute.xlu0 %22637 }
0x1e61   : > { %v22684_v31 = vsel %vm372_vm0, %v32998_v44, %v22638_v42 }
0x1e64   : > { %v22646_v52 = vpop.permute.xlu0 %22645 }
0x1e68   : > { %v22650_v49 = vpop.permute.xlu1 %22649  ;;  %v22642_v62 = vpop.permute.xlu0 %22641 }
0x1e69   : > { %v22686_v34 = vsel %vm22685_vm12, %v22684_v31, %v22642_v62  ;;  %v22689_v33 = vsel %vm372_vm0, %v22451_v39, %v22650_v49 }
0x1e6a   : > { %v22688_v47 = vsel %vm22687_vm13, %v22686_v34, %v22646_v52 }
0x1e6b   : > { %22698 = vst [vmem:[%s244_s12] sm:$0xff] %v22688_v47 }
0x1e6c   : > { %v22658_v25 = vpop.permute.xlu1 %22657 }
0x1e70   : > { %v22654_v8 = vpop.permute.xlu1 %22653 }
0x1e71   : > { %v22690_v7 = vsel %vm22685_vm12, %v22689_v33, %v22654_v8 }
0x1e72   : > { %v22691_v20 = vsel %vm22687_vm13, %v22690_v7, %v22658_v25 }
0x1e73   : > { %22699 = vst [vmem:[%s244_s12 + $0x8] sm:$0xff] %v22691_v20  ;;  %v22666_v48 = vpop.permute.xlu0 %22665 }
0x1e74   : > { %v22662_v44 = vpop.permute.xlu1 %22661 }
0x1e75   : > { %v22692_v60 = vsel %vm372_vm0, %v22523_v40, %v22662_v44 }
0x1e76   : > { %v22693_v3 = vsel %vm22685_vm12, %v22692_v60, %v22666_v48 }
0x1e77   : > { %v22670_v17 = vpop.permute.xlu0 %22669 }
0x1e78   : > { %v22694_v37 = vsel %vm22687_vm13, %v22693_v3, %v22670_v17  ;;  %v22674_v59 = vpop.permute.xlu1 %22673 }
0x1e79   : > { %22700 = vst [vmem:[%s244_s12 + $0x10] sm:$0xff] %v22694_v37  ;;  %v22695_v57 = vsel %vm372_vm0, %v22587_v36, %v22674_v59 }
0x1e7c   : > { %v22678_v6 = vpop.permute.xlu1 %22677 }
0x1e7d   : > { %v22696_v27 = vsel %vm22685_vm12, %v22695_v57, %v22678_v6 }
0x1e80   : > { %v22682_v58 = vpop.permute.xlu1 %22681 }
0x1e81   : > { %v22697_v39 = vsel %vm22687_vm13, %v22696_v27, %v22682_v58 }
0x1e82   : > { %22701 = vst [vmem:[%s244_s12 + $0x18] sm:$0xff] %v22697_v39 }
0x1e83   : > { %28191 = shalt.err (!%p28188_p3)
}
0x1e84   : > { %s28192_s28 = scalar_lea.hbm %s33064_s16, 512  ;;  %s28196_s10 = scalar_lea.hbm %s33115_s6, 1024 }
0x1e85   : > { %p28193_p4 = scmp.ne.s32.totalorder %s33064_s16, %s28192_s28  ;;  %p28197_p9 = scmp.lt.u32.totalorder %s33064_s16, %s33115_s6 }
0x1e86   : > { %p28198_p10 = scmp.lt.u32.totalorder %s28196_s10, %s28192_s28  ;;  %p28200_p12 = scmp.lt.u32.totalorder %s28192_s28, %s33064_s16 }
0x1e87   : > { %p28194_p7 = pnand %p28193_p4, %p28321_p5 }
0x1e88   : > { %p28199_p11 = por %p28198_p10, %p28197_p9 }
0x1e89   : > { %p28195_p8 = pneg %p28194_p7 }
0x1e8a   : > { %p28201_p13 = por %p28200_p12, %p28199_p11 }
0x1e8c   : > { %p28202_p0 = pnand %p28201_p13, %p28195_p8 }
0x1e8e   : > { %28205 = shalt.err (!%p28202_p0)
}
0x1e8f   : > { %27574 = dma.vmem_to_hbm [thread:$0]  (%p28321_p5), %s33066_s14, 512, %s33064_s16, %s22703_s25  }
0x1e90 PF: > { %p27580_p1 = scmp.ge.s32.totalorder %s28240_s24, 2  ;;  %s22729_s13 = sand.u32 1, %s28228_s21  }
0x1e91   : > { %s22730_s15 = scalar_lea.sflag [#allocation3], %s22729_s13 }
0x1e92   : > { %p27577_p2 = pnand %p27580_p1, %p28325_p6 }
0x1e94   : > { %28223 = dma.done.wait (!%p27577_p2), %s22730_s15, 512  }
0x1e95   : > { %28225 = vsyncadd (!%p27577_p2), %s22730_s15, 4294966784  ;;  %p16_p3 = scmp.ge.s32.totalorder %s28308_s27, 4   ;;  %s33244_s21 = smov %s28232_s22 }
0x1e96   : > { %s33245_s22 = smov %s28236_s23  ;;  %s33246_s23 = smov %s28319_s30 }
0x1e97   : > { %s33247_s24 = smov %s28308_s27  ;;  %18 = sbr.rel (!%p16_p3) target bundleno = 3 (0x3), region = 79 }
0x1e9e   :  { %22735 = vsyncpa [#allocation3], 1 }
0x1e9f   :  { %22737 = vsyncpa [#allocation3 + $0x1], 1 }

</bundles_post_ra>
